<compile_context>
chip_gen: v7x
topology: tpu7x:2x2x1
jax: 0.10.0
libtpu: 0.0.40
codegen_flags: <defaults>
</compile_context>

<pallas_src>
import functools

import jax
import jax.numpy as jnp
from jax.experimental import pallas as pl
from jax.experimental.pallas import tpu as pltpu

# ----------------------------- config (small) -------------------------------
FRAME_STACK = 6          # frame_stack
NUM_TOKENS = 8           # learned_token_num
KEY_DIM = 64             # key_dim (512 in module, scaled down)
HEADS = 4                # heads (8 in module, scaled down)
HEAD_DIM = KEY_DIM // HEADS
FF_DIM = 128             # feed_forward_size (512 in module, scaled down)
NUM_LAYERS = 2           # num_layers (8 in module, scaled down)
TEXT_DIM = 32            # stand-in for 768-d T5 embedding
IMG_SIZE = 32            # stand-in for 300x300 frames
PATCH = 8
P_PATCHES = (IMG_SIZE // PATCH) ** 2      # 16 spatial tokens per frame
PATCH_DIM = 3 * PATCH * PATCH             # 192
SEQ = FRAME_STACK * NUM_TOKENS            # 48


# -------------------------- fused per-episode kernel ------------------------
def _rt1_episode_kernel(
    patches_ref, text_ref,
    w_patch_ref, b_patch_ref, w_film_ref, b_film_ref, w_tl_ref, pos_ref,
    ln1g_ref, ln1b_ref, wqkv_ref, bqkv_ref, wo_ref, bo_ref,
    ln2g_ref, ln2b_ref, wff1_ref, bff1_ref, wff2_ref, bff2_ref,
    out_ref,
    *, frames, patches_per_frame, dim, heads, head_dim, num_tokens,
    num_layers):
  bf16 = jnp.bfloat16
  F, P, D = frames, patches_per_frame, dim
  H, HD, N, L = heads, head_dim, num_tokens, num_layers
  S = F * N                                   # sequence length of one episode

  patches = patches_ref[0]                    # (F*P, PATCH_DIM), bf16
  text = text_ref[0]                          # (1, TEXT_DIM), bf16

  # ---- image tokenizer: patch-embed "conv" (as matmul) + FiLM + ReLU -------
  feat = jnp.dot(patches, w_patch_ref[...],
                 preferred_element_type=jnp.float32) + b_patch_ref[...]  # (F*P, D)
  gb = jnp.dot(text, w_film_ref[...],
               preferred_element_type=jnp.float32) + b_film_ref[...]     # (1, 2D)
  gamma = gb[:, :D]
  beta = gb[:, D:]
  feat = feat * (1.0 + gamma) + beta
  feat = jnp.maximum(feat, 0.0)

  # ---- TokenLearner: softmax over the P spatial patches of each frame ------
  logits = jnp.dot(feat.astype(bf16), w_tl_ref[...],
                   preferred_element_type=jnp.float32)        # (F*P, N)
  logits = logits.reshape(F, P, N)
  logits = logits - jnp.max(logits, axis=1, keepdims=True)
  e = jnp.exp(logits)
  attn = e * pl.reciprocal(jnp.sum(e, axis=1, keepdims=True), approx=True)
  attn_t = jnp.swapaxes(attn, 1, 2)                           # (F, N, P)
  tokens = jnp.einsum('fnp,fpd->fnd',
                      attn_t.astype(bf16),
                      feat.reshape(F, P, D).astype(bf16),
                      preferred_element_type=jnp.float32)     # (F, N, D)

  # ---- sequence assembly: 'f n c -> (f n) c' + positional embedding --------
  x = tokens.reshape(S, D) + pos_ref[...]

  # plain per-episode causal mask (triu(1) disallowed), built once, reused.
  row = jax.lax.broadcasted_iota(jnp.int32, (S, S), 0)
  col = jax.lax.broadcasted_iota(jnp.int32, (S, S), 1)
  allow = col <= row
  scale = 1.0 / (HD ** 0.5)

  def ln(v, g, b_):
    mu = jnp.mean(v, axis=-1, keepdims=True)
    var = jnp.mean((v - mu) ** 2, axis=-1, keepdims=True)
    return (v - mu) * jax.lax.rsqrt(var + 1e-5) * g + b_

  def layer(l, xc):
    # pre-LN causal self-attention --------------------------------------------
    h1 = ln(xc, ln1g_ref[l], ln1b_ref[l])
    qkv = jnp.dot(h1.astype(bf16), wqkv_ref[l],
                  preferred_element_type=jnp.float32) + bqkv_ref[l]   # (S, 3D)
    # head-major split: one reshape + one transpose (no Python slice loop)
    qkvh = jnp.swapaxes(qkv.reshape(S, 3 * H, HD), 0, 1).astype(bf16)  # (3H,S,HD)
    qh, kh, vh = qkvh[:H], qkvh[H:2 * H], qkvh[2 * H:]
    sc = jnp.einsum('hqd,hkd->hqk', qh, kh,
                    preferred_element_type=jnp.float32) * scale       # (H,S,S)
    sc = jnp.where(allow[None, :, :], sc, -1e30)     # masking/softmax in f32
    sc = sc - jnp.max(sc, axis=-1, keepdims=True)
    es = jnp.exp(sc)
    pr = es * pl.reciprocal(jnp.sum(es, axis=-1, keepdims=True), approx=True)
    oh = jnp.einsum('hqk,hkd->hqd', pr.astype(bf16), vh,
                    preferred_element_type=jnp.float32)               # (H,S,HD)
    att_in = jnp.swapaxes(oh, 0, 1).reshape(S, D)    # head "concat" as relayout
    att = jnp.dot(att_in.astype(bf16), wo_ref[l],
                  preferred_element_type=jnp.float32) + bo_ref[l]
    xc = xc + att
    # feed-forward --------------------------------------------------------------
    h2 = ln(xc, ln2g_ref[l], ln2b_ref[l])
    ff = jnp.dot(h2.astype(bf16), wff1_ref[l],
                 preferred_element_type=jnp.float32) + bff1_ref[l]
    # TODO(synk): PyTorch nn.GELU default is the exact erf form; tanh approx here.
    ff = jax.nn.gelu(ff, approximate=True)
    ff = jnp.dot(ff.astype(bf16), wff2_ref[l],
                 preferred_element_type=jnp.float32) + bff2_ref[l]
    return xc + ff

  x = jax.lax.fori_loop(0, L, layer, x, unroll=True)

  # ---- head: last num_learned_tokens tokens, reduce 'n d -> d' (mean) -------
  out_ref[0] = jnp.mean(x[S - N:, :], axis=0, keepdims=True)


# ------------------------------ forward pass ---------------------------------
def rt1_xl_forward(params, video, text_embeddings):
  b, f, c, h, w = video.shape

  # patchify (layout-only glue): NCHW frames -> (B, F*P, C*ps*ps), pre-cast bf16
  x = video.reshape(b * f, c, h // PATCH, PATCH, w // PATCH, PATCH)
  x = x.transpose(0, 2, 4, 1, 3, 5).reshape(b, f * P_PATCHES, PATCH_DIM)
  x = x.astype(jnp.bfloat16)
  text = text_embeddings.reshape(b, 1, TEXT_DIM).astype(jnp.bfloat16)

  num_layers = params["w_qkv"].shape[0]
  kernel = functools.partial(
      _rt1_episode_kernel, frames=f, patches_per_frame=P_PATCHES,
      dim=KEY_DIM, heads=HEADS, head_dim=HEAD_DIM, num_tokens=NUM_TOKENS,
      num_layers=num_layers)

  weight_order = ["w_patch", "b_patch", "w_film", "b_film", "w_tl", "pos_emb",
                  "ln1_g", "ln1_b", "w_qkv", "b_qkv", "w_o", "b_o",
                  "ln2_g", "ln2_b", "w_ff1", "b_ff1", "w_ff2", "b_ff2"]
  weights = [params[k] for k in weight_order]

  def resident(arr):
    zeros = (0,) * arr.ndim

    def imap(bidx):
      return zeros

    return pl.BlockSpec(arr.shape, imap)

  in_specs = (
      [pl.BlockSpec((1, f * P_PATCHES, PATCH_DIM), lambda bidx: (bidx, 0, 0)),
       pl.BlockSpec((1, 1, TEXT_DIM), lambda bidx: (bidx, 0, 0))]
      + [resident(wt) for wt in weights])
  out_specs = pl.BlockSpec((1, 1, KEY_DIM), lambda bidx: (bidx, 0, 0))

  # advisory cost estimate so XLA schedules neighbors around the custom call
  seq = f * NUM_TOKENS
  flops_per_ep = 2 * (
      f * P_PATCHES * PATCH_DIM * KEY_DIM
      + TEXT_DIM * 2 * KEY_DIM
      + f * P_PATCHES * KEY_DIM * NUM_TOKENS
      + f * NUM_TOKENS * P_PATCHES * KEY_DIM
      + num_layers * (seq * KEY_DIM * 3 * KEY_DIM
                      + 2 * HEADS * seq * seq * HEAD_DIM
                      + seq * KEY_DIM * KEY_DIM
                      + 2 * seq * KEY_DIM * FF_DIM))
  transcend_per_ep = (f * P_PATCHES * NUM_TOKENS
                      + num_layers * (HEADS * seq * seq + seq * FF_DIM))
  weight_bytes = sum(int(wt.size) * wt.dtype.itemsize for wt in weights)
  bytes_accessed = (int(x.size) * x.dtype.itemsize
                    + int(text.size) * text.dtype.itemsize
                    + weight_bytes + b * KEY_DIM * 4)

  out = pl.pallas_call(
      kernel,
      out_shape=jax.ShapeDtypeStruct((b, 1, KEY_DIM), jnp.float32),
      grid=(b,),
      in_specs=in_specs,
      out_specs=out_specs,
      compiler_params=pltpu.CompilerParams(
          dimension_semantics=("parallel",)),
      cost_estimate=pl.CostEstimate(
          flops=int(b * flops_per_ep),
          transcendentals=int(b * transcend_per_ep),
          bytes_accessed=int(bytes_accessed)),
  )(x, text, *weights)
  return out.reshape(b, KEY_DIM)


# ----------------------------- deterministic init ----------------------------
def init_params(key):
  keys = iter(jax.random.split(key, 64))

  def nrm(shape, scale=0.02):
    return scale * jax.random.normal(next(keys), shape, dtype=jnp.float32)

  def stack(make):
    return jnp.stack([make() for _ in range(NUM_LAYERS)], axis=0)

  bf16 = jnp.bfloat16
  params = {
      # matmul weights stored in bf16 (halves DMA, MXU-native); biases f32
      "w_patch": nrm((PATCH_DIM, KEY_DIM)).astype(bf16),
      "b_patch": jnp.zeros((1, KEY_DIM), jnp.float32),
      "w_film": nrm((TEXT_DIM, 2 * KEY_DIM)).astype(bf16),
      "b_film": jnp.zeros((1, 2 * KEY_DIM), jnp.float32),
      "w_tl": nrm((KEY_DIM, NUM_TOKENS)).astype(bf16),
      "pos_emb": nrm((SEQ, KEY_DIM)),
      # stacked per-layer weights (indexed with ref[l] inside the kernel)
      "ln1_g": jnp.ones((NUM_LAYERS, 1, KEY_DIM), jnp.float32),
      "ln1_b": jnp.zeros((NUM_LAYERS, 1, KEY_DIM), jnp.float32),
      "w_qkv": stack(lambda: nrm((KEY_DIM, 3 * KEY_DIM))).astype(bf16),
      "b_qkv": jnp.zeros((NUM_LAYERS, 1, 3 * KEY_DIM), jnp.float32),
      "w_o": stack(lambda: nrm((KEY_DIM, KEY_DIM))).astype(bf16),
      "b_o": jnp.zeros((NUM_LAYERS, 1, KEY_DIM), jnp.float32),
      "ln2_g": jnp.ones((NUM_LAYERS, 1, KEY_DIM), jnp.float32),
      "ln2_b": jnp.zeros((NUM_LAYERS, 1, KEY_DIM), jnp.float32),
      "w_ff1": stack(lambda: nrm((KEY_DIM, FF_DIM))).astype(bf16),
      "b_ff1": jnp.zeros((NUM_LAYERS, 1, FF_DIM), jnp.float32),
      "w_ff2": stack(lambda: nrm((FF_DIM, KEY_DIM))).astype(bf16),
      "b_ff2": jnp.zeros((NUM_LAYERS, 1, KEY_DIM), jnp.float32),
  }
  return params


if __name__ == "__main__":
  root = jax.random.PRNGKey(0)
  kp, kv, kt = jax.random.split(root, 3)
  params = init_params(kp)

  video = jax.random.normal(
      kv, (2, FRAME_STACK, 3, IMG_SIZE, IMG_SIZE), dtype=jnp.float32)
  text_emb = jax.random.normal(kt, (2, TEXT_DIM), dtype=jnp.float32)

  fwd = jax.jit(rt1_xl_forward)
  out = fwd(params, video, text_emb)
  out = jax.block_until_ready(out)
  assert out.shape == (2, KEY_DIM)
  assert bool(jnp.all(jnp.isfinite(out)))
  print("KERNEL_OK")
</pallas_src>

<mosaic_0001>
module attributes {stable_mosaic.version = 11 : i64} {
  func.func @_rt1_episode_kernel(%arg0: i32, %arg1: memref<1x96x192xbf16, #tpu.memory_space<vmem>>, %arg2: memref<1x1x32xbf16, #tpu.memory_space<vmem>>, %arg3: memref<192x64xbf16, #tpu.memory_space<vmem>>, %arg4: memref<1x64xf32, #tpu.memory_space<vmem>>, %arg5: memref<32x128xbf16, #tpu.memory_space<vmem>>, %arg6: memref<1x128xf32, #tpu.memory_space<vmem>>, %arg7: memref<64x8xbf16, #tpu.memory_space<vmem>>, %arg8: memref<48x64xf32, #tpu.memory_space<vmem>>, %arg9: memref<2x1x64xf32, #tpu.memory_space<vmem>>, %arg10: memref<2x1x64xf32, #tpu.memory_space<vmem>>, %arg11: memref<2x64x192xbf16, #tpu.memory_space<vmem>>, %arg12: memref<2x1x192xf32, #tpu.memory_space<vmem>>, %arg13: memref<2x64x64xbf16, #tpu.memory_space<vmem>>, %arg14: memref<2x1x64xf32, #tpu.memory_space<vmem>>, %arg15: memref<2x1x64xf32, #tpu.memory_space<vmem>>, %arg16: memref<2x1x64xf32, #tpu.memory_space<vmem>>, %arg17: memref<2x64x128xbf16, #tpu.memory_space<vmem>>, %arg18: memref<2x1x128xf32, #tpu.memory_space<vmem>>, %arg19: memref<2x128x64xbf16, #tpu.memory_space<vmem>>, %arg20: memref<2x1x64xf32, #tpu.memory_space<vmem>>, %arg21: memref<1x1x64xf32, #tpu.memory_space<vmem>>) attributes {dimension_semantics = [#tpu.dimension_semantics<parallel>], iteration_bounds = array<i64: 2>, scalar_prefetch = 0 : i64, scratch_operands = 0 : i64, tpu.core_type = #tpu.core_type<tc>, window_params = [{transform_indices = @transform_0, window_bounds = array<i64: 1, 96, 192>}, {transform_indices = @transform_1, window_bounds = array<i64: 1, 1, 32>}, {pipeline_mode = #tpu.pipeline_mode<synchronous>, transform_indices = @transform_2, window_bounds = array<i64: 192, 64>}, {pipeline_mode = #tpu.pipeline_mode<synchronous>, transform_indices = @transform_3, window_bounds = array<i64: 1, 64>}, {pipeline_mode = #tpu.pipeline_mode<synchronous>, transform_indices = @transform_4, window_bounds = array<i64: 32, 128>}, {pipeline_mode = #tpu.pipeline_mode<synchronous>, transform_indices = @transform_5, window_bounds = array<i64: 1, 128>}, {pipeline_mode = #tpu.pipeline_mode<synchronous>, transform_indices = @transform_6, window_bounds = array<i64: 64, 8>}, {pipeline_mode = #tpu.pipeline_mode<synchronous>, transform_indices = @transform_7, window_bounds = array<i64: 48, 64>}, {pipeline_mode = #tpu.pipeline_mode<synchronous>, transform_indices = @transform_8, window_bounds = array<i64: 2, 1, 64>}, {pipeline_mode = #tpu.pipeline_mode<synchronous>, transform_indices = @transform_9, window_bounds = array<i64: 2, 1, 64>}, {pipeline_mode = #tpu.pipeline_mode<synchronous>, transform_indices = @transform_10, window_bounds = array<i64: 2, 64, 192>}, {pipeline_mode = #tpu.pipeline_mode<synchronous>, transform_indices = @transform_11, window_bounds = array<i64: 2, 1, 192>}, {pipeline_mode = #tpu.pipeline_mode<synchronous>, transform_indices = @transform_12, window_bounds = array<i64: 2, 64, 64>}, {pipeline_mode = #tpu.pipeline_mode<synchronous>, transform_indices = @transform_13, window_bounds = array<i64: 2, 1, 64>}, {pipeline_mode = #tpu.pipeline_mode<synchronous>, transform_indices = @transform_14, window_bounds = array<i64: 2, 1, 64>}, {pipeline_mode = #tpu.pipeline_mode<synchronous>, transform_indices = @transform_15, window_bounds = array<i64: 2, 1, 64>}, {pipeline_mode = #tpu.pipeline_mode<synchronous>, transform_indices = @transform_16, window_bounds = array<i64: 2, 64, 128>}, {pipeline_mode = #tpu.pipeline_mode<synchronous>, transform_indices = @transform_17, window_bounds = array<i64: 2, 1, 128>}, {pipeline_mode = #tpu.pipeline_mode<synchronous>, transform_indices = @transform_18, window_bounds = array<i64: 2, 128, 64>}, {pipeline_mode = #tpu.pipeline_mode<synchronous>, transform_indices = @transform_19, window_bounds = array<i64: 2, 1, 64>}, {transform_indices = @transform_20, window_bounds = array<i64: 1, 1, 64>}]} {
    %c0 = arith.constant 0 : index
    %c0_0 = arith.constant 0 : index
    %c0_1 = arith.constant 0 : index
    %0 = vector.load %arg1[%c0, %c0_0, %c0_1] : memref<1x96x192xbf16, #tpu.memory_space<vmem>>, vector<1x96x192xbf16>
    %1 = vector.shape_cast %0 : vector<1x96x192xbf16> to vector<96x192xbf16>
    %c0_2 = arith.constant 0 : index
    %c0_3 = arith.constant 0 : index
    %c0_4 = arith.constant 0 : index
    %2 = vector.load %arg2[%c0_2, %c0_3, %c0_4] : memref<1x1x32xbf16, #tpu.memory_space<vmem>>, vector<1x1x32xbf16>
    %3 = vector.shape_cast %2 : vector<1x1x32xbf16> to vector<1x32xbf16>
    %c0_5 = arith.constant 0 : index
    %c0_6 = arith.constant 0 : index
    %4 = vector.load %arg3[%c0_5, %c0_6] : memref<192x64xbf16, #tpu.memory_space<vmem>>, vector<192x64xbf16>
    %cst = arith.constant dense<0.000000e+00> : vector<96x64xf32>
    %5 = tpu.matmul %1, %4, %cst {dimension_numbers = #tpu.dot_dimension_numbers<[1], [0], [0], [1], [0, 0, 1, 1], [], []>} : vector<96x192xbf16>, vector<192x64xbf16>, vector<96x64xf32> -> vector<96x64xf32>
    %c0_7 = arith.constant 0 : index
    %c0_8 = arith.constant 0 : index
    %6 = vector.load %arg4[%c0_7, %c0_8] : memref<1x64xf32, #tpu.memory_space<vmem>>, vector<1x64xf32>
    %7 = vector.broadcast %6 : vector<1x64xf32> to vector<96x64xf32>
    %8 = arith.addf %5, %7 : vector<96x64xf32>
    %c0_9 = arith.constant 0 : index
    %c0_10 = arith.constant 0 : index
    %9 = vector.load %arg5[%c0_9, %c0_10] : memref<32x128xbf16, #tpu.memory_space<vmem>>, vector<32x128xbf16>
    %cst_11 = arith.constant dense<0.000000e+00> : vector<1x128xf32>
    %10 = tpu.matmul %3, %9, %cst_11 {dimension_numbers = #tpu.dot_dimension_numbers<[1], [0], [0], [1], [0, 0, 1, 1], [], []>} : vector<1x32xbf16>, vector<32x128xbf16>, vector<1x128xf32> -> vector<1x128xf32>
    %c0_12 = arith.constant 0 : index
    %c0_13 = arith.constant 0 : index
    %11 = vector.load %arg6[%c0_12, %c0_13] : memref<1x128xf32, #tpu.memory_space<vmem>>, vector<1x128xf32>
    %12 = arith.addf %10, %11 : vector<1x128xf32>
    %13 = vector.extract_strided_slice %12 {offsets = [0, 0], sizes = [1, 64], strides = [1, 1]} : vector<1x128xf32> to vector<1x64xf32>
    %14 = vector.extract_strided_slice %12 {offsets = [0, 64], sizes = [1, 64], strides = [1, 1]} : vector<1x128xf32> to vector<1x64xf32>
    %cst_14 = arith.constant 1.000000e+00 : f32
    %15 = vector.broadcast %cst_14 : f32 to vector<1x64xf32>
    %16 = arith.addf %15, %13 : vector<1x64xf32>
    %17 = vector.broadcast %16 : vector<1x64xf32> to vector<96x64xf32>
    %18 = arith.mulf %8, %17 : vector<96x64xf32>
    %19 = vector.broadcast %14 : vector<1x64xf32> to vector<96x64xf32>
    %20 = arith.addf %18, %19 : vector<96x64xf32>
    %cst_15 = arith.constant 0.000000e+00 : f32
    %21 = vector.broadcast %cst_15 : f32 to vector<96x64xf32>
    %22 = arith.maximumf %20, %21 : vector<96x64xf32>
    %23 = arith.truncf %22 : vector<96x64xf32> to vector<96x64xbf16>
    %c0_16 = arith.constant 0 : index
    %c0_17 = arith.constant 0 : index
    %24 = vector.load %arg7[%c0_16, %c0_17] : memref<64x8xbf16, #tpu.memory_space<vmem>>, vector<64x8xbf16>
    %cst_18 = arith.constant dense<0.000000e+00> : vector<96x8xf32>
    %25 = tpu.matmul %23, %24, %cst_18 {dimension_numbers = #tpu.dot_dimension_numbers<[1], [0], [0], [1], [0, 0, 1, 1], [], []>} : vector<96x64xbf16>, vector<64x8xbf16>, vector<96x8xf32> -> vector<96x8xf32>
    %26 = vector.shape_cast %25 : vector<96x8xf32> to vector<6x16x8xf32>
    %cst_19 = arith.constant dense<0xFF800000> : vector<6x8xf32>
    %27 = vector.multi_reduction <maximumf>, %26, %cst_19 [1] : vector<6x16x8xf32> to vector<6x8xf32>
    %28 = vector.shape_cast %27 : vector<6x8xf32> to vector<6x1x8xf32>
    %29 = vector.broadcast %28 : vector<6x1x8xf32> to vector<6x16x8xf32>
    %30 = arith.subf %26, %29 : vector<6x16x8xf32>
    %31 = math.exp %30 : vector<6x16x8xf32>
    %cst_20 = arith.constant dense<0.000000e+00> : vector<6x8xf32>
    %32 = vector.multi_reduction <add>, %31, %cst_20 [1] : vector<6x16x8xf32> to vector<6x8xf32>
    %33 = vector.shape_cast %32 : vector<6x8xf32> to vector<6x1x8xf32>
    %34 = tpu.reciprocal %33 {approx = true} : vector<6x1x8xf32> -> vector<6x1x8xf32>
    %35 = vector.broadcast %34 : vector<6x1x8xf32> to vector<6x16x8xf32>
    %36 = arith.mulf %31, %35 : vector<6x16x8xf32>
    %37 = tpu.transpose %36, [0, 2, 1] : vector<6x16x8xf32> -> vector<6x8x16xf32>
    %38 = arith.truncf %37 : vector<6x8x16xf32> to vector<6x8x16xbf16>
    %39 = vector.shape_cast %22 : vector<96x64xf32> to vector<6x16x64xf32>
    %40 = arith.truncf %39 : vector<6x16x64xf32> to vector<6x16x64xbf16>
    "tpu.trace_start"() <{level = 10 : i32, message = "fnp,fpd->fnd"}> : () -> ()
    %cst_21 = arith.constant dense<0.000000e+00> : vector<6x8x64xf32>
    %41 = tpu.matmul %38, %40, %cst_21 {dimension_numbers = #tpu.dot_dimension_numbers<[2], [1], [1], [2], [0, 0, 0, 1, 1, 2], [0], [0]>} : vector<6x8x16xbf16>, vector<6x16x64xbf16>, vector<6x8x64xf32> -> vector<6x8x64xf32>
    "tpu.trace_stop"() : () -> ()
    %42 = vector.shape_cast %41 : vector<6x8x64xf32> to vector<48x64xf32>
    %c0_22 = arith.constant 0 : index
    %c0_23 = arith.constant 0 : index
    %43 = vector.load %arg8[%c0_22, %c0_23] : memref<48x64xf32, #tpu.memory_space<vmem>>, vector<48x64xf32>
    %44 = arith.addf %42, %43 : vector<48x64xf32>
    %45 = tpu.iota {dimensions = array<i32: 0>} : vector<48x48xi32>
    %46 = tpu.iota {dimensions = array<i32: 1>} : vector<48x48xi32>
    %47 = arith.cmpi sle, %46, %45 : vector<48x48xi32>
    %c0_i32 = arith.constant 0 : i32
    %48 = arith.index_cast %c0_i32 : i32 to index
    %c0_24 = arith.constant 0 : index
    %c0_25 = arith.constant 0 : index
    %49 = vector.load %arg9[%48, %c0_24, %c0_25] : memref<2x1x64xf32, #tpu.memory_space<vmem>>, vector<1x1x64xf32>
    %50 = vector.shape_cast %49 : vector<1x1x64xf32> to vector<1x64xf32>
    %51 = arith.index_cast %c0_i32 : i32 to index
    %c0_26 = arith.constant 0 : index
    %c0_27 = arith.constant 0 : index
    %52 = vector.load %arg10[%51, %c0_26, %c0_27] : memref<2x1x64xf32, #tpu.memory_space<vmem>>, vector<1x1x64xf32>
    %53 = vector.shape_cast %52 : vector<1x1x64xf32> to vector<1x64xf32>
    %cst_28 = arith.constant dense<0.000000e+00> : vector<48xf32>
    %54 = vector.multi_reduction <add>, %44, %cst_28 [1] : vector<48x64xf32> to vector<48xf32>
    %55 = vector.shape_cast %54 : vector<48xf32> to vector<48x1xf32>
    %cst_29 = arith.constant 6.400000e+01 : f32
    %56 = vector.broadcast %cst_29 : f32 to vector<48x1xf32>
    %57 = arith.divf %55, %56 : vector<48x1xf32>
    %58 = vector.broadcast %57 : vector<48x1xf32> to vector<48x64xf32>
    %59 = arith.subf %44, %58 : vector<48x64xf32>
    %60 = arith.mulf %59, %59 : vector<48x64xf32>
    %cst_30 = arith.constant dense<0.000000e+00> : vector<48xf32>
    %61 = vector.multi_reduction <add>, %60, %cst_30 [1] : vector<48x64xf32> to vector<48xf32>
    %62 = vector.shape_cast %61 : vector<48xf32> to vector<48x1xf32>
    %cst_31 = arith.constant 6.400000e+01 : f32
    %63 = vector.broadcast %cst_31 : f32 to vector<48x1xf32>
    %64 = arith.divf %62, %63 : vector<48x1xf32>
    %65 = vector.broadcast %57 : vector<48x1xf32> to vector<48x64xf32>
    %66 = arith.subf %44, %65 : vector<48x64xf32>
    %cst_32 = arith.constant 9.99999974E-6 : f32
    %67 = vector.broadcast %cst_32 : f32 to vector<48x1xf32>
    %68 = arith.addf %64, %67 : vector<48x1xf32>
    %69 = math.rsqrt %68 : vector<48x1xf32>
    %70 = vector.broadcast %69 : vector<48x1xf32> to vector<48x64xf32>
    %71 = arith.mulf %66, %70 : vector<48x64xf32>
    %72 = vector.broadcast %50 : vector<1x64xf32> to vector<48x64xf32>
    %73 = arith.mulf %71, %72 : vector<48x64xf32>
    %74 = vector.broadcast %53 : vector<1x64xf32> to vector<48x64xf32>
    %75 = arith.addf %73, %74 : vector<48x64xf32>
    %76 = arith.truncf %75 : vector<48x64xf32> to vector<48x64xbf16>
    %77 = arith.index_cast %c0_i32 : i32 to index
    %c0_33 = arith.constant 0 : index
    %c0_34 = arith.constant 0 : index
    %78 = vector.load %arg11[%77, %c0_33, %c0_34] : memref<2x64x192xbf16, #tpu.memory_space<vmem>>, vector<1x64x192xbf16>
    %79 = vector.shape_cast %78 : vector<1x64x192xbf16> to vector<64x192xbf16>
    %cst_35 = arith.constant dense<0.000000e+00> : vector<48x192xf32>
    %80 = tpu.matmul %76, %79, %cst_35 {dimension_numbers = #tpu.dot_dimension_numbers<[1], [0], [0], [1], [0, 0, 1, 1], [], []>} : vector<48x64xbf16>, vector<64x192xbf16>, vector<48x192xf32> -> vector<48x192xf32>
    %81 = arith.index_cast %c0_i32 : i32 to index
    %c0_36 = arith.constant 0 : index
    %c0_37 = arith.constant 0 : index
    %82 = vector.load %arg12[%81, %c0_36, %c0_37] : memref<2x1x192xf32, #tpu.memory_space<vmem>>, vector<1x1x192xf32>
    %83 = vector.shape_cast %82 : vector<1x1x192xf32> to vector<1x192xf32>
    %84 = vector.broadcast %83 : vector<1x192xf32> to vector<48x192xf32>
    %85 = arith.addf %80, %84 : vector<48x192xf32>
    %86 = vector.shape_cast %85 : vector<48x192xf32> to vector<48x12x16xf32>
    %87 = tpu.transpose %86, [1, 0, 2] : vector<48x12x16xf32> -> vector<12x48x16xf32>
    %88 = arith.truncf %87 : vector<12x48x16xf32> to vector<12x48x16xbf16>
    %89 = vector.extract_strided_slice %88 {offsets = [0, 0, 0], sizes = [4, 48, 16], strides = [1, 1, 1]} : vector<12x48x16xbf16> to vector<4x48x16xbf16>
    %90 = vector.extract_strided_slice %88 {offsets = [4, 0, 0], sizes = [4, 48, 16], strides = [1, 1, 1]} : vector<12x48x16xbf16> to vector<4x48x16xbf16>
    %91 = vector.extract_strided_slice %88 {offsets = [8, 0, 0], sizes = [4, 48, 16], strides = [1, 1, 1]} : vector<12x48x16xbf16> to vector<4x48x16xbf16>
    "tpu.trace_start"() <{level = 10 : i32, message = "hqd,hkd->hqk"}> : () -> ()
    %cst_38 = arith.constant dense<0.000000e+00> : vector<4x48x48xf32>
    %92 = tpu.matmul %89, %90, %cst_38 {dimension_numbers = #tpu.dot_dimension_numbers<[2], [2], [1], [1], [0, 0, 0, 1, 1, 1], [0], [0]>} : vector<4x48x16xbf16>, vector<4x48x16xbf16>, vector<4x48x48xf32> -> vector<4x48x48xf32>
    "tpu.trace_stop"() : () -> ()
    %cst_39 = arith.constant 2.500000e-01 : f32
    %93 = vector.broadcast %cst_39 : f32 to vector<4x48x48xf32>
    %94 = arith.mulf %92, %93 : vector<4x48x48xf32>
    %95 = vector.shape_cast %47 : vector<48x48xi1> to vector<1x48x48xi1>
    %cst_40 = arith.constant -1.000000e+30 : f32
    %96 = vector.shape_cast %95 : vector<1x48x48xi1> to vector<1x48x48xi1>
    %97 = vector.broadcast %96 : vector<1x48x48xi1> to vector<4x48x48xi1>
    %98 = vector.broadcast %cst_40 : f32 to vector<4x48x48xf32>
    %99 = arith.select %97, %94, %98 : vector<4x48x48xi1>, vector<4x48x48xf32>
    %cst_41 = arith.constant dense<0xFF800000> : vector<4x48xf32>
    %100 = vector.multi_reduction <maximumf>, %99, %cst_41 [2] : vector<4x48x48xf32> to vector<4x48xf32>
    %101 = vector.shape_cast %100 : vector<4x48xf32> to vector<4x48x1xf32>
    %102 = vector.broadcast %101 : vector<4x48x1xf32> to vector<4x48x48xf32>
    %103 = arith.subf %99, %102 : vector<4x48x48xf32>
    %104 = math.exp %103 : vector<4x48x48xf32>
    %cst_42 = arith.constant dense<0.000000e+00> : vector<4x48xf32>
    %105 = vector.multi_reduction <add>, %104, %cst_42 [2] : vector<4x48x48xf32> to vector<4x48xf32>
    %106 = vector.shape_cast %105 : vector<4x48xf32> to vector<4x48x1xf32>
    %107 = tpu.reciprocal %106 {approx = true} : vector<4x48x1xf32> -> vector<4x48x1xf32>
    %108 = vector.broadcast %107 : vector<4x48x1xf32> to vector<4x48x48xf32>
    %109 = arith.mulf %104, %108 : vector<4x48x48xf32>
    %110 = arith.truncf %109 : vector<4x48x48xf32> to vector<4x48x48xbf16>
    "tpu.trace_start"() <{level = 10 : i32, message = "hqk,hkd->hqd"}> : () -> ()
    %cst_43 = arith.constant dense<0.000000e+00> : vector<4x48x16xf32>
    %111 = tpu.matmul %110, %91, %cst_43 {dimension_numbers = #tpu.dot_dimension_numbers<[2], [1], [1], [2], [0, 0, 0, 1, 1, 2], [0], [0]>} : vector<4x48x48xbf16>, vector<4x48x16xbf16>, vector<4x48x16xf32> -> vector<4x48x16xf32>
    "tpu.trace_stop"() : () -> ()
    %112 = tpu.transpose %111, [1, 0, 2] : vector<4x48x16xf32> -> vector<48x4x16xf32>
    %113 = vector.shape_cast %112 : vector<48x4x16xf32> to vector<48x64xf32>
    %114 = arith.truncf %113 : vector<48x64xf32> to vector<48x64xbf16>
    %115 = arith.index_cast %c0_i32 : i32 to index
    %c0_44 = arith.constant 0 : index
    %c0_45 = arith.constant 0 : index
    %116 = vector.load %arg13[%115, %c0_44, %c0_45] : memref<2x64x64xbf16, #tpu.memory_space<vmem>>, vector<1x64x64xbf16>
    %117 = vector.shape_cast %116 : vector<1x64x64xbf16> to vector<64x64xbf16>
    %cst_46 = arith.constant dense<0.000000e+00> : vector<48x64xf32>
    %118 = tpu.matmul %114, %117, %cst_46 {dimension_numbers = #tpu.dot_dimension_numbers<[1], [0], [0], [1], [0, 0, 1, 1], [], []>} : vector<48x64xbf16>, vector<64x64xbf16>, vector<48x64xf32> -> vector<48x64xf32>
    %119 = arith.index_cast %c0_i32 : i32 to index
    %c0_47 = arith.constant 0 : index
    %c0_48 = arith.constant 0 : index
    %120 = vector.load %arg14[%119, %c0_47, %c0_48] : memref<2x1x64xf32, #tpu.memory_space<vmem>>, vector<1x1x64xf32>
    %121 = vector.shape_cast %120 : vector<1x1x64xf32> to vector<1x64xf32>
    %122 = vector.broadcast %121 : vector<1x64xf32> to vector<48x64xf32>
    %123 = arith.addf %118, %122 : vector<48x64xf32>
    %124 = arith.addf %44, %123 : vector<48x64xf32>
    %125 = arith.index_cast %c0_i32 : i32 to index
    %c0_49 = arith.constant 0 : index
    %c0_50 = arith.constant 0 : index
    %126 = vector.load %arg15[%125, %c0_49, %c0_50] : memref<2x1x64xf32, #tpu.memory_space<vmem>>, vector<1x1x64xf32>
    %127 = vector.shape_cast %126 : vector<1x1x64xf32> to vector<1x64xf32>
    %128 = arith.index_cast %c0_i32 : i32 to index
    %c0_51 = arith.constant 0 : index
    %c0_52 = arith.constant 0 : index
    %129 = vector.load %arg16[%128, %c0_51, %c0_52] : memref<2x1x64xf32, #tpu.memory_space<vmem>>, vector<1x1x64xf32>
    %130 = vector.shape_cast %129 : vector<1x1x64xf32> to vector<1x64xf32>
    %cst_53 = arith.constant dense<0.000000e+00> : vector<48xf32>
    %131 = vector.multi_reduction <add>, %124, %cst_53 [1] : vector<48x64xf32> to vector<48xf32>
    %132 = vector.shape_cast %131 : vector<48xf32> to vector<48x1xf32>
    %cst_54 = arith.constant 6.400000e+01 : f32
    %133 = vector.broadcast %cst_54 : f32 to vector<48x1xf32>
    %134 = arith.divf %132, %133 : vector<48x1xf32>
    %135 = vector.broadcast %134 : vector<48x1xf32> to vector<48x64xf32>
    %136 = arith.subf %124, %135 : vector<48x64xf32>
    %137 = arith.mulf %136, %136 : vector<48x64xf32>
    %cst_55 = arith.constant dense<0.000000e+00> : vector<48xf32>
    %138 = vector.multi_reduction <add>, %137, %cst_55 [1] : vector<48x64xf32> to vector<48xf32>
    %139 = vector.shape_cast %138 : vector<48xf32> to vector<48x1xf32>
    %cst_56 = arith.constant 6.400000e+01 : f32
    %140 = vector.broadcast %cst_56 : f32 to vector<48x1xf32>
    %141 = arith.divf %139, %140 : vector<48x1xf32>
    %142 = vector.broadcast %134 : vector<48x1xf32> to vector<48x64xf32>
    %143 = arith.subf %124, %142 : vector<48x64xf32>
    %cst_57 = arith.constant 9.99999974E-6 : f32
    %144 = vector.broadcast %cst_57 : f32 to vector<48x1xf32>
    %145 = arith.addf %141, %144 : vector<48x1xf32>
    %146 = math.rsqrt %145 : vector<48x1xf32>
    %147 = vector.broadcast %146 : vector<48x1xf32> to vector<48x64xf32>
    %148 = arith.mulf %143, %147 : vector<48x64xf32>
    %149 = vector.broadcast %127 : vector<1x64xf32> to vector<48x64xf32>
    %150 = arith.mulf %148, %149 : vector<48x64xf32>
    %151 = vector.broadcast %130 : vector<1x64xf32> to vector<48x64xf32>
    %152 = arith.addf %150, %151 : vector<48x64xf32>
    %153 = arith.truncf %152 : vector<48x64xf32> to vector<48x64xbf16>
    %154 = arith.index_cast %c0_i32 : i32 to index
    %c0_58 = arith.constant 0 : index
    %c0_59 = arith.constant 0 : index
    %155 = vector.load %arg17[%154, %c0_58, %c0_59] : memref<2x64x128xbf16, #tpu.memory_space<vmem>>, vector<1x64x128xbf16>
    %156 = vector.shape_cast %155 : vector<1x64x128xbf16> to vector<64x128xbf16>
    %cst_60 = arith.constant dense<0.000000e+00> : vector<48x128xf32>
    %157 = tpu.matmul %153, %156, %cst_60 {dimension_numbers = #tpu.dot_dimension_numbers<[1], [0], [0], [1], [0, 0, 1, 1], [], []>} : vector<48x64xbf16>, vector<64x128xbf16>, vector<48x128xf32> -> vector<48x128xf32>
    %158 = arith.index_cast %c0_i32 : i32 to index
    %c0_61 = arith.constant 0 : index
    %c0_62 = arith.constant 0 : index
    %159 = vector.load %arg18[%158, %c0_61, %c0_62] : memref<2x1x128xf32, #tpu.memory_space<vmem>>, vector<1x1x128xf32>
    %160 = vector.shape_cast %159 : vector<1x1x128xf32> to vector<1x128xf32>
    %161 = vector.broadcast %160 : vector<1x128xf32> to vector<48x128xf32>
    %162 = arith.addf %157, %161 : vector<48x128xf32>
    %163 = arith.mulf %162, %162 : vector<48x128xf32>
    %164 = arith.mulf %162, %163 : vector<48x128xf32>
    %cst_63 = arith.constant 4.471500e-02 : f32
    %165 = vector.broadcast %cst_63 : f32 to vector<48x128xf32>
    %166 = arith.mulf %165, %164 : vector<48x128xf32>
    %167 = arith.addf %162, %166 : vector<48x128xf32>
    %cst_64 = arith.constant 0.797884583 : f32
    %168 = vector.broadcast %cst_64 : f32 to vector<48x128xf32>
    %169 = arith.mulf %168, %167 : vector<48x128xf32>
    %170 = math.tanh %169 : vector<48x128xf32>
    %cst_65 = arith.constant 1.000000e+00 : f32
    %171 = vector.broadcast %cst_65 : f32 to vector<48x128xf32>
    %172 = arith.addf %171, %170 : vector<48x128xf32>
    %cst_66 = arith.constant 5.000000e-01 : f32
    %173 = vector.broadcast %cst_66 : f32 to vector<48x128xf32>
    %174 = arith.mulf %173, %172 : vector<48x128xf32>
    %175 = arith.mulf %162, %174 : vector<48x128xf32>
    %176 = arith.truncf %175 : vector<48x128xf32> to vector<48x128xbf16>
    %177 = arith.index_cast %c0_i32 : i32 to index
    %c0_67 = arith.constant 0 : index
    %c0_68 = arith.constant 0 : index
    %178 = vector.load %arg19[%177, %c0_67, %c0_68] : memref<2x128x64xbf16, #tpu.memory_space<vmem>>, vector<1x128x64xbf16>
    %179 = vector.shape_cast %178 : vector<1x128x64xbf16> to vector<128x64xbf16>
    %cst_69 = arith.constant dense<0.000000e+00> : vector<48x64xf32>
    %180 = tpu.matmul %176, %179, %cst_69 {dimension_numbers = #tpu.dot_dimension_numbers<[1], [0], [0], [1], [0, 0, 1, 1], [], []>} : vector<48x128xbf16>, vector<128x64xbf16>, vector<48x64xf32> -> vector<48x64xf32>
    %181 = arith.index_cast %c0_i32 : i32 to index
    %c0_70 = arith.constant 0 : index
    %c0_71 = arith.constant 0 : index
    %182 = vector.load %arg20[%181, %c0_70, %c0_71] : memref<2x1x64xf32, #tpu.memory_space<vmem>>, vector<1x1x64xf32>
    %183 = vector.shape_cast %182 : vector<1x1x64xf32> to vector<1x64xf32>
    %184 = vector.broadcast %183 : vector<1x64xf32> to vector<48x64xf32>
    %185 = arith.addf %180, %184 : vector<48x64xf32>
    %186 = arith.addf %124, %185 : vector<48x64xf32>
    %c1_i32 = arith.constant 1 : i32
    %187 = arith.index_cast %c1_i32 : i32 to index
    %c0_72 = arith.constant 0 : index
    %c0_73 = arith.constant 0 : index
    %188 = vector.load %arg9[%187, %c0_72, %c0_73] : memref<2x1x64xf32, #tpu.memory_space<vmem>>, vector<1x1x64xf32>
    %189 = vector.shape_cast %188 : vector<1x1x64xf32> to vector<1x64xf32>
    %190 = arith.index_cast %c1_i32 : i32 to index
    %c0_74 = arith.constant 0 : index
    %c0_75 = arith.constant 0 : index
    %191 = vector.load %arg10[%190, %c0_74, %c0_75] : memref<2x1x64xf32, #tpu.memory_space<vmem>>, vector<1x1x64xf32>
    %192 = vector.shape_cast %191 : vector<1x1x64xf32> to vector<1x64xf32>
    %cst_76 = arith.constant dense<0.000000e+00> : vector<48xf32>
    %193 = vector.multi_reduction <add>, %186, %cst_76 [1] : vector<48x64xf32> to vector<48xf32>
    %194 = vector.shape_cast %193 : vector<48xf32> to vector<48x1xf32>
    %cst_77 = arith.constant 6.400000e+01 : f32
    %195 = vector.broadcast %cst_77 : f32 to vector<48x1xf32>
    %196 = arith.divf %194, %195 : vector<48x1xf32>
    %197 = vector.broadcast %196 : vector<48x1xf32> to vector<48x64xf32>
    %198 = arith.subf %186, %197 : vector<48x64xf32>
    %199 = arith.mulf %198, %198 : vector<48x64xf32>
    %cst_78 = arith.constant dense<0.000000e+00> : vector<48xf32>
    %200 = vector.multi_reduction <add>, %199, %cst_78 [1] : vector<48x64xf32> to vector<48xf32>
    %201 = vector.shape_cast %200 : vector<48xf32> to vector<48x1xf32>
    %cst_79 = arith.constant 6.400000e+01 : f32
    %202 = vector.broadcast %cst_79 : f32 to vector<48x1xf32>
    %203 = arith.divf %201, %202 : vector<48x1xf32>
    %204 = vector.broadcast %196 : vector<48x1xf32> to vector<48x64xf32>
    %205 = arith.subf %186, %204 : vector<48x64xf32>
    %cst_80 = arith.constant 9.99999974E-6 : f32
    %206 = vector.broadcast %cst_80 : f32 to vector<48x1xf32>
    %207 = arith.addf %203, %206 : vector<48x1xf32>
    %208 = math.rsqrt %207 : vector<48x1xf32>
    %209 = vector.broadcast %208 : vector<48x1xf32> to vector<48x64xf32>
    %210 = arith.mulf %205, %209 : vector<48x64xf32>
    %211 = vector.broadcast %189 : vector<1x64xf32> to vector<48x64xf32>
    %212 = arith.mulf %210, %211 : vector<48x64xf32>
    %213 = vector.broadcast %192 : vector<1x64xf32> to vector<48x64xf32>
    %214 = arith.addf %212, %213 : vector<48x64xf32>
    %215 = arith.truncf %214 : vector<48x64xf32> to vector<48x64xbf16>
    %216 = arith.index_cast %c1_i32 : i32 to index
    %c0_81 = arith.constant 0 : index
    %c0_82 = arith.constant 0 : index
    %217 = vector.load %arg11[%216, %c0_81, %c0_82] : memref<2x64x192xbf16, #tpu.memory_space<vmem>>, vector<1x64x192xbf16>
    %218 = vector.shape_cast %217 : vector<1x64x192xbf16> to vector<64x192xbf16>
    %cst_83 = arith.constant dense<0.000000e+00> : vector<48x192xf32>
    %219 = tpu.matmul %215, %218, %cst_83 {dimension_numbers = #tpu.dot_dimension_numbers<[1], [0], [0], [1], [0, 0, 1, 1], [], []>} : vector<48x64xbf16>, vector<64x192xbf16>, vector<48x192xf32> -> vector<48x192xf32>
    %220 = arith.index_cast %c1_i32 : i32 to index
    %c0_84 = arith.constant 0 : index
    %c0_85 = arith.constant 0 : index
    %221 = vector.load %arg12[%220, %c0_84, %c0_85] : memref<2x1x192xf32, #tpu.memory_space<vmem>>, vector<1x1x192xf32>
    %222 = vector.shape_cast %221 : vector<1x1x192xf32> to vector<1x192xf32>
    %223 = vector.broadcast %222 : vector<1x192xf32> to vector<48x192xf32>
    %224 = arith.addf %219, %223 : vector<48x192xf32>
    %225 = vector.shape_cast %224 : vector<48x192xf32> to vector<48x12x16xf32>
    %226 = tpu.transpose %225, [1, 0, 2] : vector<48x12x16xf32> -> vector<12x48x16xf32>
    %227 = arith.truncf %226 : vector<12x48x16xf32> to vector<12x48x16xbf16>
    %228 = vector.extract_strided_slice %227 {offsets = [0, 0, 0], sizes = [4, 48, 16], strides = [1, 1, 1]} : vector<12x48x16xbf16> to vector<4x48x16xbf16>
    %229 = vector.extract_strided_slice %227 {offsets = [4, 0, 0], sizes = [4, 48, 16], strides = [1, 1, 1]} : vector<12x48x16xbf16> to vector<4x48x16xbf16>
    %230 = vector.extract_strided_slice %227 {offsets = [8, 0, 0], sizes = [4, 48, 16], strides = [1, 1, 1]} : vector<12x48x16xbf16> to vector<4x48x16xbf16>
    "tpu.trace_start"() <{level = 10 : i32, message = "hqd,hkd->hqk"}> : () -> ()
    %cst_86 = arith.constant dense<0.000000e+00> : vector<4x48x48xf32>
    %231 = tpu.matmul %228, %229, %cst_86 {dimension_numbers = #tpu.dot_dimension_numbers<[2], [2], [1], [1], [0, 0, 0, 1, 1, 1], [0], [0]>} : vector<4x48x16xbf16>, vector<4x48x16xbf16>, vector<4x48x48xf32> -> vector<4x48x48xf32>
    "tpu.trace_stop"() : () -> ()
    %cst_87 = arith.constant 2.500000e-01 : f32
    %232 = vector.broadcast %cst_87 : f32 to vector<4x48x48xf32>
    %233 = arith.mulf %231, %232 : vector<4x48x48xf32>
    %234 = vector.shape_cast %47 : vector<48x48xi1> to vector<1x48x48xi1>
    %cst_88 = arith.constant -1.000000e+30 : f32
    %235 = vector.shape_cast %234 : vector<1x48x48xi1> to vector<1x48x48xi1>
    %236 = vector.broadcast %235 : vector<1x48x48xi1> to vector<4x48x48xi1>
    %237 = vector.broadcast %cst_88 : f32 to vector<4x48x48xf32>
    %238 = arith.select %236, %233, %237 : vector<4x48x48xi1>, vector<4x48x48xf32>
    %cst_89 = arith.constant dense<0xFF800000> : vector<4x48xf32>
    %239 = vector.multi_reduction <maximumf>, %238, %cst_89 [2] : vector<4x48x48xf32> to vector<4x48xf32>
    %240 = vector.shape_cast %239 : vector<4x48xf32> to vector<4x48x1xf32>
    %241 = vector.broadcast %240 : vector<4x48x1xf32> to vector<4x48x48xf32>
    %242 = arith.subf %238, %241 : vector<4x48x48xf32>
    %243 = math.exp %242 : vector<4x48x48xf32>
    %cst_90 = arith.constant dense<0.000000e+00> : vector<4x48xf32>
    %244 = vector.multi_reduction <add>, %243, %cst_90 [2] : vector<4x48x48xf32> to vector<4x48xf32>
    %245 = vector.shape_cast %244 : vector<4x48xf32> to vector<4x48x1xf32>
    %246 = tpu.reciprocal %245 {approx = true} : vector<4x48x1xf32> -> vector<4x48x1xf32>
    %247 = vector.broadcast %246 : vector<4x48x1xf32> to vector<4x48x48xf32>
    %248 = arith.mulf %243, %247 : vector<4x48x48xf32>
    %249 = arith.truncf %248 : vector<4x48x48xf32> to vector<4x48x48xbf16>
    "tpu.trace_start"() <{level = 10 : i32, message = "hqk,hkd->hqd"}> : () -> ()
    %cst_91 = arith.constant dense<0.000000e+00> : vector<4x48x16xf32>
    %250 = tpu.matmul %249, %230, %cst_91 {dimension_numbers = #tpu.dot_dimension_numbers<[2], [1], [1], [2], [0, 0, 0, 1, 1, 2], [0], [0]>} : vector<4x48x48xbf16>, vector<4x48x16xbf16>, vector<4x48x16xf32> -> vector<4x48x16xf32>
    "tpu.trace_stop"() : () -> ()
    %251 = tpu.transpose %250, [1, 0, 2] : vector<4x48x16xf32> -> vector<48x4x16xf32>
    %252 = vector.shape_cast %251 : vector<48x4x16xf32> to vector<48x64xf32>
    %253 = arith.truncf %252 : vector<48x64xf32> to vector<48x64xbf16>
    %254 = arith.index_cast %c1_i32 : i32 to index
    %c0_92 = arith.constant 0 : index
    %c0_93 = arith.constant 0 : index
    %255 = vector.load %arg13[%254, %c0_92, %c0_93] : memref<2x64x64xbf16, #tpu.memory_space<vmem>>, vector<1x64x64xbf16>
    %256 = vector.shape_cast %255 : vector<1x64x64xbf16> to vector<64x64xbf16>
    %cst_94 = arith.constant dense<0.000000e+00> : vector<48x64xf32>
    %257 = tpu.matmul %253, %256, %cst_94 {dimension_numbers = #tpu.dot_dimension_numbers<[1], [0], [0], [1], [0, 0, 1, 1], [], []>} : vector<48x64xbf16>, vector<64x64xbf16>, vector<48x64xf32> -> vector<48x64xf32>
    %258 = arith.index_cast %c1_i32 : i32 to index
    %c0_95 = arith.constant 0 : index
    %c0_96 = arith.constant 0 : index
    %259 = vector.load %arg14[%258, %c0_95, %c0_96] : memref<2x1x64xf32, #tpu.memory_space<vmem>>, vector<1x1x64xf32>
    %260 = vector.shape_cast %259 : vector<1x1x64xf32> to vector<1x64xf32>
    %261 = vector.broadcast %260 : vector<1x64xf32> to vector<48x64xf32>
    %262 = arith.addf %257, %261 : vector<48x64xf32>
    %263 = arith.addf %186, %262 : vector<48x64xf32>
    %264 = arith.index_cast %c1_i32 : i32 to index
    %c0_97 = arith.constant 0 : index
    %c0_98 = arith.constant 0 : index
    %265 = vector.load %arg15[%264, %c0_97, %c0_98] : memref<2x1x64xf32, #tpu.memory_space<vmem>>, vector<1x1x64xf32>
    %266 = vector.shape_cast %265 : vector<1x1x64xf32> to vector<1x64xf32>
    %267 = arith.index_cast %c1_i32 : i32 to index
    %c0_99 = arith.constant 0 : index
    %c0_100 = arith.constant 0 : index
    %268 = vector.load %arg16[%267, %c0_99, %c0_100] : memref<2x1x64xf32, #tpu.memory_space<vmem>>, vector<1x1x64xf32>
    %269 = vector.shape_cast %268 : vector<1x1x64xf32> to vector<1x64xf32>
    %cst_101 = arith.constant dense<0.000000e+00> : vector<48xf32>
    %270 = vector.multi_reduction <add>, %263, %cst_101 [1] : vector<48x64xf32> to vector<48xf32>
    %271 = vector.shape_cast %270 : vector<48xf32> to vector<48x1xf32>
    %cst_102 = arith.constant 6.400000e+01 : f32
    %272 = vector.broadcast %cst_102 : f32 to vector<48x1xf32>
    %273 = arith.divf %271, %272 : vector<48x1xf32>
    %274 = vector.broadcast %273 : vector<48x1xf32> to vector<48x64xf32>
    %275 = arith.subf %263, %274 : vector<48x64xf32>
    %276 = arith.mulf %275, %275 : vector<48x64xf32>
    %cst_103 = arith.constant dense<0.000000e+00> : vector<48xf32>
    %277 = vector.multi_reduction <add>, %276, %cst_103 [1] : vector<48x64xf32> to vector<48xf32>
    %278 = vector.shape_cast %277 : vector<48xf32> to vector<48x1xf32>
    %cst_104 = arith.constant 6.400000e+01 : f32
    %279 = vector.broadcast %cst_104 : f32 to vector<48x1xf32>
    %280 = arith.divf %278, %279 : vector<48x1xf32>
    %281 = vector.broadcast %273 : vector<48x1xf32> to vector<48x64xf32>
    %282 = arith.subf %263, %281 : vector<48x64xf32>
    %cst_105 = arith.constant 9.99999974E-6 : f32
    %283 = vector.broadcast %cst_105 : f32 to vector<48x1xf32>
    %284 = arith.addf %280, %283 : vector<48x1xf32>
    %285 = math.rsqrt %284 : vector<48x1xf32>
    %286 = vector.broadcast %285 : vector<48x1xf32> to vector<48x64xf32>
    %287 = arith.mulf %282, %286 : vector<48x64xf32>
    %288 = vector.broadcast %266 : vector<1x64xf32> to vector<48x64xf32>
    %289 = arith.mulf %287, %288 : vector<48x64xf32>
    %290 = vector.broadcast %269 : vector<1x64xf32> to vector<48x64xf32>
    %291 = arith.addf %289, %290 : vector<48x64xf32>
    %292 = arith.truncf %291 : vector<48x64xf32> to vector<48x64xbf16>
    %293 = arith.index_cast %c1_i32 : i32 to index
    %c0_106 = arith.constant 0 : index
    %c0_107 = arith.constant 0 : index
    %294 = vector.load %arg17[%293, %c0_106, %c0_107] : memref<2x64x128xbf16, #tpu.memory_space<vmem>>, vector<1x64x128xbf16>
    %295 = vector.shape_cast %294 : vector<1x64x128xbf16> to vector<64x128xbf16>
    %cst_108 = arith.constant dense<0.000000e+00> : vector<48x128xf32>
    %296 = tpu.matmul %292, %295, %cst_108 {dimension_numbers = #tpu.dot_dimension_numbers<[1], [0], [0], [1], [0, 0, 1, 1], [], []>} : vector<48x64xbf16>, vector<64x128xbf16>, vector<48x128xf32> -> vector<48x128xf32>
    %297 = arith.index_cast %c1_i32 : i32 to index
    %c0_109 = arith.constant 0 : index
    %c0_110 = arith.constant 0 : index
    %298 = vector.load %arg18[%297, %c0_109, %c0_110] : memref<2x1x128xf32, #tpu.memory_space<vmem>>, vector<1x1x128xf32>
    %299 = vector.shape_cast %298 : vector<1x1x128xf32> to vector<1x128xf32>
    %300 = vector.broadcast %299 : vector<1x128xf32> to vector<48x128xf32>
    %301 = arith.addf %296, %300 : vector<48x128xf32>
    %302 = arith.mulf %301, %301 : vector<48x128xf32>
    %303 = arith.mulf %301, %302 : vector<48x128xf32>
    %cst_111 = arith.constant 4.471500e-02 : f32
    %304 = vector.broadcast %cst_111 : f32 to vector<48x128xf32>
    %305 = arith.mulf %304, %303 : vector<48x128xf32>
    %306 = arith.addf %301, %305 : vector<48x128xf32>
    %cst_112 = arith.constant 0.797884583 : f32
    %307 = vector.broadcast %cst_112 : f32 to vector<48x128xf32>
    %308 = arith.mulf %307, %306 : vector<48x128xf32>
    %309 = math.tanh %308 : vector<48x128xf32>
    %cst_113 = arith.constant 1.000000e+00 : f32
    %310 = vector.broadcast %cst_113 : f32 to vector<48x128xf32>
    %311 = arith.addf %310, %309 : vector<48x128xf32>
    %cst_114 = arith.constant 5.000000e-01 : f32
    %312 = vector.broadcast %cst_114 : f32 to vector<48x128xf32>
    %313 = arith.mulf %312, %311 : vector<48x128xf32>
    %314 = arith.mulf %301, %313 : vector<48x128xf32>
    %315 = arith.truncf %314 : vector<48x128xf32> to vector<48x128xbf16>
    %316 = arith.index_cast %c1_i32 : i32 to index
    %c0_115 = arith.constant 0 : index
    %c0_116 = arith.constant 0 : index
    %317 = vector.load %arg19[%316, %c0_115, %c0_116] : memref<2x128x64xbf16, #tpu.memory_space<vmem>>, vector<1x128x64xbf16>
    %318 = vector.shape_cast %317 : vector<1x128x64xbf16> to vector<128x64xbf16>
    %cst_117 = arith.constant dense<0.000000e+00> : vector<48x64xf32>
    %319 = tpu.matmul %315, %318, %cst_117 {dimension_numbers = #tpu.dot_dimension_numbers<[1], [0], [0], [1], [0, 0, 1, 1], [], []>} : vector<48x128xbf16>, vector<128x64xbf16>, vector<48x64xf32> -> vector<48x64xf32>
    %320 = arith.index_cast %c1_i32 : i32 to index
    %c0_118 = arith.constant 0 : index
    %c0_119 = arith.constant 0 : index
    %321 = vector.load %arg20[%320, %c0_118, %c0_119] : memref<2x1x64xf32, #tpu.memory_space<vmem>>, vector<1x1x64xf32>
    %322 = vector.shape_cast %321 : vector<1x1x64xf32> to vector<1x64xf32>
    %323 = vector.broadcast %322 : vector<1x64xf32> to vector<48x64xf32>
    %324 = arith.addf %319, %323 : vector<48x64xf32>
    %325 = arith.addf %263, %324 : vector<48x64xf32>
    %c2_i32 = arith.constant 2 : i32
    %326 = vector.extract_strided_slice %325 {offsets = [40, 0], sizes = [8, 64], strides = [1, 1]} : vector<48x64xf32> to vector<8x64xf32>
    %cst_120 = arith.constant dense<0.000000e+00> : vector<64xf32>
    %327 = vector.multi_reduction <add>, %326, %cst_120 [0] : vector<8x64xf32> to vector<64xf32>
    %328 = vector.shape_cast %327 : vector<64xf32> to vector<1x64xf32>
    %cst_121 = arith.constant 8.000000e+00 : f32
    %329 = vector.broadcast %cst_121 : f32 to vector<1x64xf32>
    %330 = arith.divf %328, %329 : vector<1x64xf32>
    %c0_122 = arith.constant 0 : index
    %c0_123 = arith.constant 0 : index
    %c0_124 = arith.constant 0 : index
    %331 = vector.load %arg21[%c0_122, %c0_123, %c0_124] : memref<1x1x64xf32, #tpu.memory_space<vmem>>, vector<1x1x64xf32>
    %332 = vector.shape_cast %331 : vector<1x1x64xf32> to vector<1x64xf32>
    %333 = vector.shape_cast %330 : vector<1x64xf32> to vector<1x1x64xf32>
    tpu.vector_store %arg21[%c0_122, %c0_123, %c0_124], %333 {strides = array<i32>} : memref<1x1x64xf32, #tpu.memory_space<vmem>>, vector<1x1x64xf32>,
    return
  }
  func.func @transform_0(%arg0: i32) -> (i32, i32, i32) {
    %c0_i32 = arith.constant 0 : i32
    %c0_i32_0 = arith.constant 0 : i32
    %c0_i32_1 = arith.constant 0 : i32
    return %arg0, %c0_i32, %c0_i32_0 : i32, i32, i32
  }
  func.func @transform_1(%arg0: i32) -> (i32, i32, i32) {
    %c0_i32 = arith.constant 0 : i32
    %c0_i32_0 = arith.constant 0 : i32
    %c0_i32_1 = arith.constant 0 : i32
    return %arg0, %c0_i32, %c0_i32_0 : i32, i32, i32
  }
  func.func @transform_2(%arg0: i32) -> (i32, i32) {
    %c0_i32 = arith.constant 0 : i32
    %c0_i32_0 = arith.constant 0 : i32
    %c0_i32_1 = arith.constant 0 : i32
    return %c0_i32, %c0_i32_0 : i32, i32
  }
  func.func @transform_3(%arg0: i32) -> (i32, i32) {
    %c0_i32 = arith.constant 0 : i32
    %c0_i32_0 = arith.constant 0 : i32
    %c0_i32_1 = arith.constant 0 : i32
    return %c0_i32, %c0_i32_0 : i32, i32
  }
  func.func @transform_4(%arg0: i32) -> (i32, i32) {
    %c0_i32 = arith.constant 0 : i32
    %c0_i32_0 = arith.constant 0 : i32
    %c0_i32_1 = arith.constant 0 : i32
    return %c0_i32, %c0_i32_0 : i32, i32
  }
  func.func @transform_5(%arg0: i32) -> (i32, i32) {
    %c0_i32 = arith.constant 0 : i32
    %c0_i32_0 = arith.constant 0 : i32
    %c0_i32_1 = arith.constant 0 : i32
    return %c0_i32, %c0_i32_0 : i32, i32
  }
  func.func @transform_6(%arg0: i32) -> (i32, i32) {
    %c0_i32 = arith.constant 0 : i32
    %c0_i32_0 = arith.constant 0 : i32
    %c0_i32_1 = arith.constant 0 : i32
    return %c0_i32, %c0_i32_0 : i32, i32
  }
  func.func @transform_7(%arg0: i32) -> (i32, i32) {
    %c0_i32 = arith.constant 0 : i32
    %c0_i32_0 = arith.constant 0 : i32
    %c0_i32_1 = arith.constant 0 : i32
    return %c0_i32, %c0_i32_0 : i32, i32
  }
  func.func @transform_8(%arg0: i32) -> (i32, i32, i32) {
    %c0_i32 = arith.constant 0 : i32
    %c0_i32_0 = arith.constant 0 : i32
    %c0_i32_1 = arith.constant 0 : i32
    %c0_i32_2 = arith.constant 0 : i32
    return %c0_i32, %c0_i32_0, %c0_i32_1 : i32, i32, i32
  }
  func.func @transform_9(%arg0: i32) -> (i32, i32, i32) {
    %c0_i32 = arith.constant 0 : i32
    %c0_i32_0 = arith.constant 0 : i32
    %c0_i32_1 = arith.constant 0 : i32
    %c0_i32_2 = arith.constant 0 : i32
    return %c0_i32, %c0_i32_0, %c0_i32_1 : i32, i32, i32
  }
  func.func @transform_10(%arg0: i32) -> (i32, i32, i32) {
    %c0_i32 = arith.constant 0 : i32
    %c0_i32_0 = arith.constant 0 : i32
    %c0_i32_1 = arith.constant 0 : i32
    %c0_i32_2 = arith.constant 0 : i32
    return %c0_i32, %c0_i32_0, %c0_i32_1 : i32, i32, i32
  }
  func.func @transform_11(%arg0: i32) -> (i32, i32, i32) {
    %c0_i32 = arith.constant 0 : i32
    %c0_i32_0 = arith.constant 0 : i32
    %c0_i32_1 = arith.constant 0 : i32
    %c0_i32_2 = arith.constant 0 : i32
    return %c0_i32, %c0_i32_0, %c0_i32_1 : i32, i32, i32
  }
  func.func @transform_12(%arg0: i32) -> (i32, i32, i32) {
    %c0_i32 = arith.constant 0 : i32
    %c0_i32_0 = arith.constant 0 : i32
    %c0_i32_1 = arith.constant 0 : i32
    %c0_i32_2 = arith.constant 0 : i32
    return %c0_i32, %c0_i32_0, %c0_i32_1 : i32, i32, i32
  }
  func.func @transform_13(%arg0: i32) -> (i32, i32, i32) {
    %c0_i32 = arith.constant 0 : i32
    %c0_i32_0 = arith.constant 0 : i32
    %c0_i32_1 = arith.constant 0 : i32
    %c0_i32_2 = arith.constant 0 : i32
    return %c0_i32, %c0_i32_0, %c0_i32_1 : i32, i32, i32
  }
  func.func @transform_14(%arg0: i32) -> (i32, i32, i32) {
    %c0_i32 = arith.constant 0 : i32
    %c0_i32_0 = arith.constant 0 : i32
    %c0_i32_1 = arith.constant 0 : i32
    %c0_i32_2 = arith.constant 0 : i32
    return %c0_i32, %c0_i32_0, %c0_i32_1 : i32, i32, i32
  }
  func.func @transform_15(%arg0: i32) -> (i32, i32, i32) {
    %c0_i32 = arith.constant 0 : i32
    %c0_i32_0 = arith.constant 0 : i32
    %c0_i32_1 = arith.constant 0 : i32
    %c0_i32_2 = arith.constant 0 : i32
    return %c0_i32, %c0_i32_0, %c0_i32_1 : i32, i32, i32
  }
  func.func @transform_16(%arg0: i32) -> (i32, i32, i32) {
    %c0_i32 = arith.constant 0 : i32
    %c0_i32_0 = arith.constant 0 : i32
    %c0_i32_1 = arith.constant 0 : i32
    %c0_i32_2 = arith.constant 0 : i32
    return %c0_i32, %c0_i32_0, %c0_i32_1 : i32, i32, i32
  }
  func.func @transform_17(%arg0: i32) -> (i32, i32, i32) {
    %c0_i32 = arith.constant 0 : i32
    %c0_i32_0 = arith.constant 0 : i32
    %c0_i32_1 = arith.constant 0 : i32
    %c0_i32_2 = arith.constant 0 : i32
    return %c0_i32, %c0_i32_0, %c0_i32_1 : i32, i32, i32
  }
  func.func @transform_18(%arg0: i32) -> (i32, i32, i32) {
    %c0_i32 = arith.constant 0 : i32
    %c0_i32_0 = arith.constant 0 : i32
    %c0_i32_1 = arith.constant 0 : i32
    %c0_i32_2 = arith.constant 0 : i32
    return %c0_i32, %c0_i32_0, %c0_i32_1 : i32, i32, i32
  }
  func.func @transform_19(%arg0: i32) -> (i32, i32, i32) {
    %c0_i32 = arith.constant 0 : i32
    %c0_i32_0 = arith.constant 0 : i32
    %c0_i32_1 = arith.constant 0 : i32
    %c0_i32_2 = arith.constant 0 : i32
    return %c0_i32, %c0_i32_0, %c0_i32_1 : i32, i32, i32
  }
  func.func @transform_20(%arg0: i32) -> (i32, i32, i32) {
    %c0_i32 = arith.constant 0 : i32
    %c0_i32_0 = arith.constant 0 : i32
    %c0_i32_1 = arith.constant 0 : i32
    return %arg0, %c0_i32, %c0_i32_0 : i32, i32, i32
  }
}

</mosaic_0001>

<bundles_post_ra>
// kernel: rt1_xl_forward.1
= control target key start
LH: loop header
LB: loop body
LE: loop exit
PB: predicated region body
PF: predicated region fallthrough
CT: control target
= control target key end

     0   :  { %s18285_s0 = inlined_call_operand.vmem [shape: bf16[2,96,192], index: 0, kind: input, shape index: {}]   ;;  %s18286_s1 = inlined_call_operand.vmem [shape: bf16[2,1,32], index: 1, kind: input, shape index: {}]   ;;  %s18287_s2 = inlined_call_operand.vmem [shape: bf16[192,64], index: 2, kind: input, shape index: {}]   ;;  %s18288_s3 = inlined_call_operand.vmem [shape: f32[1,64], index: 3, kind: input, shape index: {}]   ;;  %s18289_s4 = inlined_call_operand.vmem [shape: bf16[32,128], index: 4, kind: input, shape index: {}]   ;;  %s18290_s5 = inlined_call_operand.vmem [shape: f32[1,128], index: 5, kind: input, shape index: {}]   ;;  %s18291_s6 = inlined_call_operand.vmem [shape: bf16[64,8], index: 6, kind: input, shape index: {}]   ;;  %s18292_s7 = inlined_call_operand.vmem [shape: f32[48,64], index: 7, kind: input, shape index: {}]   ;;  %s18293_s8 = inlined_call_operand.vmem [shape: f32[2,1,64], index: 8, kind: input, shape index: {}]   ;;  %s18294_s9 = inlined_call_operand.vmem [shape: f32[2,1,64], index: 9, kind: input, shape index: {}]   ;;  %s18295_s10 = inlined_call_operand.vmem [shape: bf16[2,64,192], index: 10, kind: input, shape index: {}]   ;;  %s18296_s11 = inlined_call_operand.vmem [shape: f32[2,1,192], index: 11, kind: input, shape index: {}]   ;;  %s18297_s12 = inlined_call_operand.vmem [shape: bf16[2,64,64], index: 12, kind: input, shape index: {}]   ;;  %s18298_s13 = inlined_call_operand.vmem [shape: f32[2,1,64], index: 13, kind: input, shape index: {}]   ;;  %s18299_s14 = inlined_call_operand.vmem [shape: f32[2,1,64], index: 14, kind: input, shape index: {}]   ;;  %s18300_s15 = inlined_call_operand.vmem [shape: f32[2,1,64], index: 15, kind: input, shape index: {}]   ;;  %s18301_s16 = inlined_call_operand.vmem [shape: bf16[2,64,128], index: 16, kind: input, shape index: {}]   ;;  %s18302_s17 = inlined_call_operand.vmem [shape: f32[2,1,128], index: 17, kind: input, shape index: {}]   ;;  %s18303_s18 = inlined_call_operand.vmem [shape: bf16[2,128,64], index: 18, kind: input, shape index: {}]   ;;  %s18304_s19 = inlined_call_operand.vmem [shape: f32[2,1,64], index: 19, kind: input, shape index: {}]   ;;  %s18305_s20 = inlined_call_operand.hbm [shape: f32[2,1,64], index: 20, kind: output, shape index: {}]  }
   0x1   :  { %18395 = sst [smem:[#allocation36_spill]] %s18285_s0 }
   0x2   :  { %18396 = sst [smem:[#allocation37_spill]] %s18286_s1 }
   0x3   :  { %18397 = sst [smem:[#allocation38_spill]] %s18287_s2 }
   0x4   :  { %18398 = sst [smem:[#allocation39_spill]] %s18288_s3 }
   0x5   :  { %18399 = sst [smem:[#allocation40_spill]] %s18289_s4 }
   0x6   :  { %18400 = sst [smem:[#allocation41_spill]] %s18290_s5 }
   0x7   :  { %18401 = sst [smem:[#allocation42_spill]] %s18305_s20 }
   0x8   :  { %25 = vsyncpa [#allocation3], 0 }
   0x9   :  { %27 = vsyncpa [#allocation3 + $0x1], 0  ;;  %s14115_s1 = smov 0   ;;  %s14117_s22 = smov 0  }
   0xa   :  { %s14119_s23 = smov 0   ;;  %s14121_s24 = smov 0  }
   0xb LB: > { %18402 = sst [smem:[#allocation5_spill]] %s13983_s1  ;;  %s14136_s2 = sadd.s32 4294967295, %s13995_s24   ;;  %s13995_s24 = sphi %s14121_s24, %s18551_s24   ;;  %s13991_s23 = sphi %s14119_s23, %s18553_s23   ;;  %s13987_s22 = sphi %s14117_s22, %s18555_s22   ;;  %s13983_s1 = sphi %s14115_s1, %s18554_s1  }
   0xc   : > { %18403 = sst [smem:[#allocation6_spill]] %s13991_s23  ;;  %s12362_s25 = sadd.s32 4294967294, %s13995_s24  }
   0xd   : > { %18404 = sst [smem:[#allocation7_spill]] %s13995_s24  ;;  %s14140_s3 = sadd.s32 1, %s13995_s24  }
   0xe   : > { %18405 = sst [smem:[#allocation8_spill]] %s14140_s3  ;;  %s470_s26 = sadd.s32 1, %s13991_s23 }
   0xf   : > { %s467_s27 = ssub.s32 %s13995_s24, %s14140_s3  ;;  %p480_p0 = scmp.ne.s32.totalorder %s13991_s23, %s13987_s22 }
  0x10   : > { %p468_p1 = scmp.eq.s32.totalorder %s467_s27, 0  ;;  %p481_p2 = scmp.eq.s32.totalorder %s14136_s2, 1 }
  0x11   : > { %p486_p3 = scmp.ne.s32.totalorder %s13987_s22, %s13983_s1  ;;  %p487_p4 = scmp.eq.s32.totalorder %s12362_s25, 1 }
  0x12   : > { %s14151_s28 = scalar_select %p468_p1, %s13991_s23, %s470_s26  }
  0x13   : > { %p14153_p5 = por %p481_p2, %p480_p0  ;;  %p14157_p6 = por %p487_p4, %p486_p3 }
  0x14   : > { %18406 = sst [smem:[#allocation9_spill]] %s14151_s28  ;;  %p12365_p7 = scmp.ge.s32.totalorder %s13995_s24, 1 }
  0x15   : > { %s18408_s29 = scalar_select %p14157_p6, 1, 0 }
  0x16   : > { %p573_p8 = scmp.lt.s32.totalorder %s13995_s24, 3 }
  0x17   : > { %18409 = sst [smem:[#allocation10_spill]] %s18408_s29 }
  0x18   : > { %p574_p9 = pnand %p12365_p7, %p573_p8 }
  0x1a   : > { %577 = sbr.rel (%p574_p9) target bundleno = 6533 (0x1985), region = 100 }
  0x21   : > { %v18316_v0 = vmov 0   ;;  %v18319_v1 = vmov 0.0   ;;  %s18410_s21 = sld [smem:[#allocation38_spill]]  ;;  %s18411_s27 = sld [smem:[#allocation40_spill]]  ;;  %vm13999_vm0 = vmmov 0   ;;  %vm929_vm1 = vcmask 261120  }
  0x22   : > { %831 = vmatprep.subr.bf16.mxu0 %v18316_v0  ;;  %12911 = vmatprep.subr.bf16.mxu1 %v18319_v1  ;;  %p633_p10 = scmp.lt.s32.totalorder %s14136_s2, 1  ;;  %s18412_s29 = sld [smem:[#allocation37_spill]]  ;;  %vm812_vm2 = vcmask 523264   ;;  %v13573_v29 = vld [vmem:[%s18291_s6] sm:$0xff]   ;;  %v13574_v30 = vld [vmem:[%s18291_s6 + $0x8] sm:$0xff]   ;;  %v13575_v31 = vld [vmem:[%s18291_s6 + $0x10] sm:$0xff]   ;;  %v18318_v32 = vlaneseq }
  0x23   : > { %12915 = vmatprep.mubr.msk.bf16.mxu1 %vm13999_vm0, %v18319_v1  ;;  %s18413_s25 = sld [smem:[#allocation36_spill]]  ;;  %v13576_v33 = vld [vmem:[%s18291_s6 + $0x18] sm:$0xff]   ;;  %s18415_s5 = sld [smem:[#allocation41_spill]]  ;;  %vm1159_vm3 = vcmask 64512   ;;  %vm1520_vm4 = vcmask 130048   ;;  %vm5082_vm6 = vcmask 392192  }
  0x24   : > { %s634_s0 = scalar_select %p633_p10, %s14136_s2, 1  ;;  %v14266_v34 = vshrl.u32 %v18318_v32, 7  ;;  %vm12283_vm12 = vcmask 516096  }
  0x25   : > { %s18368_s3 = smov 64   ;;  %s18366_s23 = smov 32  }
  0x26   : > { %s13399_s24 = smul.u32 96, %s634_s0  ;;  %18414 = vst [vmem:[#allocation11_spill] sm:$0xff] %v14266_v34  ;;  %v14273_v36 = vsub.s32 0, %v14266_v34  ;;  %s18362_s28 = smov 112  }
  0x27   : > { %v13541_v2 = vld [vmem:[%s18410_s21] sm:$0xff]   ;;  %v13543_v4 = vld [vmem:[%s18410_s21 + $0x8] sm:$0xff]   ;;  %v13545_v6 = vld [vmem:[%s18410_s21 + $0x10] sm:$0xff]   ;;  %s18360_s30 = smov 96   ;;  %s18496_s26 = smov 64  }
  0x28   : > { %v13542_v3 = vld [vmem:[%s18411_s27] sm:$0xff]   ;;  %832 = vmatpush1.bf16.msra.mxu0 %v13541_v2  ;;  %v13544_v5 = vld [vmem:[%s18411_s27 + $0x8] sm:$0xff]   ;;  %s640_s1 = scalar_lea.vmem %s18412_s29, %s634_s0  ;;  %v13546_v8 = vld [vmem:[%s18410_s21 + $0x18] sm:$0xff]   ;;  %18416 = vst [vmem:[#allocation12_spill] sm:$0xff] %v14273_v36  ;;  %s18417_s29 = sld [smem:[#allocation39_spill]] }
  0x29   : > { %12912 = vmatpush3.bf16.msra.mxu1 %v13542_v3  ;;  %833 = vmatprep.subr.bf16.mxu0 %v18316_v0  ;;  %v654_v7 = vld [vmem:[%s640_s1] sm:$0x1]  ;;  %s14197_s0 = scalar_lea.vmem %s18413_s25, %s13399_s24  ;;  %v13548_v11 = vld [vmem:[%s18410_s21 + $0x28] sm:$0xff]   ;;  %v13549_v12 = vld [vmem:[%s18410_s21 + $0x30] sm:$0xff]   ;;  %s14001_s1 = smov 48  }
  0x2a   : > { %12913 = vmatprep.subr.bf16.mxu1 %v18319_v1  ;;  %v13547_v9 = vld [vmem:[%s18410_s21 + $0x20] sm:$0xff]   ;;  %v13550_v13 = vld [vmem:[%s18410_s21 + $0x38] sm:$0xff]   ;;  %v13552_v15 = vld [vmem:[%s18410_s21 + $0x48] sm:$0xff]   ;;  %s18364_s24 = smov 16  }
  0x2b   : > { %v13557_v10 = vld [vmem:[%s14197_s0 + $0x4] ss:$8 sps:$4 sm:$0xff]   ;;  %v13553_v16 = vld [vmem:[%s18410_s21 + $0x50] sm:$0xff]   ;;  %v13554_v17 = vld [vmem:[%s18410_s21 + $0x58] sm:$0xff]  }
  0x2c   : > { %834 = vmatpush1.bf16.msra.mxu0 %v13543_v4  ;;  %12392 = vmatprep.mubr.msk.bf16.mxu0 %vm812_vm2, %v13557_v10  ;;  %v13551_v14 = vld [vmem:[%s18410_s21 + $0x40] sm:$0xff]   ;;  %v13558_v19 = vld [vmem:[%s14197_s0 + $0x14] ss:$8 sps:$4 sm:$0xff]   ;;  %v13560_v20 = vld [vmem:[%s14197_s0 + $0x10] ss:$8 sps:$4 sm:$0xff]  }
  0x2d   : > { %12914 = vmatpush3.bf16.msra.mxu1 %v13544_v5  ;;  %835 = vmatprep.subr.bf16.mxu0 %v18316_v0  ;;  %v13555_v18 = vld [vmem:[%s14197_s0] ss:$8 sps:$4 sm:$0xff]   ;;  %v13561_v21 = vld [vmem:[%s14197_s0 + $0x24] ss:$8 sps:$4 sm:$0xff]   ;;  %v13564_v23 = vld [vmem:[%s14197_s0 + $0x34] ss:$8 sps:$4 sm:$0xff]  }
  0x2e   : > { %v13563_v22 = vld [vmem:[%s14197_s0 + $0x20] ss:$8 sps:$4 sm:$0xff]   ;;  %v13566_v24 = vld [vmem:[%s14197_s0 + $0x30] ss:$8 sps:$4 sm:$0xff]   ;;  %v13567_v25 = vld [vmem:[%s14197_s0 + $0x44] ss:$8 sps:$4 sm:$0xff]   ;;  %12919 = vmatprep.subr.bf16.mxu1 %v13573_v29 }
  0x2f   : > { %v13569_v26 = vld [vmem:[%s14197_s0 + $0x40] ss:$8 sps:$4 sm:$0xff]   ;;  %v13570_v27 = vld [vmem:[%s14197_s0 + $0x54] ss:$8 sps:$4 sm:$0xff]   ;;  %v13572_v28 = vld [vmem:[%s14197_s0 + $0x50] ss:$8 sps:$4 sm:$0xff]  }
  0x30   : > { %12916 = vmatmul.mubr.msk.bf16.vlgmr.msra.gmra.mrb[0].mxu1 %vm929_vm1, %v654_v7  ;;  %836 = vmatpush1.bf16.msra.mxu0 %v13545_v6  ;;  %v916_v35 = vld [vmem:[%s18415_s5] sm:$0x1]  ;;  %s18497_s0 = smov 32  }
  0x31   : > { %837 = vmatprep.subr.bf16.mxu0 %v18316_v0  ;;  %12920 = vmatpush3.bf16.msra.mxu1 %v13573_v29  ;;  %v12367_v44 = vld [vmem:[%s18417_s29] ss:$0 sm:$0xff]  ;;  %s18358_s29 = smov 80  }
  0x32   : > { %12921 = vmatprep.subr.bf16.mxu1 %v13574_v30 }
  0x34   : > { %838 = vmatpush1.bf16.msra.mxu0 %v13546_v8 }
  0x35   : > { %839 = vmatprep.subr.bf16.mxu0 %v18316_v0  ;;  %12922 = vmatpush3.bf16.msra.mxu1 %v13574_v30 }
  0x36   : > { %12923 = vmatprep.subr.bf16.mxu1 %v13575_v31 }
  0x38   : > { %840 = vmatpush1.bf16.msra.mxu0 %v13547_v9 }
  0x39   : > { %841 = vmatprep.subr.bf16.mxu0 %v18316_v0  ;;  %12924 = vmatpush3.bf16.msra.mxu1 %v13575_v31 }
  0x3a   : > { %12925 = vmatprep.subr.bf16.mxu1 %v13576_v33 }
  0x3c   : > { %842 = vmatpush1.bf16.msra.mxu0 %v13548_v11 }
  0x3d   : > { %843 = vmatprep.subr.bf16.mxu0 %v18316_v0  ;;  %12926 = vmatpush3.bf16.msra.mxu1 %v13576_v33 }
  0x3e   : > { %12939 = vmatprep.subr.bf16.mxu1 %v18319_v1 }
  0x40   : > { %844 = vmatpush1.bf16.msra.mxu0 %v13549_v12 }
  0x41   : > { %845 = vmatprep.subr.bf16.mxu0 %v18316_v0 }
  0x44   : > { %846 = vmatpush1.bf16.msra.mxu0 %v13550_v13 }
  0x45   : > { %847 = vmatprep.subr.bf16.mxu0 %v18316_v0 }
  0x48   : > { %848 = vmatpush1.bf16.msra.mxu0 %v13551_v14 }
  0x49   : > { %849 = vmatprep.subr.bf16.mxu0 %v18316_v0 }
  0x4c   : > { %850 = vmatpush1.bf16.msra.mxu0 %v13552_v15 }
  0x4d   : > { %851 = vmatprep.subr.bf16.mxu0 %v18316_v0 }
  0x50   : > { %852 = vmatpush1.bf16.msra.mxu0 %v13553_v16 }
  0x51   : > { %853 = vmatprep.subr.bf16.mxu0 %v18316_v0 }
  0x54   : > { %854 = vmatpush1.bf16.msra.mxu0 %v13554_v17 }
  0x55   : > { %12993 = vmatprep.subr.bf16.mxu0 %v18319_v1 }
  0x57   : > { %864 = vmatmul.mubr.bf16.vlgmr.msra.gmra.mrb[0].mxu0 %v13555_v18 }
  0x58   : > { %12393 = vmatprep.mubr.msk.bf16.mxu0 %vm812_vm2, %v13558_v19 }
  0x5f   : > { %872 = vmatmul.mubr.bf16.gmra.mrb[4].mxu0 %v13560_v20 }
  0x60   : > { %12394 = vmatprep.mubr.msk.bf16.mxu0 %vm812_vm2, %v13561_v21 }
  0x67   : > { %880 = vmatmul.mubr.bf16.gmra.mrb[8].mxu0 %v13563_v22 }
  0x68   : > { %12395 = vmatprep.mubr.msk.bf16.mxu0 %vm812_vm2, %v13564_v23 }
  0x6f   : > { %888 = vmatmul.mubr.bf16.gmra.mrb[12].mxu0 %v13566_v24 }
  0x70   : > { %12396 = vmatprep.mubr.msk.bf16.mxu0 %vm812_vm2, %v13567_v25 }
  0x77   : > { %896 = vmatmul.mubr.bf16.gmra.mrb[16].mxu0 %v13569_v26 }
  0x78   : > { %12397 = vmatprep.mubr.msk.bf16.mxu0 %vm812_vm2, %v13570_v27 }
  0x7f   : > { %904 = vmatmul.mubr.bf16.gmra.mrb[20].mxu0 %v13572_v28 }
  0x80   : > { %12999 = vmatprep.mubr.msk.bf16.mxu0 %vm13999_vm0, %v18319_v1 }
 0x103   : > { %v967_v37 = vpop.f32.mrb[0].mxu1 }
 0x104   : > { %v968_v38 = vadd.f32 %v967_v37, %v916_v35  ;;  %v12917_v39 = vpop.f32.mrb[1].mxu1 }
 0x105   : > { %v970_v40 = vpop.f32.mrb[2].mxu1 }
 0x106   : > { %v12918_v41 = vpop.f32.mrb[3].mxu1  ;;  %v993_v42 = vrot.slane %v968_v38, %v14273_v36  ;;  %v973_v43 = vadd.f32 1.0, %v968_v38 }
 0x108   : > { %995 = vrot.lane.b32.xlu0 %v993_v42, %s18368_s3  ;;  %v977_v46 = vrot.slane %v973_v43, %v14273_v36 }
 0x12a   : > { %v865_v45 = vpop.f32.mrb[0].mxu0 }
 0x12b   : > { %v866_v47 = vadd.f32 %v12367_v44, %v865_v45  ;;  %v867_v48 = vpop.f32.mrb[1].mxu0 }
 0x12c   : > { %v868_v49 = vpop.f32.mrb[2].mxu0 }
 0x12d   : > { %v978_v50 = vmul.f32 %v977_v46, %v866_v47  ;;  %v869_v51 = vadd.f32 %v12367_v44, %v868_v49  ;;  %v870_v52 = vpop.f32.mrb[3].mxu0 }
 0x12f   : > { %v979_v53 = vmul.f32 %v977_v46, %v869_v51 }
 0x132   : > { %v873_v54 = vpop.f32.mrb[4].mxu0 }
 0x133   : > { %v874_v55 = vadd.f32 %v12367_v44, %v873_v54  ;;  %v875_v56 = vpop.f32.mrb[5].mxu0 }
 0x134   : > { %v876_v57 = vpop.f32.mrb[6].mxu0 }
 0x135   : > { %v980_v58 = vmul.f32 %v977_v46, %v874_v55  ;;  %v877_v59 = vadd.f32 %v12367_v44, %v876_v57  ;;  %v878_v60 = vpop.f32.mrb[7].mxu0 }
 0x137   : > { %v981_v61 = vmul.f32 %v977_v46, %v877_v59 }
 0x13a   : > { %v881_v62 = vpop.f32.mrb[8].mxu0 }
 0x13b   : > { %v882_v63 = vadd.f32 %v12367_v44, %v881_v62  ;;  %v883_v2 = vpop.f32.mrb[9].mxu0 }
 0x13c   : > { %v884_v3 = vpop.f32.mrb[10].mxu0 }
 0x13d   : > { %v982_v4 = vmul.f32 %v977_v46, %v882_v63  ;;  %v885_v5 = vadd.f32 %v12367_v44, %v884_v3  ;;  %v886_v6 = vpop.f32.mrb[11].mxu0 }
 0x13f   : > { %v983_v7 = vmul.f32 %v977_v46, %v885_v5 }
 0x142   : > { %v889_v8 = vpop.f32.mrb[12].mxu0 }
 0x143   : > { %v890_v9 = vadd.f32 %v12367_v44, %v889_v8  ;;  %v891_v10 = vpop.f32.mrb[13].mxu0 }
 0x144   : > { %v892_v11 = vpop.f32.mrb[14].mxu0 }
 0x145   : > { %v984_v12 = vmul.f32 %v977_v46, %v890_v9  ;;  %v893_v13 = vadd.f32 %v12367_v44, %v892_v11  ;;  %v894_v14 = vpop.f32.mrb[15].mxu0 }
 0x147   : > { %v985_v15 = vmul.f32 %v977_v46, %v893_v13 }
 0x14a   : > { %v897_v16 = vpop.f32.mrb[16].mxu0 }
 0x14b   : > { %v898_v17 = vadd.f32 %v12367_v44, %v897_v16  ;;  %v899_v18 = vpop.f32.mrb[17].mxu0 }
 0x14c   : > { %v900_v19 = vpop.f32.mrb[18].mxu0 }
 0x14d   : > { %v986_v20 = vmul.f32 %v977_v46, %v898_v17  ;;  %v901_v21 = vadd.f32 %v12367_v44, %v900_v19  ;;  %v902_v22 = vpop.f32.mrb[19].mxu0 }
 0x14f   : > { %v987_v23 = vmul.f32 %v977_v46, %v901_v21 }
 0x152   : > { %v905_v24 = vpop.f32.mrb[20].mxu0 }
 0x153   : > { %v906_v25 = vadd.f32 %v12367_v44, %v905_v24  ;;  %v907_v26 = vpop.f32.mrb[21].mxu0 }
 0x154   : > { %v908_v27 = vpop.f32.mrb[22].mxu0 }
 0x155   : > { %v988_v28 = vmul.f32 %v977_v46, %v906_v25  ;;  %v909_v29 = vadd.f32 %v12367_v44, %v908_v27  ;;  %v910_v30 = vpop.f32.mrb[23].mxu0 }
 0x157   : > { %v989_v31 = vmul.f32 %v977_v46, %v909_v29 }
 0x17a   : > { %v996_v33 = vpop.permute.xlu0 %995 }
 0x17b   : > { %v998_v35 = vadd.f32 %v996_v33, %v978_v50  ;;  %v999_v37 = vadd.f32 %v996_v33, %v979_v53  ;;  %v1000_v38 = vadd.f32 %v996_v33, %v980_v58  ;;  %v1001_v39 = vadd.f32 %v996_v33, %v981_v61 }
 0x17c   : > { %v1002_v40 = vadd.f32 %v996_v33, %v982_v4  ;;  %v1003_v41 = vadd.f32 %v996_v33, %v983_v7  ;;  %v1004_v42 = vadd.f32 %v996_v33, %v984_v12  ;;  %v1005_v43 = vadd.f32 %v996_v33, %v985_v15 }
 0x17d   : > { %v1010_v45 = vmax.f32 %v998_v35, 0.0  ;;  %v1011_v47 = vmax.f32 %v999_v37, 0.0  ;;  %v1012_v48 = vmax.f32 %v1000_v38, 0.0  ;;  %v1013_v49 = vmax.f32 %v1001_v39, 0.0 }
 0x17e   : > { %v1014_v51 = vmax.f32 %v1002_v40, 0.0  ;;  %v1015_v52 = vmax.f32 %v1003_v41, 0.0  ;;  %v1016_v54 = vmax.f32 %v1004_v42, 0.0  ;;  %v1017_v55 = vmax.f32 %v1005_v43, 0.0 }
 0x17f   : > { %v1022_v44 = vpack.c.bf16 %v1011_v47, %v1010_v45  ;;  %v14281_v56 = vpack.c.bf16 %v1013_v49, %v1012_v48  ;;  %v1006_v46 = vadd.f32 %v996_v33, %v986_v20  ;;  %v1007_v50 = vadd.f32 %v996_v33, %v987_v23 }
 0x180   : > { %v14283_v53 = vpack.c.bf16 %v1015_v52, %v1014_v51  ;;  %v14285_v57 = vpack.c.bf16 %v1017_v55, %v1016_v54  ;;  %v1008_v58 = vadd.f32 %v996_v33, %v988_v28  ;;  %v1009_v59 = vadd.f32 %v996_v33, %v989_v31 }
 0x181   : > { %12927 = vmatprep.mubr.msk.bf16.mxu1 %vm812_vm2, %v1022_v44  ;;  %v1018_v60 = vmax.f32 %v1006_v46, 0.0  ;;  %v1019_v61 = vmax.f32 %v1007_v50, 0.0 }
 0x182   : > { %12928 = vmatmul.mubr.msk.bf16.vlgmr.msra.gmra.mrb[4].mxu1 %vm812_vm2, %v14281_v56  ;;  %v1020_v62 = vmax.f32 %v1008_v58, 0.0  ;;  %v1021_v63 = vmax.f32 %v1009_v59, 0.0 }
 0x183   : > { %12940 = vmatpush3.bf16.msra.mxu1 %v1022_v44  ;;  %12931 = vmatprep.mubr.msk.bf16.mxu1 %vm812_vm2, %v14283_v53  ;;  %v14292_v2 = vpack.c.bf16 %v1019_v61, %v1018_v60 }
 0x184   : > { %v14294_v3 = vpack.c.bf16 %v1021_v63, %v1020_v62  ;;  %12945 = vmatprep.subr.bf16.mxu1 %v18319_v1 }
 0x18a   : > { %12932 = vmatmul.mubr.msk.bf16.gmra.mrb[8].mxu1 %vm812_vm2, %v14285_v57 }
 0x18b   : > { %12935 = vmatprep.mubr.msk.bf16.mxu1 %vm812_vm2, %v14292_v2 }
 0x192   : > { %12936 = vmatmul.mubr.msk.bf16.gmra.mrb[12].mxu1 %vm812_vm2, %v14294_v3 }
 0x193   : > { %12941 = vmatprep.mubr.msk.bf16.mxu1 %vm13999_vm0, %v18319_v1 }
 0x255   : > { %v12929_v4 = vpop.f32.mrb[4].mxu1 }
 0x256   : > { %v1112_v5 = vpop.f32.mrb[5].mxu1  ;;  %v1169_v7 = vsel %vm1159_vm3, %v12929_v4, -inf }
 0x257   : > { %v12930_v6 = vpop.f32.mrb[6].mxu1  ;;  %v1160_v10 = vsel %vm1159_vm3, %v1112_v5, -inf }
 0x258   : > { %v1170_v8 = vsel %vm1159_vm3, %v12930_v6, -inf  ;;  %v1115_v9 = vpop.f32.mrb[7].mxu1 }
 0x259   : > { %v1171_v11 = vmax.f32 %v1169_v7, %v1170_v8  ;;  %v1161_v12 = vsel %vm1159_vm3, %v1115_v9, -inf }
 0x25a   : > { %v1162_v13 = vmax.f32 %v1160_v10, %v1161_v12 }
 0x25b   : > { %v1172_v14 = vrot.slane %v1171_v11, 4 }
 0x25c   : > { %v1163_v15 = vrot.slane %v1162_v13, 4 }
 0x25d   : > { %v1173_v16 = vmax.f32 %v1171_v11, %v1172_v14  ;;  %v12933_v17 = vpop.f32.mrb[8].mxu1 }
 0x25e   : > { %v1164_v18 = vmax.f32 %v1162_v13, %v1163_v15  ;;  %v14309_v19 = vpop.f32.mrb[9].mxu1  ;;  %v1187_v23 = vsel %vm1159_vm3, %v12933_v17, -inf }
 0x25f   : > { %v1174_v20 = vrot.slane %v1173_v16, 2  ;;  %v12934_v21 = vpop.f32.mrb[10].mxu1  ;;  %v1178_v27 = vsel %vm1159_vm3, %v14309_v19, -inf }
 0x260   : > { %v1165_v22 = vrot.slane %v1164_v18, 2  ;;  %v1188_v24 = vsel %vm1159_vm3, %v12934_v21, -inf  ;;  %v1131_v25 = vpop.f32.mrb[11].mxu1 }
 0x261   : > { %v1175_v26 = vmax.f32 %v1173_v16, %v1174_v20  ;;  %v1189_v28 = vmax.f32 %v1187_v23, %v1188_v24  ;;  %v1179_v29 = vsel %vm1159_vm3, %v1131_v25, -inf }
 0x262   : > { %v1166_v30 = vmax.f32 %v1164_v18, %v1165_v22  ;;  %v1180_v31 = vmax.f32 %v1178_v27, %v1179_v29 }
 0x263   : > { %v1176_v33 = vrot.slane %v1175_v26, 1  ;;  %v1190_v35 = vrot.slane %v1189_v28, 4 }
 0x264   : > { %v1167_v37 = vrot.slane %v1166_v30, 1  ;;  %v1181_v38 = vrot.slane %v1180_v31, 4 }
 0x265   : > { %v1177_v39 = vmax.f32 %v1175_v26, %v1176_v33  ;;  %v1191_v40 = vmax.f32 %v1189_v28, %v1190_v35  ;;  %v14316_v41 = vpop.f32.mrb[12].mxu1 }
 0x266   : > { %v1168_v42 = vmax.f32 %v1166_v30, %v1167_v37  ;;  %v1182_v43 = vmax.f32 %v1180_v31, %v1181_v38  ;;  %v1205_v45 = vsel %vm1159_vm3, %v14316_v41, -inf  ;;  %v14320_v47 = vpop.f32.mrb[13].mxu1 }
 0x267   : > { %v1216_v48 = vsub.f32 %v12929_v4, %v1177_v39  ;;  %v1217_v49 = vsub.f32 %v12930_v6, %v1177_v39  ;;  %v1192_v51 = vrot.slane %v1191_v40, 2  ;;  %v1196_v52 = vsel %vm1159_vm3, %v14320_v47, -inf  ;;  %v12938_v54 = vpop.f32.mrb[14].mxu1 }
 0x268   : > { %v1214_v55 = vsub.f32 %v1112_v5, %v1168_v42  ;;  %v1215_v44 = vsub.f32 %v1115_v9, %v1168_v42  ;;  %v1183_v46 = vrot.slane %v1182_v43, 2  ;;  %v1206_v50 = vsel %vm1159_vm3, %v12938_v54, -inf  ;;  %v14325_v58 = vpop.f32.mrb[15].mxu1 }
 0x269   : > { %v1230_v59 = vmul.f32 1.442695, %v1216_v48  ;;  %v1232_v60 = vmul.f32 1.442695, %v1217_v49  ;;  %v1193_v61 = vmax.f32 %v1191_v40, %v1192_v51  ;;  %v1207_v62 = vmax.f32 %v1205_v45, %v1206_v50 }
 0x26a   : > { %v1226_v63 = vmul.f32 1.442695, %v1214_v55  ;;  %v1228_v7 = vmul.f32 1.442695, %v1215_v44  ;;  %v1184_v4 = vmax.f32 %v1182_v43, %v1183_v46  ;;  %v1197_v6 = vsel %vm1159_vm3, %v14325_v58, -inf }
 0x26b   : > { %13633 = vpow2.f32 %v1230_v59  ;;  %v1194_v8 = vrot.slane %v1193_v61, 1  ;;  %v1208_v10 = vrot.slane %v1207_v62, 4  ;;  %v1198_v5 = vmax.f32 %v1196_v52, %v1197_v6 }
 0x26c   : > { %13635 = vpow2.f32 %v1232_v60  ;;  %v1185_v9 = vrot.slane %v1184_v4, 1 }
 0x26d   : > { %13637 = vpow2.f32 %v1226_v63  ;;  %v1195_v11 = vmax.f32 %v1193_v61, %v1194_v8  ;;  %v1209_v12 = vmax.f32 %v1207_v62, %v1208_v10  ;;  %v1199_v13 = vrot.slane %v1198_v5, 4 }
 0x26e   : > { %13639 = vpow2.f32 %v1228_v7  ;;  %v1186_v14 = vmax.f32 %v1184_v4, %v1185_v9 }
 0x26f   : > { %v1220_v15 = vsub.f32 %v12933_v17, %v1195_v11  ;;  %v1221_v16 = vsub.f32 %v12934_v21, %v1195_v11  ;;  %v1210_v18 = vrot.slane %v1209_v12, 2  ;;  %v1200_v20 = vmax.f32 %v1198_v5, %v1199_v13 }
 0x270   : > { %v1218_v22 = vsub.f32 %v14309_v19, %v1186_v14  ;;  %v1219_v23 = vsub.f32 %v1131_v25, %v1186_v14 }
 0x271   : > { %v1238_v24 = vmul.f32 1.442695, %v1220_v15  ;;  %v1240_v26 = vmul.f32 1.442695, %v1221_v16  ;;  %v1211_v27 = vmax.f32 %v1209_v12, %v1210_v18  ;;  %v1201_v28 = vrot.slane %v1200_v20, 2 }
 0x272   : > { %v1234_v29 = vmul.f32 1.442695, %v1218_v22  ;;  %v1236_v30 = vmul.f32 1.442695, %v1219_v23 }
 0x273   : > { %13641 = vpow2.f32 %v1238_v24  ;;  %v1212_v31 = vrot.slane %v1211_v27, 1  ;;  %v1202_v33 = vmax.f32 %v1200_v20, %v1201_v28 }
 0x274   : > { %13643 = vpow2.f32 %v1240_v26 }
 0x275   : > { %v14330_v35 = vpop.eup %13633  ;;  %13645 = vpow2.f32 %v1234_v29  ;;  %v1213_v17 = vmax.f32 %v1211_v27, %v1212_v31  ;;  %v1203_v21 = vrot.slane %v1202_v33, 1 }
 0x276   : > { %v14332_v37 = vpop.eup %13635  ;;  %v1259_v19 = vsel %vm1159_vm3, %v14330_v35, 0.0  ;;  %13647 = vpow2.f32 %v1236_v30 }
 0x277   : > { %v14336_v25 = vpop.eup %13637  ;;  %v1260_v38 = vsel %vm1159_vm3, %v14332_v37, 0.0  ;;  %v1224_v39 = vsub.f32 %v14316_v41, %v1213_v17  ;;  %v1225_v40 = vsub.f32 %v12938_v54, %v1213_v17  ;;  %v1204_v42 = vmax.f32 %v1202_v33, %v1203_v21 }
 0x278   : > { %v14341_v43 = vpop.eup %13639  ;;  %v1261_v45 = vadd.f32 %v1260_v38, %v1259_v19  ;;  %v1250_v48 = vsel %vm1159_vm3, %v14336_v25, 0.0 }
 0x279   : > { %v1251_v49 = vsel %vm1159_vm3, %v14341_v43, 0.0  ;;  %v1246_v51 = vmul.f32 1.442695, %v1224_v39  ;;  %v1248_v52 = vmul.f32 1.442695, %v1225_v40  ;;  %v1222_v55 = vsub.f32 %v14320_v47, %v1204_v42 }
 0x27a   : > { %v1262_v44 = vrot.slane %v1261_v45, 4  ;;  %v1252_v46 = vadd.f32 %v1251_v49, %v1250_v48  ;;  %v1223_v50 = vsub.f32 %v14325_v58, %v1204_v42 }
 0x27b   : > { %13649 = vpow2.f32 %v1246_v51  ;;  %v1242_v41 = vmul.f32 1.442695, %v1222_v55 }
 0x27c   : > { %v1253_v54 = vrot.slane %v1252_v46, 4  ;;  %13651 = vpow2.f32 %v1248_v52  ;;  %v1244_v59 = vmul.f32 1.442695, %v1223_v50  ;;  %v1263_v60 = vadd.f32 %v1262_v44, %v1261_v45 }
 0x27d   : > { %v14349_v61 = vpop.eup %13641  ;;  %13653 = vpow2.f32 %v1242_v41 }
 0x27e   : > { %v14351_v62 = vpop.eup %13643  ;;  %v1254_v63 = vadd.f32 %v1253_v54, %v1252_v46  ;;  %v1277_v7 = vsel %vm1159_vm3, %v14349_v61, 0.0  ;;  %13655 = vpow2.f32 %v1244_v59  ;;  %v1264_v47 = vrot.slane %v1263_v60, 2 }
 0x27f   : > { %v14355_v4 = vpop.eup %13645  ;;  %v1278_v58 = vsel %vm1159_vm3, %v14351_v62, 0.0 }
 0x280   : > { %v14359_v6 = vpop.eup %13647  ;;  %v1279_v8 = vadd.f32 %v1278_v58, %v1277_v7  ;;  %v1268_v10 = vsel %vm1159_vm3, %v14355_v4, 0.0  ;;  %v1265_v5 = vadd.f32 %v1264_v47, %v1263_v60  ;;  %v1255_v9 = vrot.slane %v1254_v63, 2 }
 0x281   : > { %v1269_v11 = vsel %vm1159_vm3, %v14359_v6, 0.0 }
 0x282   : > { %v1280_v12 = vrot.slane %v1279_v8, 4  ;;  %v1270_v13 = vadd.f32 %v1269_v11, %v1268_v10  ;;  %v1266_v14 = vrot.slane %v1265_v5, 1  ;;  %v1256_v15 = vadd.f32 %v1255_v9, %v1254_v63 }
 0x284   : > { %v1281_v16 = vadd.f32 %v1280_v12, %v1279_v8  ;;  %v1271_v18 = vrot.slane %v1270_v13, 4  ;;  %v1267_v20 = vadd.f32 %v1266_v14, %v1265_v5  ;;  %v1257_v22 = vrot.slane %v1256_v15, 1 }
 0x285   : > { %v13650_v23 = vpop.eup %13649 }
 0x286   : > { %v13652_v24 = vpop.eup %13651  ;;  %v1272_v26 = vadd.f32 %v1271_v18, %v1270_v13  ;;  %v1295_v27 = vsel %vm1159_vm3, %v13650_v23, 0.0  ;;  %13657 = vrcp.f32 %v1267_v20  ;;  %v1258_v28 = vadd.f32 %v1257_v22, %v1256_v15 }
 0x287   : > { %v13654_v29 = vpop.eup %13653  ;;  %v1296_v30 = vsel %vm1159_vm3, %v13652_v24, 0.0  ;;  %v1282_v31 = vrot.slane %v1281_v16, 2 }
 0x288   : > { %v13656_v33 = vpop.eup %13655  ;;  %v1297_v17 = vadd.f32 %v1296_v30, %v1295_v27  ;;  %v1286_v21 = vsel %vm1159_vm3, %v13654_v29, 0.0  ;;  %13659 = vrcp.f32 %v1258_v28  ;;  %v1273_v19 = vrot.slane %v1272_v26, 2 }
 0x289   : > { %v1287_v38 = vsel %vm1159_vm3, %v13656_v33, 0.0  ;;  %v1283_v39 = vadd.f32 %v1282_v31, %v1281_v16 }
 0x28a   : > { %v1298_v40 = vrot.slane %v1297_v17, 4  ;;  %v1288_v42 = vadd.f32 %v1287_v38, %v1286_v21  ;;  %v1274_v45 = vadd.f32 %v1273_v19, %v1272_v26  ;;  %v1780_v21 = vld [vmem:[%s18292_s7 + $0x8] sm:$0xff] }
 0x28b   : > { %v1284_v48 = vrot.slane %v1283_v39, 1 }
 0x28c   : > { %v1299_v49 = vadd.f32 %v1298_v40, %v1297_v17  ;;  %v1289_v51 = vrot.slane %v1288_v42, 4  ;;  %v1275_v52 = vrot.slane %v1274_v45, 1 }
 0x28d   : > { %v1285_v55 = vadd.f32 %v1284_v48, %v1283_v39  ;;  %v1781_v48 = vld [vmem:[%s18292_s7 + $0x10] sm:$0xff] }
 0x28e   : > { %v1290_v44 = vadd.f32 %v1289_v51, %v1288_v42  ;;  %v1276_v46 = vadd.f32 %v1275_v52, %v1274_v45  ;;  %v1300_v50 = vrot.slane %v1299_v49, 2 }
 0x28f   : > { %13661 = vrcp.f32 %v1285_v55 }
 0x290   : > { %v13658_v41 = vpop.eup %13657  ;;  %13663 = vrcp.f32 %v1276_v46  ;;  %v1291_v54 = vrot.slane %v1290_v44, 2  ;;  %v1301_v59 = vadd.f32 %v1300_v50, %v1299_v49  ;;  %v1782_v50 = vld [vmem:[%s18292_s7 + $0x18] sm:$0xff] }
 0x291   : > { %v1312_v60 = vmul.f32 %v13658_v41, %v14330_v35  ;;  %v1313_v63 = vmul.f32 %v13658_v41, %v14332_v37 }
 0x292   : > { %v13660_v7 = vpop.eup %13659  ;;  %v1292_v47 = vadd.f32 %v1291_v54, %v1290_v44  ;;  %v1302_v58 = vrot.slane %v1301_v59, 1 }
 0x293   : > { %1354 = vxpose.xlu1.b32.start [1/2] (short) (narrow) %v1312_v60, 8  ;;  %v1310_v8 = vmul.f32 %v13660_v7, %v14336_v25  ;;  %v1311_v10 = vmul.f32 %v13660_v7, %v14341_v43 }
 0x294   : > { %v1293_v5 = vrot.slane %v1292_v47, 1  ;;  %v1303_v9 = vadd.f32 %v1302_v58, %v1301_v59 }
 0x295   : > { %1322 = vxpose.xlu0.b32.start [1/2] (short) (narrow) %v1310_v8, 8 }
 0x296   : > { %v1294_v11 = vadd.f32 %v1293_v5, %v1292_v47  ;;  %13665 = vrcp.f32 %v1303_v9  ;;  %v1783_v47 = vld [vmem:[%s18292_s7 + $0x20] sm:$0xff] }
 0x297   : > { %1355 = vxpose.xlu1.b32.end [2/2] (short) (narrow) %v1313_v63, 8 }
 0x298   : > { %13667 = vrcp.f32 %v1294_v11 }
 0x299   : > { %v13662_v12 = vpop.eup %13661  ;;  %1323 = vxpose.xlu0.b32.end [2/2] (short) (narrow) %v1311_v10, 8 }
 0x29a   : > { %v13664_v35 = vpop.eup %13663  ;;  %v1316_v37 = vmul.f32 %v13662_v12, %v14349_v61  ;;  %v1317_v13 = vmul.f32 %v13662_v12, %v14351_v62  ;;  %v1784_v12 = vld [vmem:[%s18292_s7 + $0x28] sm:$0xff] }
 0x29b   : > { %v1314_v14 = vmul.f32 %v13664_v35, %v14355_v4  ;;  %v1315_v25 = vmul.f32 %v13664_v35, %v14359_v6 }
 0x29d   : > { %1386 = vxpose.xlu1.b32.start [1/2] (short) (narrow) %v1314_v14, 8 }
 0x2a0   : > { %v13666_v43 = vpop.eup %13665 }
 0x2a1   : > { %1387 = vxpose.xlu1.b32.end [2/2] (short) (narrow) %v1315_v25, 8  ;;  %v1320_v15 = vmul.f32 %v13666_v43, %v13650_v23  ;;  %v1321_v16 = vmul.f32 %v13666_v43, %v13652_v24 }
 0x2a2   : > { %v13668_v18 = vpop.eup %13667 }
 0x2a3   : > { %v1318_v20 = vmul.f32 %v13668_v18, %v13654_v29  ;;  %v1319_v22 = vmul.f32 %v13668_v18, %v13656_v33 }
 0x2a5   : > { %1418 = vxpose.xlu1.b32.start [1/2] (short) (narrow) %v1316_v37, 8 }
 0x2a9   : > { %1419 = vxpose.xlu1.b32.end [2/2] (short) (narrow) %v1317_v13, 8 }
 0x2ad   : > { %1450 = vxpose.xlu1.b32.start [1/2] (short) (narrow) %v1318_v20, 8 }
 0x2b1   : > { %1451 = vxpose.xlu1.b32.end [2/2] (short) (narrow) %v1319_v22, 8 }
 0x2b5   : > { %1482 = vxpose.xlu1.b32.start [1/2] (short) (narrow) %v1320_v15, 8 }
 0x2b9   : > { %1483 = vxpose.xlu1.b32.end [2/2] (short) (narrow) %v1321_v16, 8 }
 0x313   : > { %v1370_v4 = vpop.trf.xlu1 }
 0x314   : > { %v1515_v6 = vpack.c.bf16 %v1370_v4, %v1370_v4 }
 0x315   : > { %v1338_v61 = vpop.trf.xlu0 }
 0x316   : > { %v1514_v62 = vpack.c.bf16 %v1338_v61, %v1338_v61 }
 0x318   : > { %12942 = vmatmul.mubr.msk.bf16.vlgmr.msra.gmra.mrb[16].mxu1 %vm1520_vm4, %v1514_v62 }
 0x319   : > { %12946 = vmatpush3.bf16.msra.mxu1 %v14281_v56  ;;  %12947 = vmatprep.mubr.msk.bf16.mxu1 %vm13999_vm0, %v18319_v1 }
 0x31a   : > { %12951 = vmatprep.subr.bf16.mxu1 %v18319_v1 }
 0x31d   : > { %v1402_v23 = vpop.trf.xlu1 }
 0x31e   : > { %v1516_v24 = vpack.c.bf16 %v1402_v23, %v1402_v23 }
 0x320   : > { %12948 = vmatmul.mubr.msk.bf16.vlgmr.msra.gmra.mrb[20].mxu1 %vm1520_vm4, %v1515_v6 }
 0x321   : > { %12952 = vmatpush3.bf16.msra.mxu1 %v14283_v53  ;;  %12953 = vmatprep.mubr.msk.bf16.mxu1 %vm13999_vm0, %v18319_v1 }
 0x322   : > { %12957 = vmatprep.subr.bf16.mxu1 %v18319_v1 }
 0x325   : > { %v1434_v56 = vpop.trf.xlu1 }
 0x326   : > { %v1517_v26 = vpack.c.bf16 %v1434_v56, %v1434_v56 }
 0x328   : > { %12954 = vmatmul.mubr.msk.bf16.vlgmr.msra.gmra.mrb[24].mxu1 %vm1520_vm4, %v1516_v24 }
 0x329   : > { %12958 = vmatpush3.bf16.msra.mxu1 %v14285_v57  ;;  %12959 = vmatprep.mubr.msk.bf16.mxu1 %vm13999_vm0, %v18319_v1 }
 0x32a   : > { %12963 = vmatprep.subr.bf16.mxu1 %v18319_v1 }
 0x32d   : > { %v1466_v53 = vpop.trf.xlu1 }
 0x32e   : > { %v1518_v27 = vpack.c.bf16 %v1466_v53, %v1466_v53 }
 0x330   : > { %12960 = vmatmul.mubr.msk.bf16.vlgmr.msra.gmra.mrb[28].mxu1 %vm1520_vm4, %v1517_v26 }
 0x331   : > { %12964 = vmatpush3.bf16.msra.mxu1 %v14292_v2  ;;  %12965 = vmatprep.mubr.msk.bf16.mxu1 %vm13999_vm0, %v18319_v1  ;;  %v1779_v2 = vld [vmem:[%s18292_s7] sm:$0xff] }
 0x332   : > { %12969 = vmatprep.subr.bf16.mxu1 %v18319_v1 }
 0x335   : > { %v1498_v57 = vpop.trf.xlu1 }
 0x336   : > { %v1519_v28 = vpack.c.bf16 %v1498_v57, %v1498_v57 }
 0x338   : > { %12966 = vmatmul.mubr.msk.bf16.vlgmr.msra.gmra.mrb[32].mxu1 %vm1520_vm4, %v1518_v27 }
 0x339   : > { %12970 = vmatpush3.bf16.msra.mxu1 %v14294_v3  ;;  %12971 = vmatprep.mubr.msk.bf16.mxu1 %vm13999_vm0, %v18319_v1 }
 0x340   : > { %12972 = vmatmul.mubr.msk.bf16.vlgmr.msra.gmra.mrb[36].mxu1 %vm1520_vm4, %v1519_v28 }
 0x341   : > { %2015 = vmatprep.mubr.bf16.mxu1 %v18316_v0 }
 0x3eb   : > { %v1558_v29 = vpop.f32.mrb[16].mxu1 }
 0x3ec   : > { %v14406_v30 = vadd.f32 %v1779_v2, %v1558_v29  ;;  %v12943_v31 = vpop.f32.mrb[17].mxu1 }
 0x3ed   : > { %v1561_v33 = vpop.f32.mrb[18].mxu1 }
 0x3ee   : > { %18418 = vst [vmem:[#allocation13_spill] sm:$0xff] %v14406_v30  ;;  %v12944_v17 = vpop.f32.mrb[19].mxu1  ;;  %v1808_v3 = vsel %vm812_vm2, %v14406_v30, 0.0 }
 0x3ef   : > { %1809 = vadd.xlane.f32.xlu0 %v1808_v3 }
 0x3f3   : > { %v1601_v19 = vpop.f32.mrb[20].mxu1 }
 0x3f4   : > { %v14413_v38 = vadd.f32 %v1780_v21, %v1601_v19  ;;  %v12949_v39 = vpop.f32.mrb[21].mxu1  ;;  %v13579_v19 = vld [vmem:[%s18295_s10 + $0x4] ss:$8 sps:$4 sm:$0xff]  }
 0x3f5   : > { %v1604_v40 = vpop.f32.mrb[22].mxu1  ;;  %1983 = vmatprep.subr.bf16.mxu1 %v13579_v19 }
 0x3f6   : > { %18419 = vst [vmem:[#allocation14_spill] sm:$0xff] %v14413_v38  ;;  %v12950_v42 = vpop.f32.mrb[23].mxu1  ;;  %v1811_v45 = vsel %vm812_vm2, %v14413_v38, 0.0  ;;  %v13577_v40 = vld [vmem:[%s18295_s10] ss:$8 sps:$4 sm:$0xff]  }
 0x3f7   : > { %1812 = vadd.xlane.f32.xlu1 %v1811_v45  ;;  %1984 = vmatpush1.bf16.msra.mxu1 %v13577_v40 }
 0x3fb   : > { %v1644_v49 = vpop.f32.mrb[24].mxu1 }
 0x3fc   : > { %v14420_v51 = vadd.f32 %v1781_v48, %v1644_v49  ;;  %v12955_v52 = vpop.f32.mrb[25].mxu1  ;;  %v13582_v48 = vld [vmem:[%s18295_s10 + $0x14] ss:$8 sps:$4 sm:$0xff]  }
 0x3fd   : > { %v1647_v55 = vpop.f32.mrb[26].mxu1  ;;  %v13580_v52 = vld [vmem:[%s18295_s10 + $0x10] ss:$8 sps:$4 sm:$0xff]   ;;  %1985 = vmatprep.subr.bf16.mxu1 %v13582_v48 }
 0x3fe   : > { %18420 = vst [vmem:[#allocation15_spill] sm:$0xff] %v14420_v51  ;;  %v1814_v44 = vsel %vm812_vm2, %v14420_v51, 0.0  ;;  %v12956_v46 = vpop.f32.mrb[27].mxu1  ;;  %1986 = vmatpush1.bf16.msra.mxu1 %v13580_v52 }
 0x3ff   : > { %1815 = vadd.xlane.f32.xlu1 %v1814_v44  ;;  %v13585_v44 = vld [vmem:[%s18295_s10 + $0x24] ss:$8 sps:$4 sm:$0xff]  }
 0x400   : > { %1987 = vmatprep.subr.bf16.mxu1 %v13585_v44 }
 0x403   : > { %v1687_v41 = vpop.f32.mrb[28].mxu1 }
 0x404   : > { %v14427_v54 = vadd.f32 %v1782_v50, %v1687_v41  ;;  %v12961_v59 = vpop.f32.mrb[29].mxu1  ;;  %v13583_v50 = vld [vmem:[%s18295_s10 + $0x20] ss:$8 sps:$4 sm:$0xff]   ;;  %v13586_v41 = vld [vmem:[%s18295_s10 + $0x30] ss:$8 sps:$4 sm:$0xff]  }
 0x405   : > { %v1690_v60 = vpop.f32.mrb[30].mxu1  ;;  %1988 = vmatpush1.bf16.msra.mxu1 %v13583_v50  ;;  %v13588_v59 = vld [vmem:[%s18295_s10 + $0x34] ss:$8 sps:$4 sm:$0xff]  }
 0x406   : > { %18421 = vst [vmem:[#allocation16_spill] sm:$0xff] %v14427_v54  ;;  %v1817_v63 = vsel %vm812_vm2, %v14427_v54, 0.0  ;;  %v12962_v7 = vpop.f32.mrb[31].mxu1  ;;  %1989 = vmatprep.subr.bf16.mxu1 %v13588_v59 }
 0x407   : > { %1818 = vadd.xlane.f32.xlu0 %v1817_v63 }
 0x409   : > { %1990 = vmatpush1.bf16.msra.mxu1 %v13586_v41 }
 0x40a   : > { %12975 = vmatprep.subr.bf16.mxu1 %v18319_v1 }
 0x40b   : > { %v1730_v58 = vpop.f32.mrb[32].mxu1 }
 0x40c   : > { %v14434_v8 = vadd.f32 %v1783_v47, %v1730_v58  ;;  %v12967_v10 = vpop.f32.mrb[33].mxu1 }
 0x40d   : > { %v1733_v5 = vpop.f32.mrb[34].mxu1 }
 0x40e   : > { %18422 = vst [vmem:[#allocation17_spill] sm:$0xff] %v14434_v8  ;;  %v1820_v9 = vsel %vm812_vm2, %v14434_v8, 0.0  ;;  %v12968_v11 = vpop.f32.mrb[35].mxu1 }
 0x40f   : > { %1821 = vadd.xlane.f32.xlu1 %v1820_v9 }
 0x413   : > { %v1773_v35 = vpop.f32.mrb[36].mxu1 }
 0x414   : > { %v14441_v37 = vadd.f32 %v1784_v12, %v1773_v35  ;;  %v12973_v13 = vpop.f32.mrb[37].mxu1 }
 0x415   : > { %v1776_v14 = vpop.f32.mrb[38].mxu1  ;;  %v12417_v13 = vld [vmem:[%s18293_s8] ss:$0 sm:$0xff] }
 0x416   : > { %18423 = vst [vmem:[#allocation18_spill] sm:$0xff] %v14441_v37  ;;  %v1823_v25 = vsel %vm812_vm2, %v14441_v37, 0.0  ;;  %v12974_v43 = vpop.f32.mrb[39].mxu1 }
 0x417   : > { %1824 = vadd.xlane.f32.xlu0 %v1823_v25 }
 0x47c   : > { %v1810_v15 = vpop.xlane.xlu0 %1809 }
 0x47d   : > { %v1827_v16 = vmul.f32 0.015625, %v1810_v15 }
 0x47f   : > { %v14446_v18 = vsub.f32 %v14406_v30, %v1827_v16 }
 0x481   : > { %v1839_v20 = vmul.f32 %v14446_v18, %v14446_v18 }
 0x483   : > { %v1845_v22 = vsel %vm812_vm2, %v1839_v20, 0.0  ;;  %v12418_v20 = vld [vmem:[%s18294_s9] ss:$0 sm:$0xff] }
 0x484   : > { %1846 = vadd.xlane.f32.xlu1 %v1845_v22  ;;  %v1813_v61 = vpop.xlane.xlu1 %1812 }
 0x485   : > { %v1828_v62 = vmul.f32 0.015625, %v1813_v61 }
 0x487   : > { %v1834_v4 = vsub.f32 %v14413_v38, %v1828_v62 }
 0x489   : > { %v1840_v6 = vmul.f32 %v1834_v4, %v1834_v4 }
 0x48b   : > { %v1848_v23 = vsel %vm812_vm2, %v1840_v6, 0.0 }
 0x48c   : > { %1849 = vadd.xlane.f32.xlu0 %v1848_v23  ;;  %v1816_v24 = vpop.xlane.xlu1 %1815 }
 0x48d   : > { %v1829_v56 = vmul.f32 0.015625, %v1816_v24 }
 0x48f   : > { %v14454_v26 = vsub.f32 %v14420_v51, %v1829_v56 }
 0x491   : > { %v1841_v53 = vmul.f32 %v14454_v26, %v14454_v26 }
 0x493   : > { %v1851_v27 = vsel %vm812_vm2, %v1841_v53, 0.0 }
 0x494   : > { %v1819_v57 = vpop.xlane.xlu0 %1818  ;;  %1852 = vadd.xlane.f32.xlu1 %v1851_v27 }
 0x495   : > { %v1830_v28 = vmul.f32 0.015625, %v1819_v57 }
 0x497   : > { %v14460_v2 = vsub.f32 %v14427_v54, %v1830_v28 }
 0x499   : > { %v1842_v29 = vmul.f32 %v14460_v2, %v14460_v2 }
 0x49b   : > { %v1854_v31 = vsel %vm812_vm2, %v1842_v29, 0.0 }
 0x49c   : > { %1855 = vadd.xlane.f32.xlu0 %v1854_v31  ;;  %v1822_v33 = vpop.xlane.xlu1 %1821 }
 0x49d   : > { %v1831_v17 = vmul.f32 0.015625, %v1822_v33 }
 0x49f   : > { %v14466_v3 = vsub.f32 %v14434_v8, %v1831_v17 }
 0x4a1   : > { %v1843_v21 = vmul.f32 %v14466_v3, %v14466_v3 }
 0x4a3   : > { %v1857_v39 = vsel %vm812_vm2, %v1843_v21, 0.0 }
 0x4a4   : > { %v1825_v42 = vpop.xlane.xlu0 %1824  ;;  %1858 = vadd.xlane.f32.xlu1 %v1857_v39 }
 0x4a5   : > { %v1832_v45 = vmul.f32 0.015625, %v1825_v42 }
 0x4a7   : > { %v14481_v49 = vsub.f32 %v14441_v37, %v1832_v45 }
 0x4a9   : > { %v1844_v55 = vmul.f32 %v14481_v49, %v14481_v49 }
 0x4ab   : > { %v1860_v46 = vsel %vm812_vm2, %v1844_v55, 0.0 }
 0x4ac   : > { %1861 = vadd.xlane.f32.xlu0 %v1860_v46  ;;  %v14523_v46 = vld [vmem:[%s18296_s11] sm:$0x3] }
 0x511   : > { %v1847_v60 = vpop.xlane.xlu1 %1846 }
 0x512   : > { %v1863_v63 = vmul.f32 0.015625, %v1847_v60 }
 0x514   : > { %v1869_v7 = vadd.f32 1e-05, %v1863_v63 }
 0x516   : > { %13669 = vrsqrt.f32 %v1869_v7 }
 0x519   : > { %v1850_v47 = vpop.xlane.xlu0 %1849 }
 0x51a   : > { %v1864_v58 = vmul.f32 0.015625, %v1850_v47 }
 0x51c   : > { %v1870_v10 = vadd.f32 1e-05, %v1864_v58 }
 0x51e   : > { %13671 = vrsqrt.f32 %v1870_v10 }
 0x520   : > { %v13670_v9 = vpop.eup %13669 }
 0x521   : > { %v1853_v5 = vpop.xlane.xlu1 %1852  ;;  %v1881_v35 = vmul.f32 %v13670_v9, %v14446_v18 }
 0x522   : > { %v1865_v11 = vmul.f32 0.015625, %v1853_v5 }
 0x523   : > { %v1893_v25 = vmul.f32 %v12417_v13, %v1881_v35 }
 0x524   : > { %v1871_v12 = vadd.f32 1e-05, %v1865_v11 }
 0x525   : > { %v1905_v62 = vadd.f32 %v12418_v20, %v1893_v25 }
 0x526   : > { %13673 = vrsqrt.f32 %v1871_v12 }
 0x528   : > { %v13672_v14 = vpop.eup %13671 }
 0x529   : > { %v1882_v43 = vmul.f32 %v13672_v14, %v1834_v4  ;;  %v1856_v15 = vpop.xlane.xlu0 %1855 }
 0x52a   : > { %v1866_v16 = vmul.f32 0.015625, %v1856_v15 }
 0x52b   : > { %v1894_v22 = vmul.f32 %v12417_v13, %v1882_v43  ;;  %v18315_v43 = vsub.s32 1, %v14266_v34 }
 0x52c   : > { %v1872_v61 = vadd.f32 1e-05, %v1866_v16 }
 0x52d   : > { %v1906_v6 = vadd.f32 %v12418_v20, %v1894_v22  ;;  %v1931_v15 = vrot.slane %v14523_v46, %v18315_v43 }
 0x52e   : > { %13675 = vrsqrt.f32 %v1872_v61 }
 0x52f   : > { %v1911_v18 = vpack.c.bf16 %v1906_v6, %v1905_v62 }
 0x530   : > { %v13674_v24 = vpop.eup %13673 }
 0x531   : > { %12427 = vmatmul.mubr.msk.bf16.vlgmr.msra.gmra.mrb[40].mxu1 %vm812_vm2, %v1911_v18  ;;  %v1859_v23 = vpop.xlane.xlu1 %1858  ;;  %v1883_v53 = vmul.f32 %v13674_v24, %v14454_v26 }
 0x532   : > { %v1867_v56 = vmul.f32 0.015625, %v1859_v23  ;;  %2025 = vmatprep.mubr.bf16.mxu1 %v18316_v0 }
 0x533   : > { %v1895_v29 = vmul.f32 %v12417_v13, %v1883_v53  ;;  %v14008_v53 = vmov 1934713408  }
 0x534   : > { %v1873_v4 = vadd.f32 1e-05, %v1867_v56  ;;  %v14007_v56 = vmov 1983009808  }
 0x535   : > { %v1907_v21 = vadd.f32 %v12418_v20, %v1895_v29 }
 0x536   : > { %13677 = vrsqrt.f32 %v1873_v4  ;;  %v2241_v4 = vunpack.c.l.s4 %v14007_v56 }
 0x538   : > { %v13676_v27 = vpop.eup %13675  ;;  %v2242_v29 = vunpack.c.0.s8 %v2241_v4 }
 0x539   : > { %v1862_v57 = vpop.xlane.xlu0 %1861  ;;  %v1884_v28 = vmul.f32 %v13676_v27, %v14460_v2  ;;  %v2305_v27 = vunpack.c.l.s4 %v14008_v53 }
 0x53a   : > { %v1868_v31 = vmul.f32 0.015625, %v1862_v57 }
 0x53b   : > { %v1896_v33 = vmul.f32 %v12417_v13, %v1884_v28 }
 0x53c   : > { %v1874_v17 = vadd.f32 1e-05, %v1868_v31  ;;  %v2306_v31 = vunpack.c.0.s8 %v2305_v27 }
 0x53d   : > { %v1908_v19 = vadd.f32 %v12418_v20, %v1896_v33 }
 0x53e   : > { %13679 = vrsqrt.f32 %v1874_v17 }
 0x53f   : > { %v1912_v39 = vpack.c.bf16 %v1908_v19, %v1907_v21 }
 0x540   : > { %v13678_v40 = vpop.eup %13677 }
 0x541   : > { %12428 = vmatmul.mubr.msk.bf16.gmra.mrb[44].mxu1 %vm812_vm2, %v1912_v39  ;;  %v1885_v26 = vmul.f32 %v13678_v40, %v14466_v3  ;;  %v1927_v3 = vrot.slane %v14523_v46, %v14273_v36  ;;  %v14681_v39 = vsub.s32 %v2242_v29, %v14266_v34 }
 0x542   : > { %2035 = vmatprep.mubr.bf16.mxu1 %v18316_v0 }
 0x543   : > { %v1897_v48 = vmul.f32 %v12417_v13, %v1885_v26 }
 0x545   : > { %v1909_v52 = vadd.f32 %v12418_v20, %v1897_v48 }
 0x548   : > { %v13680_v42 = vpop.eup %13679 }
 0x549   : > { %v1886_v45 = vmul.f32 %v13680_v42, %v14481_v49  ;;  %v14684_v42 = vsub.s32 %v2306_v31, %v14266_v34 }
 0x54b   : > { %v1898_v2 = vmul.f32 %v12417_v13, %v1886_v45 }
 0x54d   : > { %v1910_v55 = vadd.f32 %v12418_v20, %v1898_v2 }
 0x54f   : > { %v1913_v44 = vpack.c.bf16 %v1910_v55, %v1909_v52 }
 0x551   : > { %12429 = vmatmul.mubr.msk.bf16.gmra.mrb[48].mxu1 %vm812_vm2, %v1913_v44 }
 0x552   : > { %12981 = vmatprep.mubr.msk.bf16.mxu1 %vm13999_vm0, %v18319_v1 }
 0x604   : > { %v2017_v50 = vpop.f32.mrb[40].mxu1 }
 0x605   : > { %v14527_v49 = vadd.f32 %v2017_v50, %v1927_v3  ;;  %v14529_v41 = vpop.f32.mrb[41].mxu1 }
 0x606   : > { %v2021_v59 = vpop.f32.mrb[42].mxu1  ;;  %v14634_v20 = vadd.f32 %v14529_v41, %v1931_v15 }
 0x607   : > { %v14531_v60 = vadd.f32 %v2021_v59, %v1927_v3  ;;  %v2023_v63 = vpop.f32.mrb[43].mxu1  ;;  %2106 = vrot.lane.b32.xlu1 %v14527_v49, %s18368_s3 }
 0x608   : > { %v14625_v16 = vadd.f32 %v2023_v63, %v1931_v15 }
 0x609   : > { %2108 = vrot.lane.b32.xlu0 %v14531_v60, %s18368_s3 }
 0x60b   : > { %2124 = vrot.lane.b32.xlu1 %v14527_v49, %s14001_s1 }
 0x60d   : > { %2144 = vrot.lane.b32.xlu0 %v14531_v60, %s18366_s23 }
 0x60f   : > { %2142 = vrot.lane.b32.xlu1 %v14527_v49, %s18366_s23 }
 0x611   : > { %2162 = vrot.lane.b32.xlu0 %v14531_v60, %s18364_s24 }
 0x613   : > { %2160 = vrot.lane.b32.xlu1 %v14527_v49, %s18364_s24 }
 0x614   : > { %v2027_v7 = vpop.f32.mrb[44].mxu1 }
 0x615   : > { %2054 = vrot.lane.b32.xlu0 %v14531_v60, %s18362_s28  ;;  %v2029_v47 = vpop.f32.mrb[45].mxu1  ;;  %v14565_v11 = vadd.f32 %v2027_v7, %v1927_v3 }
 0x616   : > { %v2031_v58 = vpop.f32.mrb[46].mxu1  ;;  %v14656_v62 = vadd.f32 %v2029_v47, %v1931_v15 }
 0x617   : > { %2052 = vrot.lane.b32.xlu1 %v14527_v49, %s18362_s28  ;;  %v2033_v10 = vpop.f32.mrb[47].mxu1  ;;  %v14557_v5 = vadd.f32 %v2031_v58, %v1927_v3 }
 0x618   : > { %v14638_v22 = vadd.f32 %v2033_v10, %v1931_v15  ;;  %18426 = vst [vmem:[#allocation21_spill] sm:$0xff] %v14656_v62 }
 0x619   : > { %2072 = vrot.lane.b32.xlu0 %v14531_v60, %s18360_s30 }
 0x61a   : > { %18424 = vst [vmem:[#allocation19_spill] sm:$0xff] %v14638_v22 }
 0x61b   : > { %2070 = vrot.lane.b32.xlu1 %v14527_v49, %s18360_s30 }
 0x61d   : > { %2090 = vrot.lane.b32.xlu0 %v14531_v60, %s18358_s29 }
 0x61f   : > { %2088 = vrot.lane.b32.xlu1 %v14527_v49, %s18358_s29 }
 0x621   : > { %2112 = vrot.lane.b32.xlu0 %v14557_v5, %s18368_s3 }
 0x623   : > { %2126 = vrot.lane.b32.xlu1 %v14531_v60, %s14001_s1 }
 0x624   : > { %v2037_v9 = vpop.f32.mrb[48].mxu1 }
 0x625   : > { %2130 = vrot.lane.b32.xlu0 %v14557_v5, %s14001_s1  ;;  %v2039_v12 = vpop.f32.mrb[49].mxu1  ;;  %v14585_v25 = vadd.f32 %v2037_v9, %v1927_v3 }
 0x626   : > { %v2041_v35 = vpop.f32.mrb[50].mxu1  ;;  %v14670_v23 = vadd.f32 %v2039_v12, %v1931_v15 }
 0x627   : > { %2110 = vrot.lane.b32.xlu1 %v14565_v11, %s18368_s3  ;;  %v2043_v13 = vpop.f32.mrb[51].mxu1  ;;  %v14577_v14 = vadd.f32 %v2041_v35, %v1927_v3 }
 0x628   : > { %v14648_v61 = vadd.f32 %v2043_v13, %v1931_v15  ;;  %18427 = vst [vmem:[#allocation22_spill] sm:$0xff] %v14670_v23 }
 0x629   : > { %2148 = vrot.lane.b32.xlu0 %v14557_v5, %s18366_s23 }
 0x62a   : > { %18425 = vst [vmem:[#allocation20_spill] sm:$0xff] %v14648_v61 }
 0x62b   : > { %2128 = vrot.lane.b32.xlu1 %v14565_v11, %s14001_s1 }
 0x62d   : > { %2166 = vrot.lane.b32.xlu0 %v14557_v5, %s18364_s24 }
 0x62f   : > { %2146 = vrot.lane.b32.xlu1 %v14565_v11, %s18366_s23 }
 0x631   : > { %2116 = vrot.lane.b32.xlu0 %v14577_v14, %s18368_s3 }
 0x633   : > { %2164 = vrot.lane.b32.xlu1 %v14565_v11, %s18364_s24 }
 0x635   : > { %2134 = vrot.lane.b32.xlu0 %v14577_v14, %s14001_s1 }
 0x637   : > { %2114 = vrot.lane.b32.xlu1 %v14585_v25, %s18368_s3  ;;  %s18500_s3 = smov 96  }
 0x639   : > { %2152 = vrot.lane.b32.xlu0 %v14577_v14, %s18366_s23 }
 0x63b   : > { %2132 = vrot.lane.b32.xlu1 %v14585_v25, %s14001_s1 }
 0x63d   : > { %2170 = vrot.lane.b32.xlu0 %v14577_v14, %s18364_s24 }
 0x63f   : > { %2150 = vrot.lane.b32.xlu1 %v14585_v25, %s18366_s23 }
 0x641   : > { %2058 = vrot.lane.b32.xlu0 %v14557_v5, %s18362_s28 }
 0x643   : > { %2168 = vrot.lane.b32.xlu1 %v14585_v25, %s18364_s24 }
 0x645   : > { %2076 = vrot.lane.b32.xlu0 %v14557_v5, %s18360_s30 }
 0x647   : > { %2056 = vrot.lane.b32.xlu1 %v14565_v11, %s18362_s28 }
 0x649   : > { %2094 = vrot.lane.b32.xlu0 %v14557_v5, %s18358_s29 }
 0x64b   : > { %2074 = vrot.lane.b32.xlu1 %v14565_v11, %s18360_s30 }
 0x64d   : > { %2062 = vrot.lane.b32.xlu0 %v14577_v14, %s18362_s28 }
 0x64f   : > { %2092 = vrot.lane.b32.xlu1 %v14565_v11, %s18358_s29 }
 0x651   : > { %2080 = vrot.lane.b32.xlu0 %v14577_v14, %s18360_s30 }
 0x653   : > { %2060 = vrot.lane.b32.xlu1 %v14585_v25, %s18362_s28 }
 0x655   : > { %2098 = vrot.lane.b32.xlu0 %v14577_v14, %s18358_s29 }
 0x657   : > { %2078 = vrot.lane.b32.xlu1 %v14585_v25, %s18360_s30 }
 0x659   : > { %2186 = vrot.lane.b32.xlu0 %v14625_v16, %s18362_s28 }
 0x65b   : > { %2096 = vrot.lane.b32.xlu1 %v14585_v25, %s18358_s29 }
 0x65d   : > { %2222 = vrot.lane.b32.xlu0 %v14625_v16, %s18358_s29 }
 0x65f   : > { %2184 = vrot.lane.b32.xlu1 %v14634_v20, %s18362_s28 }
 0x661   : > { %2190 = vrot.lane.b32.xlu0 %v14638_v22, %s18362_s28 }
 0x663   : > { %2202 = vrot.lane.b32.xlu1 %v14634_v20, %s18360_s30 }
 0x665   : > { %2226 = vrot.lane.b32.xlu0 %v14638_v22, %s18358_s29 }
 0x667   : > { %2204 = vrot.lane.b32.xlu1 %v14625_v16, %s18360_s30 }
 0x669   : > { %2194 = vrot.lane.b32.xlu0 %v14648_v61, %s18362_s28 }
 0x66b   : > { %2220 = vrot.lane.b32.xlu1 %v14634_v20, %s18358_s29 }
 0x66d   : > { %2212 = vrot.lane.b32.xlu0 %v14648_v61, %s18360_s30 }
 0x66f   : > { %2188 = vrot.lane.b32.xlu1 %v14656_v62, %s18362_s28 }
 0x673   : > { %2206 = vrot.lane.b32.xlu1 %v14656_v62, %s18360_s30 }
 0x677   : > { %2208 = vrot.lane.b32.xlu1 %v14638_v22, %s18360_s30 }
 0x679   : > { %v2107_v6 = vpop.permute.xlu1 %2106 }
 0x67b   : > { %v14666_v18 = vpop.permute.xlu0 %2108  ;;  %2224 = vrot.lane.b32.xlu1 %v14656_v62, %s18358_s29 }
 0x67d   : > { %v2125_v24 = vpop.permute.xlu1 %2124 }
 0x67f   : > { %v14672_v57 = vpop.permute.xlu0 %2144  ;;  %2192 = vrot.lane.b32.xlu1 %v14670_v23, %s18362_s28 }
 0x681   : > { %v2143_v28 = vpop.permute.xlu1 %2142 }
 0x682   : > { %v2270_v17 = vcombine.low %v2107_v6, %v2143_v28  ;;  %v2271_v21 = vcombine.high %v2107_v6, %v2143_v28 }
 0x683   : > { %v14676_v33 = vpop.permute.xlu0 %2162  ;;  %2210 = vrot.lane.b32.xlu1 %v14670_v23, %s18360_s30  ;;  %s18498_s30 = smov 16  }
 0x684   : > { %v2278_v48 = vrot.slane %v2270_v17, %v14681_v39  ;;  %v2285_v2 = vrot.slane %v2271_v21, %v14681_v39 }
 0x685   : > { %v2161_v19 = vpop.permute.xlu1 %2160 }
 0x686   : > { %v2286_v40 = vcombine.low %v2125_v24, %v2161_v19  ;;  %v2287_v26 = vcombine.high %v2125_v24, %v2161_v19 }
 0x687   : > { %v2055_v45 = vpop.permute.xlu0 %2054 }
 0x688   : > { %v2294_v52 = vrot.slane %v2286_v40, %v14681_v39  ;;  %v2301_v55 = vrot.slane %v2287_v26, %v14681_v39 }
 0x689   : > { %v2053_v44 = vpop.permute.xlu1 %2052 }
 0x68a   : > { %v2334_v46 = vcombine.low %v2278_v48, %v2294_v52  ;;  %v2335_v3 = vcombine.high %v2278_v48, %v2294_v52  ;;  %v2350_v50 = vcombine.low %v2285_v2, %v2301_v55  ;;  %v2351_v41 = vcombine.high %v2285_v2, %v2301_v55 }
 0x68b   : > { %v2073_v59 = vpop.permute.xlu0 %2072  ;;  %v2475_v2 = vcombine.high %v14666_v18, %v14672_v57 }
 0x68c   : > { %v2342_v63 = vrot.slane %v2334_v46, %v14684_v42  ;;  %v2349_v7 = vrot.slane %v2335_v3, %v14684_v42  ;;  %v2358_v47 = vrot.slane %v2350_v50, %v14684_v42  ;;  %v2365_v58 = vrot.slane %v2351_v41, %v14684_v42 }
 0x68d   : > { %v2442_v10 = vcombine.low %v14531_v60, %v2073_v59  ;;  %v2443_v9 = vcombine.high %v14531_v60, %v2073_v59  ;;  %v2071_v12 = vpop.permute.xlu1 %2070 }
 0x68e   : > { %v12431_v35 = vcombine.low %v2342_v63, %v2349_v7  ;;  %v12433_v13 = vcombine.high %v2342_v63, %v2349_v7  ;;  %v12435_v15 = vcombine.low %v2358_v47, %v2365_v58  ;;  %v12437_v6 = vcombine.high %v2358_v47, %v2365_v58 }
 0x68f   : > { %v2238_v24 = vcombine.low %v14527_v49, %v2071_v12  ;;  %v2239_v56 = vcombine.high %v14527_v49, %v2071_v12  ;;  %v2091_v4 = vpop.permute.xlu0 %2090  ;;  %v2450_v53 = vrot.slane %v2442_v10, %v14681_v39  ;;  %v2457_v27 = vrot.slane %v2443_v9, %v14681_v39 }
 0x690   : > { %v2458_v28 = vcombine.low %v2055_v45, %v2091_v4  ;;  %v2459_v29 = vcombine.high %v2055_v45, %v2091_v4  ;;  %v14701_v17 = vrot.slane %v12431_v35, %v14681_v39  ;;  %v14704_v60 = vrot.slane %v12433_v13, %v14681_v39 }
 0x691   : > { %v2089_v31 = vpop.permute.xlu1 %2088  ;;  %v14707_v21 = vrot.slane %v12435_v15, %v14681_v39  ;;  %v14710_v19 = vrot.slane %v12437_v6, %v14681_v39  ;;  %v2474_v45 = vcombine.low %v14666_v18, %v14672_v57  ;;  %v2246_v52 = vrot.slane %v2238_v24, %v14681_v39 }
 0x692   : > { %v2466_v49 = vrot.slane %v2458_v28, %v14681_v39  ;;  %v2473_v40 = vrot.slane %v2459_v29, %v14681_v39  ;;  %v2254_v26 = vcombine.low %v2053_v44, %v2089_v31  ;;  %v2255_v48 = vcombine.high %v2053_v44, %v2089_v31 }
 0x693   : > { %v2253_v55 = vrot.slane %v2239_v56, %v14681_v39  ;;  %v14720_v46 = vpop.permute.xlu0 %2112  ;;  %v3542_v47 = vcombine.low %v14701_v17, %v14704_v60  ;;  %v3574_v18 = vcombine.low %v14707_v21, %v14710_v19 }
 0x694   : > { %v2506_v3 = vcombine.low %v2450_v53, %v2466_v49  ;;  %v2507_v50 = vcombine.high %v2450_v53, %v2466_v49  ;;  %v2522_v41 = vcombine.low %v2457_v27, %v2473_v40  ;;  %v2523_v59 = vcombine.high %v2457_v27, %v2473_v40 }
 0x695   : > { %v2262_v63 = vrot.slane %v2254_v26, %v14681_v39  ;;  %v2269_v44 = vrot.slane %v2255_v48, %v14681_v39  ;;  %v2127_v7 = vpop.permute.xlu1 %2126 }
 0x696   : > { %v2514_v57 = vrot.slane %v2506_v3, %v14684_v42  ;;  %v2521_v58 = vrot.slane %v2507_v50, %v14684_v42  ;;  %v2530_v10 = vrot.slane %v2522_v41, %v14684_v42  ;;  %v2537_v9 = vrot.slane %v2523_v59, %v14684_v42 }
 0x697   : > { %v2302_v12 = vcombine.low %v2246_v52, %v2262_v63  ;;  %v2303_v35 = vcombine.high %v2246_v52, %v2262_v63  ;;  %v2318_v13 = vcombine.low %v2253_v55, %v2269_v44  ;;  %v2319_v15 = vcombine.high %v2253_v55, %v2269_v44  ;;  %v2131_v6 = vpop.permute.xlu0 %2130 }
 0x698   : > { %v12438_v24 = vcombine.low %v2514_v57, %v2521_v58  ;;  %v12440_v56 = vcombine.high %v2514_v57, %v2521_v58  ;;  %v12442_v4 = vcombine.low %v2530_v10, %v2537_v9  ;;  %v12444_v53 = vcombine.high %v2530_v10, %v2537_v9 }
 0x699   : > { %v2310_v27 = vrot.slane %v2302_v12, %v14684_v42  ;;  %v2317_v28 = vrot.slane %v2303_v35, %v14684_v42  ;;  %v2326_v29 = vrot.slane %v2318_v13, %v14684_v42  ;;  %v2333_v31 = vrot.slane %v2319_v15, %v14684_v42  ;;  %v14736_v49 = vpop.permute.xlu1 %2110 }
 0x69a   : > { %v3606_v40 = vrot.slane %v12438_v24, %v14681_v39  ;;  %v3622_v26 = vrot.slane %v12440_v56, %v14681_v39  ;;  %v3638_v48 = vrot.slane %v12442_v4, %v14681_v39  ;;  %v3654_v52 = vrot.slane %v12444_v53, %v14681_v39 }
 0x69b   : > { %v12430_v55 = vcombine.low %v2310_v27, %v2317_v28  ;;  %v12432_v3 = vcombine.high %v2310_v27, %v2317_v28  ;;  %v12434_v50 = vcombine.low %v2326_v29, %v2333_v31  ;;  %v12436_v41 = vcombine.high %v2326_v29, %v2333_v31  ;;  %v2149_v59 = vpop.permute.xlu0 %2148 }
 0x69c   : > { %v2482_v63 = vrot.slane %v2474_v45, %v14681_v39  ;;  %v3662_v44 = vcombine.low %v3606_v40, %v3622_v26  ;;  %v3663_v57 = vcombine.high %v3606_v40, %v3622_v26  ;;  %v3694_v58 = vcombine.low %v3638_v48, %v3654_v52 }
 0x69d   : > { %v3470_v10 = vrot.slane %v12430_v55, %v14681_v39  ;;  %v3486_v9 = vrot.slane %v12432_v3, %v14681_v39  ;;  %v14745_v12 = vpop.permute.xlu1 %2128  ;;  %v2489_v35 = vrot.slane %v2475_v2, %v14681_v39  ;;  %v3502_v13 = vrot.slane %v12434_v50, %v14681_v39 }
 0x69e   : > { %v3518_v15 = vrot.slane %v12436_v41, %v14681_v39  ;;  %v3695_v56 = vcombine.high %v3638_v48, %v3654_v52  ;;  %v14753_v4 = vrot.slane %v3542_v47, %v14684_v42  ;;  %v14756_v53 = vrot.slane %v3574_v18, %v14684_v42 }
 0x69f   : > { %v2167_v45 = vpop.permute.xlu0 %2166  ;;  %v14761_v2 = vrot.slane %v3662_v44, %v14684_v42  ;;  %v2490_v28 = vcombine.low %v2127_v7, %v14676_v33  ;;  %v2491_v29 = vcombine.high %v2127_v7, %v14676_v33  ;;  %v2882_v31 = vcombine.low %v14720_v46, %v2149_v59 }
 0x6a0   : > { %v14767_v40 = vrot.slane %v3663_v57, %v14684_v42  ;;  %v14770_v47 = vrot.slane %v3694_v58, %v14684_v42  ;;  %v3526_v18 = vcombine.low %v3470_v10, %v3486_v9  ;;  %v2883_v26 = vcombine.high %v14720_v46, %v2149_v59 }
 0x6a1   : > { %v2147_v48 = vpop.permute.xlu1 %2146  ;;  %v3527_v52 = vcombine.high %v3470_v10, %v3486_v9  ;;  %v3558_v55 = vcombine.low %v3502_v13, %v3518_v15  ;;  %v2498_v3 = vrot.slane %v2490_v28, %v14681_v39  ;;  %v2505_v50 = vrot.slane %v2491_v29, %v14681_v39 }
 0x6a2   : > { %18428 = vst [vmem:[#allocation23_spill] sm:$0xff] %v14767_v40  ;;  %v3559_v41 = vcombine.high %v3502_v13, %v3518_v15  ;;  %v2890_v33 = vrot.slane %v2882_v31, %v14681_v39  ;;  %v2898_v7 = vcombine.low %v2131_v6, %v2167_v45  ;;  %v2899_v44 = vcombine.high %v2131_v6, %v2167_v45 }
 0x6a3   : > { %v14776_v57 = vpop.permute.xlu0 %2116  ;;  %v2538_v43 = vcombine.low %v2482_v63, %v2498_v3  ;;  %v2539_v58 = vcombine.high %v2482_v63, %v2498_v3  ;;  %v2554_v0 = vcombine.low %v2489_v35, %v2505_v50  ;;  %v2555_v32 = vcombine.high %v2489_v35, %v2505_v50 }
 0x6a4   : > { %v2897_v46 = vrot.slane %v2883_v26, %v14681_v39  ;;  %v2906_v59 = vrot.slane %v2898_v7, %v14681_v39  ;;  %v2913_v10 = vrot.slane %v2899_v44, %v14681_v39  ;;  %v2678_v9 = vcombine.low %v14736_v49, %v2147_v48 }
 0x6a5   : > { %v2165_v28 = vpop.permute.xlu1 %2164  ;;  %v2546_v13 = vrot.slane %v2538_v43, %v14684_v42  ;;  %v2553_v15 = vrot.slane %v2539_v58, %v14684_v42  ;;  %v2562_v6 = vrot.slane %v2554_v0, %v14684_v42  ;;  %v2569_v45 = vrot.slane %v2555_v32, %v14684_v42 }
 0x6a6   : > { %v14787_v63 = vrot.slane %v3695_v56, %v14684_v42  ;;  %v14790_v35 = vrot.slane %v3526_v18, %v14684_v42  ;;  %v2946_v29 = vcombine.low %v2890_v33, %v2906_v59  ;;  %v2679_v31 = vcombine.high %v14736_v49, %v2147_v48 }
 0x6a7   : > { %v2135_v26 = vpop.permute.xlu0 %2134  ;;  %v14794_v3 = vrot.slane %v3527_v52, %v14684_v42  ;;  %v12439_v43 = vcombine.low %v2546_v13, %v2553_v15  ;;  %v2947_v50 = vcombine.high %v2890_v33, %v2906_v59  ;;  %v2962_v7 = vcombine.low %v2897_v46, %v2913_v10 }
 0x6a8   : > { %18429 = vst [vmem:[#allocation24_spill] sm:$0xff] %v14787_v63  ;;  %v14797_v0 = vrot.slane %v3558_v55, %v14684_v42  ;;  %v12441_v32 = vcombine.high %v2546_v13, %v2553_v15  ;;  %v12443_v44 = vcombine.low %v2562_v6, %v2569_v45  ;;  %v12445_v56 = vcombine.high %v2562_v6, %v2569_v45 }
 0x6a9   : > { %18430 = vst [vmem:[#allocation25_spill] sm:$0xff] %v14794_v3  ;;  %v14799_v58 = vpop.permute.xlu1 %2114  ;;  %v14802_v18 = vrot.slane %v3559_v41, %v14684_v42  ;;  %v2686_v49 = vrot.slane %v2678_v9, %v14681_v39  ;;  %v2694_v48 = vcombine.low %v14745_v12, %v2165_v28  ;;  %v2695_v52 = vcombine.high %v14745_v12, %v2165_v28 }
 0x6aa   : > { %v14808_v33 = vrot.slane %v2946_v29, %v14684_v42  ;;  %v2963_v59 = vcombine.high %v2897_v46, %v2913_v10  ;;  %v2693_v55 = vrot.slane %v2679_v31, %v14681_v39  ;;  %v14812_v15 = vrot.slane %v12439_v43, %v14681_v39 }
 0x6ab   : > { %18431 = vst [vmem:[#allocation26_spill] sm:$0xff] %v14802_v18  ;;  %v2153_v13 = vpop.permute.xlu0 %2152  ;;  %v14815_v6 = vrot.slane %v2947_v50, %v14684_v42  ;;  %v14818_v41 = vrot.slane %v2962_v7, %v14684_v42  ;;  %v2702_v9 = vrot.slane %v2694_v48, %v14681_v39  ;;  %v2709_v12 = vrot.slane %v2695_v52, %v14681_v39 }
 0x6ac   : > { %v3290_v28 = vcombine.low %v14776_v57, %v2153_v13  ;;  %v14824_v46 = vrot.slane %v12441_v32, %v14681_v39  ;;  %v14827_v10 = vrot.slane %v12443_v44, %v14681_v39  ;;  %v14830_v45 = vrot.slane %v12445_v56, %v14681_v39 }
 0x6ad   : > { %v14832_v29 = vpop.permute.xlu1 %2132  ;;  %v2742_v31 = vcombine.low %v2686_v49, %v2702_v9  ;;  %v2743_v43 = vcombine.high %v2686_v49, %v2702_v9  ;;  %v2758_v50 = vcombine.low %v2693_v55, %v2709_v12  ;;  %v2759_v7 = vcombine.high %v2693_v55, %v2709_v12 }
 0x6ae   : > { %v14835_v48 = vrot.slane %v2963_v59, %v14684_v42  ;;  %v3594_v52 = vcombine.low %v14753_v4, %v14756_v53  ;;  %v3678_v32 = vcombine.low %v14812_v15, %v14824_v46  ;;  %v3710_v44 = vcombine.low %v14827_v10, %v14830_v45 }
 0x6af   : > { %v2171_v56 = vpop.permute.xlu0 %2170  ;;  %v2750_v49 = vrot.slane %v2742_v31, %v14684_v42  ;;  %v2757_v55 = vrot.slane %v2743_v43, %v14684_v42  ;;  %v3291_v59 = vcombine.high %v14776_v57, %v2153_v13  ;;  %v2766_v37 = vrot.slane %v2758_v50, %v14684_v42 }
 0x6b0   : > { %v3686_v9 = vrot.slane %v3678_v32, %v14684_v42  ;;  %v3718_v12 = vrot.slane %v3710_v44, %v14684_v42  ;;  %v3306_v24 = vcombine.low %v2135_v26, %v2171_v56  ;;  %v3307_v1 = vcombine.high %v2135_v26, %v2171_v56 }
 0x6b1   : > { %v2151_v36 = vpop.permute.xlu1 %2150  ;;  %v2773_v8 = vrot.slane %v2759_v7, %v14684_v42  ;;  %v3298_v54 = vrot.slane %v3290_v28, %v14681_v39  ;;  %v3595_v31 = vcombine.high %v14753_v4, %v14756_v53  ;;  %v12447_v44 = vcombine.low %v2750_v49, %v2757_v55 }
 0x6b2   : > { %v3730_v27 = vcombine.low %v3686_v9, %v3718_v12  ;;  %v3731_v43 = vcombine.high %v3686_v9, %v3718_v12  ;;  %v3314_v57 = vrot.slane %v3306_v24, %v14681_v39  ;;  %v3321_v13 = vrot.slane %v3307_v1, %v14681_v39 }
 0x6b3   : > { %v2059_v32 = vpop.permute.xlu0 %2058  ;;  %v12449_v56 = vcombine.high %v2750_v49, %v2757_v55  ;;  %v3305_v50 = vrot.slane %v3291_v59, %v14681_v39  ;;  %v12451_v53 = vcombine.low %v2766_v37, %v2773_v8  ;;  %v12453_v1 = vcombine.high %v2766_v37, %v2773_v8 }
 0x6b4   : > { %v4698_v7 = vpack.c.bf16 %v3730_v27, %v3594_v52  ;;  %v4701_v51 = vpack.c.bf16 %v3731_v43, %v3595_v31  ;;  %v3354_v28 = vcombine.low %v3298_v54, %v3314_v57  ;;  %v3355_v38 = vcombine.high %v3298_v54, %v3314_v57 }
 0x6b5   : > { %v2169_v30 = vpop.permute.xlu1 %2168  ;;  %v3370_v24 = vcombine.low %v3305_v50, %v3321_v13  ;;  %v3371_v9 = vcombine.high %v3305_v50, %v3321_v13  ;;  %v3086_v49 = vcombine.low %v14799_v58, %v2151_v36  ;;  %v3087_v27 = vcombine.high %v14799_v58, %v2151_v36 }
 0x6b6   : > { %v4732_v12 = vsel %vm1520_vm4, %v4698_v7, 0  ;;  %v4807_v26 = vsel %vm1520_vm4, %v4701_v51, 0  ;;  %v3102_v54 = vcombine.low %v14832_v29, %v2169_v30  ;;  %v14868_v52 = vrot.slane %v12447_v44, %v14681_v39 }
 0x6b7   : > { %v2077_v55 = vpop.permute.xlu0 %2076  ;;  %12976 = vmatpush3.bf16.xpose.msra.mxu1 %v4732_v12  ;;  %12994 = vmatpush3.bf16.xpose.msra.mxu0 %v4807_v26  ;;  %v14871_v59 = vrot.slane %v3354_v28, %v14684_v42  ;;  %v14874_v8 = vrot.slane %v3355_v38, %v14684_v42  ;;  %v3103_v51 = vcombine.high %v14832_v29, %v2169_v30  ;;  %v18432_v31 = vmov 0.0  }
 0x6b8   : > { %12977 = vmatprep.subr.bf16.mxu1 %v18432_v31  ;;  %v14881_v43 = vrot.slane %v12449_v56, %v14681_v39  ;;  %v12461_v36 = vcombine.high %v14818_v41, %v14835_v48  ;;  %v14886_v58 = vrot.slane %v3370_v24, %v14684_v42  ;;  %v14889_v57 = vrot.slane %v3371_v9, %v14684_v42 }
 0x6b9   : > { %v14877_v37 = vpop.permute.xlu1 %2056  ;;  %v2850_v38 = vcombine.low %v14557_v5, %v2077_v55  ;;  %12995 = vmatprep.subr.bf16.mxu0 %v18432_v31  ;;  %v3110_v30 = vrot.slane %v3102_v54, %v14681_v39  ;;  %v2851_v29 = vcombine.high %v14557_v5, %v2077_v55  ;;  %v14896_v26 = vrot.slane %v12451_v53, %v14681_v39 }
 0x6ba   : > { %v14899_v44 = vrot.slane %v12453_v1, %v14681_v39  ;;  %v3094_v56 = vrot.slane %v3086_v49, %v14681_v39  ;;  %v3101_v50 = vrot.slane %v3087_v27, %v14681_v39  ;;  %v3117_v7 = vrot.slane %v3103_v51, %v14681_v39 }
 0x6bb   : > { %v2095_v13 = vpop.permute.xlu0 %2094  ;;  %v3814_v53 = vcombine.low %v14868_v52, %v14881_v43  ;;  %v2858_v49 = vrot.slane %v2850_v38, %v14681_v39 }
 0x6bc   : > { %v2866_v28 = vcombine.low %v2059_v32, %v2095_v13  ;;  %v2867_v9 = vcombine.high %v2059_v32, %v2095_v13  ;;  %v3846_v27 = vcombine.low %v14896_v26, %v14899_v44  ;;  %v3150_v51 = vcombine.low %v3094_v56, %v3110_v30 }
 0x6bd   : > { %v2075_v12 = vpop.permute.xlu1 %2074  ;;  %v2865_v32 = vrot.slane %v2851_v29, %v14681_v39  ;;  %v3151_v24 = vcombine.high %v3094_v56, %v3110_v30  ;;  %v3166_v4 = vcombine.low %v3101_v50, %v3117_v7  ;;  %v3167_v61 = vcombine.high %v3101_v50, %v3117_v7 }
 0x6be   : > { %v2874_v55 = vrot.slane %v2866_v28, %v14681_v39  ;;  %v2881_v13 = vrot.slane %v2867_v9, %v14681_v39  ;;  %v3822_v28 = vrot.slane %v3814_v53, %v14684_v42  ;;  %v3854_v29 = vrot.slane %v3846_v27, %v14684_v42 }
 0x6bf   : > { %v2063_v5 = vpop.permute.xlu0 %2062  ;;  %v18433_v30 = vcombine.low %v14808_v33, %v14815_v6  ;;  %v18436_v53 = vcombine.low %v14818_v41, %v14835_v48  ;;  %v14956_v27 = vrot.slane %v3151_v24, %v14684_v42 }
 0x6c0   : > { %v2914_v23 = vcombine.low %v2858_v49, %v2874_v55  ;;  %v2915_v1 = vcombine.high %v2858_v49, %v2874_v55  ;;  %v2930_v38 = vcombine.low %v2865_v32, %v2881_v13  ;;  %v2931_v34 = vcombine.high %v2865_v32, %v2881_v13 }
 0x6c1   : > { %v2093_v40 = vpop.permute.xlu1 %2092  ;;  %v14932_v56 = vrot.slane %v18433_v30, %v14681_v39  ;;  %v14953_v55 = vrot.slane %v3150_v51, %v14684_v42  ;;  %v2646_v32 = vcombine.low %v14565_v11, %v2075_v12 }
 0x6c2   : > { %v14922_v63 = vrot.slane %v2914_v23, %v14684_v42  ;;  %v14925_v54 = vrot.slane %v2915_v1, %v14684_v42  ;;  %v14935_v50 = vrot.slane %v2930_v38, %v14684_v42  ;;  %v14938_v7 = vrot.slane %v2931_v34, %v14684_v42 }
 0x6c3   : > { %18434 = vst [vmem:[#allocation27_spill] sm:$0xff] %v14932_v56  ;;  %v18435_v23 = vcombine.high %v14808_v33, %v14815_v6  ;;  %v14950_v1 = vrot.slane %v18436_v53, %v14681_v39  ;;  %v2081_v49 = vpop.permute.xlu0 %2080  ;;  %v14959_v34 = vrot.slane %v3166_v4, %v14684_v42  ;;  %v14962_v33 = vrot.slane %v12461_v36, %v14681_v39 }
 0x6c4   : > { %v14965_v6 = vrot.slane %v3167_v61, %v14684_v42  ;;  %v12454_v41 = vcombine.low %v14922_v63, %v14925_v54  ;;  %v12456_v48 = vcombine.high %v14922_v63, %v14925_v54  ;;  %v12458_v24 = vcombine.low %v14935_v50, %v14938_v7 }
 0x6c5   : > { %v14944_v9 = vrot.slane %v18435_v23, %v14681_v39  ;;  %18437 = vst [vmem:[#allocation28_spill] sm:$0xff] %v14950_v1  ;;  %18438 = vst [vmem:[#allocation29_spill] sm:$0xff] %v14962_v33  ;;  %v3866_v4 = vcombine.low %v3822_v28, %v3854_v29  ;;  %v3982_v36 = vcombine.low %v14950_v1, %v14962_v33  ;;  %v14982_v54 = vpop.permute.xlu1 %2060 }
 0x6c6   : > { %v12460_v61 = vcombine.high %v14935_v50, %v14938_v7  ;;  %v3867_v38 = vcombine.high %v3822_v28, %v3854_v29  ;;  %v2647_v63 = vcombine.high %v14565_v11, %v2075_v12  ;;  %v2654_v53 = vrot.slane %v2646_v32, %v14681_v39 }
 0x6c7   : > { %v3950_v51 = vcombine.low %v14932_v56, %v14944_v9  ;;  %v2099_v30 = vpop.permute.xlu0 %2098  ;;  %v3990_v23 = vrot.slane %v3982_v36, %v14684_v42  ;;  %v2662_v3 = vcombine.low %v14877_v37, %v2093_v40  ;;  %v2663_v18 = vcombine.high %v14877_v37, %v2093_v40 }
 0x6c8   : > { %v2661_v62 = vrot.slane %v2647_v63, %v14681_v39  ;;  %v3258_v50 = vcombine.low %v14577_v14, %v2081_v49  ;;  %v3259_v7 = vcombine.high %v14577_v14, %v2081_v49  ;;  %v3274_v28 = vcombine.low %v2063_v5, %v2099_v30 }
 0x6c9   : > { %v3958_v13 = vrot.slane %v3950_v51, %v14684_v42  ;;  %v2670_v12 = vrot.slane %v2662_v3, %v14681_v39  ;;  %v2677_v51 = vrot.slane %v2663_v18, %v14681_v39  ;;  %v3275_v22 = vcombine.high %v2063_v5, %v2099_v30 }
 0x6ca   : > { %v3266_v36 = vrot.slane %v3258_v50, %v14681_v39  ;;  %v3273_v32 = vrot.slane %v3259_v7, %v14681_v39  ;;  %v3282_v40 = vrot.slane %v3274_v28, %v14681_v39 }
 0x6cb   : > { %v4002_v29 = vcombine.low %v3958_v13, %v3990_v23  ;;  %v4003_v11 = vcombine.high %v3958_v13, %v3990_v23  ;;  %v2710_v1 = vcombine.low %v2654_v53, %v2670_v12  ;;  %v2711_v33 = vcombine.high %v2654_v53, %v2670_v12  ;;  %v2079_v23 = vpop.permute.xlu1 %2078 }
 0x6cc   : > { %v2726_v56 = vcombine.low %v2661_v62, %v2677_v51  ;;  %v2727_v14 = vcombine.high %v2661_v62, %v2677_v51  ;;  %v3289_v49 = vrot.slane %v3275_v22, %v14681_v39  ;;  %v3322_v13 = vcombine.low %v3266_v36, %v3282_v40 }
 0x6cd   : > { %v4699_v37 = vpack.c.bf16 %v4002_v29, %v3866_v4  ;;  %v4702_v63 = vpack.c.bf16 %v4003_v11, %v3867_v38  ;;  %v2718_v50 = vrot.slane %v2710_v1, %v14684_v42  ;;  %v2725_v5 = vrot.slane %v2711_v33, %v14684_v42 }
 0x6ce   : > { %v2734_v4 = vrot.slane %v2726_v56, %v14684_v42  ;;  %v2741_v38 = vrot.slane %v2727_v14, %v14684_v42  ;;  %v3323_v30 = vcombine.high %v3266_v36, %v3282_v40  ;;  %v12463_v22 = vcombine.low %v14953_v55, %v14956_v27 }
 0x6cf   : > { %v4735_v3 = vsel %vm1520_vm4, %v4699_v37, 0  ;;  %v4810_v18 = vsel %vm1520_vm4, %v4702_v63, 0  ;;  %v12446_v62 = vcombine.low %v2718_v50, %v2725_v5  ;;  %v12448_v53 = vcombine.high %v2718_v50, %v2725_v5  ;;  %v2097_v37 = vpop.permute.xlu1 %2096  ;;  %v15044_v63 = vpop.permute.xlu0 %2186 }
 0x6d0   : > { %12978 = vmatpush3.bf16.xpose.msra.mxu1 %v4735_v3  ;;  %12996 = vmatpush3.bf16.xpose.msra.mxu0 %v4810_v18  ;;  %v3338_v7 = vcombine.low %v3273_v32, %v3289_v49  ;;  %v12465_v1 = vcombine.high %v14953_v55, %v14956_v27  ;;  %v12467_v33 = vcombine.low %v14959_v34, %v14965_v6 }
 0x6d1   : > { %12979 = vmatprep.subr.bf16.mxu1 %v18432_v31  ;;  %v12450_v28 = vcombine.low %v2734_v4, %v2741_v38  ;;  %v12452_v29 = vcombine.high %v2734_v4, %v2741_v38  ;;  %12997 = vmatprep.subr.bf16.mxu0 %v18432_v31  ;;  %v12469_v56 = vcombine.high %v14959_v34, %v14965_v6 }
 0x6d2   : > { %v3330_v11 = vrot.slane %v3322_v13, %v14684_v42  ;;  %v3337_v12 = vrot.slane %v3323_v30, %v14684_v42  ;;  %v3339_v51 = vcombine.high %v3273_v32, %v3289_v49  ;;  %v15016_v36 = vrot.slane %v12454_v41, %v14681_v39 }
 0x6d3   : > { %v15019_v55 = vrot.slane %v12456_v48, %v14681_v39  ;;  %v15022_v27 = vrot.slane %v12458_v24, %v14681_v39  ;;  %v15025_v40 = vrot.slane %v12460_v61, %v14681_v39  ;;  %v15028_v34 = vrot.slane %v12446_v62, %v14681_v39 }
 0x6d4   : > { %v15031_v6 = vrot.slane %v12448_v53, %v14681_v39  ;;  %v3346_v32 = vrot.slane %v3338_v7, %v14684_v42  ;;  %v15035_v41 = vrot.slane %v12463_v22, %v14681_v39  ;;  %v15038_v48 = vrot.slane %v12450_v28, %v14681_v39 }
 0x6d5   : > { %v15041_v24 = vrot.slane %v12452_v29, %v14681_v39  ;;  %v3054_v61 = vcombine.low %v14585_v25, %v2079_v23  ;;  %v15047_v14 = vrot.slane %v12465_v1, %v14681_v39  ;;  %v3353_v49 = vrot.slane %v3339_v51, %v14684_v42  ;;  %v15089_v29 = vpop.permute.xlu1 %2184 }
 0x6d6   : > { %v12470_v13 = vcombine.low %v3330_v11, %v3337_v12  ;;  %v15051_v3 = vrot.slane %v12467_v33, %v14681_v39  ;;  %v15054_v18 = vrot.slane %v12469_v56, %v14681_v39  ;;  %v12472_v50 = vcombine.high %v3330_v11, %v3337_v12 }
 0x6d7   : > { %v3055_v5 = vcombine.high %v14585_v25, %v2079_v23  ;;  %v4086_v4 = vcombine.low %v15035_v41, %v15047_v14  ;;  %v18439_v38 = vcombine.low %v14871_v59, %v14874_v8  ;;  %v18441_v62 = vcombine.high %v14871_v59, %v14874_v8 }
 0x6d8   : > { %v4118_v22 = vcombine.low %v15051_v3, %v15054_v18  ;;  %v18443_v25 = vcombine.low %v14886_v58, %v14889_v57  ;;  %v18445_v7 = vcombine.high %v14886_v58, %v14889_v57  ;;  %v3062_v33 = vrot.slane %v3054_v61, %v14681_v39 }
 0x6d9   : > { %v15063_v30 = vrot.slane %v18439_v38, %v14681_v39  ;;  %v15071_v53 = vrot.slane %v18441_v62, %v14681_v39  ;;  %v4094_v28 = vrot.slane %v4086_v4, %v14684_v42  ;;  %v3070_v59 = vcombine.low %v14982_v54, %v2097_v37  ;;  %v2223_v38 = vpop.permute.xlu0 %2222 }
 0x6da   : > { %v15077_v23 = vrot.slane %v18443_v25, %v14681_v39  ;;  %v15083_v1 = vrot.slane %v18445_v7, %v14681_v39  ;;  %v3071_v8 = vcombine.high %v14982_v54, %v2097_v37  ;;  %v12474_v56 = vcombine.low %v3346_v32, %v3353_v49 }
 0x6db   : > { %18440 = vst [vmem:[#allocation30_spill] sm:$0xff] %v15063_v30  ;;  %18442 = vst [vmem:[#allocation31_spill] sm:$0xff] %v15071_v53  ;;  %v4126_v11 = vrot.slane %v4118_v22, %v14684_v42  ;;  %v4222_v12 = vcombine.low %v15063_v30, %v15071_v53  ;;  %v12476_v57 = vcombine.high %v3346_v32, %v3353_v49 }
 0x6dc   : > { %18444 = vst [vmem:[#allocation32_spill] sm:$0xff] %v15077_v23  ;;  %v4254_v58 = vcombine.low %v15077_v23, %v15083_v1  ;;  %v3069_v51 = vrot.slane %v3055_v5, %v14681_v39  ;;  %v3078_v61 = vrot.slane %v3070_v59, %v14681_v39  ;;  %v3085_v4 = vrot.slane %v3071_v8, %v14681_v39 }
 0x6dd   : > { %v4138_v54 = vcombine.low %v4094_v28, %v4126_v11  ;;  %v4230_v37 = vrot.slane %v4222_v12, %v14684_v42  ;;  %v4139_v22 = vcombine.high %v4094_v28, %v4126_v11  ;;  %v15102_v23 = vrot.slane %v12470_v13, %v14681_v39  ;;  %v15109_v28 = vpop.permute.xlu1 %2202 }
 0x6de   : > { %v4262_v62 = vrot.slane %v4254_v58, %v14684_v42  ;;  %v3118_v25 = vcombine.low %v3062_v33, %v3078_v61  ;;  %v3119_v7 = vcombine.high %v3062_v33, %v3078_v61  ;;  %v3134_v30 = vcombine.low %v3069_v51, %v3085_v4 }
 0x6df   : > { %v3135_v53 = vcombine.high %v3069_v51, %v3085_v4  ;;  %v2594_v5 = vcombine.low %v15044_v63, %v2223_v38  ;;  %v15112_v33 = vrot.slane %v12472_v50, %v14681_v39  ;;  %v2595_v51 = vcombine.high %v15044_v63, %v2223_v38  ;;  %v15130_v38 = vpop.permute.xlu0 %2190 }
 0x6e0   : > { %v4274_v32 = vcombine.low %v4230_v37, %v4262_v62  ;;  %v4275_v49 = vcombine.high %v4230_v37, %v4262_v62  ;;  %v3126_v59 = vrot.slane %v3118_v25, %v14684_v42  ;;  %v3133_v8 = vrot.slane %v3119_v7, %v14684_v42 }
 0x6e1   : > { %v3142_v12 = vrot.slane %v3134_v30, %v14684_v42  ;;  %v3149_v58 = vrot.slane %v3135_v53, %v14684_v42  ;;  %v15116_v61 = vrot.slane %v12474_v56, %v14681_v39  ;;  %v15119_v4 = vrot.slane %v12476_v57, %v14681_v39 }
 0x6e2   : > { %v4700_v11 = vpack.c.bf16 %v4274_v32, %v4138_v54  ;;  %v4703_v13 = vpack.c.bf16 %v4275_v49, %v4139_v22  ;;  %v12462_v37 = vcombine.low %v3126_v59, %v3133_v8  ;;  %v3590_v30 = vcombine.low %v14790_v35, %v14797_v0 }
 0x6e3   : > { %v12464_v50 = vcombine.high %v3126_v59, %v3133_v8  ;;  %v12466_v25 = vcombine.low %v3142_v12, %v3149_v58  ;;  %v2602_v63 = vrot.slane %v2594_v5, %v14681_v39  ;;  %v3726_v56 = vcombine.low %v14761_v2, %v14770_v47  ;;  %v2205_v8 = vpop.permute.xlu1 %2204 }
 0x6e4   : > { %v4738_v53 = vsel %vm1520_vm4, %v4700_v11, 0  ;;  %v4813_v62 = vsel %vm1520_vm4, %v4703_v13, 0  ;;  %v3591_v57 = vcombine.high %v14790_v35, %v14797_v0  ;;  %v15133_v54 = vrot.slane %v2595_v51, %v14681_v39 }
 0x6e5   : > { %12980 = vmatpush3.bf16.xpose.msra.mxu1 %v4738_v53  ;;  %12998 = vmatpush3.bf16.xpose.msra.mxu0 %v4813_v62  ;;  %v18446_v22 = vcombine.high %v14701_v17, %v14704_v60  ;;  %v18447_v32 = vcombine.high %v14707_v21, %v14710_v19  ;;  %v4686_v35 = vpack.c.bf16 %v3726_v56, %v3590_v30  ;;  %v2227_v30 = vpop.permute.xlu0 %2226 }
 0x6e6   : > { %13011 = vmatprep.subr.bf16.mxu1 %v18432_v31  ;;  %13029 = vmatprep.subr.bf16.mxu0 %v18432_v31  ;;  %v3727_v0 = vcombine.high %v14761_v2, %v14770_v47  ;;  %v3679_v5 = vcombine.high %v14812_v15, %v14824_v46  ;;  %v3711_v59 = vcombine.high %v14827_v10, %v14830_v45 }
 0x6e7   : > { %v3557_v7 = vrot.slane %v18446_v22, %v14684_v42  ;;  %v3589_v49 = vrot.slane %v18447_v32, %v14684_v42  ;;  %v15152_v11 = vrot.slane %v12462_v37, %v14681_v39  ;;  %v15155_v17 = vrot.slane %v12464_v50, %v14681_v39 }
 0x6e8   : > { %v15158_v60 = vrot.slane %v12466_v25, %v14681_v39  ;;  %v12468_v21 = vcombine.high %v3142_v12, %v3149_v58  ;;  %v4689_v19 = vpack.c.bf16 %v3727_v0, %v3591_v57  ;;  %v3693_v2 = vrot.slane %v3679_v5, %v14684_v42 }
 0x6e9   : > { %v3725_v47 = vrot.slane %v3711_v59, %v14684_v42  ;;  %v2374_v15 = vcombine.low %v14634_v20, %v15109_v28  ;;  %v3596_v46 = vcombine.low %v3557_v7, %v3589_v49  ;;  %v3597_v10 = vcombine.high %v3557_v7, %v3589_v49 }
 0x6ea   : > { %v2578_v45 = vcombine.low %v14625_v16, %v2205_v8  ;;  %v2579_v13 = vcombine.high %v14625_v16, %v2205_v8  ;;  %v3798_v12 = vcombine.low %v15028_v34, %v15031_v6  ;;  %v3830_v58 = vcombine.low %v15038_v48, %v15041_v24  ;;  %v2221_v8 = vpop.permute.xlu1 %2220 }
 0x6eb   : > { %v3732_v51 = vcombine.low %v3693_v2, %v3725_v47  ;;  %v3733_v37 = vcombine.high %v3693_v2, %v3725_v47  ;;  %v2375_v53 = vcombine.high %v14634_v20, %v15109_v28  ;;  %v3934_v56 = vcombine.low %v15016_v36, %v15019_v55 }
 0x6ec   : > { %12982 = vmatmul.mubr.msk.bf16.vlgmr.msra.gmra.mrb[52].mxu1 %vm1520_vm4, %v4686_v35  ;;  %13000 = vmatmul.mubr.msk.bf16.vlgmr.msra.gmra.mrb[24].mxu0 %vm1520_vm4, %v4689_v19  ;;  %v2586_v62 = vrot.slane %v2578_v45, %v14681_v39  ;;  %v2593_v16 = vrot.slane %v2579_v13, %v14681_v39  ;;  %v15183_v57 = vrot.slane %v12468_v21, %v14681_v39  ;;  %v18448_v13 = vld [vmem:[#allocation27_spill] sm:$0xff] }
 0x6ed   : > { %v4704_v50 = vpack.c.bf16 %v3732_v51, %v3596_v46  ;;  %v4707_v25 = vpack.c.bf16 %v3733_v37, %v3597_v10  ;;  %12985 = vmatprep.mubr.msk.bf16.mxu1 %vm13999_vm0, %v18432_v31  ;;  %13003 = vmatprep.mubr.msk.bf16.mxu0 %vm13999_vm0, %v18432_v31  ;;  %v3002_v20 = vcombine.low %v15130_v38, %v2227_v30 }
 0x6ee   : > { %v2610_v28 = vcombine.low %v2586_v62, %v2602_v63  ;;  %v2611_v22 = vcombine.high %v2586_v62, %v2602_v63  ;;  %v3806_v49 = vrot.slane %v3798_v12, %v14684_v42  ;;  %v3838_v35 = vrot.slane %v3830_v58, %v14684_v42 }
 0x6ef   : > { %v4882_v7 = vsel %vm1520_vm4, %v4704_v50, 0  ;;  %v4957_v32 = vsel %vm1520_vm4, %v4707_v25, 0  ;;  %v2382_v0 = vrot.slane %v2374_v15, %v14681_v39  ;;  %v2389_v5 = vrot.slane %v2375_v53, %v14681_v39  ;;  %v18450_v50 = vld [vmem:[#allocation28_spill] sm:$0xff] }
 0x6f0   : > { %13012 = vmatpush3.bf16.xpose.msra.mxu1 %v4882_v7  ;;  %13030 = vmatpush3.bf16.xpose.msra.mxu0 %v4957_v32  ;;  %v3003_v59 = vcombine.high %v15130_v38, %v2227_v30  ;;  %v2626_v21 = vcombine.low %v2593_v16, %v15133_v54  ;;  %v2627_v63 = vcombine.high %v2593_v16, %v15133_v54  ;;  %v18449_v16 = vld [vmem:[#allocation29_spill] sm:$0xff] }
 0x6f1   : > { %v3942_v19 = vrot.slane %v3934_v56, %v14684_v42  ;;  %v3966_v2 = vcombine.low %v15022_v27, %v15025_v40  ;;  %13013 = vmatprep.subr.bf16.mxu1 %v18432_v31  ;;  %v2618_v47 = vrot.slane %v2610_v28, %v14684_v42  ;;  %v2625_v15 = vrot.slane %v2611_v22, %v14684_v42  ;;  %v15222_v56 = vpop.permute.xlu1 %2188 }
 0x6f2   : > { %13031 = vmatprep.subr.bf16.mxu0 %v18432_v31  ;;  %v3815_v38 = vcombine.high %v14868_v52, %v14881_v43  ;;  %v3847_v46 = vcombine.high %v14896_v26, %v14899_v44  ;;  %v3862_v54 = vcombine.low %v3806_v49, %v3838_v35  ;;  %v3863_v45 = vcombine.high %v3806_v49, %v3838_v35 }
 0x6f3   : > { %v3974_v10 = vrot.slane %v3966_v2, %v14684_v42  ;;  %v3951_v51 = vcombine.high %v18448_v13, %v14944_v9  ;;  %v15210_v37 = vrot.slane %v3002_v20, %v14681_v39  ;;  %v15213_v30 = vrot.slane %v3003_v59, %v14681_v39 }
 0x6f4   : > { %v3829_v12 = vrot.slane %v3815_v38, %v14684_v42  ;;  %v3861_v52 = vrot.slane %v3847_v46, %v14684_v42  ;;  %v2634_v43 = vrot.slane %v2626_v21, %v14684_v42  ;;  %v2641_v26 = vrot.slane %v2627_v63, %v14684_v42 }
 0x6f5   : > { %v3998_v44 = vcombine.low %v3942_v19, %v3974_v10  ;;  %v3999_v58 = vcombine.high %v3942_v19, %v3974_v10  ;;  %v4346_v53 = vcombine.low %v2618_v47, %v2625_v15  ;;  %v12480_v62 = vcombine.high %v2618_v47, %v2625_v15 }
 0x6f6   : > { %v3965_v9 = vrot.slane %v3951_v51, %v14684_v42  ;;  %v3983_v25 = vcombine.high %v18450_v50, %v18449_v16  ;;  %v2390_v22 = vcombine.low %v15089_v29, %v2221_v8  ;;  %v2391_v7 = vcombine.high %v15089_v29, %v2221_v8 }
 0x6f7   : > { %v4687_v20 = vpack.c.bf16 %v3998_v44, %v3862_v54  ;;  %v4690_v28 = vpack.c.bf16 %v3999_v58, %v3863_v45  ;;  %v3868_v32 = vcombine.low %v3829_v12, %v3861_v52  ;;  %v3869_v35 = vcombine.high %v3829_v12, %v3861_v52  ;;  %v15241_v12 = vpop.permute.xlu1 %2206 }
 0x6f8   : > { %v3997_v49 = vrot.slane %v3983_v25, %v14684_v42  ;;  %v4070_v59 = vcombine.low %v15152_v11, %v15155_v17  ;;  %v2398_v21 = vrot.slane %v2390_v22, %v14681_v39  ;;  %v2405_v63 = vrot.slane %v2391_v7, %v14681_v39 }
 0x6f9   : > { %12986 = vmatmul.mubr.msk.bf16.gmra.mrb[56].mxu1 %vm1520_vm4, %v4687_v20  ;;  %13004 = vmatmul.mubr.msk.bf16.gmra.mrb[28].mxu0 %vm1520_vm4, %v4690_v28  ;;  %v4102_v19 = vcombine.low %v15158_v60, %v15183_v57  ;;  %v4362_v2 = vcombine.low %v2634_v43, %v2641_v26  ;;  %v12481_v29 = vcombine.high %v2634_v43, %v2641_v26 }
 0x6fa   : > { %v4004_v8 = vcombine.low %v3965_v9, %v3997_v49  ;;  %v4005_v47 = vcombine.high %v3965_v9, %v3997_v49  ;;  %12989 = vmatprep.mubr.msk.bf16.mxu1 %vm13999_vm0, %v18432_v31  ;;  %v2406_v15 = vcombine.low %v2382_v0, %v2398_v21  ;;  %v2407_v38 = vcombine.high %v2382_v0, %v2398_v21 }
 0x6fb   : > { %v2422_v46 = vcombine.low %v2389_v5, %v2405_v63  ;;  %v2423_v54 = vcombine.high %v2389_v5, %v2405_v63  ;;  %13007 = vmatprep.mubr.msk.bf16.mxu0 %vm13999_vm0, %v18432_v31  ;;  %v4078_v13 = vrot.slane %v4070_v59, %v14684_v42  ;;  %v4110_v51 = vrot.slane %v4102_v19, %v14684_v42  ;;  %v18451_v63 = vld [vmem:[#allocation31_spill] sm:$0xff]  ;;  %v18452_v19 = vld [vmem:[#allocation30_spill] sm:$0xff] }
 0x6fc   : > { %v4705_v10 = vpack.c.bf16 %v4004_v8, %v3868_v32  ;;  %v4708_v45 = vpack.c.bf16 %v4005_v47, %v3869_v35  ;;  %v2414_v52 = vrot.slane %v2406_v15, %v14684_v42  ;;  %v2421_v43 = vrot.slane %v2407_v38, %v14684_v42 }
 0x6fd   : > { %v2430_v26 = vrot.slane %v2422_v46, %v14684_v42  ;;  %v2437_v0 = vrot.slane %v2423_v54, %v14684_v42  ;;  %v15248_v5 = vrot.slane %v4346_v53, %v14681_v39  ;;  %v4206_v9 = vcombine.low %v15102_v23, %v15112_v33 }
 0x6fe   : > { %v4885_v44 = vsel %vm1520_vm4, %v4705_v10, 0  ;;  %v4960_v58 = vsel %vm1520_vm4, %v4708_v45, 0  ;;  %v15255_v16 = vrot.slane %v12480_v62, %v14681_v39  ;;  %v4278_v50 = vcombine.low %v2414_v52, %v2421_v43 }
 0x6ff   : > { %13014 = vmatpush3.bf16.xpose.msra.mxu1 %v4885_v44  ;;  %13032 = vmatpush3.bf16.xpose.msra.mxu0 %v4960_v58  ;;  %v12478_v25 = vcombine.high %v2414_v52, %v2421_v43  ;;  %v15258_v20 = vrot.slane %v4362_v2, %v14681_v39  ;;  %v15261_v53 = vrot.slane %v12481_v29, %v14681_v39  ;;  %v2209_v29 = vpop.permute.xlu1 %2208 }
 0x700   : > { %v4214_v28 = vrot.slane %v4206_v9, %v14684_v42  ;;  %v4238_v22 = vcombine.low %v15116_v61, %v15119_v4  ;;  %13015 = vmatprep.subr.bf16.mxu1 %v18432_v31  ;;  %v4294_v7 = vcombine.low %v2430_v26, %v2437_v0  ;;  %v12479_v62 = vcombine.high %v2430_v26, %v2437_v0 }
 0x701   : > { %v4134_v32 = vcombine.low %v4078_v13, %v4110_v51  ;;  %13033 = vmatprep.subr.bf16.mxu0 %v18432_v31  ;;  %v4087_v49 = vcombine.high %v15035_v41, %v15047_v14  ;;  %v4135_v59 = vcombine.high %v4078_v13, %v4110_v51  ;;  %v4119_v21 = vcombine.high %v15051_v3, %v15054_v18  ;;  %v18453_v41 = vld [vmem:[#allocation32_spill] sm:$0xff]  ;;  %v18454_v13 = vld [vmem:[#allocation19_spill] sm:$0xff] }
 0x702   : > { %v4246_v35 = vrot.slane %v4238_v22, %v14684_v42  ;;  %v4223_v2 = vcombine.high %v18452_v19, %v18451_v63  ;;  %v15276_v8 = vrot.slane %v4278_v50, %v14681_v39  ;;  %v15279_v47 = vrot.slane %v12478_v25, %v14681_v39  ;;  %v18455_v50 = vld [vmem:[#allocation21_spill] sm:$0xff]  ;;  %v18456_v22 = vld [vmem:[#allocation26_spill] sm:$0xff]  ;;  %v18458_v63 = vld [vmem:[#allocation24_spill] sm:$0xff] }
 0x703   : > { %v4101_v15 = vrot.slane %v4087_v49, %v14684_v42  ;;  %v4255_v14 = vcombine.high %v18453_v41, %v15083_v1  ;;  %v4133_v54 = vrot.slane %v4119_v21, %v14684_v42  ;;  %v15287_v18 = vrot.slane %v4294_v7, %v14681_v39  ;;  %v18457_v7 = vld [vmem:[#allocation25_spill] sm:$0xff]  ;;  %v18459_v19 = vld [vmem:[#allocation23_spill] sm:$0xff] }
 0x704   : > { %v4270_v38 = vcombine.low %v4214_v28, %v4246_v35  ;;  %v4271_v46 = vcombine.high %v4214_v28, %v4246_v35  ;;  %v4237_v3 = vrot.slane %v4223_v2, %v14684_v42  ;;  %v15290_v10 = vrot.slane %v12479_v62, %v14681_v39 }
 0x705   : > { %v4269_v45 = vrot.slane %v4255_v14, %v14684_v42  ;;  %v2986_v51 = vcombine.low %v18454_v13, %v2209_v29  ;;  %v4140_v26 = vcombine.low %v4101_v15, %v4133_v54  ;;  %v4141_v1 = vcombine.high %v4101_v15, %v4133_v54 }
 0x706   : > { %v4688_v52 = vpack.c.bf16 %v4270_v38, %v4134_v32  ;;  %v4691_v43 = vpack.c.bf16 %v4271_v46, %v4135_v59  ;;  %v2987_v58 = vcombine.high %v18454_v13, %v2209_v29  ;;  %v2782_v25 = vcombine.low %v18455_v50, %v15241_v12  ;;  %v2225_v29 = vpop.permute.xlu1 %2224 }
 0x707   : > { %v4276_v0 = vcombine.low %v4237_v3, %v4269_v45  ;;  %v4277_v44 = vcombine.high %v4237_v3, %v4269_v45  ;;  %v2994_v9 = vrot.slane %v2986_v51, %v14681_v39  ;;  %v2783_v28 = vcombine.high %v18455_v50, %v15241_v12 }
 0x708   : > { %12990 = vmatmul.mubr.msk.bf16.gmra.mrb[60].mxu1 %vm1520_vm4, %v4688_v52  ;;  %13008 = vmatmul.mubr.msk.bf16.gmra.mrb[32].mxu0 %vm1520_vm4, %v4691_v43  ;;  %v3592_v62 = vcombine.low %v18457_v7, %v18456_v22  ;;  %v3001_v35 = vrot.slane %v2987_v58, %v14681_v39  ;;  %v3728_v12 = vcombine.low %v18459_v19, %v18458_v63 }
 0x709   : > { %v4706_v32 = vpack.c.bf16 %v4276_v0, %v4140_v26  ;;  %v4709_v49 = vpack.c.bf16 %v4277_v44, %v4141_v1  ;;  %13017 = vmatprep.mubr.msk.bf16.mxu1 %vm13999_vm0, %v18432_v31  ;;  %13035 = vmatprep.mubr.msk.bf16.mxu0 %vm13999_vm0, %v18432_v31  ;;  %v3018_v59 = vcombine.low %v2994_v9, %v15210_v37 }
 0x70a   : > { %v3019_v21 = vcombine.high %v2994_v9, %v15210_v37  ;;  %v3593_v2 = vcombine.high %v18457_v7, %v18456_v22  ;;  %v3034_v14 = vcombine.low %v3001_v35, %v15213_v30  ;;  %v3035_v38 = vcombine.high %v3001_v35, %v15213_v30 }
 0x70b   : > { %v4888_v15 = vsel %vm1520_vm4, %v4706_v32, 0  ;;  %v4963_v41 = vsel %vm1520_vm4, %v4709_v49, 0  ;;  %v3026_v46 = vrot.slane %v3018_v59, %v14684_v42  ;;  %v3729_v54 = vcombine.high %v18459_v19, %v18458_v63 }
 0x70c   : > { %13016 = vmatpush3.bf16.xpose.msra.mxu1 %v4888_v15  ;;  %13034 = vmatpush3.bf16.xpose.msra.mxu0 %v4963_v41  ;;  %v3033_v37 = vrot.slane %v3019_v21, %v14684_v42  ;;  %v15324_v3 = vrot.slane %v3034_v14, %v14684_v42  ;;  %v15327_v45 = vrot.slane %v3035_v38, %v14684_v42 }
 0x70d   : > { %v2798_v13 = vcombine.low %v15222_v56, %v2225_v29  ;;  %v2799_v51 = vcombine.high %v15222_v56, %v2225_v29  ;;  %13047 = vmatprep.subr.bf16.mxu1 %v18432_v31  ;;  %v2790_v30 = vrot.slane %v2782_v25, %v14681_v39  ;;  %v2797_v52 = vrot.slane %v2783_v28, %v14681_v39 }
 0x70e   : > { %13065 = vmatprep.subr.bf16.mxu0 %v18432_v31  ;;  %v3799_v43 = vcombine.high %v15028_v34, %v15031_v6  ;;  %v3831_v26 = vcombine.high %v15038_v48, %v15041_v24  ;;  %v4692_v1 = vpack.c.bf16 %v3728_v12, %v3592_v62  ;;  %v4695_v0 = vpack.c.bf16 %v3729_v54, %v3593_v2 }
 0x70f   : > { %v2806_v44 = vrot.slane %v2798_v13, %v14681_v39  ;;  %v2813_v56 = vrot.slane %v2799_v51, %v14681_v39  ;;  %v4482_v58 = vcombine.low %v3026_v46, %v3033_v37  ;;  %v12484_v9 = vcombine.high %v3026_v46, %v3033_v37 }
 0x710   : > { %v3813_v50 = vrot.slane %v3799_v43, %v14684_v42  ;;  %v3845_v25 = vrot.slane %v3831_v26, %v14684_v42  ;;  %v4498_v28 = vcombine.low %v15324_v3, %v15327_v45  ;;  %v12485_v34 = vcombine.high %v15324_v3, %v15327_v45 }
 0x711   : > { %v2814_v6 = vcombine.low %v2790_v30, %v2806_v44  ;;  %v2815_v48 = vcombine.high %v2790_v30, %v2806_v44  ;;  %v2830_v24 = vcombine.low %v2797_v52, %v2813_v56  ;;  %v2831_v22 = vcombine.high %v2797_v52, %v2813_v56 }
 0x712   : > { %v3864_v7 = vcombine.low %v3813_v50, %v3845_v25  ;;  %v3935_v62 = vcombine.high %v15016_v36, %v15019_v55  ;;  %v3967_v35 = vcombine.high %v15022_v27, %v15025_v40  ;;  %v3865_v12 = vcombine.high %v3813_v50, %v3845_v25 }
 0x713   : > { %13018 = vmatmul.mubr.msk.bf16.vlgmr.msra.gmra.mrb[64].mxu1 %vm1520_vm4, %v4692_v1  ;;  %13036 = vmatmul.mubr.msk.bf16.vlgmr.msra.gmra.mrb[36].mxu0 %vm1520_vm4, %v4695_v0  ;;  %v2822_v32 = vrot.slane %v2814_v6, %v14684_v42  ;;  %v2829_v49 = vrot.slane %v2815_v48, %v14684_v42  ;;  %v2838_v59 = vrot.slane %v2830_v24, %v14684_v42 }
 0x714   : > { %v2845_v21 = vrot.slane %v2831_v22, %v14684_v42  ;;  %13021 = vmatprep.mubr.msk.bf16.mxu1 %vm13999_vm0, %v18432_v31  ;;  %13039 = vmatprep.mubr.msk.bf16.mxu0 %vm13999_vm0, %v18432_v31  ;;  %v3949_v36 = vrot.slane %v3935_v62, %v14684_v42  ;;  %v3981_v19 = vrot.slane %v3967_v35, %v14684_v42 }
 0x715   : > { %v4414_v55 = vcombine.low %v2822_v32, %v2829_v49  ;;  %v12482_v63 = vcombine.high %v2822_v32, %v2829_v49  ;;  %v4310_v27 = vcombine.low %v15276_v8, %v15279_v47  ;;  %v4326_v40 = vcombine.low %v15287_v18, %v15290_v10 }
 0x716   : > { %v4430_v2 = vcombine.low %v2838_v59, %v2845_v21  ;;  %v12483_v29 = vcombine.high %v2838_v59, %v2845_v21  ;;  %v15368_v15 = vrot.slane %v4482_v58, %v14681_v39  ;;  %v15371_v41 = vrot.slane %v12484_v9, %v14681_v39 }
 0x717   : > { %v4000_v14 = vcombine.low %v3949_v36, %v3981_v19  ;;  %v4001_v38 = vcombine.high %v3949_v36, %v3981_v19  ;;  %v15374_v46 = vrot.slane %v4414_v55, %v14681_v39  ;;  %v15377_v37 = vrot.slane %v12482_v63, %v14681_v39 }
 0x718   : > { %v4318_v54 = vrot.slane %v4310_v27, %v14684_v42  ;;  %v4334_v3 = vrot.slane %v4326_v40, %v14684_v42  ;;  %v4378_v51 = vcombine.low %v15248_v5, %v15255_v16  ;;  %v4394_v30 = vcombine.low %v15258_v20, %v15261_v53 }
 0x719   : > { %v4693_v45 = vpack.c.bf16 %v4000_v14, %v3864_v7  ;;  %v4696_v13 = vpack.c.bf16 %v4001_v38, %v3865_v12  ;;  %v15386_v52 = vrot.slane %v4430_v2, %v14681_v39  ;;  %v15389_v43 = vrot.slane %v12483_v29, %v14681_v39 }
 0x71a   : > { %v4342_v26 = vcombine.low %v4318_v54, %v4334_v3  ;;  %v4343_v1 = vcombine.high %v4318_v54, %v4334_v3  ;;  %v4386_v0 = vrot.slane %v4378_v51, %v14684_v42  ;;  %v4402_v44 = vrot.slane %v4394_v30, %v14684_v42 }
 0x71b   : > { %13022 = vmatmul.mubr.msk.bf16.gmra.mrb[68].mxu1 %vm1520_vm4, %v4693_v45  ;;  %13040 = vmatmul.mubr.msk.bf16.gmra.mrb[40].mxu0 %vm1520_vm4, %v4696_v13  ;;  %v4071_v56 = vcombine.high %v15152_v11, %v15155_v17  ;;  %v15398_v58 = vrot.slane %v4498_v28, %v14681_v39  ;;  %v15401_v9 = vrot.slane %v12485_v34, %v14681_v39 }
 0x71c   : > { %13025 = vmatprep.mubr.msk.bf16.mxu1 %vm13999_vm0, %v18432_v31  ;;  %13043 = vmatprep.mubr.msk.bf16.mxu0 %vm13999_vm0, %v18432_v31  ;;  %v4103_v50 = vcombine.high %v15158_v60, %v15183_v57  ;;  %v4410_v25 = vcombine.low %v4386_v0, %v4402_v44  ;;  %v4411_v6 = vcombine.high %v4386_v0, %v4402_v44 }
 0x71d   : > { %v4085_v48 = vrot.slane %v4071_v56, %v14684_v42  ;;  %v4207_v11 = vcombine.high %v15102_v23, %v15112_v33  ;;  %v4239_v28 = vcombine.high %v15116_v61, %v15119_v4  ;;  %v4446_v34 = vcombine.low %v15374_v46, %v15377_v37 }
 0x71e   : > { %v4117_v17 = vrot.slane %v4103_v50, %v14684_v42  ;;  %v4462_v24 = vcombine.low %v15386_v52, %v15389_v43  ;;  %v4710_v22 = vpack.c.bf16 %v4410_v25, %v4342_v26  ;;  %v4713_v60 = vpack.c.bf16 %v4411_v6, %v4343_v1  ;;  %v18461_v50 = vld [vmem:[#allocation11_spill] sm:$0xff] }
 0x71f   : > { %v4221_v57 = vrot.slane %v4207_v11, %v14684_v42  ;;  %v4514_v7 = vcombine.low %v15368_v15, %v15371_v41  ;;  %v4253_v23 = vrot.slane %v4239_v28, %v14684_v42  ;;  %v4454_v32 = vrot.slane %v4446_v34, %v14684_v42 }
 0x720   : > { %v4136_v62 = vcombine.low %v4085_v48, %v4117_v17  ;;  %v4137_v33 = vcombine.high %v4085_v48, %v4117_v17  ;;  %13048 = vmatpush3.bf16.msra.mxu1 %v4710_v22  ;;  %13066 = vmatpush3.bf16.msra.mxu0 %v4713_v60  ;;  %v4470_v61 = vrot.slane %v4462_v24, %v14684_v42  ;;  %v1793_v25 = vadd.s32 8, %v18461_v50 }
 0x721   : > { %v4522_v4 = vrot.slane %v4514_v7, %v14684_v42  ;;  %v4530_v49 = vcombine.low %v15398_v58, %v15401_v9  ;;  %v4272_v35 = vcombine.low %v4221_v57, %v4253_v23  ;;  %v4273_v59 = vcombine.high %v4221_v57, %v4253_v23  ;;  %13049 = vmatprep.subr.bf16.mxu1 %v18432_v31 }
 0x722   : > { %13067 = vmatprep.subr.bf16.mxu0 %v18432_v31  ;;  %v4311_v21 = vcombine.high %v15276_v8, %v15279_v47  ;;  %v4478_v36 = vcombine.low %v4454_v32, %v4470_v61  ;;  %v4479_v63 = vcombine.high %v4454_v32, %v4470_v61  ;;  %v4327_v19 = vcombine.high %v15287_v18, %v15290_v10 }
 0x723   : > { %v4538_v55 = vrot.slane %v4530_v49, %v14684_v42  ;;  %v4694_v12 = vpack.c.bf16 %v4272_v35, %v4136_v62  ;;  %v4697_v2 = vpack.c.bf16 %v4273_v59, %v4137_v33  ;;  %v4379_v27 = vcombine.high %v15248_v5, %v15255_v16 }
 0x724   : > { %v4325_v29 = vrot.slane %v4311_v21, %v14684_v42  ;;  %v4341_v38 = vrot.slane %v4327_v19, %v14684_v42  ;;  %v4395_v8 = vcombine.high %v15258_v20, %v15261_v53  ;;  %v4447_v18 = vcombine.high %v15374_v46, %v15377_v37 }
 0x725   : > { %v4546_v40 = vcombine.low %v4522_v4, %v4538_v55  ;;  %v4547_v14 = vcombine.high %v4522_v4, %v4538_v55  ;;  %13026 = vmatmul.mubr.msk.bf16.gmra.mrb[72].mxu1 %vm1520_vm4, %v4694_v12  ;;  %13044 = vmatmul.mubr.msk.bf16.gmra.mrb[44].mxu0 %vm1520_vm4, %v4697_v2  ;;  %v4393_v47 = vrot.slane %v4379_v27, %v14684_v42  ;;  %v18462_v11 = vmov 0 }
 0x726   : > { %v4463_v10 = vcombine.high %v15386_v52, %v15389_v43  ;;  %13053 = vmatprep.mubr.msk.bf16.mxu1 %vm13999_vm0, %v18432_v31  ;;  %13071 = vmatprep.mubr.msk.bf16.mxu0 %vm13999_vm0, %v18432_v31  ;;  %v4344_v20 = vcombine.low %v4325_v29, %v4341_v38  ;;  %v4409_v53 = vrot.slane %v4395_v8, %v14684_v42  ;;  %v18465_v57 = vmov 0 }
 0x727   : > { %v4711_v5 = vpack.c.bf16 %v4546_v40, %v4478_v36  ;;  %v4714_v16 = vpack.c.bf16 %v4547_v14, %v4479_v63  ;;  %v4345_v54 = vcombine.high %v4325_v29, %v4341_v38  ;;  %v4461_v3 = vrot.slane %v4447_v18, %v14684_v42 }
 0x728   : > { %v4477_v45 = vrot.slane %v4463_v10, %v14684_v42  ;;  %v4515_v46 = vcombine.high %v15368_v15, %v15371_v41  ;;  %v4531_v37 = vcombine.high %v15398_v58, %v15401_v9  ;;  %v4412_v13 = vcombine.low %v4393_v47, %v4409_v53 }
 0x729   : > { %13050 = vmatpush3.bf16.msra.mxu1 %v4711_v5  ;;  %13068 = vmatpush3.bf16.msra.mxu0 %v4714_v16  ;;  %v4413_v51 = vcombine.high %v4393_v47, %v4409_v53  ;;  %v18460_v58 = vlaneseq  ;;  %v1794_v36 = vadd.s32 16, %v18461_v50  ;;  %v1795_v55 = vadd.s32 24, %v18461_v50 }
 0x72a   : > { %13051 = vmatprep.subr.bf16.mxu1 %v18432_v31  ;;  %13069 = vmatprep.subr.bf16.mxu0 %v18432_v31  ;;  %v4480_v30 = vcombine.low %v4461_v3, %v4477_v45  ;;  %v4529_v52 = vrot.slane %v4515_v46, %v14684_v42  ;;  %v4545_v43 = vrot.slane %v4531_v37, %v14684_v42  ;;  %v18468_v2 = vmov 0 }
 0x72b   : > { %v4481_v26 = vcombine.high %v4461_v3, %v4477_v45  ;;  %v15463_v1 = vpack.c.bf16 %v4412_v13, %v4344_v20  ;;  %v15465_v0 = vpack.c.bf16 %v4413_v51, %v4345_v54  ;;  %v15472_v9 = vand.u32 127, %v18460_v58 }
 0x72c   : > { %v4548_v15 = vcombine.low %v4529_v52, %v4545_v43  ;;  %v4549_v41 = vcombine.high %v4529_v52, %v4545_v43  ;;  %v18471_v47 = vmov 0  ;;  %v1796_v51 = vadd.s32 32, %v18461_v50 }
 0x72d   : > { %vm15477_vm5 = vcmp.le.s32.totalorder %v15472_v9, %v18461_v50  ;;  %vm15482_vm7 = vcmp.le.s32.totalorder %v15472_v9, %v1793_v25  ;;  %vm15513_vm8 = vcmp.le.s32.totalorder %v15472_v9, %v1794_v36  ;;  %vm15518_vm9 = vcmp.le.s32.totalorder %v15472_v9, %v1795_v55 }
 0x72e   : > { %v15467_v44 = vpack.c.bf16 %v4548_v15, %v4480_v30  ;;  %v15469_v56 = vpack.c.bf16 %v4549_v41, %v4481_v26  ;;  %v18463_v11 = vsel %vm15477_vm5, 4294967295, %v18462_v11  ;;  %v18466_v57 = vsel %vm15482_vm7, 4294967295, %v18465_v57 }
 0x72f   : > { %18464 = vst [vmem:[#allocation27_spill] sm:$0xff] %v18463_v11  ;;  %18467 = vst [vmem:[#allocation29_spill] sm:$0xff] %v18466_v57  ;;  %v18469_v2 = vsel %vm15513_vm8, 4294967295, %v18468_v2  ;;  %v18472_v47 = vsel %vm15518_vm9, 4294967295, %v18471_v47  ;;  %v1797_v30 = vadd.s32 40, %v18461_v50  ;;  %vm15549_vm10 = vcmp.le.s32.totalorder %v15472_v9, %v1796_v51 }
 0x730   : > { %18470 = vst [vmem:[#allocation28_spill] sm:$0xff] %v18469_v2  ;;  %18473 = vst [vmem:[#allocation31_spill] sm:$0xff] %v18472_v47  ;;  %v18474_v26 = vmov 0 }
 0x731   : > { %v18475_v26 = vsel %vm15549_vm10, 4294967295, %v18474_v26  ;;  %vm15554_vm11 = vcmp.le.s32.totalorder %v15472_v9, %v1797_v30 }
 0x732   : > { %18476 = vst [vmem:[#allocation30_spill] sm:$0xff] %v18475_v26 }
 0x7bf   : > { %v4774_v6 = vpop.f32.mrb[52].mxu1  ;;  %v4849_v48 = vpop.f32.mrb[24].mxu0 }
 0x7c0   : > { %v5022_v17 = vmul.f32 0.25, %v4774_v6  ;;  %v5028_v28 = vmul.f32 0.25, %v4849_v48  ;;  %v12983_v34 = vpop.f32.mrb[53].mxu1  ;;  %v13001_v24 = vpop.f32.mrb[25].mxu0 }
 0x7c1   : > { %v4777_v22 = vpop.f32.mrb[54].mxu1  ;;  %v4852_v60 = vpop.f32.mrb[26].mxu0 }
 0x7c2   : > { %v5023_v7 = vmul.f32 0.25, %v4777_v22  ;;  %v12984_v62 = vpop.f32.mrb[55].mxu1  ;;  %v13002_v23 = vpop.f32.mrb[27].mxu0  ;;  %v15488_v33 = vsel %vm15477_vm5, %v5028_v28, -1e+30  ;;  %v5029_v4 = vmul.f32 0.25, %v4852_v60 }
 0x7c3   : > { %v5101_v32 = vsel %vm5082_vm6, %v15488_v33, -inf  ;;  %v15494_v61 = vsel %vm15477_vm5, %v5022_v17, -1e+30  ;;  %v18477_v17 = vmov 0 }
 0x7c4   : > { %5102 = vmax.xlane.f32.xlu0 %v5101_v32  ;;  %v5083_v49 = vsel %vm5082_vm6, %v15494_v61, -inf  ;;  %v15500_v35 = vsel %vm15482_vm7, %v5023_v7, -1e+30  ;;  %v15506_v21 = vsel %vm15482_vm7, %v5029_v4, -1e+30  ;;  %v18478_v17 = vsel %vm15554_vm11, 4294967295, %v18477_v17 }
 0x7c5   : > { %5084 = vmax.xlane.f32.xlu1 %v5083_v49  ;;  %v5086_v59 = vsel %vm5082_vm6, %v15500_v35, -inf  ;;  %v5104_v63 = vsel %vm5082_vm6, %v15506_v21, -inf  ;;  %18479 = vst [vmem:[#allocation32_spill] sm:$0xff] %v18478_v17 }
 0x7c8   : > { %5087 = vmax.xlane.f32.xlu0 %v5086_v59 }
 0x7cc   : > { %v4782_v19 = vpop.f32.mrb[56].mxu1  ;;  %v4857_v12 = vpop.f32.mrb[28].mxu0  ;;  %5105 = vmax.xlane.f32.xlu0 %v5104_v63 }
 0x7cd   : > { %v5024_v29 = vmul.f32 0.25, %v4782_v19  ;;  %v5030_v27 = vmul.f32 0.25, %v4857_v12  ;;  %v12987_v40 = vpop.f32.mrb[57].mxu1  ;;  %v13005_v14 = vpop.f32.mrb[29].mxu0 }
 0x7ce   : > { %v4785_v38 = vpop.f32.mrb[58].mxu1  ;;  %v4860_v8 = vpop.f32.mrb[30].mxu0 }
 0x7cf   : > { %v5025_v18 = vmul.f32 0.25, %v4785_v38  ;;  %v5031_v10 = vmul.f32 0.25, %v4860_v8  ;;  %v12988_v5 = vpop.f32.mrb[59].mxu1  ;;  %v13006_v16 = vpop.f32.mrb[31].mxu0  ;;  %v15524_v20 = vsel %vm15513_vm8, %v5024_v29, -1e+30 }
 0x7d0   : > { %v5089_v53 = vsel %vm5082_vm6, %v15524_v20, -inf  ;;  %v15530_v54 = vsel %vm15513_vm8, %v5030_v27, -1e+30 }
 0x7d1   : > { %5090 = vmax.xlane.f32.xlu1 %v5089_v53  ;;  %v15534_v3 = vsel %vm15518_vm9, %v5025_v18, -1e+30  ;;  %v15540_v46 = vsel %vm15518_vm9, %v5031_v10, -1e+30  ;;  %v5107_v37 = vsel %vm5082_vm6, %v15530_v54, -inf }
 0x7d2   : > { %v5092_v45 = vsel %vm5082_vm6, %v15534_v3, -inf  ;;  %v5110_v13 = vsel %vm5082_vm6, %v15540_v46, -inf }
 0x7d3   : > { %5093 = vmax.xlane.f32.xlu0 %v5092_v45 }
 0x7d5   : > { %5108 = vmax.xlane.f32.xlu1 %v5107_v37 }
 0x7d7   : > { %5111 = vmax.xlane.f32.xlu0 %v5110_v13 }
 0x7db   : > { %v4790_v52 = vpop.f32.mrb[60].mxu1  ;;  %v4865_v43 = vpop.f32.mrb[32].mxu0 }
 0x7dc   : > { %v5026_v15 = vmul.f32 0.25, %v4790_v52  ;;  %v5032_v41 = vmul.f32 0.25, %v4865_v43  ;;  %v12991_v58 = vpop.f32.mrb[61].mxu1  ;;  %v13009_v25 = vpop.f32.mrb[33].mxu0 }
 0x7dd   : > { %v4793_v6 = vpop.f32.mrb[62].mxu1  ;;  %v4868_v48 = vpop.f32.mrb[34].mxu0 }
 0x7de   : > { %v5027_v28 = vmul.f32 0.25, %v4793_v6  ;;  %v5033_v34 = vmul.f32 0.25, %v4868_v48  ;;  %v12992_v24 = vpop.f32.mrb[63].mxu1  ;;  %v13010_v22 = vpop.f32.mrb[35].mxu0  ;;  %v15560_v60 = vsel %vm15549_vm10, %v5026_v15, -1e+30 }
 0x7df   : > { %v5095_v7 = vsel %vm5082_vm6, %v15560_v60, -inf  ;;  %v15566_v62 = vsel %vm15549_vm10, %v5032_v41, -1e+30 }
 0x7e0   : > { %5096 = vmax.xlane.f32.xlu1 %v5095_v7  ;;  %v15570_v9 = vsel %vm15554_vm11, %v5027_v28, -1e+30  ;;  %v15576_v32 = vsel %vm15554_vm11, %v5033_v34, -1e+30  ;;  %v5113_v4 = vsel %vm5082_vm6, %v15566_v62, -inf }
 0x7e1   : > { %v5098_v23 = vsel %vm5082_vm6, %v15570_v9, -inf  ;;  %v5116_v49 = vsel %vm5082_vm6, %v15576_v32, -inf }
 0x7e2   : > { %5099 = vmax.xlane.f32.xlu0 %v5098_v23 }
 0x7e4   : > { %5114 = vmax.xlane.f32.xlu1 %v5113_v4 }
 0x7e6   : > { %v4924_v59 = vpop.f32.mrb[64].mxu1  ;;  %v4999_v36 = vpop.f32.mrb[36].mxu0  ;;  %5117 = vmax.xlane.f32.xlu0 %v5116_v49 }
 0x7e7   : > { %v5034_v55 = vmul.f32 0.25, %v4924_v59  ;;  %v13037_v63 = vpop.f32.mrb[37].mxu0  ;;  %v13019_v19 = vpop.f32.mrb[65].mxu1  ;;  %v5040_v12 = vmul.f32 0.25, %v4999_v36 }
 0x7e8   : > { %v4927_v29 = vpop.f32.mrb[66].mxu1  ;;  %v5002_v27 = vpop.f32.mrb[38].mxu0 }
 0x7e9   : > { %v5035_v40 = vmul.f32 0.25, %v4927_v29  ;;  %v5041_v14 = vmul.f32 0.25, %v5002_v27  ;;  %v13020_v38 = vpop.f32.mrb[67].mxu1  ;;  %v13038_v8 = vpop.f32.mrb[39].mxu0  ;;  %v15584_v18 = vsel %vm15477_vm5, %v5034_v55, -1e+30 }
 0x7ea   : > { %v5119_v10 = vsel %vm5082_vm6, %v15584_v18, -inf  ;;  %v15594_v16 = vsel %vm15477_vm5, %v5040_v12, -1e+30 }
 0x7eb   : > { %v15590_v5 = vsel %vm15482_vm7, %v5035_v40, -1e+30  ;;  %5120 = vmax.xlane.f32.xlu1 %v5119_v10  ;;  %v15600_v45 = vsel %vm15482_vm7, %v5041_v14, -1e+30  ;;  %v5137_v52 = vsel %vm5082_vm6, %v15594_v16, -inf }
 0x7ec   : > { %v5122_v53 = vsel %vm5082_vm6, %v15590_v5, -inf  ;;  %v5140_v25 = vsel %vm5082_vm6, %v15600_v45, -inf }
 0x7ed   : > { %5123 = vmax.xlane.f32.xlu0 %v5122_v53 }
 0x7ee   : > { %v4932_v37 = vpop.f32.mrb[68].mxu1  ;;  %v5007_v13 = vpop.f32.mrb[40].mxu0 }
 0x7ef   : > { %v5036_v51 = vmul.f32 0.25, %v4932_v37  ;;  %v13041_v30 = vpop.f32.mrb[41].mxu0  ;;  %v13023_v43 = vpop.f32.mrb[69].mxu1  ;;  %v5042_v15 = vmul.f32 0.25, %v5007_v13  ;;  %5138 = vmax.xlane.f32.xlu1 %v5137_v52 }
 0x7f0   : > { %v4935_v41 = vpop.f32.mrb[70].mxu1  ;;  %v5010_v58 = vpop.f32.mrb[42].mxu0 }
 0x7f1   : > { %v15608_v6 = vsel %vm15513_vm8, %v5036_v51, -1e+30  ;;  %v5037_v48 = vmul.f32 0.25, %v4935_v41  ;;  %v5043_v28 = vmul.f32 0.25, %v5010_v58  ;;  %5141 = vmax.xlane.f32.xlu0 %v5140_v25  ;;  %v13024_v34 = vpop.f32.mrb[71].mxu1  ;;  %v13042_v24 = vpop.f32.mrb[43].mxu0 }
 0x7f2   : > { %v5125_v22 = vsel %vm5082_vm6, %v15608_v6, -inf  ;;  %v15618_v23 = vsel %vm15513_vm8, %v5042_v15, -1e+30  ;;  %v18480_v58 = vld [vmem:[#allocation20_spill] sm:$0xff]  ;;  %v15656_v25 = vpop.permute.xlu0 %2194 }
 0x7f3   : > { %v15614_v7 = vsel %vm15518_vm9, %v5037_v48, -1e+30  ;;  %5126 = vmax.xlane.f32.xlu1 %v5125_v22  ;;  %v15624_v49 = vsel %vm15518_vm9, %v5043_v28, -1e+30  ;;  %v5143_v59 = vsel %vm5082_vm6, %v15618_v23, -inf  ;;  %v15658_v48 = vpop.permute.xlu1 %2192 }
 0x7f4   : > { %v5128_v4 = vsel %vm5082_vm6, %v15614_v7, -inf  ;;  %v5146_v36 = vsel %vm5082_vm6, %v15624_v49, -inf }
 0x7f5   : > { %5129 = vmax.xlane.f32.xlu0 %v5128_v4 }
 0x7f6   : > { %v15660_v28 = vpop.permute.xlu0 %2212 }
 0x7f7   : > { %5144 = vmax.xlane.f32.xlu1 %v5143_v59  ;;  %v15662_v34 = vpop.permute.xlu1 %2210 }
 0x7f8   : > { %v4940_v55 = vpop.f32.mrb[72].mxu1  ;;  %v5015_v63 = vpop.f32.mrb[44].mxu0 }
 0x7f9   : > { %5147 = vmax.xlane.f32.xlu0 %v5146_v36  ;;  %v5038_v19 = vmul.f32 0.25, %v4940_v55  ;;  %v5044_v12 = vmul.f32 0.25, %v5015_v63  ;;  %v13045_v29 = vpop.f32.mrb[45].mxu0  ;;  %v13027_v27 = vpop.f32.mrb[73].mxu1 }
 0x7fa   : > { %v4943_v40 = vpop.f32.mrb[74].mxu1  ;;  %v5018_v14 = vpop.f32.mrb[46].mxu0 }
 0x7fb   : > { %v15632_v38 = vsel %vm15549_vm10, %v5038_v19, -1e+30  ;;  %v5039_v8 = vmul.f32 0.25, %v4943_v40  ;;  %v5045_v10 = vmul.f32 0.25, %v5018_v14  ;;  %v13028_v53 = vpop.f32.mrb[75].mxu1  ;;  %v13046_v37 = vpop.f32.mrb[47].mxu0 }
 0x7fc   : > { %v5131_v13 = vsel %vm5082_vm6, %v15632_v38, -inf  ;;  %v15638_v51 = vsel %vm15549_vm10, %v5044_v12, -1e+30 }
 0x7fd   : > { %5132 = vmax.xlane.f32.xlu1 %v5131_v13  ;;  %v15642_v30 = vsel %vm15554_vm11, %v5039_v8, -1e+30  ;;  %v15648_v43 = vsel %vm15554_vm11, %v5045_v10, -1e+30  ;;  %v5149_v15 = vsel %vm5082_vm6, %v15638_v51, -inf }
 0x7fe   : > { %v5134_v52 = vsel %vm5082_vm6, %v15642_v30, -inf  ;;  %v5152_v41 = vsel %vm5082_vm6, %v15648_v43, -inf }
 0x7ff   : > { %5135 = vmax.xlane.f32.xlu0 %v5134_v52 }
 0x801   : > { %5150 = vmax.xlane.f32.xlu1 %v5149_v15 }
 0x803   : > { %5153 = vmax.xlane.f32.xlu0 %v5152_v41 }
 0x819   : > { %2230 = vrot.lane.b32.xlu0 %v18480_v58, %s18358_s29 }
 0x851   : > { %v5103_v24 = vpop.xlane.xlu0 %5102 }
 0x852   : > { %v5161_v22 = vsub.f32 %v15488_v33, %v5103_v24  ;;  %v5085_v4 = vpop.xlane.xlu1 %5084 }
 0x853   : > { %v5155_v59 = vsub.f32 %v15494_v61, %v5085_v4 }
 0x854   : > { %v5191_v36 = vmul.f32 1.442695, %v5161_v22 }
 0x855   : > { %v5179_v55 = vmul.f32 1.442695, %v5155_v59  ;;  %v5088_v63 = vpop.xlane.xlu0 %5087 }
 0x856   : > { %13681 = vpow2.f32 %v5191_v36  ;;  %v5156_v19 = vsub.f32 %v15500_v35, %v5088_v63 }
 0x857   : > { %13683 = vpow2.f32 %v5179_v55 }
 0x858   : > { %v5181_v12 = vmul.f32 1.442695, %v5156_v19 }
 0x859   : > { %v5106_v29 = vpop.xlane.xlu0 %5105 }
 0x85a   : > { %13685 = vpow2.f32 %v5181_v12  ;;  %v5162_v27 = vsub.f32 %v15506_v21, %v5106_v29 }
 0x85c   : > { %v5193_v40 = vmul.f32 1.442695, %v5162_v27  ;;  %v18481_v27 = vld [vmem:[#allocation22_spill] sm:$0xff] }
 0x85e   : > { %13687 = vpow2.f32 %v5193_v40  ;;  %v15668_v14 = vpop.xlane.xlu1 %5090 }
 0x860   : > { %v15670_v33 = vpop.eup %13681  ;;  %v5094_v8 = vpop.xlane.xlu0 %5093 }
 0x861   : > { %v15672_v61 = vpop.eup %13683  ;;  %v5158_v10 = vsub.f32 %v15534_v3, %v5094_v8  ;;  %v5245_v35 = vsel %vm5082_vm6, %v15670_v33, 0.0 }
 0x862   : > { %v5109_v53 = vpop.xlane.xlu1 %5108  ;;  %5246 = vadd.xlane.f32.xlu0 %v5245_v35  ;;  %v5227_v37 = vsel %vm5082_vm6, %v15672_v61, 0.0 }
 0x863   : > { %v5163_v21 = vsub.f32 %v15530_v54, %v5109_v53  ;;  %5228 = vadd.xlane.f32.xlu1 %v5227_v37  ;;  %v5185_v15 = vmul.f32 1.442695, %v5158_v10 }
 0x864   : > { %v15680_v13 = vpop.eup %13685  ;;  %v5112_v52 = vpop.xlane.xlu0 %5111 }
 0x865   : > { %v5195_v41 = vmul.f32 1.442695, %v5163_v21  ;;  %v5164_v24 = vsub.f32 %v15540_v46, %v5112_v52  ;;  %v5230_v3 = vsel %vm5082_vm6, %v15680_v13, 0.0 }
 0x866   : > { %5231 = vadd.xlane.f32.xlu0 %v5230_v3 }
 0x867   : > { %13689 = vpow2.f32 %v5195_v41  ;;  %v5197_v4 = vmul.f32 1.442695, %v5164_v24 }
 0x868   : > { %v15685_v22 = vpop.eup %13687  ;;  %13691 = vpow2.f32 %v5185_v15 }
 0x869   : > { %v5248_v54 = vsel %vm5082_vm6, %v15685_v22, 0.0  ;;  %13693 = vpow2.f32 %v5197_v4 }
 0x86a   : > { %5249 = vadd.xlane.f32.xlu0 %v5248_v54 }
 0x86d   : > { %v5097_v40 = vpop.xlane.xlu1 %5096 }
 0x86f   : > { %v5100_v59 = vpop.xlane.xlu0 %5099 }
 0x870   : > { %v5160_v36 = vsub.f32 %v15570_v9, %v5100_v59  ;;  %v5157_v59 = vsub.f32 %v15524_v20, %v15668_v14 }
 0x871   : > { %v15690_v55 = vpop.eup %13689  ;;  %v5115_v37 = vpop.xlane.xlu1 %5114 }
 0x872   : > { %v5189_v46 = vmul.f32 1.442695, %v5160_v36  ;;  %v5251_v63 = vsel %vm5082_vm6, %v15690_v55, 0.0  ;;  %v15694_v19 = vpop.eup %13691  ;;  %v5165_v20 = vsub.f32 %v15566_v62, %v5115_v37 }
 0x873   : > { %v5118_v12 = vpop.xlane.xlu0 %5117  ;;  %5252 = vadd.xlane.f32.xlu0 %v5251_v63  ;;  %v5236_v9 = vsel %vm5082_vm6, %v15694_v19, 0.0  ;;  %v15701_v10 = vpop.eup %13693  ;;  %v5183_v63 = vmul.f32 1.442695, %v5157_v59 }
 0x874   : > { %13695 = vpow2.f32 %v5189_v46  ;;  %v5166_v29 = vsub.f32 %v15576_v32, %v5118_v12  ;;  %2228 = vrot.lane.b32.xlu1 %v18481_v27, %s18358_s29  ;;  %v5254_v53 = vsel %vm5082_vm6, %v15701_v10, 0.0  ;;  %v5159_v12 = vsub.f32 %v15560_v60, %v5097_v40  ;;  %s18499_s29 = smov 112  }
 0x875   : > { %v5199_v60 = vmul.f32 1.442695, %v5165_v20 }
 0x876   : > { %v5201_v8 = vmul.f32 1.442695, %v5166_v29 }
 0x877   : > { %5237 = vadd.xlane.f32.xlu0 %v5236_v9 }
 0x878   : > { %13697 = vpow2.f32 %v5201_v8  ;;  %v5121_v3 = vpop.xlane.xlu1 %5120 }
 0x879   : > { %v5167_v40 = vsub.f32 %v15584_v18, %v5121_v3 }
 0x87a   : > { %v5124_v35 = vpop.xlane.xlu0 %5123 }
 0x87b   : > { %v5168_v21 = vsub.f32 %v15590_v5, %v5124_v35  ;;  %5255 = vadd.xlane.f32.xlu0 %v5254_v53 }
 0x87c   : > { %v5139_v8 = vpop.xlane.xlu1 %5138 }
 0x87d   : > { %v5205_v32 = vmul.f32 1.442695, %v5168_v21  ;;  %v5173_v59 = vsub.f32 %v15594_v16, %v5139_v8 }
 0x87e   : > { %v15706_v52 = vpop.eup %13695  ;;  %v5142_v15 = vpop.xlane.xlu0 %5141 }
 0x87f   : > { %13699 = vpow2.f32 %v5205_v32  ;;  %v5174_v41 = vsub.f32 %v15600_v45, %v5142_v15  ;;  %v5242_v24 = vsel %vm5082_vm6, %v15706_v52, 0.0 }
 0x880   : > { %5243 = vadd.xlane.f32.xlu0 %v5242_v24  ;;  %v5127_v32 = vpop.xlane.xlu1 %5126  ;;  %v5203_v24 = vmul.f32 1.442695, %v5167_v40 }
 0x881   : > { %v5217_v4 = vmul.f32 1.442695, %v5174_v41 }
 0x882   : > { %v15711_v54 = vpop.eup %13697  ;;  %v5130_v5 = vpop.xlane.xlu0 %5129 }
 0x883   : > { %13701 = vpow2.f32 %v5217_v4  ;;  %v5170_v36 = vsub.f32 %v15614_v7, %v5130_v5  ;;  %v5260_v46 = vsel %vm5082_vm6, %v15711_v54, 0.0  ;;  %v5187_v7 = vmul.f32 1.442695, %v5159_v12 }
 0x884   : > { %5261 = vadd.xlane.f32.xlu0 %v5260_v46  ;;  %v5145_v5 = vpop.xlane.xlu1 %5144 }
 0x885   : > { %v5209_v45 = vmul.f32 1.442695, %v5170_v36 }
 0x886   : > { %v5148_v29 = vpop.xlane.xlu0 %5147 }
 0x887   : > { %13703 = vpow2.f32 %v5209_v45  ;;  %v5176_v9 = vsub.f32 %v15624_v49, %v5148_v29  ;;  %v5215_v45 = vmul.f32 1.442695, %v5173_v59 }
 0x888   : > { %13705 = vpow2.f32 %v5183_v63  ;;  %v5169_v63 = vsub.f32 %v15608_v6, %v5127_v32 }
 0x889   : > { %v15720_v35 = vpop.eup %13699  ;;  %v5221_v14 = vmul.f32 1.442695, %v5176_v9  ;;  %v5175_v9 = vsub.f32 %v15618_v23, %v5145_v5 }
 0x88a   : > { %v5266_v53 = vsel %vm5082_vm6, %v15720_v35, 0.0  ;;  %v5133_v29 = vpop.xlane.xlu1 %5132  ;;  %v5207_v8 = vmul.f32 1.442695, %v5169_v63 }
 0x88b   : > { %13707 = vpow2.f32 %v5221_v14  ;;  %5267 = vadd.xlane.f32.xlu0 %v5266_v53  ;;  %v5219_v53 = vmul.f32 1.442695, %v5175_v9 }
 0x88c   : > { %v5136_v15 = vpop.xlane.xlu0 %5135  ;;  %13709 = vpow2.f32 %v5187_v7 }
 0x88d   : > { %v15725_v21 = vpop.eup %13701  ;;  %v5172_v49 = vsub.f32 %v15642_v30, %v5136_v15  ;;  %13711 = vpow2.f32 %v5199_v60  ;;  %v5171_v60 = vsub.f32 %v15632_v38, %v5133_v29 }
 0x88e   : > { %v5284_v62 = vsel %vm5082_vm6, %v15725_v21, 0.0  ;;  %v5151_v32 = vpop.xlane.xlu1 %5150 }
 0x88f   : > { %5285 = vadd.xlane.f32.xlu0 %v5284_v62  ;;  %v5213_v37 = vmul.f32 1.442695, %v5172_v49  ;;  %v5211_v62 = vmul.f32 1.442695, %v5171_v60 }
 0x890   : > { %v5154_v4 = vpop.xlane.xlu0 %5153 }
 0x891   : > { %v15731_v41 = vpop.eup %13703  ;;  %13713 = vpow2.f32 %v5213_v37  ;;  %v5178_v18 = vsub.f32 %v15648_v43, %v5154_v4  ;;  %v5177_v37 = vsub.f32 %v15638_v51, %v5151_v32 }
 0x892   : > { %v5272_v3 = vsel %vm5082_vm6, %v15731_v41, 0.0  ;;  %v15737_v30 = vpop.eup %13705  ;;  %13715 = vpow2.f32 %v5203_v24 }
 0x893   : > { %5273 = vadd.xlane.f32.xlu0 %v5272_v3  ;;  %v5225_v36 = vmul.f32 1.442695, %v5178_v18  ;;  %v5233_v43 = vsel %vm5082_vm6, %v15737_v30, 0.0  ;;  %v5223_v4 = vmul.f32 1.442695, %v5177_v37 }
 0x895   : > { %v15739_v46 = vpop.eup %13707  ;;  %13717 = vpow2.f32 %v5225_v36 }
 0x896   : > { %v5290_v16 = vsel %vm5082_vm6, %v15739_v46, 0.0  ;;  %v15746_v12 = vpop.eup %13709  ;;  %13719 = vpow2.f32 %v5215_v45 }
 0x897   : > { %5291 = vadd.xlane.f32.xlu0 %v5290_v16  ;;  %v15749_v20 = vpop.eup %13711  ;;  %v5239_v6 = vsel %vm5082_vm6, %v15746_v12, 0.0  ;;  %13721 = vpow2.f32 %v5207_v8  ;;  %v3394_v8 = vcombine.low %v18480_v58, %v15660_v28 }
 0x898   : > { %5234 = vadd.xlane.f32.xlu1 %v5233_v43  ;;  %v5257_v23 = vsel %vm5082_vm6, %v15749_v20, 0.0  ;;  %13723 = vpow2.f32 %v5219_v53  ;;  %v2231_v43 = vpop.permute.xlu0 %2230 }
 0x899   : > { %13725 = vpow2.f32 %v5211_v62  ;;  %v3410_v29 = vcombine.low %v15656_v25, %v2231_v43  ;;  %v3411_v9 = vcombine.high %v15656_v25, %v2231_v43  ;;  %v3402_v53 = vrot.slane %v3394_v8, %v14681_v39 }
 0x89a   : > { %13727 = vpow2.f32 %v5223_v4 }
 0x89b   : > { %v15753_v14 = vpop.eup %13713  ;;  %v3425_v60 = vrot.slane %v3411_v9, %v14681_v39 }
 0x89c   : > { %5240 = vadd.xlane.f32.xlu1 %v5239_v6  ;;  %v5278_v7 = vsel %vm5082_vm6, %v15753_v14, 0.0  ;;  %v15758_v40 = vpop.eup %13715  ;;  %v3395_v6 = vcombine.high %v18480_v58, %v15660_v28 }
 0x89d   : > { %5279 = vadd.xlane.f32.xlu0 %v5278_v7  ;;  %v5263_v38 = vsel %vm5082_vm6, %v15758_v40, 0.0  ;;  %v3418_v7 = vrot.slane %v3410_v29, %v14681_v39 }
 0x89e   : > { %v3409_v32 = vrot.slane %v3395_v6, %v14681_v39 }
 0x89f   : > { %v15762_v15 = vpop.eup %13717 }
 0x8a0   : > { %5258 = vadd.xlane.f32.xlu1 %v5257_v23  ;;  %v5296_v49 = vsel %vm5082_vm6, %v15762_v15, 0.0  ;;  %v15769_v24 = vpop.eup %13719  ;;  %v3426_v23 = vcombine.low %v3402_v53, %v3418_v7  ;;  %v3442_v62 = vcombine.low %v3409_v32, %v3425_v60  ;;  %v3443_v37 = vcombine.high %v3409_v32, %v3425_v60 }
 0x8a1   : > { %5297 = vadd.xlane.f32.xlu0 %v5296_v49  ;;  %v5281_v59 = vsel %vm5082_vm6, %v15769_v24, 0.0  ;;  %v15773_v18 = vpop.eup %13721  ;;  %v3427_v49 = vcombine.high %v3402_v53, %v3418_v7 }
 0x8a2   : > { %v5269_v3 = vsel %vm5082_vm6, %v15773_v18, 0.0  ;;  %v15777_v51 = vpop.eup %13723  ;;  %v3434_v4 = vrot.slane %v3426_v23, %v14684_v42  ;;  %v3450_v58 = vrot.slane %v3442_v62, %v14684_v42  ;;  %v3457_v28 = vrot.slane %v3443_v37, %v14684_v42 }
 0x8a3   : > { %v5287_v5 = vsel %vm5082_vm6, %v15777_v51, 0.0  ;;  %v15781_v36 = vpop.eup %13725  ;;  %v3441_v25 = vrot.slane %v3427_v49, %v14684_v42 }
 0x8a4   : > { %5264 = vadd.xlane.f32.xlu1 %v5263_v38  ;;  %v5275_v45 = vsel %vm5082_vm6, %v15781_v36, 0.0  ;;  %v15785_v63 = vpop.eup %13727  ;;  %v4634_v6 = vcombine.low %v3450_v58, %v3457_v28  ;;  %v12489_v7 = vcombine.high %v3450_v58, %v3457_v28 }
 0x8a5   : > { %v5293_v16 = vsel %vm5082_vm6, %v15785_v63, 0.0  ;;  %v12488_v9 = vcombine.high %v3434_v4, %v3441_v25 }
 0x8a6   : > { %v4649_v58 = vrot.slane %v12489_v7, %v14681_v39 }
 0x8a8   : > { %5282 = vadd.xlane.f32.xlu1 %v5281_v59 }
 0x8ac   : > { %5270 = vadd.xlane.f32.xlu1 %v5269_v3  ;;  %v3190_v3 = vcombine.low %v18481_v27, %v15662_v34 }
 0x8ae   : > { %v3198_v53 = vrot.slane %v3190_v3, %v14681_v39 }
 0x8b0   : > { %5288 = vadd.xlane.f32.xlu1 %v5287_v5  ;;  %v3191_v5 = vcombine.high %v18481_v27, %v15662_v34 }
 0x8b2   : > { %v3205_v60 = vrot.slane %v3191_v5, %v14681_v39 }
 0x8b4   : > { %5276 = vadd.xlane.f32.xlu1 %v5275_v45 }
 0x8b8   : > { %5294 = vadd.xlane.f32.xlu1 %v5293_v16  ;;  %v4618_v16 = vcombine.low %v3434_v4, %v3441_v25  ;;  %v4633_v4 = vrot.slane %v12488_v9, %v14681_v39  ;;  %v4641_v25 = vrot.slane %v4634_v6, %v14681_v39 }
 0x8ba   : > { %v15814_v34 = vrot.slane %v4618_v16, %v14681_v39  ;;  %v4666_v6 = vcombine.low %v4641_v25, %v4649_v58 }
 0x8bc   : > { %v4650_v9 = vcombine.low %v15814_v34, %v4633_v4 }
 0x8ef   : > { %v5247_v38 = vpop.xlane.xlu0 %5246 }
 0x8f0   : > { %v5229_v59 = vpop.xlane.xlu1 %5228 }
 0x8f3   : > { %v5232_v45 = vpop.xlane.xlu0 %5231 }
 0x8f4   : > { %v2229_v43 = vpop.permute.xlu1 %2228  ;;  %13729 = vrcp.f32 %v5232_v45 }
 0x8f5   : > { %v3206_v29 = vcombine.low %v15658_v48, %v2229_v43  ;;  %v3207_v8 = vcombine.high %v15658_v48, %v2229_v43 }
 0x8f7   : > { %v3214_v32 = vrot.slane %v3206_v29, %v14681_v39  ;;  %v3221_v23 = vrot.slane %v3207_v8, %v14681_v39  ;;  %v5250_v49 = vpop.xlane.xlu0 %5249 }
 0x8f8   : > { %13731 = vrcp.f32 %v5250_v49 }
 0x8f9   : > { %v3222_v27 = vcombine.low %v3198_v53, %v3214_v32  ;;  %v3223_v62 = vcombine.high %v3198_v53, %v3214_v32  ;;  %v3238_v37 = vcombine.low %v3205_v60, %v3221_v23  ;;  %v3239_v48 = vcombine.high %v3205_v60, %v3221_v23 }
 0x8fa   : > { %13733 = vrcp.f32 %v5247_v38 }
 0x8fb   : > { %v3230_v28 = vrot.slane %v3222_v27, %v14684_v42  ;;  %v3237_v3 = vrot.slane %v3223_v62, %v14684_v42  ;;  %v3246_v5 = vrot.slane %v3238_v37, %v14684_v42  ;;  %13735 = vrcp.f32 %v5229_v59 }
 0x8fc   : > { %v3253_v45 = vrot.slane %v3239_v48, %v14684_v42  ;;  %v4658_v27 = vrot.slane %v4650_v9, %v14684_v42  ;;  %v4674_v62 = vrot.slane %v4666_v6, %v14684_v42 }
 0x8fd   : > { %v4550_v16 = vcombine.low %v3230_v28, %v3237_v3  ;;  %v12486_v43 = vcombine.high %v3230_v28, %v3237_v3 }
 0x8fe   : > { %v4566_v29 = vcombine.low %v3246_v5, %v3253_v45  ;;  %v12487_v8 = vcombine.high %v3246_v5, %v3253_v45  ;;  %v13730_v59 = vpop.eup %13729 }
 0x8ff   : > { %v4557_v7 = vrot.slane %v4550_v16, %v14681_v39  ;;  %v4565_v38 = vrot.slane %v12486_v43, %v14681_v39  ;;  %v4682_v43 = vcombine.low %v4658_v27, %v4674_v62  ;;  %v5324_v17 = vmul.f32 %v13730_v59, %v15680_v13 }
 0x900   : > { %v4573_v53 = vrot.slane %v4566_v29, %v14681_v39  ;;  %v4581_v60 = vrot.slane %v12487_v8, %v14681_v39  ;;  %v5253_v32 = vpop.xlane.xlu0 %5252  ;;  %v4683_v8 = vcombine.high %v4658_v27, %v4674_v62  ;;  %v4667_v27 = vcombine.high %v4641_v25, %v4649_v58 }
 0x901   : > { %v4582_v23 = vcombine.low %v4557_v7, %v4565_v38  ;;  %13737 = vrcp.f32 %v5253_v32  ;;  %v4583_v2 = vcombine.high %v4557_v7, %v4565_v38 }
 0x902   : > { %v4598_v49 = vcombine.low %v4573_v53, %v4581_v60  ;;  %v13732_v48 = vpop.eup %13731 }
 0x903   : > { %v4590_v37 = vrot.slane %v4582_v23, %v14684_v42  ;;  %v5330_v26 = vmul.f32 %v13732_v48, %v15685_v22  ;;  %v4599_v23 = vcombine.high %v4573_v53, %v4581_v60  ;;  %v4597_v22 = vrot.slane %v4583_v2, %v14684_v42 }
 0x904   : > { %v5238_v28 = vpop.xlane.xlu0 %5237  ;;  %v4606_v3 = vrot.slane %v4598_v49, %v14684_v42  ;;  %v13734_v5 = vpop.eup %13733 }
 0x905   : > { %v13736_v45 = vpop.eup %13735  ;;  %v5329_v57 = vmul.f32 %v13734_v5, %v15670_v33  ;;  %v4613_v7 = vrot.slane %v4599_v23, %v14684_v42 }
 0x906   : > { %v4614_v16 = vcombine.low %v4590_v37, %v4606_v3  ;;  %v4615_v29 = vcombine.high %v4590_v37, %v4606_v3  ;;  %v5323_v49 = vmul.f32 %v13736_v45, %v15672_v61  ;;  %v4651_v37 = vcombine.high %v15814_v34, %v4633_v4 }
 0x907   : > { %v5350_v13 = vpack.c.bf16 %v5330_v26, %v5329_v57  ;;  %v4681_v57 = vrot.slane %v4667_v27, %v14684_v42  ;;  %v4616_v2 = vcombine.low %v4597_v22, %v4613_v7  ;;  %v4617_v26 = vcombine.high %v4597_v22, %v4613_v7 }
 0x908   : > { %v5256_v9 = vpop.xlane.xlu0 %5255  ;;  %v4712_v47 = vpack.c.bf16 %v4682_v43, %v4614_v16  ;;  %v4715_v6 = vpack.c.bf16 %v4683_v8, %v4615_v29  ;;  %v5347_v62 = vpack.c.bf16 %v5324_v17, %v5323_v49 }
 0x909   : > { %13739 = vrcp.f32 %v5256_v9 }
 0x90a   : > { %13052 = vmatpush3.bf16.msra.mxu1 %v4712_v47  ;;  %13070 = vmatpush3.bf16.msra.mxu0 %v4715_v6  ;;  %v4665_v47 = vrot.slane %v4651_v37, %v14684_v42  ;;  %13741 = vrcp.f32 %v5238_v28 }
 0x90b   : > { %13083 = vmatprep.subr.bf16.mxu1 %v18432_v31  ;;  %13101 = vmatprep.subr.bf16.mxu0 %v18432_v31  ;;  %v13738_v17 = vpop.eup %13737 }
 0x90c   : > { %v5331_v61 = vmul.f32 %v13738_v17, %v15690_v55 }
 0x90d   : > { %13054 = vmatmul.mubr.msk.bf16.vlgmr.msra.gmra.mrb[76].mxu1 %vm5082_vm6, %v5347_v62  ;;  %13072 = vmatmul.mubr.msk.bf16.vlgmr.msra.gmra.mrb[48].mxu0 %vm5082_vm6, %v5350_v13  ;;  %v5244_v38 = vpop.xlane.xlu0 %5243 }
 0x90e   : > { %13084 = vmatpush3.bf16.msra.mxu1 %v15463_v1  ;;  %13102 = vmatpush3.bf16.msra.mxu0 %v15465_v0  ;;  %v4684_v1 = vcombine.low %v4665_v47, %v4681_v57  ;;  %v4685_v0 = vcombine.high %v4665_v47, %v4681_v57 }
 0x90f   : > { %13085 = vmatprep.subr.bf16.mxu1 %v18432_v31  ;;  %13103 = vmatprep.subr.bf16.mxu0 %v18432_v31 }
 0x910   : > { %13075 = vmatprep.mubr.msk.bf16.mxu0 %vm13999_vm0, %v18432_v31  ;;  %13057 = vmatprep.mubr.msk.bf16.mxu1 %vm13999_vm0, %v18432_v31  ;;  %v4718_v4 = vpack.c.bf16 %v4684_v1, %v4616_v2  ;;  %v4721_v25 = vpack.c.bf16 %v4685_v0, %v4617_v26 }
 0x912   : > { %13086 = vmatpush3.bf16.msra.mxu1 %v15467_v44  ;;  %13104 = vmatpush3.bf16.msra.mxu0 %v15469_v56  ;;  %v5262_v44 = vpop.xlane.xlu0 %5261 }
 0x913   : > { %v13740_v33 = vpop.eup %13739  ;;  %13087 = vmatprep.subr.bf16.mxu1 %v18432_v31  ;;  %13105 = vmatprep.subr.bf16.mxu0 %v18432_v31 }
 0x914   : > { %v5332_v34 = vmul.f32 %v13740_v33, %v15701_v10  ;;  %v13742_v32 = vpop.eup %13741 }
 0x915   : > { %v5326_v45 = vmul.f32 %v13742_v32, %v15694_v19 }
 0x916   : > { %v5351_v58 = vpack.c.bf16 %v5332_v34, %v5331_v61  ;;  %13088 = vmatpush3.bf16.msra.mxu1 %v4718_v4  ;;  %13106 = vmatpush3.bf16.msra.mxu0 %v4721_v25 }
 0x917   : > { %13119 = vmatprep.subr.bf16.mxu1 %v18432_v31  ;;  %13139 = vmatprep.subr.bf16.mxu0 %v18432_v31 }
 0x918   : > { %13076 = vmatmul.mubr.msk.bf16.gmra.mrb[52].mxu0 %vm5082_vm6, %v5351_v58  ;;  %v5268_v56 = vpop.xlane.xlu0 %5267 }
 0x919   : > { %13079 = vmatprep.mubr.msk.bf16.mxu0 %vm13999_vm0, %v18432_v31 }
 0x91c   : > { %v5286_v10 = vpop.xlane.xlu0 %5285 }
 0x920   : > { %v5274_v59 = vpop.xlane.xlu0 %5273 }
 0x924   : > { %v5292_v29 = vpop.xlane.xlu0 %5291 }
 0x925   : > { %v5235_v55 = vpop.xlane.xlu1 %5234 }
 0x926   : > { %13743 = vrcp.f32 %v5235_v55 }
 0x929   : > { %v5241_v53 = vpop.xlane.xlu1 %5240 }
 0x92a   : > { %13745 = vrcp.f32 %v5241_v53  ;;  %v5280_v27 = vpop.xlane.xlu0 %5279 }
 0x92b   : > { %13747 = vrcp.f32 %v5244_v38 }
 0x92c   : > { %13749 = vrcp.f32 %v5262_v44 }
 0x92d   : > { %v5259_v60 = vpop.xlane.xlu1 %5258 }
 0x92e   : > { %13751 = vrcp.f32 %v5259_v60  ;;  %v5298_v2 = vpop.xlane.xlu0 %5297 }
 0x930   : > { %v13744_v48 = vpop.eup %13743 }
 0x931   : > { %v5265_v3 = vpop.xlane.xlu1 %5264  ;;  %v5325_v5 = vmul.f32 %v13744_v48, %v15737_v30 }
 0x932   : > { %13753 = vrcp.f32 %v5265_v3 }
 0x933   : > { %13755 = vrcp.f32 %v5268_v56  ;;  %v5348_v28 = vpack.c.bf16 %v5326_v45, %v5325_v5  ;;  %v13591_v5 = vld [vmem:[%s18297_s12 + $0x10] sm:$0xff]  }
 0x934   : > { %v13746_v16 = vpop.eup %13745  ;;  %13757 = vrcp.f32 %v5286_v10 }
 0x935   : > { %v13748_v43 = vpop.eup %13747  ;;  %13058 = vmatmul.mubr.msk.bf16.gmra.mrb[80].mxu1 %vm5082_vm6, %v5348_v28  ;;  %v5283_v8 = vpop.xlane.xlu1 %5282  ;;  %v5327_v6 = vmul.f32 %v13746_v16, %v15746_v12 }
 0x936   : > { %v13750_v9 = vpop.eup %13749  ;;  %13759 = vrcp.f32 %v5283_v8  ;;  %13061 = vmatprep.mubr.msk.bf16.mxu1 %vm13999_vm0, %v18432_v31  ;;  %v5328_v19 = vmul.f32 %v13748_v43, %v15706_v52 }
 0x937   : > { %v5334_v37 = vmul.f32 %v13750_v9, %v15711_v54 }
 0x938   : > { %v13752_v30 = vpop.eup %13751  ;;  %v5349_v62 = vpack.c.bf16 %v5328_v19, %v5327_v6 }
 0x939   : > { %v5271_v23 = vpop.xlane.xlu1 %5270  ;;  %v5333_v49 = vmul.f32 %v13752_v30, %v15749_v20 }
 0x93a   : > { %13761 = vrcp.f32 %v5271_v23 }
 0x93b   : > { %13763 = vrcp.f32 %v5274_v59  ;;  %v5352_v13 = vpack.c.bf16 %v5334_v37, %v5333_v49 }
 0x93c   : > { %v13754_v22 = vpop.eup %13753  ;;  %13765 = vrcp.f32 %v5292_v29 }
 0x93d   : > { %v13756_v7 = vpop.eup %13755  ;;  %13062 = vmatmul.mubr.msk.bf16.gmra.mrb[84].mxu1 %vm5082_vm6, %v5349_v62  ;;  %13080 = vmatmul.mubr.msk.bf16.gmra.mrb[56].mxu0 %vm5082_vm6, %v5352_v13  ;;  %v5289_v12 = vpop.xlane.xlu1 %5288  ;;  %v5335_v52 = vmul.f32 %v13754_v22, %v15758_v40 }
 0x93e   : > { %v13758_v47 = vpop.eup %13757  ;;  %13767 = vrcp.f32 %v5289_v12  ;;  %13089 = vmatprep.mubr.msk.bf16.mxu1 %vm13999_vm0, %v18432_v31  ;;  %13107 = vmatprep.mubr.msk.bf16.mxu0 %vm13999_vm0, %v18432_v31  ;;  %v5336_v20 = vmul.f32 %v13756_v7, %v15720_v35 }
 0x93f   : > { %v5342_v57 = vmul.f32 %v13758_v47, %v15725_v21 }
 0x940   : > { %v13760_v54 = vpop.eup %13759  ;;  %v5353_v1 = vpack.c.bf16 %v5336_v20, %v5335_v52 }
 0x941   : > { %v5341_v26 = vmul.f32 %v13760_v54, %v15769_v24  ;;  %v5277_v17 = vpop.xlane.xlu1 %5276 }
 0x942   : > { %13769 = vrcp.f32 %v5277_v17 }
 0x943   : > { %13771 = vrcp.f32 %v5280_v27  ;;  %v5356_v0 = vpack.c.bf16 %v5342_v57, %v5341_v26 }
 0x944   : > { %v13762_v33 = vpop.eup %13761  ;;  %13773 = vrcp.f32 %v5298_v2 }
 0x945   : > { %v13764_v61 = vpop.eup %13763  ;;  %13090 = vmatmul.mubr.msk.bf16.vlgmr.msra.gmra.mrb[88].mxu1 %vm5082_vm6, %v5353_v1  ;;  %13108 = vmatmul.mubr.msk.bf16.vlgmr.msra.gmra.mrb[60].mxu0 %vm5082_vm6, %v5356_v0  ;;  %v5295_v40 = vpop.xlane.xlu1 %5294  ;;  %v5337_v35 = vmul.f32 %v13762_v33, %v15773_v18 }
 0x946   : > { %v13766_v34 = vpop.eup %13765  ;;  %13775 = vrcp.f32 %v5295_v40  ;;  %13093 = vmatprep.mubr.msk.bf16.mxu1 %vm13999_vm0, %v18432_v31  ;;  %13111 = vmatprep.mubr.msk.bf16.mxu0 %vm13999_vm0, %v18432_v31  ;;  %v5338_v24 = vmul.f32 %v13764_v61, %v15731_v41 }
 0x947   : > { %v5344_v25 = vmul.f32 %v13766_v34, %v15739_v46 }
 0x948   : > { %v13768_v21 = vpop.eup %13767  ;;  %v5354_v58 = vpack.c.bf16 %v5338_v24, %v5337_v35 }
 0x949   : > { %v5343_v4 = vmul.f32 %v13768_v21, %v15777_v51 }
 0x94b   : > { %v5357_v38 = vpack.c.bf16 %v5344_v25, %v5343_v4 }
 0x94c   : > { %v13770_v44 = vpop.eup %13769 }
 0x94d   : > { %v13772_v56 = vpop.eup %13771  ;;  %13094 = vmatmul.mubr.msk.bf16.gmra.mrb[92].mxu1 %vm5082_vm6, %v5354_v58  ;;  %13112 = vmatmul.mubr.msk.bf16.gmra.mrb[64].mxu0 %vm5082_vm6, %v5357_v38  ;;  %v5339_v41 = vmul.f32 %v13770_v44, %v15781_v36 }
 0x94e   : > { %v13774_v55 = vpop.eup %13773  ;;  %13097 = vmatprep.mubr.msk.bf16.mxu1 %vm13999_vm0, %v18432_v31  ;;  %13115 = vmatprep.mubr.msk.bf16.mxu0 %vm13999_vm0, %v18432_v31  ;;  %v5340_v46 = vmul.f32 %v13772_v56, %v15753_v14  ;;  %v13589_v14 = vld [vmem:[%s18297_s12] sm:$0xff]  }
 0x94f   : > { %v5346_v10 = vmul.f32 %v13774_v55, %v15762_v15  ;;  %13120 = vmatpush3.bf16.msra.mxu1 %v13589_v14  ;;  %v13590_v15 = vld [vmem:[%s18297_s12 + $0x8] sm:$0xff]  }
 0x950   : > { %v13776_v18 = vpop.eup %13775  ;;  %v5355_v53 = vpack.c.bf16 %v5340_v46, %v5339_v41  ;;  %13121 = vmatprep.subr.bf16.mxu1 %v18432_v31 }
 0x951   : > { %v5345_v51 = vmul.f32 %v13776_v18, %v15785_v63 }
 0x953   : > { %v5358_v60 = vpack.c.bf16 %v5346_v10, %v5345_v51  ;;  %13122 = vmatpush3.bf16.msra.mxu1 %v13590_v15 }
 0x954   : > { %13123 = vmatprep.subr.bf16.mxu1 %v18432_v31 }
 0x955   : > { %13098 = vmatmul.mubr.msk.bf16.gmra.mrb[96].mxu1 %vm5082_vm6, %v5355_v53  ;;  %13116 = vmatmul.mubr.msk.bf16.gmra.mrb[68].mxu0 %vm5082_vm6, %v5358_v60 }
 0x956   : > { %13127 = vmatprep.mubr.msk.bf16.mxu1 %vm13999_vm0, %v18432_v31  ;;  %13147 = vmatprep.mubr.msk.bf16.mxu0 %vm13999_vm0, %v18432_v31 }
 0x957   : > { %13124 = vmatpush3.bf16.msra.mxu1 %v13591_v5 }
 0x958   : > { %13125 = vmatprep.subr.bf16.mxu1 %v18432_v31 }
 0x9e0   : > { %v5402_v36 = vpop.f32.mrb[76].mxu1  ;;  %v5468_v63 = vpop.f32.mrb[48].mxu0 }
 0x9e1   : > { %v13055_v32 = vpop.f32.mrb[77].mxu1  ;;  %v13073_v59 = vpop.f32.mrb[49].mxu0 }
 0x9e2   : > { %v5405_v48 = vpop.f32.mrb[78].mxu1  ;;  %v5471_v3 = vpop.f32.mrb[50].mxu0 }
 0x9e3   : > { %v13056_v45 = vpop.f32.mrb[79].mxu1  ;;  %v13074_v28 = vpop.f32.mrb[51].mxu0 }
 0x9eb   : > { %v15921_v16 = vpop.f32.mrb[52].mxu0 }
 0x9ec   : > { %v13077_v43 = vpop.f32.mrb[53].mxu0 }
 0x9ed   : > { %v15923_v29 = vpop.f32.mrb[54].mxu0 }
 0x9ee   : > { %v13078_v8 = vpop.f32.mrb[55].mxu0 }
 0xa08   : > { %v15925_v9 = vpop.f32.mrb[80].mxu1 }
 0xa09   : > { %v13059_v6 = vpop.f32.mrb[81].mxu1 }
 0xa0a   : > { %v15927_v30 = vpop.f32.mrb[82].mxu1 }
 0xa0b   : > { %v13060_v23 = vpop.f32.mrb[83].mxu1 }
 0xa10   : > { %v15929_v19 = vpop.f32.mrb[84].mxu1  ;;  %v15931_v49 = vpop.f32.mrb[56].mxu0 }
 0xa11   : > { %v13063_v37 = vpop.f32.mrb[85].mxu1  ;;  %v13081_v27 = vpop.f32.mrb[57].mxu0 }
 0xa12   : > { %v15933_v62 = vpop.f32.mrb[86].mxu1  ;;  %v15935_v13 = vpop.f32.mrb[58].mxu0 }
 0xa13   : > { %v13064_v22 = vpop.f32.mrb[87].mxu1  ;;  %v13082_v7 = vpop.f32.mrb[59].mxu0 }
 0xa18   : > { %v5534_v12 = vpop.f32.mrb[88].mxu1  ;;  %v5600_v47 = vpop.f32.mrb[60].mxu0 }
 0xa19   : > { %v5623_v52 = vcombine.low %v5402_v36, %v5534_v12  ;;  %v5624_v54 = vcombine.high %v5402_v36, %v5534_v12  ;;  %v5639_v20 = vcombine.low %v5468_v63, %v5600_v47  ;;  %v5640_v57 = vcombine.high %v5468_v63, %v5600_v47  ;;  %v13091_v2 = vpop.f32.mrb[89].mxu1  ;;  %v13109_v26 = vpop.f32.mrb[61].mxu0 }
 0xa1a   : > { %v5537_v17 = vpop.f32.mrb[90].mxu1  ;;  %v5603_v1 = vpop.f32.mrb[62].mxu0 }
 0xa1b   : > { %v5631_v0 = vrot.slane %v5623_v52, %v14681_v39  ;;  %v5638_v33 = vrot.slane %v5624_v54, %v14681_v39  ;;  %v5647_v61 = vrot.slane %v5639_v20, %v14681_v39  ;;  %v5654_v40 = vrot.slane %v5640_v57, %v14681_v39  ;;  %v13092_v34 = vpop.f32.mrb[91].mxu1  ;;  %v13110_v35 = vpop.f32.mrb[63].mxu0 }
 0xa1c   : > { %v5691_v21 = vcombine.low %v5405_v48, %v5537_v17  ;;  %v5692_v24 = vcombine.high %v5405_v48, %v5537_v17  ;;  %v5707_v4 = vcombine.low %v5471_v3, %v5603_v1  ;;  %v5708_v25 = vcombine.high %v5471_v3, %v5603_v1 }
 0xa1d   : > { %v5655_v58 = vcombine.low %v5631_v0, %v5647_v61  ;;  %v5656_v38 = vcombine.high %v5631_v0, %v5647_v61  ;;  %v5671_v44 = vcombine.low %v5638_v33, %v5654_v40  ;;  %v5672_v56 = vcombine.high %v5638_v33, %v5654_v40 }
 0xa1e   : > { %v5699_v55 = vrot.slane %v5691_v21, %v14681_v39  ;;  %v5706_v41 = vrot.slane %v5692_v24, %v14681_v39  ;;  %v5715_v18 = vrot.slane %v5707_v4, %v14681_v39  ;;  %v5722_v46 = vrot.slane %v5708_v25, %v14681_v39 }
 0xa1f   : > { %v5663_v51 = vrot.slane %v5655_v58, %v14684_v42  ;;  %v5670_v10 = vrot.slane %v5656_v38, %v14684_v42  ;;  %v5679_v53 = vrot.slane %v5671_v44, %v14684_v42  ;;  %v5686_v60 = vrot.slane %v5672_v56, %v14684_v42 }
 0xa20   : > { %v5723_v14 = vcombine.low %v5699_v55, %v5715_v18  ;;  %v5724_v15 = vcombine.high %v5699_v55, %v5715_v18  ;;  %v5739_v36 = vcombine.low %v5706_v41, %v5722_v46  ;;  %v5740_v63 = vcombine.high %v5706_v41, %v5722_v46  ;;  %v5542_v32 = vpop.f32.mrb[92].mxu1  ;;  %v5608_v59 = vpop.f32.mrb[64].mxu0 }
 0xa21   : > { %v6031_v48 = vcombine.low %v5663_v51, %v5670_v10  ;;  %v12514_v3 = vcombine.high %v5663_v51, %v5670_v10  ;;  %v6047_v5 = vcombine.low %v5679_v53, %v5686_v60  ;;  %v12515_v45 = vcombine.high %v5679_v53, %v5686_v60  ;;  %v13095_v28 = vpop.f32.mrb[93].mxu1  ;;  %v13113_v43 = vpop.f32.mrb[65].mxu0 }
 0xa22   : > { %v5731_v8 = vrot.slane %v5723_v14, %v14684_v42  ;;  %v5738_v6 = vrot.slane %v5724_v15, %v14684_v42  ;;  %v5747_v23 = vrot.slane %v5739_v36, %v14684_v42  ;;  %v5754_v37 = vrot.slane %v5740_v63, %v14684_v42  ;;  %v5545_v27 = vpop.f32.mrb[94].mxu1  ;;  %v5611_v22 = vpop.f32.mrb[66].mxu0 }
 0xa23   : > { %v15954_v7 = vrot.slane %v6031_v48, %v14681_v39  ;;  %v15957_v12 = vrot.slane %v12514_v3, %v14681_v39  ;;  %v15960_v47 = vrot.slane %v6047_v5, %v14681_v39  ;;  %v15963_v52 = vrot.slane %v12515_v45, %v14681_v39  ;;  %v13096_v54 = vpop.f32.mrb[95].mxu1  ;;  %v13114_v20 = vpop.f32.mrb[67].mxu0 }
 0xa24   : > { %v6099_v57 = vcombine.low %v5731_v8, %v5738_v6  ;;  %v12516_v2 = vcombine.high %v5731_v8, %v5738_v6  ;;  %v6115_v26 = vcombine.low %v5747_v23, %v5754_v37  ;;  %v12517_v17 = vcombine.high %v5747_v23, %v5754_v37 }
 0xa25   : > { %v5759_v1 = vcombine.low %v15925_v9, %v5542_v32  ;;  %v5760_v0 = vcombine.high %v15925_v9, %v5542_v32  ;;  %v5775_v33 = vcombine.low %v15921_v16, %v5608_v59  ;;  %v5776_v61 = vcombine.high %v15921_v16, %v5608_v59 }
 0xa26   : > { %v15970_v40 = vrot.slane %v6099_v57, %v14681_v39  ;;  %v15973_v34 = vrot.slane %v12516_v2, %v14681_v39  ;;  %v15976_v35 = vrot.slane %v6115_v26, %v14681_v39  ;;  %v15979_v21 = vrot.slane %v12517_v17, %v14681_v39 }
 0xa27   : > { %v5767_v24 = vrot.slane %v5759_v1, %v14681_v39  ;;  %v5774_v9 = vrot.slane %v5760_v0, %v14681_v39  ;;  %v5783_v4 = vrot.slane %v5775_v33, %v14681_v39  ;;  %v5790_v16 = vrot.slane %v5776_v61, %v14681_v39 }
 0xa28   : > { %v5827_v25 = vcombine.low %v15927_v30, %v5545_v27  ;;  %v5828_v58 = vcombine.high %v15927_v30, %v5545_v27  ;;  %v5843_v38 = vcombine.low %v15923_v29, %v5611_v22  ;;  %v5844_v44 = vcombine.high %v15923_v29, %v5611_v22  ;;  %v5550_v56 = vpop.f32.mrb[96].mxu1  ;;  %v5616_v55 = vpop.f32.mrb[68].mxu0 }
 0xa29   : > { %v5791_v41 = vcombine.low %v5767_v24, %v5783_v4  ;;  %v5792_v18 = vcombine.high %v5767_v24, %v5783_v4  ;;  %v5807_v46 = vcombine.low %v5774_v9, %v5790_v16  ;;  %v5808_v51 = vcombine.high %v5774_v9, %v5790_v16  ;;  %v13099_v10 = vpop.f32.mrb[97].mxu1  ;;  %v13117_v53 = vpop.f32.mrb[69].mxu0 }
 0xa2a   : > { %v5835_v60 = vrot.slane %v5827_v25, %v14681_v39  ;;  %v5842_v14 = vrot.slane %v5828_v58, %v14681_v39  ;;  %v5851_v15 = vrot.slane %v5843_v38, %v14681_v39  ;;  %v5858_v30 = vrot.slane %v5844_v44, %v14681_v39  ;;  %v5553_v36 = vpop.f32.mrb[98].mxu1  ;;  %v5619_v63 = vpop.f32.mrb[70].mxu0 }
 0xa2b   : > { %v5799_v29 = vrot.slane %v5791_v41, %v14684_v42  ;;  %v5806_v32 = vrot.slane %v5792_v18, %v14684_v42  ;;  %v5815_v59 = vrot.slane %v5807_v46, %v14684_v42  ;;  %v5822_v48 = vrot.slane %v5808_v51, %v14684_v42  ;;  %v13100_v3 = vpop.f32.mrb[99].mxu1  ;;  %v13118_v5 = vpop.f32.mrb[71].mxu0 }
 0xa2c   : > { %v5859_v45 = vcombine.low %v5835_v60, %v5851_v15  ;;  %v5860_v28 = vcombine.high %v5835_v60, %v5851_v15  ;;  %v5875_v43 = vcombine.low %v5842_v14, %v5858_v30  ;;  %v5876_v8 = vcombine.high %v5842_v14, %v5858_v30 }
 0xa2d   : > { %v6167_v6 = vcombine.low %v5799_v29, %v5806_v32  ;;  %v12518_v23 = vcombine.high %v5799_v29, %v5806_v32  ;;  %v6183_v37 = vcombine.low %v5815_v59, %v5822_v48  ;;  %v12519_v27 = vcombine.high %v5815_v59, %v5822_v48 }
 0xa2e   : > { %v5867_v22 = vrot.slane %v5859_v45, %v14684_v42  ;;  %v5874_v54 = vrot.slane %v5860_v28, %v14684_v42  ;;  %v5883_v20 = vrot.slane %v5875_v43, %v14684_v42  ;;  %v5890_v57 = vrot.slane %v5876_v8, %v14684_v42 }
 0xa2f   : > { %v16002_v2 = vrot.slane %v6167_v6, %v14681_v39  ;;  %v16005_v26 = vrot.slane %v12518_v23, %v14681_v39  ;;  %v16008_v17 = vrot.slane %v6183_v37, %v14681_v39  ;;  %v16011_v1 = vrot.slane %v12519_v27, %v14681_v39 }
 0xa30   : > { %v6235_v0 = vcombine.low %v5867_v22, %v5874_v54  ;;  %v12520_v33 = vcombine.high %v5867_v22, %v5874_v54  ;;  %v6251_v61 = vcombine.low %v5883_v20, %v5890_v57  ;;  %v12521_v24 = vcombine.high %v5883_v20, %v5890_v57 }
 0xa31   : > { %v5895_v9 = vcombine.low %v15929_v19, %v5550_v56  ;;  %v5896_v4 = vcombine.high %v15929_v19, %v5550_v56  ;;  %v5911_v16 = vcombine.low %v15931_v49, %v5616_v55  ;;  %v5912_v25 = vcombine.high %v15931_v49, %v5616_v55 }
 0xa32   : > { %v16018_v58 = vrot.slane %v6235_v0, %v14681_v39  ;;  %v16021_v38 = vrot.slane %v12520_v33, %v14681_v39  ;;  %v16024_v44 = vrot.slane %v6251_v61, %v14681_v39  ;;  %v16027_v41 = vrot.slane %v12521_v24, %v14681_v39 }
 0xa33   : > { %v5903_v18 = vrot.slane %v5895_v9, %v14681_v39  ;;  %v5910_v19 = vrot.slane %v5896_v4, %v14681_v39  ;;  %v5919_v56 = vrot.slane %v5911_v16, %v14681_v39  ;;  %v5926_v49 = vrot.slane %v5912_v25, %v14681_v39 }
 0xa34   : > { %v5963_v55 = vcombine.low %v15933_v62, %v5553_v36  ;;  %v5964_v46 = vcombine.high %v15933_v62, %v5553_v36  ;;  %v5979_v51 = vcombine.low %v15935_v13, %v5619_v63  ;;  %v5980_v10 = vcombine.high %v15935_v13, %v5619_v63 }
 0xa35   : > { %v5927_v53 = vcombine.low %v5903_v18, %v5919_v56  ;;  %v5928_v60 = vcombine.high %v5903_v18, %v5919_v56  ;;  %v5943_v14 = vcombine.low %v5910_v19, %v5926_v49  ;;  %v5944_v15 = vcombine.high %v5910_v19, %v5926_v49 }
 0xa36   : > { %v5971_v30 = vrot.slane %v5963_v55, %v14681_v39  ;;  %v5978_v29 = vrot.slane %v5964_v46, %v14681_v39  ;;  %v5987_v32 = vrot.slane %v5979_v51, %v14681_v39  ;;  %v5994_v59 = vrot.slane %v5980_v10, %v14681_v39 }
 0xa37   : > { %v5935_v48 = vrot.slane %v5927_v53, %v14684_v42  ;;  %v5942_v62 = vrot.slane %v5928_v60, %v14684_v42  ;;  %v5951_v36 = vrot.slane %v5943_v14, %v14684_v42  ;;  %v5958_v13 = vrot.slane %v5944_v15, %v14684_v42 }
 0xa38   : > { %v5995_v63 = vcombine.low %v5971_v30, %v5987_v32  ;;  %v5996_v3 = vcombine.high %v5971_v30, %v5987_v32  ;;  %v6011_v5 = vcombine.low %v5978_v29, %v5994_v59  ;;  %v6012_v45 = vcombine.high %v5978_v29, %v5994_v59 }
 0xa39   : > { %v6303_v28 = vcombine.low %v5935_v48, %v5942_v62  ;;  %v12522_v43 = vcombine.high %v5935_v48, %v5942_v62  ;;  %v6319_v8 = vcombine.low %v5951_v36, %v5958_v13  ;;  %v12523_v6 = vcombine.high %v5951_v36, %v5958_v13 }
 0xa3a   : > { %v6003_v23 = vrot.slane %v5995_v63, %v14684_v42  ;;  %v6010_v37 = vrot.slane %v5996_v3, %v14684_v42  ;;  %v6019_v27 = vrot.slane %v6011_v5, %v14684_v42  ;;  %v6026_v22 = vrot.slane %v6012_v45, %v14684_v42 }
 0xa3b   : > { %v16050_v54 = vrot.slane %v6303_v28, %v14681_v39  ;;  %v16053_v20 = vrot.slane %v12522_v43, %v14681_v39  ;;  %v16056_v57 = vrot.slane %v6319_v8, %v14681_v39  ;;  %v16059_v0 = vrot.slane %v12523_v6, %v14681_v39 }
 0xa3c   : > { %v6371_v33 = vcombine.low %v6003_v23, %v6010_v37  ;;  %v12524_v61 = vcombine.high %v6003_v23, %v6010_v37  ;;  %v6387_v24 = vcombine.low %v6019_v27, %v6026_v22  ;;  %v12525_v9 = vcombine.high %v6019_v27, %v6026_v22 }
 0xa3d   : > { %v6064_v4 = vcombine.high %v15954_v7, %v15957_v12  ;;  %v6080_v16 = vcombine.high %v15960_v47, %v15963_v52  ;;  %v6132_v25 = vcombine.high %v15970_v40, %v15973_v34  ;;  %v6148_v18 = vcombine.high %v15976_v35, %v15979_v21 }
 0xa3e   : > { %v16070_v19 = vrot.slane %v6371_v33, %v14681_v39  ;;  %v16073_v56 = vrot.slane %v12524_v61, %v14681_v39  ;;  %v16076_v49 = vrot.slane %v6387_v24, %v14681_v39  ;;  %v16079_v55 = vrot.slane %v12525_v9, %v14681_v39 }
 0xa3f   : > { %v6078_v46 = vrot.slane %v6064_v4, %v14684_v42  ;;  %v6094_v51 = vrot.slane %v6080_v16, %v14684_v42  ;;  %v6146_v10 = vrot.slane %v6132_v25, %v14684_v42  ;;  %v6162_v53 = vrot.slane %v6148_v18, %v14684_v42 }
 0xa40   : > { %v6063_v60 = vcombine.low %v15954_v7, %v15957_v12  ;;  %v6079_v14 = vcombine.low %v15960_v47, %v15963_v52  ;;  %v6131_v15 = vcombine.low %v15970_v40, %v15973_v34  ;;  %v6147_v30 = vcombine.low %v15976_v35, %v15979_v21  ;;  %v13592_v47 = vld [vmem:[%s18297_s12 + $0x18] sm:$0xff]  }
 0xa41   : > { %v6097_v29 = vcombine.low %v6078_v46, %v6094_v51  ;;  %v6165_v32 = vcombine.low %v6146_v10, %v6162_v53  ;;  %v6098_v59 = vcombine.high %v6078_v46, %v6094_v51  ;;  %v6166_v48 = vcombine.high %v6146_v10, %v6162_v53  ;;  %13126 = vmatpush3.bf16.msra.mxu1 %v13592_v47 }
 0xa42   : > { %v16094_v62 = vrot.slane %v6063_v60, %v14684_v42  ;;  %v16097_v36 = vrot.slane %v6079_v14, %v14684_v42  ;;  %v16100_v7 = vrot.slane %v6131_v15, %v14684_v42  ;;  %v16103_v12 = vrot.slane %v6147_v30, %v14684_v42  ;;  %13159 = vmatprep.subr.bf16.mxu1 %v18432_v31 }
 0xa43   : > { %v13456_v52 = vpack.i.bf16 %v6165_v32, %v6097_v29  ;;  %v13461_v40 = vpack.i.bf16 %v6166_v48, %v6098_v59  ;;  %v6200_v34 = vcombine.high %v16002_v2, %v16005_v26  ;;  %v6216_v35 = vcombine.high %v16008_v17, %v16011_v1 }
 0xa44   : > { %v6096_v21 = vcombine.high %v16094_v62, %v16097_v36  ;;  %v6164_v13 = vcombine.high %v16100_v7, %v16103_v12  ;;  %v6268_v63 = vcombine.high %v16018_v58, %v16021_v38  ;;  %v6284_v3 = vcombine.high %v16024_v44, %v16027_v41 }
 0xa45   : > { %13457 = vrot.lane.b32.xlu0 %v13456_v52, %s18366_s23  ;;  %v6214_v5 = vrot.slane %v6200_v34, %v14684_v42  ;;  %v6230_v45 = vrot.slane %v6216_v35, %v14684_v42  ;;  %v6199_v28 = vcombine.low %v16002_v2, %v16005_v26  ;;  %v6215_v43 = vcombine.low %v16008_v17, %v16011_v1 }
 0xa46   : > { %v13451_v8 = vpack.i.bf16 %v6164_v13, %v6096_v21  ;;  %v6282_v6 = vrot.slane %v6268_v63, %v14684_v42  ;;  %v6298_v23 = vrot.slane %v6284_v3, %v14684_v42  ;;  %v6267_v37 = vcombine.low %v16018_v58, %v16021_v38 }
 0xa47   : > { %v6234_v27 = vcombine.high %v6214_v5, %v6230_v45  ;;  %v16133_v22 = vrot.slane %v6199_v28, %v14684_v42  ;;  %v16136_v33 = vrot.slane %v6215_v43, %v14684_v42  ;;  %v6283_v2 = vcombine.low %v16024_v44, %v16027_v41 }
 0xa48   : > { %13452 = vrot.lane.b32.xlu1 %v13451_v8, %s18364_s24  ;;  %v6302_v26 = vcombine.high %v6282_v6, %v6298_v23  ;;  %v16142_v17 = vrot.slane %v6267_v37, %v14684_v42  ;;  %v6233_v1 = vcombine.low %v6214_v5, %v6230_v45  ;;  %v6301_v58 = vcombine.low %v6282_v6, %v6298_v23 }
 0xa49   : > { %v6232_v38 = vcombine.high %v16133_v22, %v16136_v33  ;;  %v16147_v61 = vrot.slane %v6283_v2, %v14684_v42  ;;  %v6336_v24 = vcombine.high %v16050_v54, %v16053_v20  ;;  %v6352_v44 = vcombine.high %v16056_v57, %v16059_v0 }
 0xa4a   : > { %v13476_v41 = vpack.i.bf16 %v6302_v26, %v6234_v27  ;;  %v13471_v9 = vpack.i.bf16 %v6301_v58, %v6233_v1  ;;  %v6404_v4 = vcombine.high %v16070_v19, %v16073_v56  ;;  %v6420_v16 = vcombine.high %v16076_v49, %v16079_v55 }
 0xa4b   : > { %v6300_v25 = vcombine.high %v16142_v17, %v16147_v61  ;;  %v6350_v18 = vrot.slane %v6336_v24, %v14684_v42  ;;  %v6366_v46 = vrot.slane %v6352_v44, %v14684_v42  ;;  %v6335_v51 = vcombine.low %v16050_v54, %v16053_v20 }
 0xa4c   : > { %13462 = vrot.lane.b32.xlu1 %v13461_v40, %s14001_s1  ;;  %13477 = vrot.lane.b32.xlu0 %v13476_v41, %s14001_s1  ;;  %v6418_v10 = vrot.slane %v6404_v4, %v14684_v42  ;;  %v6434_v53 = vrot.slane %v6420_v16, %v14684_v42  ;;  %v6351_v60 = vcombine.low %v16056_v57, %v16059_v0 }
 0xa4d   : > { %v13466_v14 = vpack.i.bf16 %v6300_v25, %v6232_v38  ;;  %v6369_v15 = vcombine.low %v6350_v18, %v6366_v46  ;;  %v16170_v30 = vrot.slane %v6335_v51, %v14684_v42  ;;  %v6403_v29 = vcombine.low %v16070_v19, %v16073_v56 }
 0xa4e   : > { %v6437_v54 = vcombine.low %v6418_v10, %v6434_v53  ;;  %v16175_v20 = vrot.slane %v6351_v60, %v14684_v42  ;;  %v6419_v32 = vcombine.low %v16076_v49, %v16079_v55  ;;  %v6370_v59 = vcombine.high %v6350_v18, %v6366_v46 }
 0xa4f   : > { %v6411_v48 = vrot.slane %v6403_v29, %v14684_v42  ;;  %v6438_v47 = vcombine.high %v6418_v10, %v6434_v53  ;;  %v6095_v57 = vcombine.low %v16094_v62, %v16097_v36  ;;  %v6163_v0 = vcombine.low %v16100_v7, %v16103_v12 }
 0xa50   : > { %13467 = vrot.lane.b32.xlu1 %v13466_v14, %s18364_s24  ;;  %v13486_v19 = vpack.i.bf16 %v6437_v54, %v6369_v15  ;;  %v6368_v56 = vcombine.high %v16170_v30, %v16175_v20  ;;  %v6427_v52 = vrot.slane %v6419_v32, %v14684_v42  ;;  %v6231_v49 = vcombine.low %v16133_v22, %v16136_v33 }
 0xa51   : > { %v13491_v55 = vpack.i.bf16 %v6438_v47, %v6370_v59  ;;  %v6299_v40 = vcombine.low %v16142_v17, %v16147_v61  ;;  %v6367_v62 = vcombine.low %v16170_v30, %v16175_v20 }
 0xa52   : > { %13487 = vrot.lane.b32.xlu0 %v13486_v19, %s18366_s23  ;;  %v6436_v36 = vcombine.high %v6411_v48, %v6427_v52  ;;  %v6435_v7 = vcombine.low %v6411_v48, %v6427_v52 }
 0xa54   : > { %13472 = vrot.lane.b32.xlu1 %v13471_v9, %s18366_s23  ;;  %v13481_v12 = vpack.i.bf16 %v6436_v36, %v6368_v56  ;;  %s18501_s23 = smov 80  }
 0xa58   : > { %13482 = vrot.lane.b32.xlu1 %v13481_v12, %s18364_s24 }
 0xa5c   : > { %13492 = vrot.lane.b32.xlu1 %v13491_v55, %s14001_s1  ;;  %v18482_v55 = vld [vmem:[#allocation13_spill] sm:$0xff] }
 0xab7   : > { %v13458_v34 = vpop.permute.xlu0 %13457 }
 0xab8   : > { %v13460_v63 = vunpack.i.h.bf16 %v13458_v34  ;;  %v13459_v3 = vunpack.i.l.bf16 %v13458_v34 }
 0xaba   : > { %v13453_v35 = vpop.permute.xlu1 %13452 }
 0xabb   : > { %v13455_v21 = vunpack.i.h.bf16 %v13453_v35  ;;  %v13454_v13 = vunpack.i.l.bf16 %v13453_v35 }
 0xabd   : > { %v6512_v5 = vsel %vm1520_vm4, %v6163_v0, %v13455_v21  ;;  %v6511_v45 = vsel %vm1520_vm4, %v6095_v57, %v13454_v13  ;;  %v12526_v0 = vld [vmem:[%s18298_s13] ss:$0 sm:$0xff] }
 0xabe   : > { %v13463_v28 = vpop.permute.xlu1 %13462  ;;  %v6517_v6 = vsel %vm929_vm1, %v6511_v45, %v13459_v3  ;;  %v6518_v23 = vsel %vm929_vm1, %v6512_v5, %v13460_v63  ;;  %v13478_v17 = vpop.permute.xlu0 %13477  ;;  %v18484_v5 = vld [vmem:[#allocation15_spill] sm:$0xff] }
 0xabf   : > { %v13465_v43 = vunpack.i.h.bf16 %v13463_v28  ;;  %v13464_v8 = vunpack.i.l.bf16 %v13463_v28  ;;  %v13480_v61 = vunpack.i.h.bf16 %v13478_v17  ;;  %v13479_v24 = vunpack.i.l.bf16 %v13478_v17 }
 0xac1   : > { %v6523_v37 = vsel %vm5082_vm6, %v6517_v6, %v13464_v8  ;;  %v6524_v27 = vsel %vm5082_vm6, %v6518_v23, %v13465_v43  ;;  %v18485_v8 = vld [vmem:[#allocation16_spill] sm:$0xff] }
 0xac2   : > { %v6529_v22 = vpack.c.bf16 %v6524_v27, %v6523_v37  ;;  %v13468_v33 = vpop.permute.xlu1 %13467 }
 0xac3   : > { %v13470_v2 = vunpack.i.h.bf16 %v13468_v33  ;;  %v13469_v26 = vunpack.i.l.bf16 %v13468_v33 }
 0xac4   : > { %13128 = vmatmul.mubr.msk.bf16.vlgmr.msra.gmra.mrb[100].mxu1 %vm812_vm2, %v6529_v22  ;;  %v13488_v16 = vpop.permute.xlu0 %13487 }
 0xac5   : > { %13131 = vmatprep.mubr.msk.bf16.mxu1 %vm13999_vm0, %v18432_v31  ;;  %v6514_v44 = vsel %vm1520_vm4, %v6299_v40, %v13470_v2  ;;  %v6513_v41 = vsel %vm1520_vm4, %v6231_v49, %v13469_v26  ;;  %v13490_v60 = vunpack.i.h.bf16 %v13488_v16  ;;  %v13489_v14 = vunpack.i.l.bf16 %v13488_v16  ;;  %v18486_v26 = vld [vmem:[#allocation17_spill] sm:$0xff] }
 0xac6   : > { %v13473_v1 = vpop.permute.xlu1 %13472 }
 0xac7   : > { %v13475_v58 = vunpack.i.h.bf16 %v13473_v1  ;;  %v13474_v38 = vunpack.i.l.bf16 %v13473_v1 }
 0xac9   : > { %v6519_v9 = vsel %vm929_vm1, %v6513_v41, %v13474_v38  ;;  %v6520_v4 = vsel %vm929_vm1, %v6514_v44, %v13475_v58  ;;  %v18487_v38 = vld [vmem:[#allocation18_spill] sm:$0xff] }
 0xaca   : > { %v13483_v25 = vpop.permute.xlu1 %13482  ;;  %v6525_v18 = vsel %vm5082_vm6, %v6519_v9, %v13479_v24  ;;  %v6526_v46 = vsel %vm5082_vm6, %v6520_v4, %v13480_v61 }
 0xacb   : > { %v13485_v51 = vunpack.i.h.bf16 %v13483_v25  ;;  %v13484_v10 = vunpack.i.l.bf16 %v13483_v25  ;;  %v6530_v53 = vpack.c.bf16 %v6526_v46, %v6525_v18 }
 0xacd   : > { %v6516_v15 = vsel %vm1520_vm4, %v6435_v7, %v13485_v51  ;;  %v6515_v30 = vsel %vm1520_vm4, %v6367_v62, %v13484_v10  ;;  %13132 = vmatmul.mubr.msk.bf16.gmra.mrb[104].mxu1 %vm812_vm2, %v6530_v53  ;;  %v18483_v7 = vld [vmem:[#allocation14_spill] sm:$0xff] }
 0xace   : > { %v13493_v29 = vpop.permute.xlu1 %13492  ;;  %13135 = vmatprep.mubr.msk.bf16.mxu1 %vm13999_vm0, %v18432_v31  ;;  %v6521_v32 = vsel %vm929_vm1, %v6515_v30, %v13489_v14  ;;  %v6522_v59 = vsel %vm929_vm1, %v6516_v15, %v13490_v60 }
 0xacf   : > { %v13495_v54 = vunpack.i.h.bf16 %v13493_v29  ;;  %v13494_v20 = vunpack.i.l.bf16 %v13493_v29 }
 0xad1   : > { %v6527_v48 = vsel %vm5082_vm6, %v6521_v32, %v13494_v20  ;;  %v6528_v47 = vsel %vm5082_vm6, %v6522_v59, %v13495_v54 }
 0xad2   : > { %v6531_v57 = vpack.c.bf16 %v6528_v47, %v6527_v48 }
 0xad5   : > { %13136 = vmatmul.mubr.msk.bf16.gmra.mrb[108].mxu1 %vm812_vm2, %v6531_v57 }
 0xad6   : > { %13175 = vmatprep.mubr.msk.bf16.mxu1 %vm13999_vm0, %v18432_v31 }
 0xb97   : > { %v6614_v19 = vpop.f32.mrb[100].mxu1 }
 0xb98   : > { %v6615_v56 = vadd.f32 %v12526_v0, %v6614_v19  ;;  %v13129_v52 = vpop.f32.mrb[101].mxu1 }
 0xb99   : > { %v6617_v49 = vpop.f32.mrb[102].mxu1 }
 0xb9a   : > { %v16229_v40 = vadd.f32 %v6615_v56, %v18482_v55  ;;  %v6618_v62 = vadd.f32 %v12526_v0, %v6617_v49  ;;  %v13130_v36 = vpop.f32.mrb[103].mxu1 }
 0xb9c   : > { %v16232_v12 = vadd.f32 %v6618_v62, %v18483_v7  ;;  %v6645_v34 = vsel %vm812_vm2, %v16229_v40, 0.0  ;;  %v13593_v7 = vld [vmem:[%s18301_s16] sm:$0xff]  }
 0xb9d   : > { %6646 = vadd.xlane.f32.xlu0 %v6645_v34  ;;  %13140 = vmatpush3.bf16.msra.mxu0 %v13593_v7  ;;  %v13594_v34 = vld [vmem:[%s18301_s16 + $0x8] sm:$0xff]   ;;  %v18488_v7 = vmov 0  }
 0xb9e   : > { %v6648_v35 = vsel %vm812_vm2, %v16232_v12, 0.0  ;;  %13141 = vmatprep.subr.bf16.mxu0 %v18432_v31 }
 0xb9f   : > { %6649 = vadd.xlane.f32.xlu1 %v6648_v35  ;;  %v13595_v35 = vld [vmem:[%s18301_s16 + $0x10] sm:$0xff]  }
 0xba0   : > { %v6622_v21 = vpop.f32.mrb[104].mxu1 }
 0xba1   : > { %v6623_v13 = vadd.f32 %v12526_v0, %v6622_v21  ;;  %v13133_v63 = vpop.f32.mrb[105].mxu1  ;;  %13142 = vmatpush3.bf16.msra.mxu0 %v13594_v34  ;;  %v13596_v21 = vld [vmem:[%s18301_s16 + $0x18] sm:$0xff]   ;;  %v13599_v34 = vld [vmem:[%s18303_s18 + $0x10] sm:$0xff]  }
 0xba2   : > { %v6625_v3 = vpop.f32.mrb[106].mxu1  ;;  %13143 = vmatprep.subr.bf16.mxu0 %v18432_v31 }
 0xba3   : > { %v16239_v45 = vadd.f32 %v6623_v13, %v18484_v5  ;;  %v6626_v28 = vadd.f32 %v12526_v0, %v6625_v3  ;;  %v13134_v43 = vpop.f32.mrb[107].mxu1 }
 0xba5   : > { %v16242_v6 = vadd.f32 %v6626_v28, %v18485_v8  ;;  %v6651_v23 = vsel %vm812_vm2, %v16239_v45, 0.0  ;;  %13144 = vmatpush3.bf16.msra.mxu0 %v13595_v35  ;;  %v13600_v35 = vld [vmem:[%s18303_s18 + $0x18] sm:$0xff]  }
 0xba6   : > { %6652 = vadd.xlane.f32.xlu0 %v6651_v23  ;;  %13145 = vmatprep.subr.bf16.mxu0 %v18432_v31 }
 0xba7   : > { %v6654_v33 = vsel %vm812_vm2, %v16242_v6, 0.0 }
 0xba8   : > { %v6630_v37 = vpop.f32.mrb[108].mxu1 }
 0xba9   : > { %v6631_v27 = vadd.f32 %v12526_v0, %v6630_v37  ;;  %v13137_v22 = vpop.f32.mrb[109].mxu1  ;;  %13146 = vmatpush3.bf16.msra.mxu0 %v13596_v21  ;;  %v13601_v21 = vld [vmem:[%s18303_s18 + $0x20] sm:$0xff]  }
 0xbaa   : > { %6655 = vadd.xlane.f32.xlu0 %v6654_v33  ;;  %v6633_v2 = vpop.f32.mrb[110].mxu1 }
 0xbab   : > { %v16249_v17 = vadd.f32 %v6631_v27, %v18486_v26  ;;  %v6634_v1 = vadd.f32 %v12526_v0, %v6633_v2  ;;  %v13138_v58 = vpop.f32.mrb[111].mxu1  ;;  %v12534_v2 = vld [vmem:[%s18299_s14] ss:$0 sm:$0xff] }
 0xbad   : > { %v16252_v61 = vadd.f32 %v6634_v1, %v18487_v38  ;;  %v6657_v24 = vsel %vm812_vm2, %v16249_v17, 0.0 }
 0xbae   : > { %6658 = vadd.xlane.f32.xlu0 %v6657_v24 }
 0xbaf   : > { %v6660_v44 = vsel %vm812_vm2, %v16252_v61, 0.0 }
 0xbb0   : > { %6661 = vadd.xlane.f32.xlu1 %v6660_v44 }
 0xc2a   : > { %v6647_v41 = vpop.xlane.xlu0 %6646 }
 0xc2b   : > { %v6663_v9 = vmul.f32 0.015625, %v6647_v41 }
 0xc2c   : > { %v6650_v4 = vpop.xlane.xlu1 %6649 }
 0xc2d   : > { %v6669_v16 = vsub.f32 %v16229_v40, %v6663_v9  ;;  %v6664_v25 = vmul.f32 0.015625, %v6650_v4  ;;  %v12535_v9 = vld [vmem:[%s18300_s15] ss:$0 sm:$0xff] }
 0xc2f   : > { %v16260_v18 = vsub.f32 %v16232_v12, %v6664_v25  ;;  %v6675_v46 = vmul.f32 %v6669_v16, %v6669_v16 }
 0xc31   : > { %v6681_v51 = vsel %vm812_vm2, %v6675_v46, 0.0  ;;  %v6676_v10 = vmul.f32 %v16260_v18, %v16260_v18 }
 0xc32   : > { %6682 = vadd.xlane.f32.xlu0 %v6681_v51 }
 0xc33   : > { %v6653_v53 = vpop.xlane.xlu0 %6652  ;;  %v6684_v60 = vsel %vm812_vm2, %v6676_v10, 0.0 }
 0xc34   : > { %v6665_v14 = vmul.f32 0.015625, %v6653_v53  ;;  %6685 = vadd.xlane.f32.xlu1 %v6684_v60 }
 0xc36   : > { %v16267_v15 = vsub.f32 %v16239_v45, %v6665_v14 }
 0xc37   : > { %v6656_v30 = vpop.xlane.xlu0 %6655 }
 0xc38   : > { %v6666_v29 = vmul.f32 0.015625, %v6656_v30  ;;  %v6677_v54 = vmul.f32 %v16267_v15, %v16267_v15 }
 0xc3a   : > { %v16272_v20 = vsub.f32 %v16242_v6, %v6666_v29  ;;  %v6687_v32 = vsel %vm812_vm2, %v6677_v54, 0.0 }
 0xc3b   : > { %6688 = vadd.xlane.f32.xlu0 %v6687_v32  ;;  %v6659_v59 = vpop.xlane.xlu0 %6658 }
 0xc3c   : > { %v6667_v48 = vmul.f32 0.015625, %v6659_v59  ;;  %v6678_v47 = vmul.f32 %v16272_v20, %v16272_v20 }
 0xc3d   : > { %v6662_v57 = vpop.xlane.xlu1 %6661 }
 0xc3e   : > { %v16278_v0 = vsub.f32 %v16249_v17, %v6667_v48  ;;  %v6668_v19 = vmul.f32 0.015625, %v6662_v57  ;;  %v6690_v56 = vsel %vm812_vm2, %v6678_v47, 0.0 }
 0xc3f   : > { %6691 = vadd.xlane.f32.xlu1 %v6690_v56 }
 0xc40   : > { %v16282_v52 = vsub.f32 %v16252_v61, %v6668_v19  ;;  %v6679_v49 = vmul.f32 %v16278_v0, %v16278_v0 }
 0xc42   : > { %v6693_v55 = vsel %vm812_vm2, %v6679_v49, 0.0  ;;  %v6680_v62 = vmul.f32 %v16282_v52, %v16282_v52 }
 0xc43   : > { %6694 = vadd.xlane.f32.xlu0 %v6693_v55 }
 0xc44   : > { %v6696_v36 = vsel %vm812_vm2, %v6680_v62, 0.0 }
 0xc45   : > { %6697 = vadd.xlane.f32.xlu1 %v6696_v36 }
 0xcbf   : > { %v6683_v13 = vpop.xlane.xlu0 %6682 }
 0xcc0   : > { %v6699_v63 = vmul.f32 0.015625, %v6683_v13  ;;  %v13602_v13 = vld [vmem:[%s18303_s18 + $0x28] sm:$0xff]  }
 0xcc1   : > { %v6686_v3 = vpop.xlane.xlu1 %6685 }
 0xcc2   : > { %v6705_v5 = vadd.f32 1e-05, %v6699_v63  ;;  %v6700_v28 = vmul.f32 0.015625, %v6686_v3  ;;  %v13603_v63 = vld [vmem:[%s18303_s18 + $0x30] sm:$0xff]   ;;  %v13604_v3 = vld [vmem:[%s18303_s18 + $0x38] sm:$0xff]  }
 0xcc4   : > { %13777 = vrsqrt.f32 %v6705_v5  ;;  %v6706_v43 = vadd.f32 1e-05, %v6700_v28  ;;  %v12536_v5 = vld [vmem:[%s18302_s17] ss:$0 sm:$0xff] }
 0xcc6   : > { %13779 = vrsqrt.f32 %v6706_v43 }
 0xcc8   : > { %v6689_v8 = vpop.xlane.xlu0 %6688 }
 0xcc9   : > { %v6701_v23 = vmul.f32 0.015625, %v6689_v8 }
 0xccb   : > { %v6707_v37 = vadd.f32 1e-05, %v6701_v23 }
 0xccc   : > { %v6692_v27 = vpop.xlane.xlu1 %6691 }
 0xccd   : > { %13781 = vrsqrt.f32 %v6707_v37  ;;  %v6702_v22 = vmul.f32 0.015625, %v6692_v27 }
 0xcce   : > { %v13778_v33 = vpop.eup %13777 }
 0xccf   : > { %v6717_v26 = vmul.f32 %v13778_v33, %v6669_v16  ;;  %v6708_v1 = vadd.f32 1e-05, %v6702_v22 }
 0xcd0   : > { %v13780_v58 = vpop.eup %13779  ;;  %v6695_v38 = vpop.xlane.xlu0 %6694 }
 0xcd1   : > { %v6729_v24 = vmul.f32 %v12534_v2, %v6717_v26  ;;  %v6718_v44 = vmul.f32 %v13780_v58, %v16260_v18  ;;  %13783 = vrsqrt.f32 %v6708_v1  ;;  %v6703_v41 = vmul.f32 0.015625, %v6695_v38 }
 0xcd2   : > { %v6698_v4 = vpop.xlane.xlu1 %6697 }
 0xcd3   : > { %v6730_v25 = vmul.f32 %v12534_v2, %v6718_v44  ;;  %v6709_v46 = vadd.f32 1e-05, %v6703_v41  ;;  %v6704_v51 = vmul.f32 0.015625, %v6698_v4  ;;  %v6741_v10 = vadd.f32 %v12535_v9, %v6729_v24 }
 0xcd5   : > { %v6742_v53 = vadd.f32 %v12535_v9, %v6730_v25  ;;  %13785 = vrsqrt.f32 %v6709_v46  ;;  %v6710_v16 = vadd.f32 1e-05, %v6704_v51 }
 0xcd7   : > { %v13782_v60 = vpop.eup %13781  ;;  %13787 = vrsqrt.f32 %v6710_v16  ;;  %v6747_v14 = vpack.c.bf16 %v6742_v53, %v6741_v10 }
 0xcd8   : > { %v6719_v30 = vmul.f32 %v13782_v60, %v16267_v15 }
 0xcd9   : > { %13148 = vmatmul.mubr.msk.bf16.vlgmr.msra.gmra.mrb[72].mxu0 %vm812_vm2, %v6747_v14 }
 0xcda   : > { %13151 = vmatprep.mubr.msk.bf16.mxu0 %vm13999_vm0, %v18432_v31  ;;  %v6731_v54 = vmul.f32 %v12534_v2, %v6719_v30 }
 0xcdb   : > { %v13784_v18 = vpop.eup %13783 }
 0xcdc   : > { %v6720_v29 = vmul.f32 %v13784_v18, %v16272_v20  ;;  %v6743_v48 = vadd.f32 %v12535_v9, %v6731_v54 }
 0xcde   : > { %v6732_v32 = vmul.f32 %v12534_v2, %v6720_v29 }
 0xcdf   : > { %v13786_v59 = vpop.eup %13785 }
 0xce0   : > { %v6744_v47 = vadd.f32 %v12535_v9, %v6732_v32  ;;  %v6721_v57 = vmul.f32 %v13786_v59, %v16278_v0  ;;  %v13597_v0 = vld [vmem:[%s18303_s18] sm:$0xff]  }
 0xce1   : > { %v13788_v19 = vpop.eup %13787  ;;  %13160 = vmatpush3.bf16.msra.mxu1 %v13597_v0 }
 0xce2   : > { %v6748_v56 = vpack.c.bf16 %v6744_v47, %v6743_v48  ;;  %v6722_v49 = vmul.f32 %v13788_v19, %v16282_v52  ;;  %v6733_v15 = vmul.f32 %v12534_v2, %v6721_v57  ;;  %v13598_v52 = vld [vmem:[%s18303_s18 + $0x8] sm:$0xff]   ;;  %13161 = vmatprep.subr.bf16.mxu1 %v18432_v31 }
 0xce4   : > { %13152 = vmatmul.mubr.msk.bf16.gmra.mrb[76].mxu0 %vm812_vm2, %v6748_v56  ;;  %v6734_v55 = vmul.f32 %v12534_v2, %v6722_v49  ;;  %v6745_v20 = vadd.f32 %v12535_v9, %v6733_v15 }
 0xce5   : > { %13155 = vmatprep.mubr.msk.bf16.mxu0 %vm13999_vm0, %v18432_v31  ;;  %13162 = vmatpush3.bf16.msra.mxu1 %v13598_v52 }
 0xce6   : > { %v6746_v62 = vadd.f32 %v12535_v9, %v6734_v55  ;;  %13163 = vmatprep.subr.bf16.mxu1 %v18432_v31 }
 0xce8   : > { %v6749_v36 = vpack.c.bf16 %v6746_v62, %v6745_v20 }
 0xce9   : > { %13164 = vmatpush3.bf16.msra.mxu1 %v13599_v34 }
 0xcea   : > { %13165 = vmatprep.subr.bf16.mxu1 %v18432_v31 }
 0xcec   : > { %13156 = vmatmul.mubr.msk.bf16.gmra.mrb[80].mxu0 %vm812_vm2, %v6749_v36 }
 0xced   : > { %7258 = vmatprep.mubr.bf16.mxu0 %v18488_v7  ;;  %13166 = vmatpush3.bf16.msra.mxu1 %v13600_v35 }
 0xcee   : > { %13167 = vmatprep.subr.bf16.mxu1 %v18432_v31 }
 0xcf1   : > { %13168 = vmatpush3.bf16.msra.mxu1 %v13601_v21 }
 0xcf2   : > { %13169 = vmatprep.subr.bf16.mxu1 %v18432_v31 }
 0xcf5   : > { %13170 = vmatpush3.bf16.msra.mxu1 %v13602_v13 }
 0xcf6   : > { %13171 = vmatprep.subr.bf16.mxu1 %v18432_v31 }
 0xcf9   : > { %13172 = vmatpush3.bf16.msra.mxu1 %v13603_v63 }
 0xcfa   : > { %13173 = vmatprep.subr.bf16.mxu1 %v18432_v31 }
 0xcfd   : > { %13174 = vmatpush3.bf16.msra.mxu1 %v13604_v3 }
 0xcfe   : > { %13205 = vmatprep.subr.bf16.mxu1 %v18432_v31 }
 0xdac   : > { %v6832_v28 = vpop.f32.mrb[72].mxu0 }
 0xdad   : > { %v6833_v43 = vadd.f32 %v12536_v5, %v6832_v28  ;;  %v13149_v8 = vpop.f32.mrb[73].mxu0 }
 0xdae   : > { %v6835_v23 = vpop.f32.mrb[74].mxu0 }
 0xdaf   : > { %v6855_v37 = vmul.f32 %v6833_v43, %v6833_v43  ;;  %v6836_v27 = vadd.f32 %v12536_v5, %v6835_v23  ;;  %v13150_v22 = vpop.f32.mrb[75].mxu0 }
 0xdb1   : > { %v6861_v33 = vmul.f32 %v6855_v37, %v6833_v43  ;;  %v6856_v2 = vmul.f32 %v6836_v27, %v6836_v27 }
 0xdb3   : > { %v6867_v26 = vmul.f32 0.044715, %v6861_v33  ;;  %v6862_v1 = vmul.f32 %v6856_v2, %v6836_v27 }
 0xdb5   : > { %v6873_v58 = vadd.f32 %v6867_v26, %v6833_v43  ;;  %v6868_v38 = vmul.f32 0.044715, %v6862_v1 }
 0xdb7   : > { %v6879_v24 = vmul.f32 0.7978846, %v6873_v58  ;;  %v6874_v44 = vadd.f32 %v6868_v38, %v6836_v27  ;;  %v6840_v41 = vpop.f32.mrb[76].mxu0 }
 0xdb8   : > { %v6841_v9 = vadd.f32 %v12536_v5, %v6840_v41  ;;  %v13153_v4 = vpop.f32.mrb[77].mxu0 }
 0xdb9   : > { %13789 = vtanh.f32 %v6879_v24  ;;  %v6880_v25 = vmul.f32 0.7978846, %v6874_v44  ;;  %v6843_v46 = vpop.f32.mrb[78].mxu0 }
 0xdba   : > { %v6857_v51 = vmul.f32 %v6841_v9, %v6841_v9  ;;  %v6844_v10 = vadd.f32 %v12536_v5, %v6843_v46  ;;  %v13154_v53 = vpop.f32.mrb[79].mxu0 }
 0xdbb   : > { %13791 = vtanh.f32 %v6880_v25 }
 0xdbc   : > { %v6863_v16 = vmul.f32 %v6857_v51, %v6841_v9  ;;  %v6858_v60 = vmul.f32 %v6844_v10, %v6844_v10 }
 0xdbe   : > { %v6869_v14 = vmul.f32 0.044715, %v6863_v16  ;;  %v6864_v30 = vmul.f32 %v6858_v60, %v6844_v10 }
 0xdbf   : > { %v6848_v18 = vpop.f32.mrb[80].mxu0 }
 0xdc0   : > { %v6875_v29 = vadd.f32 %v6869_v14, %v6841_v9  ;;  %v6870_v54 = vmul.f32 0.044715, %v6864_v30  ;;  %v6849_v32 = vadd.f32 %v12536_v5, %v6848_v18  ;;  %v13157_v59 = vpop.f32.mrb[81].mxu0 }
 0xdc1   : > { %v6851_v48 = vpop.f32.mrb[82].mxu0 }
 0xdc2   : > { %v6881_v47 = vmul.f32 0.7978846, %v6875_v29  ;;  %v6876_v57 = vadd.f32 %v6870_v54, %v6844_v10  ;;  %v6859_v19 = vmul.f32 %v6849_v32, %v6849_v32  ;;  %v6852_v56 = vadd.f32 %v12536_v5, %v6851_v48  ;;  %v13158_v49 = vpop.f32.mrb[83].mxu0 }
 0xdc3   : > { %v13790_v15 = vpop.eup %13789 }
 0xdc4   : > { %v6891_v55 = vadd.f32 1.0, %v13790_v15  ;;  %13793 = vtanh.f32 %v6881_v47  ;;  %v6882_v62 = vmul.f32 0.7978846, %v6876_v57  ;;  %v6865_v20 = vmul.f32 %v6859_v19, %v6849_v32 }
 0xdc5   : > { %v13792_v36 = vpop.eup %13791  ;;  %v6860_v0 = vmul.f32 %v6852_v56, %v6852_v56 }
 0xdc6   : > { %v6897_v52 = vmul.f32 0.5, %v6891_v55  ;;  %v6892_v34 = vadd.f32 1.0, %v13792_v36  ;;  %13795 = vtanh.f32 %v6882_v62  ;;  %v6871_v35 = vmul.f32 0.044715, %v6865_v20 }
 0xdc7   : > { %v6866_v21 = vmul.f32 %v6860_v0, %v6852_v56 }
 0xdc8   : > { %v6898_v13 = vmul.f32 0.5, %v6892_v34  ;;  %v6877_v63 = vadd.f32 %v6871_v35, %v6849_v32  ;;  %v6903_v28 = vmul.f32 %v6897_v52, %v6833_v43 }
 0xdc9   : > { %v6872_v3 = vmul.f32 0.044715, %v6866_v21 }
 0xdca   : > { %v6904_v8 = vmul.f32 %v6898_v13, %v6836_v27  ;;  %v6883_v23 = vmul.f32 0.7978846, %v6877_v63 }
 0xdcb   : > { %v6878_v5 = vadd.f32 %v6872_v3, %v6852_v56 }
 0xdcc   : > { %v6909_v37 = vpack.c.bf16 %v6904_v8, %v6903_v28  ;;  %13797 = vtanh.f32 %v6883_v23 }
 0xdcd   : > { %v6884_v22 = vmul.f32 0.7978846, %v6878_v5 }
 0xdce   : > { %v13794_v33 = vpop.eup %13793  ;;  %13176 = vmatmul.mubr.bf16.vlgmr.msra.gmra.mrb[112].mxu1 %v6909_v37 }
 0xdcf   : > { %13799 = vtanh.f32 %v6884_v22  ;;  %13179 = vmatprep.mubr.msk.bf16.mxu1 %vm13999_vm0, %v18432_v31  ;;  %v6893_v2 = vadd.f32 1.0, %v13794_v33 }
 0xdd0   : > { %v13796_v26 = vpop.eup %13795 }
 0xdd1   : > { %v6894_v1 = vadd.f32 1.0, %v13796_v26  ;;  %v6899_v58 = vmul.f32 0.5, %v6893_v2 }
 0xdd3   : > { %v6900_v38 = vmul.f32 0.5, %v6894_v1  ;;  %v6905_v24 = vmul.f32 %v6899_v58, %v6841_v9  ;;  %v12544_v9 = vld [vmem:[%s18304_s19] ss:$0 sm:$0xff] }
 0xdd5   : > { %v6906_v44 = vmul.f32 %v6900_v38, %v6844_v10 }
 0xdd6   : > { %v13798_v43 = vpop.eup %13797 }
 0xdd7   : > { %v6910_v27 = vpack.c.bf16 %v6906_v44, %v6905_v24  ;;  %v6895_v41 = vadd.f32 1.0, %v13798_v43 }
 0xdd9   : > { %v13800_v4 = vpop.eup %13799  ;;  %13180 = vmatmul.mubr.bf16.gmra.mrb[116].mxu1 %v6910_v27  ;;  %v6901_v46 = vmul.f32 0.5, %v6895_v41 }
 0xdda   : > { %13183 = vmatprep.mubr.msk.bf16.mxu1 %vm13999_vm0, %v18432_v31  ;;  %v6896_v25 = vadd.f32 1.0, %v13800_v4 }
 0xddb   : > { %v6907_v53 = vmul.f32 %v6901_v46, %v6849_v32 }
 0xddc   : > { %v6902_v51 = vmul.f32 0.5, %v6896_v25 }
 0xdde   : > { %v6908_v16 = vmul.f32 %v6902_v51, %v6852_v56 }
 0xde0   : > { %v6911_v60 = vpack.c.bf16 %v6908_v16, %v6907_v53 }
 0xde2   : > { %13184 = vmatmul.mubr.bf16.gmra.mrb[120].mxu1 %v6911_v60 }
 0xde3   : > { %13211 = vmatprep.mubr.msk.bf16.mxu1 %vm13999_vm0, %v18432_v31 }
 0xea1   : > { %v7017_v10 = vpop.f32.mrb[112].mxu1 }
 0xea2   : > { %v7018_v14 = vadd.f32 %v12544_v9, %v7017_v10  ;;  %v13177_v30 = vpop.f32.mrb[113].mxu1 }
 0xea3   : > { %v7020_v18 = vpop.f32.mrb[114].mxu1  ;;  %v13605_v30 = vld [vmem:[%s18295_s10 + $0x40] ss:$8 sps:$4 sm:$0xff]  }
 0xea4   : > { %v16369_v29 = vadd.f32 %v7018_v14, %v16229_v40  ;;  %v7021_v54 = vadd.f32 %v12544_v9, %v7020_v18  ;;  %v13178_v59 = vpop.f32.mrb[115].mxu1  ;;  %v13607_v18 = vld [vmem:[%s18295_s10 + $0x44] ss:$8 sps:$4 sm:$0xff]  }
 0xea5   : > { %7226 = vmatprep.subr.bf16.mxu0 %v13607_v18  ;;  %v13608_v59 = vld [vmem:[%s18295_s10 + $0x50] ss:$8 sps:$4 sm:$0xff]  }
 0xea6   : > { %18489 = vst [vmem:[#allocation19_spill] sm:$0xff] %v16369_v29  ;;  %v16372_v32 = vadd.f32 %v7021_v54, %v16232_v12  ;;  %v7050_v48 = vsel %vm812_vm2, %v16369_v29, 0.0  ;;  %v13610_v54 = vld [vmem:[%s18295_s10 + $0x54] ss:$8 sps:$4 sm:$0xff]   ;;  %7227 = vmatpush1.bf16.msra.mxu0 %v13605_v30 }
 0xea7   : > { %7051 = vadd.xlane.f32.xlu0 %v7050_v48  ;;  %7228 = vmatprep.subr.bf16.mxu0 %v13610_v54  ;;  %v13613_v48 = vld [vmem:[%s18295_s10 + $0x64] ss:$8 sps:$4 sm:$0xff]  }
 0xea8   : > { %18490 = vst [vmem:[#allocation21_spill] sm:$0xff] %v16372_v32  ;;  %v7053_v47 = vsel %vm812_vm2, %v16372_v32, 0.0 }
 0xea9   : > { %7054 = vadd.xlane.f32.xlu1 %v7053_v47  ;;  %v13611_v47 = vld [vmem:[%s18295_s10 + $0x60] ss:$8 sps:$4 sm:$0xff]  }
 0xeaa   : > { %7229 = vmatpush1.bf16.msra.mxu0 %v13608_v59 }
 0xeab   : > { %7230 = vmatprep.subr.bf16.mxu0 %v13613_v48 }
 0xeac   : > { %v7025_v57 = vpop.f32.mrb[116].mxu1 }
 0xead   : > { %v7026_v19 = vadd.f32 %v12544_v9, %v7025_v57  ;;  %v13181_v56 = vpop.f32.mrb[117].mxu1  ;;  %v13616_v57 = vld [vmem:[%s18295_s10 + $0x74] ss:$8 sps:$4 sm:$0xff]  }
 0xeae   : > { %v7028_v49 = vpop.f32.mrb[118].mxu1  ;;  %7231 = vmatpush1.bf16.msra.mxu0 %v13611_v47  ;;  %v18495_v47 = vld [vmem:[#allocation12_spill] sm:$0xff] }
 0xeaf   : > { %v16379_v40 = vadd.f32 %v7026_v19, %v16239_v45  ;;  %v7029_v15 = vadd.f32 %v12544_v9, %v7028_v49  ;;  %v13182_v55 = vpop.f32.mrb[119].mxu1  ;;  %v13614_v19 = vld [vmem:[%s18295_s10 + $0x70] ss:$8 sps:$4 sm:$0xff]   ;;  %7232 = vmatprep.subr.bf16.mxu0 %v13616_v57 }
 0xeb1   : > { %18491 = vst [vmem:[#allocation26_spill] sm:$0xff] %v16379_v40  ;;  %v16382_v12 = vadd.f32 %v7029_v15, %v16242_v6  ;;  %v7056_v62 = vsel %vm812_vm2, %v16379_v40, 0.0 }
 0xeb2   : > { %7057 = vadd.xlane.f32.xlu0 %v7056_v62  ;;  %7233 = vmatpush1.bf16.msra.mxu0 %v13614_v19 }
 0xeb3   : > { %18492 = vst [vmem:[#allocation25_spill] sm:$0xff] %v16382_v12  ;;  %v7059_v20 = vsel %vm812_vm2, %v16382_v12, 0.0  ;;  %13187 = vmatprep.subr.bf16.mxu0 %v18432_v31 }
 0xeb4   : > { %7060 = vadd.xlane.f32.xlu1 %v7059_v20 }
 0xeb5   : > { %v7033_v36 = vpop.f32.mrb[120].mxu1 }
 0xeb6   : > { %v7034_v0 = vadd.f32 %v12544_v9, %v7033_v36  ;;  %v13185_v52 = vpop.f32.mrb[121].mxu1 }
 0xeb7   : > { %v7036_v34 = vpop.f32.mrb[122].mxu1 }
 0xeb8   : > { %v16389_v45 = vadd.f32 %v7034_v0, %v16249_v17  ;;  %v7037_v35 = vadd.f32 %v12544_v9, %v7036_v34  ;;  %v13186_v21 = vpop.f32.mrb[123].mxu1 }
 0xeba   : > { %18493 = vst [vmem:[#allocation24_spill] sm:$0xff] %v16389_v45  ;;  %v16392_v6 = vadd.f32 %v7037_v35, %v16252_v61  ;;  %v7062_v13 = vsel %vm812_vm2, %v16389_v45, 0.0 }
 0xebb   : > { %7063 = vadd.xlane.f32.xlu0 %v7062_v13  ;;  %v12555_v13 = vld [vmem:[%s18293_s8 + $0x1] ss:$0 sm:$0xff] }
 0xebc   : > { %18494 = vst [vmem:[#allocation23_spill] sm:$0xff] %v16392_v6  ;;  %v7065_v63 = vsel %vm812_vm2, %v16392_v6, 0.0 }
 0xebd   : > { %7066 = vadd.xlane.f32.xlu1 %v7065_v63 }
 0xf34   : > { %v7052_v3 = vpop.xlane.xlu0 %7051 }
 0xf35   : > { %v7068_v28 = vmul.f32 0.015625, %v7052_v3 }
 0xf36   : > { %v7055_v8 = vpop.xlane.xlu1 %7054 }
 0xf37   : > { %v16399_v23 = vsub.f32 %v16369_v29, %v7068_v28  ;;  %v7069_v17 = vmul.f32 0.015625, %v7055_v8 }
 0xf39   : > { %v16402_v5 = vsub.f32 %v16372_v32, %v7069_v17  ;;  %v7080_v61 = vmul.f32 %v16399_v23, %v16399_v23 }
 0xf3b   : > { %v7086_v37 = vsel %vm812_vm2, %v7080_v61, 0.0  ;;  %v7081_v22 = vmul.f32 %v16402_v5, %v16402_v5  ;;  %v12556_v61 = vld [vmem:[%s18294_s9 + $0x1] ss:$0 sm:$0xff] }
 0xf3c   : > { %7087 = vadd.xlane.f32.xlu0 %v7086_v37 }
 0xf3d   : > { %v7089_v33 = vsel %vm812_vm2, %v7081_v22, 0.0 }
 0xf3e   : > { %7090 = vadd.xlane.f32.xlu1 %v7089_v33 }
 0xf3f   : > { %v7058_v2 = vpop.xlane.xlu0 %7057 }
 0xf40   : > { %v7070_v26 = vmul.f32 0.015625, %v7058_v2 }
 0xf41   : > { %v7061_v1 = vpop.xlane.xlu1 %7060 }
 0xf42   : > { %v16411_v58 = vsub.f32 %v16379_v40, %v7070_v26  ;;  %v7071_v38 = vmul.f32 0.015625, %v7061_v1 }
 0xf44   : > { %v16414_v24 = vsub.f32 %v16382_v12, %v7071_v38  ;;  %v7082_v44 = vmul.f32 %v16411_v58, %v16411_v58 }
 0xf46   : > { %v7092_v43 = vsel %vm812_vm2, %v7082_v44, 0.0  ;;  %v7083_v27 = vmul.f32 %v16414_v24, %v16414_v24 }
 0xf47   : > { %7093 = vadd.xlane.f32.xlu0 %v7092_v43 }
 0xf48   : > { %v7064_v41 = vpop.xlane.xlu0 %7063  ;;  %v7095_v4 = vsel %vm812_vm2, %v7083_v27, 0.0 }
 0xf49   : > { %v7072_v25 = vmul.f32 0.015625, %v7064_v41  ;;  %7096 = vadd.xlane.f32.xlu1 %v7095_v4 }
 0xf4a   : > { %v7067_v46 = vpop.xlane.xlu1 %7066 }
 0xf4b   : > { %v16423_v51 = vsub.f32 %v16389_v45, %v7072_v25  ;;  %v7073_v53 = vmul.f32 0.015625, %v7067_v46 }
 0xf4d   : > { %v16426_v16 = vsub.f32 %v16392_v6, %v7073_v53  ;;  %v7084_v60 = vmul.f32 %v16423_v51, %v16423_v51 }
 0xf4f   : > { %v7098_v9 = vsel %vm812_vm2, %v7084_v60, 0.0  ;;  %v7085_v10 = vmul.f32 %v16426_v16, %v16426_v16 }
 0xf50   : > { %7099 = vadd.xlane.f32.xlu0 %v7098_v9 }
 0xf51   : > { %v7101_v14 = vsel %vm812_vm2, %v7085_v10, 0.0 }
 0xf52   : > { %7102 = vadd.xlane.f32.xlu1 %v7101_v14 }
 0xfc9   : > { %v7088_v56 = vpop.xlane.xlu0 %7087 }
 0xfca   : > { %v7104_v49 = vmul.f32 0.015625, %v7088_v56 }
 0xfcb   : > { %v7091_v15 = vpop.xlane.xlu1 %7090 }
 0xfcc   : > { %v7110_v55 = vadd.f32 1e-05, %v7104_v49  ;;  %v7105_v62 = vmul.f32 0.015625, %v7091_v15 }
 0xfce   : > { %13801 = vrsqrt.f32 %v7110_v55  ;;  %v7111_v20 = vadd.f32 1e-05, %v7105_v62 }
 0xfd0   : > { %13803 = vrsqrt.f32 %v7111_v20 }
 0xfd4   : > { %v7094_v36 = vpop.xlane.xlu0 %7093 }
 0xfd5   : > { %v7106_v0 = vmul.f32 0.015625, %v7094_v36 }
 0xfd6   : > { %v7097_v52 = vpop.xlane.xlu1 %7096 }
 0xfd7   : > { %v7112_v34 = vadd.f32 1e-05, %v7106_v0  ;;  %v7107_v35 = vmul.f32 0.015625, %v7097_v52 }
 0xfd8   : > { %v13802_v21 = vpop.eup %13801 }
 0xfd9   : > { %v7122_v63 = vmul.f32 %v13802_v21, %v16399_v23  ;;  %13805 = vrsqrt.f32 %v7112_v34  ;;  %v7113_v3 = vadd.f32 1e-05, %v7107_v35 }
 0xfda   : > { %v13804_v28 = vpop.eup %13803 }
 0xfdb   : > { %v7134_v8 = vmul.f32 %v12555_v13, %v7122_v63  ;;  %v7123_v17 = vmul.f32 %v13804_v28, %v16402_v5  ;;  %13807 = vrsqrt.f32 %v7113_v3  ;;  %v18502_v28 = vsub.s32 1, %v18461_v50 }
 0xfdd   : > { %v7135_v37 = vmul.f32 %v12555_v13, %v7123_v17  ;;  %v7100_v22 = vpop.xlane.xlu0 %7099  ;;  %v7146_v2 = vadd.f32 %v12556_v61, %v7134_v8 }
 0xfde   : > { %v7108_v33 = vmul.f32 0.015625, %v7100_v22 }
 0xfdf   : > { %v7147_v26 = vadd.f32 %v12556_v61, %v7135_v37  ;;  %v7103_v1 = vpop.xlane.xlu1 %7102 }
 0xfe0   : > { %v7114_v38 = vadd.f32 1e-05, %v7108_v33  ;;  %v7109_v44 = vmul.f32 0.015625, %v7103_v1 }
 0xfe1   : > { %v7152_v23 = vpack.c.bf16 %v7147_v26, %v7146_v2 }
 0xfe2   : > { %13809 = vrsqrt.f32 %v7114_v38  ;;  %v7115_v43 = vadd.f32 1e-05, %v7109_v44 }
 0xfe3   : > { %v13806_v27 = vpop.eup %13805  ;;  %12574 = vmatmul.mubr.msk.bf16.vlgmr.msra.gmra.mrb[84].mxu0 %vm812_vm2, %v7152_v23 }
 0xfe4   : > { %13811 = vrsqrt.f32 %v7115_v43  ;;  %7268 = vmatprep.mubr.bf16.mxu0 %v18488_v7  ;;  %v7124_v5 = vmul.f32 %v13806_v27, %v16411_v58 }
 0xfe5   : > { %v13808_v41 = vpop.eup %13807 }
 0xfe6   : > { %v7125_v4 = vmul.f32 %v13808_v41, %v16414_v24  ;;  %v7136_v25 = vmul.f32 %v12555_v13, %v7124_v5 }
 0xfe8   : > { %v7137_v46 = vmul.f32 %v12555_v13, %v7125_v4  ;;  %v7148_v53 = vadd.f32 %v12556_v61, %v7136_v25 }
 0xfea   : > { %v7149_v60 = vadd.f32 %v12556_v61, %v7137_v46 }
 0xfec   : > { %v13810_v9 = vpop.eup %13809  ;;  %v7153_v10 = vpack.c.bf16 %v7149_v60, %v7148_v53 }
 0xfed   : > { %v7126_v14 = vmul.f32 %v13810_v9, %v16423_v51  ;;  %v12565_v51 = vld [vmem:[%s18296_s11 + $0x2] sm:$0x3] }
 0xfee   : > { %v13812_v30 = vpop.eup %13811  ;;  %12575 = vmatmul.mubr.msk.bf16.gmra.mrb[88].mxu0 %vm812_vm2, %v7153_v10  ;;  %v7170_v57 = vrot.slane %v12565_v51, %v18495_v47  ;;  %v7174_v8 = vrot.slane %v12565_v51, %v18502_v28 }
 0xfef   : > { %7278 = vmatprep.mubr.bf16.mxu0 %v18488_v7  ;;  %v7127_v18 = vmul.f32 %v13812_v30, %v16426_v16  ;;  %v7138_v54 = vmul.f32 %v12555_v13, %v7126_v14 }
 0xff1   : > { %v7139_v58 = vmul.f32 %v12555_v13, %v7127_v18  ;;  %v7150_v59 = vadd.f32 %v12556_v61, %v7138_v54 }
 0xff3   : > { %v7151_v48 = vadd.f32 %v12556_v61, %v7139_v58 }
 0xff5   : > { %v7154_v24 = vpack.c.bf16 %v7151_v48, %v7150_v59 }
 0xff7   : > { %12576 = vmatmul.mubr.msk.bf16.gmra.mrb[92].mxu0 %vm812_vm2, %v7154_v24 }
 0xff8   : > { %13193 = vmatprep.mubr.msk.bf16.mxu0 %vm13999_vm0, %v18432_v31 }
0x10b6   : > { %v7260_v19 = vpop.f32.mrb[84].mxu0 }
0x10b7   : > { %v16482_v7 = vadd.f32 %v7260_v19, %v7170_v57  ;;  %v7262_v16 = vpop.f32.mrb[85].mxu0 }
0x10b8   : > { %v7264_v56 = vpop.f32.mrb[86].mxu0  ;;  %v16576_v17 = vadd.f32 %v7262_v16, %v7174_v8 }
0x10b9   : > { %v7266_v49 = vpop.f32.mrb[87].mxu0  ;;  %7367 = vrot.lane.b32.xlu1 %v16482_v7, %s14001_s1  ;;  %7349 = vrot.lane.b32.xlu0 %v16482_v7, %s18496_s26  ;;  %v16488_v15 = vadd.f32 %v7264_v56, %v7170_v57 }
0x10ba   : > { %v16586_v50 = vadd.f32 %v7266_v49, %v7174_v8 }
0x10bd   : > { %7351 = vrot.lane.b32.xlu1 %v16488_v15, %s18496_s26  ;;  %7385 = vrot.lane.b32.xlu0 %v16482_v7, %s18497_s0 }
0x10c1   : > { %7369 = vrot.lane.b32.xlu1 %v16488_v15, %s14001_s1  ;;  %7403 = vrot.lane.b32.xlu0 %v16482_v7, %s18498_s30  ;;  %v7270_v55 = vpop.f32.mrb[88].mxu0 }
0x10c2   : > { %v7272_v62 = vpop.f32.mrb[89].mxu0  ;;  %v16510_v21 = vadd.f32 %v7270_v55, %v7170_v57 }
0x10c3   : > { %v7274_v20 = vpop.f32.mrb[90].mxu0  ;;  %v16588_v61 = vadd.f32 %v7272_v62, %v7174_v8 }
0x10c4   : > { %v7276_v36 = vpop.f32.mrb[91].mxu0  ;;  %v16520_v13 = vadd.f32 %v7274_v20, %v7170_v57 }
0x10c5   : > { %7387 = vrot.lane.b32.xlu1 %v16488_v15, %s18497_s0  ;;  %7295 = vrot.lane.b32.xlu0 %v16482_v7, %s18499_s29  ;;  %18503 = vst [vmem:[#allocation11_spill] sm:$0xff] %v16588_v61  ;;  %v16608_v22 = vadd.f32 %v7276_v36, %v7174_v8 }
0x10c7   : > { %18505 = vst [vmem:[#allocation22_spill] sm:$0xff] %v16608_v22 }
0x10c9   : > { %7405 = vrot.lane.b32.xlu1 %v16488_v15, %s18498_s30  ;;  %7313 = vrot.lane.b32.xlu0 %v16482_v7, %s18500_s3 }
0x10ca   : > { %v7280_v0 = vpop.f32.mrb[92].mxu0 }
0x10cb   : > { %v7282_v52 = vpop.f32.mrb[93].mxu0  ;;  %v16530_v63 = vadd.f32 %v7280_v0, %v7170_v57 }
0x10cc   : > { %v7284_v34 = vpop.f32.mrb[94].mxu0  ;;  %v16598_v37 = vadd.f32 %v7282_v52, %v7174_v8 }
0x10cd   : > { %v7286_v35 = vpop.f32.mrb[95].mxu0  ;;  %7297 = vrot.lane.b32.xlu1 %v16488_v15, %s18499_s29  ;;  %7331 = vrot.lane.b32.xlu0 %v16482_v7, %s18501_s23  ;;  %v16540_v3 = vadd.f32 %v7284_v34, %v7170_v57 }
0x10ce   : > { %18504 = vst [vmem:[#allocation20_spill] sm:$0xff] %v16598_v37  ;;  %v16618_v26 = vadd.f32 %v7286_v35, %v7174_v8 }
0x10d0   : > { %18506 = vst [vmem:[#allocation13_spill] sm:$0xff] %v16618_v26 }
0x10d1   : > { %7315 = vrot.lane.b32.xlu1 %v16488_v15, %s18500_s3  ;;  %7353 = vrot.lane.b32.xlu0 %v16510_v21, %s18496_s26 }
0x10d5   : > { %7333 = vrot.lane.b32.xlu1 %v16488_v15, %s18501_s23  ;;  %7371 = vrot.lane.b32.xlu0 %v16510_v21, %s14001_s1 }
0x10d9   : > { %7355 = vrot.lane.b32.xlu1 %v16520_v13, %s18496_s26  ;;  %7389 = vrot.lane.b32.xlu0 %v16510_v21, %s18497_s0 }
0x10dd   : > { %7373 = vrot.lane.b32.xlu1 %v16520_v13, %s14001_s1  ;;  %7407 = vrot.lane.b32.xlu0 %v16510_v21, %s18498_s30 }
0x10e1   : > { %7391 = vrot.lane.b32.xlu1 %v16520_v13, %s18497_s0  ;;  %7357 = vrot.lane.b32.xlu0 %v16530_v63, %s18496_s26 }
0x10e5   : > { %7409 = vrot.lane.b32.xlu1 %v16520_v13, %s18498_s30  ;;  %7375 = vrot.lane.b32.xlu0 %v16530_v63, %s14001_s1 }
0x10e9   : > { %7359 = vrot.lane.b32.xlu1 %v16540_v3, %s18496_s26  ;;  %7393 = vrot.lane.b32.xlu0 %v16530_v63, %s18497_s0  ;;  %s18547_s26 = sld [smem:[#allocation42_spill]] }
0x10ed   : > { %7377 = vrot.lane.b32.xlu1 %v16540_v3, %s14001_s1  ;;  %7411 = vrot.lane.b32.xlu0 %v16530_v63, %s18498_s30 }
0x10f1   : > { %7395 = vrot.lane.b32.xlu1 %v16540_v3, %s18497_s0  ;;  %7299 = vrot.lane.b32.xlu0 %v16510_v21, %s18499_s29 }
0x10f5   : > { %7413 = vrot.lane.b32.xlu1 %v16540_v3, %s18498_s30  ;;  %7317 = vrot.lane.b32.xlu0 %v16510_v21, %s18500_s3 }
0x10f9   : > { %7301 = vrot.lane.b32.xlu1 %v16520_v13, %s18499_s29  ;;  %7335 = vrot.lane.b32.xlu0 %v16510_v21, %s18501_s23 }
0x10fd   : > { %7319 = vrot.lane.b32.xlu1 %v16520_v13, %s18500_s3  ;;  %7303 = vrot.lane.b32.xlu0 %v16530_v63, %s18499_s29 }
0x1101   : > { %7337 = vrot.lane.b32.xlu1 %v16520_v13, %s18501_s23  ;;  %7321 = vrot.lane.b32.xlu0 %v16530_v63, %s18500_s3 }
0x1105   : > { %7305 = vrot.lane.b32.xlu1 %v16540_v3, %s18499_s29  ;;  %7339 = vrot.lane.b32.xlu0 %v16530_v63, %s18501_s23 }
0x1109   : > { %7323 = vrot.lane.b32.xlu1 %v16540_v3, %s18500_s3  ;;  %7427 = vrot.lane.b32.xlu0 %v16576_v17, %s18499_s29 }
0x110d   : > { %7341 = vrot.lane.b32.xlu1 %v16540_v3, %s18501_s23  ;;  %7463 = vrot.lane.b32.xlu0 %v16576_v17, %s18501_s23 }
0x1111   : > { %7429 = vrot.lane.b32.xlu1 %v16586_v50, %s18499_s29  ;;  %7431 = vrot.lane.b32.xlu0 %v16588_v61, %s18499_s29 }
0x1115   : > { %7445 = vrot.lane.b32.xlu1 %v16576_v17, %s18500_s3  ;;  %7467 = vrot.lane.b32.xlu0 %v16588_v61, %s18501_s23 }
0x1119   : > { %7447 = vrot.lane.b32.xlu1 %v16586_v50, %s18500_s3  ;;  %7435 = vrot.lane.b32.xlu0 %v16598_v37, %s18499_s29 }
0x111d   : > { %7465 = vrot.lane.b32.xlu1 %v16586_v50, %s18501_s23  ;;  %7453 = vrot.lane.b32.xlu0 %v16598_v37, %s18500_s3 }
0x1121   : > { %7433 = vrot.lane.b32.xlu1 %v16608_v22, %s18499_s29 }
0x1125   : > { %7449 = vrot.lane.b32.xlu1 %v16588_v61, %s18500_s3 }
0x1129   : > { %7451 = vrot.lane.b32.xlu1 %v16608_v22, %s18500_s3 }
0x112b   : > { %v7350_v33 = vpop.permute.xlu0 %7349  ;;  %v7368_v2 = vpop.permute.xlu1 %7367 }
0x112d   : > { %7469 = vrot.lane.b32.xlu1 %v16608_v22, %s18501_s23 }
0x112f   : > { %v7386_v1 = vpop.permute.xlu0 %7385  ;;  %v7352_v38 = vpop.permute.xlu1 %7351 }
0x1130   : > { %v7513_v44 = vcombine.low %v7350_v33, %v7386_v1  ;;  %v7514_v23 = vcombine.high %v7350_v33, %v7386_v1 }
0x1131   : > { %7437 = vrot.lane.b32.xlu1 %v16618_v26, %s18499_s29 }
0x1132   : > { %v7521_v4 = vrot.slane %v7513_v44, %v14681_v39  ;;  %v7528_v25 = vrot.slane %v7514_v23, %v14681_v39 }
0x1133   : > { %v7404_v43 = vpop.permute.xlu0 %7403  ;;  %v7370_v27 = vpop.permute.xlu1 %7369 }
0x1134   : > { %v7529_v5 = vcombine.low %v7368_v2, %v7404_v43  ;;  %v7530_v41 = vcombine.high %v7368_v2, %v7404_v43 }
0x1135   : > { %7455 = vrot.lane.b32.xlu1 %v16618_v26, %s18500_s3 }
0x1136   : > { %v7537_v46 = vrot.slane %v7529_v5, %v14681_v39  ;;  %v7544_v53 = vrot.slane %v7530_v41, %v14681_v39 }
0x1137   : > { %v7296_v60 = vpop.permute.xlu0 %7295  ;;  %v7388_v9 = vpop.permute.xlu1 %7387 }
0x1138   : > { %v7577_v10 = vcombine.low %v7521_v4, %v7537_v46  ;;  %v7578_v14 = vcombine.high %v7521_v4, %v7537_v46  ;;  %v7593_v30 = vcombine.low %v7528_v25, %v7544_v53  ;;  %v7594_v18 = vcombine.high %v7528_v25, %v7544_v53 }
0x1139   : > { %v7717_v24 = vcombine.low %v7352_v38, %v7388_v9  ;;  %v7718_v51 = vcombine.high %v7352_v38, %v7388_v9 }
0x113a   : > { %v7585_v54 = vrot.slane %v7577_v10, %v14684_v42  ;;  %v7592_v58 = vrot.slane %v7578_v14, %v14684_v42  ;;  %v7601_v59 = vrot.slane %v7593_v30, %v14684_v42  ;;  %v7608_v48 = vrot.slane %v7594_v18, %v14684_v42 }
0x113b   : > { %v7314_v47 = vpop.permute.xlu0 %7313  ;;  %v7406_v57 = vpop.permute.xlu1 %7405  ;;  %v7725_v0 = vrot.slane %v7717_v24, %v14681_v39  ;;  %v7732_v52 = vrot.slane %v7718_v51, %v14681_v39 }
0x113c   : > { %v12578_v19 = vcombine.low %v7585_v54, %v7592_v58  ;;  %v12580_v16 = vcombine.high %v7585_v54, %v7592_v58  ;;  %v12582_v56 = vcombine.low %v7601_v59, %v7608_v48  ;;  %v12584_v49 = vcombine.high %v7601_v59, %v7608_v48 }
0x113d   : > { %v7733_v55 = vcombine.low %v7370_v27, %v7406_v57  ;;  %v7734_v62 = vcombine.high %v7370_v27, %v7406_v57  ;;  %v7481_v20 = vcombine.low %v16482_v7, %v7314_v47  ;;  %v7482_v36 = vcombine.high %v16482_v7, %v7314_v47 }
0x113e   : > { %v16639_v1 = vrot.slane %v12578_v19, %v14681_v39  ;;  %v16642_v38 = vrot.slane %v12580_v16, %v14681_v39  ;;  %v16645_v23 = vrot.slane %v12582_v56, %v14681_v39  ;;  %v16648_v43 = vrot.slane %v12584_v49, %v14681_v39 }
0x113f   : > { %v7741_v34 = vrot.slane %v7733_v55, %v14681_v39  ;;  %v7748_v35 = vrot.slane %v7734_v62, %v14681_v39  ;;  %v7332_v28 = vpop.permute.xlu0 %7331  ;;  %v7298_v8 = vpop.permute.xlu1 %7297  ;;  %v7489_v27 = vrot.slane %v7481_v20, %v14681_v39  ;;  %v7496_v5 = vrot.slane %v7482_v36, %v14681_v39 }
0x1140   : > { %v7497_v33 = vcombine.low %v7296_v60, %v7332_v28  ;;  %v7498_v2 = vcombine.high %v7296_v60, %v7332_v28  ;;  %v8785_v58 = vcombine.low %v16639_v1, %v16642_v38  ;;  %v8817_v59 = vcombine.low %v16645_v23, %v16648_v43 }
0x1141   : > { %v7781_v44 = vcombine.low %v7725_v0, %v7741_v34  ;;  %v7782_v7 = vcombine.high %v7725_v0, %v7741_v34  ;;  %v7797_v25 = vcombine.low %v7732_v52, %v7748_v35  ;;  %v7798_v46 = vcombine.high %v7732_v52, %v7748_v35 }
0x1142   : > { %v7505_v41 = vrot.slane %v7497_v33, %v14681_v39  ;;  %v7512_v4 = vrot.slane %v7498_v2, %v14681_v39  ;;  %v16679_v35 = vrot.slane %v8785_v58, %v14684_v42  ;;  %v16682_v28 = vrot.slane %v8817_v59, %v14684_v42 }
0x1143   : > { %v16654_v53 = vpop.permute.xlu0 %7353  ;;  %v7316_v60 = vpop.permute.xlu1 %7315  ;;  %v16657_v18 = vrot.slane %v7781_v44, %v14684_v42  ;;  %v16660_v54 = vrot.slane %v7782_v7, %v14684_v42  ;;  %v16671_v57 = vrot.slane %v7797_v25, %v14684_v42  ;;  %v16674_v19 = vrot.slane %v7798_v46, %v14684_v42 }
0x1144   : > { %v7545_v9 = vcombine.low %v7489_v27, %v7505_v41  ;;  %v7546_v10 = vcombine.high %v7489_v27, %v7505_v41  ;;  %v7561_v14 = vcombine.low %v7496_v5, %v7512_v4  ;;  %v7562_v30 = vcombine.high %v7496_v5, %v7512_v4 }
0x1145   : > { %v7685_v16 = vcombine.low %v16488_v15, %v7316_v60  ;;  %v7686_v56 = vcombine.high %v16488_v15, %v7316_v60  ;;  %v12586_v25 = vcombine.low %v16657_v18, %v16660_v54  ;;  %v12588_v46 = vcombine.high %v16657_v18, %v16660_v54 }
0x1146   : > { %v7553_v48 = vrot.slane %v7545_v9, %v14684_v42  ;;  %v7560_v24 = vrot.slane %v7546_v10, %v14684_v42  ;;  %v7569_v51 = vrot.slane %v7561_v14, %v14684_v42  ;;  %v7576_v47 = vrot.slane %v7562_v30, %v14684_v42 }
0x1147   : > { %v7372_v49 = vpop.permute.xlu0 %7371  ;;  %v7334_v55 = vpop.permute.xlu1 %7333  ;;  %v7693_v7 = vrot.slane %v7685_v16, %v14681_v39  ;;  %v7700_v27 = vrot.slane %v7686_v56, %v14681_v39  ;;  %v12590_v60 = vcombine.low %v16671_v57, %v16674_v19  ;;  %v12592_v9 = vcombine.high %v16671_v57, %v16674_v19 }
0x1148   : > { %v12577_v62 = vcombine.low %v7553_v48, %v7560_v24  ;;  %v12579_v20 = vcombine.high %v7553_v48, %v7560_v24  ;;  %v12581_v36 = vcombine.low %v7569_v51, %v7576_v47  ;;  %v12583_v0 = vcombine.high %v7569_v51, %v7576_v47 }
0x1149   : > { %v7701_v52 = vcombine.low %v7298_v8, %v7334_v55  ;;  %v7702_v34 = vcombine.high %v7298_v8, %v7334_v55 }
0x114a   : > { %v8713_v33 = vrot.slane %v12577_v62, %v14681_v39  ;;  %v8729_v2 = vrot.slane %v12579_v20, %v14681_v39  ;;  %v8745_v15 = vrot.slane %v12581_v36, %v14681_v39  ;;  %v8761_v44 = vrot.slane %v12583_v0, %v14681_v39 }
0x114b   : > { %v7709_v8 = vrot.slane %v7701_v52, %v14681_v39  ;;  %v7716_v5 = vrot.slane %v7702_v34, %v14681_v39  ;;  %v7390_v41 = vpop.permute.xlu0 %7389  ;;  %v16692_v4 = vpop.permute.xlu1 %7355 }
0x114c   : > { %v8769_v59 = vcombine.low %v8713_v33, %v8729_v2  ;;  %v8770_v48 = vcombine.high %v8713_v33, %v8729_v2  ;;  %v8801_v24 = vcombine.low %v8745_v15, %v8761_v44  ;;  %v8802_v51 = vcombine.high %v8745_v15, %v8761_v44 }
0x114d   : > { %v7749_v10 = vcombine.low %v7693_v7, %v7709_v8  ;;  %v7750_v14 = vcombine.high %v7693_v7, %v7709_v8  ;;  %v7765_v30 = vcombine.low %v7700_v27, %v7716_v5  ;;  %v7766_v58 = vcombine.high %v7700_v27, %v7716_v5 }
0x114e   : > { %v7921_v57 = vcombine.low %v16654_v53, %v7390_v41  ;;  %v7922_v19 = vcombine.high %v16654_v53, %v7390_v41 }
0x114f   : > { %v7757_v47 = vrot.slane %v7749_v10, %v14684_v42  ;;  %v7764_v16 = vrot.slane %v7750_v14, %v14684_v42  ;;  %v7773_v18 = vrot.slane %v7765_v30, %v14684_v42  ;;  %v7780_v54 = vrot.slane %v7766_v58, %v14684_v42  ;;  %v7408_v56 = vpop.permute.xlu0 %7407  ;;  %v7374_v55 = vpop.permute.xlu1 %7373 }
0x1150   : > { %v7937_v62 = vcombine.low %v7372_v49, %v7408_v56  ;;  %v7938_v20 = vcombine.high %v7372_v49, %v7408_v56  ;;  %v7929_v33 = vrot.slane %v7921_v57, %v14681_v39  ;;  %v7936_v2 = vrot.slane %v7922_v19, %v14681_v39 }
0x1151   : > { %v12585_v36 = vcombine.low %v7757_v47, %v7764_v16  ;;  %v12587_v0 = vcombine.high %v7757_v47, %v7764_v16  ;;  %v12589_v52 = vcombine.low %v7773_v18, %v7780_v54  ;;  %v12591_v34 = vcombine.high %v7773_v18, %v7780_v54 }
0x1152   : > { %v7945_v15 = vrot.slane %v7937_v62, %v14681_v39  ;;  %v7952_v44 = vrot.slane %v7938_v20, %v14681_v39  ;;  %v8837_v47 = vcombine.low %v16679_v35, %v16682_v28  ;;  %v16723_v16 = vrot.slane %v12586_v25, %v14681_v39 }
0x1153   : > { %v8849_v7 = vrot.slane %v12585_v36, %v14681_v39  ;;  %v8865_v27 = vrot.slane %v12587_v0, %v14681_v39  ;;  %v16715_v53 = vrot.slane %v12589_v52, %v14681_v39  ;;  %v16718_v49 = vrot.slane %v12591_v34, %v14681_v39  ;;  %v7358_v8 = vpop.permute.xlu0 %7357  ;;  %v7392_v5 = vpop.permute.xlu1 %7391 }
0x1154   : > { %v7985_v41 = vcombine.low %v7929_v33, %v7945_v15  ;;  %v7986_v10 = vcombine.high %v7929_v33, %v7945_v15  ;;  %v8001_v14 = vcombine.low %v7936_v2, %v7952_v44  ;;  %v8002_v30 = vcombine.high %v7936_v2, %v7952_v44 }
0x1155   : > { %v8905_v58 = vcombine.low %v8849_v7, %v8865_v27  ;;  %v16726_v18 = vrot.slane %v12588_v46, %v14681_v39  ;;  %v16729_v54 = vrot.slane %v8769_v59, %v14684_v42  ;;  %v16734_v19 = vrot.slane %v12590_v60, %v14681_v39 }
0x1156   : > { %v7993_v56 = vrot.slane %v7985_v41, %v14684_v42  ;;  %v8000_v57 = vrot.slane %v7986_v10, %v14684_v42  ;;  %v16737_v62 = vrot.slane %v8770_v48, %v14684_v42  ;;  %v16740_v20 = vrot.slane %v8801_v24, %v14684_v42 }
0x1157   : > { %v16743_v25 = vrot.slane %v8802_v51, %v14684_v42  ;;  %v8906_v46 = vcombine.high %v8849_v7, %v8865_v27  ;;  %v7376_v36 = vpop.permute.xlu0 %7375  ;;  %v7410_v59 = vpop.permute.xlu1 %7409  ;;  %v8009_v60 = vrot.slane %v8001_v14, %v14684_v42  ;;  %v8016_v48 = vrot.slane %v8002_v30, %v14684_v42 }
0x1158   : > { %18507 = vst [vmem:[#allocation14_spill] sm:$0xff] %v16737_v62  ;;  %v16752_v34 = vrot.slane %v8905_v58, %v14684_v42  ;;  %v16755_v24 = vrot.slane %v12592_v9, %v14681_v39  ;;  %v8921_v51 = vcombine.low %v16723_v16, %v16726_v18  ;;  %v8125_v33 = vcombine.low %v16692_v4, %v7392_v5 }
0x1159   : > { %18508 = vst [vmem:[#allocation15_spill] sm:$0xff] %v16743_v25  ;;  %v12594_v2 = vcombine.low %v7993_v56, %v8000_v57  ;;  %v8126_v15 = vcombine.high %v16692_v4, %v7392_v5  ;;  %v8141_v44 = vcombine.low %v7374_v55, %v7410_v59  ;;  %v8142_v7 = vcombine.high %v7374_v55, %v7410_v59 }
0x115a   : > { %v12596_v27 = vcombine.high %v7993_v56, %v8000_v57  ;;  %v8929_v41 = vrot.slane %v8921_v51, %v14684_v42  ;;  %v8953_v10 = vcombine.low %v16734_v19, %v16755_v24  ;;  %v8133_v14 = vrot.slane %v8125_v33, %v14681_v39 }
0x115b   : > { %v7394_v9 = vpop.permute.xlu0 %7393  ;;  %v7360_v30 = vpop.permute.xlu1 %7359  ;;  %v8140_v58 = vrot.slane %v8126_v15, %v14681_v39  ;;  %v8149_v52 = vrot.slane %v8141_v44, %v14681_v39  ;;  %v8156_v0 = vrot.slane %v8142_v7, %v14681_v39  ;;  %v16769_v4 = vrot.slane %v8906_v46, %v14684_v42 }
0x115c   : > { %v8329_v6 = vcombine.low %v7358_v8, %v7394_v9  ;;  %v12598_v55 = vcombine.low %v8009_v60, %v8016_v48  ;;  %v8961_v5 = vrot.slane %v8953_v10, %v14684_v42  ;;  %v8330_v56 = vcombine.high %v7358_v8, %v7394_v9 }
0x115d   : > { %18509 = vst [vmem:[#allocation16_spill] sm:$0xff] %v16769_v4  ;;  %v8189_v57 = vcombine.low %v8133_v14, %v8149_v52  ;;  %v8190_v59 = vcombine.high %v8133_v14, %v8149_v52  ;;  %v8205_v51 = vcombine.low %v8140_v58, %v8156_v0  ;;  %v8206_v33 = vcombine.high %v8140_v58, %v8156_v0 }
0x115e   : > { %v12600_v45 = vcombine.high %v8009_v60, %v8016_v48  ;;  %v8973_v12 = vcombine.low %v8929_v41, %v8961_v5  ;;  %v8838_v15 = vcombine.high %v16679_v35, %v16682_v28  ;;  %v8974_v44 = vcombine.high %v8929_v41, %v8961_v5 }
0x115f   : > { %v7412_v40 = vpop.permute.xlu0 %7411  ;;  %v7378_v7 = vpop.permute.xlu1 %7377  ;;  %v8337_v32 = vrot.slane %v8329_v6, %v14681_v39  ;;  %v8344_v46 = vrot.slane %v8330_v56, %v14681_v39  ;;  %v16777_v29 = vrot.slane %v12594_v2, %v14681_v39  ;;  %v16780_v8 = vrot.slane %v12596_v27, %v14681_v39 }
0x1160   : > { %v9941_v52 = vpack.c.bf16 %v8973_v12, %v8837_v47  ;;  %v9944_v0 = vpack.c.bf16 %v8974_v44, %v8838_v15  ;;  %v8345_v60 = vcombine.low %v7376_v36, %v7412_v40  ;;  %v8346_v48 = vcombine.high %v7376_v36, %v7412_v40 }
0x1161   : > { %v8197_v10 = vrot.slane %v8189_v57, %v14684_v42  ;;  %v8204_v35 = vrot.slane %v8190_v59, %v14684_v42  ;;  %v8213_v28 = vrot.slane %v8205_v51, %v14684_v42  ;;  %v8220_v6 = vrot.slane %v8206_v33, %v14684_v42 }
0x1162   : > { %v9975_v41 = vsel %vm1520_vm4, %v9941_v52, 0  ;;  %v10050_v2 = vsel %vm1520_vm4, %v9944_v0, 0  ;;  %v8353_v14 = vrot.slane %v8345_v60, %v14681_v39  ;;  %v8360_v27 = vrot.slane %v8346_v48, %v14681_v39 }
0x1163   : > { %v7300_v12 = vpop.permute.xlu0 %7299  ;;  %v7396_v47 = vpop.permute.xlu1 %7395  ;;  %13188 = vmatpush3.bf16.xpose.msra.mxu0 %v9975_v41  ;;  %13206 = vmatpush3.bf16.xpose.msra.mxu1 %v10050_v2  ;;  %v9057_v9 = vcombine.low %v16777_v29, %v16780_v8  ;;  %v16794_v56 = vrot.slane %v12598_v55, %v14681_v39  ;;  %v16797_v57 = vrot.slane %v12600_v45, %v14681_v39 }
0x1164   : > { %v8533_v40 = vcombine.low %v7360_v30, %v7396_v47  ;;  %v8534_v36 = vcombine.high %v7360_v30, %v7396_v47  ;;  %v8393_v58 = vcombine.low %v8337_v32, %v8353_v14  ;;  %v8394_v5 = vcombine.high %v8337_v32, %v8353_v14  ;;  %13189 = vmatprep.subr.bf16.mxu0 %v18432_v31 }
0x1165   : > { %v18510_v59 = vcombine.low %v16715_v53, %v16718_v49  ;;  %v12602_v30 = vcombine.low %v8197_v10, %v8204_v35  ;;  %v12604_v33 = vcombine.high %v8197_v10, %v8204_v35  ;;  %v8409_v15 = vcombine.low %v8344_v46, %v8360_v27  ;;  %13207 = vmatprep.subr.bf16.mxu1 %v18432_v31 }
0x1166   : > { %v12606_v32 = vcombine.low %v8213_v28, %v8220_v6  ;;  %v12608_v44 = vcombine.high %v8213_v28, %v8220_v6  ;;  %v8410_v52 = vcombine.high %v8344_v46, %v8360_v27  ;;  %v8541_v55 = vrot.slane %v8533_v40, %v14681_v39 }
0x1167   : > { %v16803_v51 = vrot.slane %v18510_v59, %v14684_v42  ;;  %v7318_v0 = vpop.permute.xlu0 %7317  ;;  %v7414_v60 = vpop.permute.xlu1 %7413  ;;  %v8548_v45 = vrot.slane %v8534_v36, %v14681_v39  ;;  %v16809_v2 = vrot.slane %v9057_v9, %v14684_v42  ;;  %v16812_v14 = vrot.slane %v8393_v58, %v14684_v42 }
0x1168   : > { %v8549_v48 = vcombine.low %v7378_v7, %v7414_v60  ;;  %v8550_v41 = vcombine.high %v7378_v7, %v7414_v60  ;;  %v16815_v10 = vrot.slane %v8394_v5, %v14684_v42  ;;  %v7889_v35 = vcombine.low %v16510_v21, %v7318_v0 }
0x1169   : > { %v9089_v46 = vcombine.low %v16794_v56, %v16797_v57  ;;  %v16821_v28 = vrot.slane %v8409_v15, %v14684_v42  ;;  %v7890_v6 = vcombine.high %v16510_v21, %v7318_v0  ;;  %v16827_v47 = vrot.slane %v8410_v52, %v14684_v42 }
0x116a   : > { %v8557_v7 = vrot.slane %v8549_v48, %v14681_v39  ;;  %v8564_v27 = vrot.slane %v8550_v41, %v14681_v39  ;;  %v16832_v9 = vrot.slane %v12602_v30, %v14681_v39  ;;  %v16835_v58 = vrot.slane %v12604_v33, %v14681_v39 }
0x116b   : > { %v7336_v40 = vpop.permute.xlu0 %7335  ;;  %v16829_v36 = vpop.permute.xlu1 %7301  ;;  %v16838_v5 = vrot.slane %v12606_v32, %v14681_v39  ;;  %v7897_v60 = vrot.slane %v7889_v35, %v14681_v39  ;;  %v16842_v41 = vrot.slane %v12608_v44, %v14681_v39  ;;  %v7904_v30 = vrot.slane %v7890_v6, %v14681_v39 }
0x116c   : > { %v8597_v21 = vcombine.low %v8541_v55, %v8557_v7  ;;  %v8598_v59 = vcombine.high %v8541_v55, %v8557_v7  ;;  %v8613_v15 = vcombine.low %v8548_v45, %v8564_v27  ;;  %v8614_v0 = vcombine.high %v8548_v45, %v8564_v27 }
0x116d   : > { %v7905_v52 = vcombine.low %v7300_v12, %v7336_v40  ;;  %v7906_v48 = vcombine.high %v7300_v12, %v7336_v40  ;;  %v9097_v32 = vrot.slane %v9089_v46, %v14684_v42  ;;  %v9193_v27 = vcombine.low %v16832_v9, %v16835_v58 }
0x116e   : > { %v8605_v26 = vrot.slane %v8597_v21, %v14684_v42  ;;  %v8612_v33 = vrot.slane %v8598_v59, %v14684_v42  ;;  %v16849_v37 = vrot.slane %v8613_v15, %v14684_v42  ;;  %v16852_v55 = vrot.slane %v8614_v0, %v14684_v42 }
0x116f   : > { %v7913_v45 = vrot.slane %v7905_v52, %v14681_v39  ;;  %v7920_v12 = vrot.slane %v7906_v48, %v14681_v39  ;;  %v7304_v44 = vpop.permute.xlu0 %7303  ;;  %v7320_v35 = vpop.permute.xlu1 %7319  ;;  %v9225_v46 = vcombine.low %v16838_v5, %v16842_v41  ;;  %v18511_v0 = vcombine.high %v16715_v53, %v16718_v49 }
0x1170   : > { %v12618_v7 = vcombine.low %v8605_v26, %v8612_v33  ;;  %v12620_v6 = vcombine.high %v8605_v26, %v8612_v33  ;;  %v9201_v33 = vrot.slane %v9193_v27, %v14684_v42  ;;  %v12624_v26 = vcombine.high %v16849_v37, %v16852_v55 }
0x1171   : > { %v7953_v40 = vcombine.low %v7897_v60, %v7913_v45  ;;  %v7954_v21 = vcombine.high %v7897_v60, %v7913_v45  ;;  %v7969_v59 = vcombine.low %v7904_v30, %v7920_v12  ;;  %v7970_v15 = vcombine.high %v7904_v30, %v7920_v12 }
0x1172   : > { %v16864_v52 = vrot.slane %v18511_v0, %v14684_v42  ;;  %v9109_v0 = vcombine.low %v16809_v2, %v9097_v32  ;;  %v9110_v12 = vcombine.high %v16809_v2, %v9097_v32  ;;  %v8093_v27 = vcombine.low %v16520_v13, %v7320_v35 }
0x1173   : > { %v16873_v11 = vrot.slane %v7953_v40, %v14684_v42  ;;  %v16876_v60 = vrot.slane %v7954_v21, %v14684_v42  ;;  %v16879_v30 = vrot.slane %v7969_v59, %v14684_v42  ;;  %v16882_v53 = vrot.slane %v7970_v15, %v14684_v42  ;;  %v7322_v49 = vpop.permute.xlu0 %7321  ;;  %v7338_v45 = vpop.permute.xlu1 %7337 }
0x1174   : > { %18512 = vst [vmem:[#allocation17_spill] sm:$0xff] %v16864_v52  ;;  %v9233_v40 = vrot.slane %v9225_v46, %v14684_v42  ;;  %v16890_v21 = vrot.slane %v12618_v7, %v14681_v39  ;;  %v16893_v59 = vrot.slane %v12620_v6, %v14681_v39  ;;  %v12622_v15 = vcombine.low %v16849_v37, %v16852_v55 }
0x1175   : > { %v12593_v46 = vcombine.low %v16873_v11, %v16876_v60  ;;  %v12595_v7 = vcombine.high %v16873_v11, %v16876_v60  ;;  %v12597_v6 = vcombine.low %v16879_v30, %v16882_v53  ;;  %v8094_v25 = vcombine.high %v16520_v13, %v7320_v35 }
0x1176   : > { %18513 = vst [vmem:[#allocation18_spill] sm:$0xff] %v16890_v21  ;;  %18514 = vst [vmem:[#allocation12_spill] sm:$0xff] %v16893_v59  ;;  %v9245_v48 = vcombine.low %v9201_v33, %v9233_v40  ;;  %v9246_v62 = vcombine.high %v9201_v33, %v9233_v40  ;;  %v12599_v37 = vcombine.high %v16879_v30, %v16882_v53 }
0x1177   : > { %v7340_v4 = vpop.permute.xlu0 %7339  ;;  %v8297_v32 = vcombine.low %v16530_v63, %v7322_v49  ;;  %v16911_v33 = vpop.permute.xlu1 %7305  ;;  %v8298_v40 = vcombine.high %v16530_v63, %v7322_v49  ;;  %v8109_v52 = vcombine.low %v16829_v36, %v7338_v45  ;;  %v8110_v11 = vcombine.high %v16829_v36, %v7338_v45 }
0x1178   : > { %v9942_v55 = vpack.c.bf16 %v9245_v48, %v9109_v0  ;;  %v9945_v2 = vpack.c.bf16 %v9246_v62, %v9110_v12  ;;  %v8313_v60 = vcombine.low %v7304_v44, %v7340_v4  ;;  %v8101_v35 = vrot.slane %v8093_v27, %v14681_v39 }
0x1179   : > { %v8314_v30 = vcombine.high %v7304_v44, %v7340_v4  ;;  %v8108_v62 = vrot.slane %v8094_v25, %v14681_v39  ;;  %v8117_v48 = vrot.slane %v8109_v52, %v14681_v39  ;;  %v8124_v63 = vrot.slane %v8110_v11, %v14681_v39 }
0x117a   : > { %v9978_v22 = vsel %vm1520_vm4, %v9942_v55, 0  ;;  %v10053_v13 = vsel %vm1520_vm4, %v9945_v2, 0  ;;  %v8305_v53 = vrot.slane %v8297_v32, %v14681_v39  ;;  %v8312_v36 = vrot.slane %v8298_v40, %v14681_v39 }
0x117b   : > { %13190 = vmatpush3.bf16.xpose.msra.mxu0 %v9978_v22  ;;  %13208 = vmatpush3.bf16.xpose.msra.mxu1 %v10053_v13  ;;  %v8321_v49 = vrot.slane %v8313_v60, %v14681_v39  ;;  %v8328_v45 = vrot.slane %v8314_v30, %v14681_v39  ;;  %v8157_v12 = vcombine.low %v8101_v35, %v8117_v48  ;;  %v7324_v55 = vpop.permute.xlu1 %7323 }
0x117c   : > { %13191 = vmatprep.subr.bf16.mxu0 %v18432_v31  ;;  %v8158_v4 = vcombine.high %v8101_v35, %v8117_v48  ;;  %v8173_v22 = vcombine.low %v8108_v62, %v8124_v63  ;;  %v8174_v44 = vcombine.high %v8108_v62, %v8124_v63  ;;  %13209 = vmatprep.subr.bf16.mxu1 %v18432_v31 }
0x117d   : > { %v8361_v25 = vcombine.low %v8305_v53, %v8321_v49  ;;  %v8362_v52 = vcombine.high %v8305_v53, %v8321_v49  ;;  %v8377_v0 = vcombine.low %v8312_v36, %v8328_v45  ;;  %v8378_v27 = vcombine.high %v8312_v36, %v8328_v45 }
0x117e   : > { %v8165_v2 = vrot.slane %v8157_v12, %v14684_v42  ;;  %v8172_v32 = vrot.slane %v8158_v4, %v14684_v42  ;;  %v8181_v40 = vrot.slane %v8173_v22, %v14684_v42  ;;  %v8188_v11 = vrot.slane %v8174_v44, %v14684_v42  ;;  %v16956_v4 = vpop.permute.xlu0 %7427 }
0x117f   : > { %v8369_v60 = vrot.slane %v8361_v25, %v14684_v42  ;;  %v8376_v13 = vrot.slane %v8362_v52, %v14684_v42  ;;  %v16935_v35 = vrot.slane %v8377_v0, %v14684_v42  ;;  %v8392_v30 = vrot.slane %v8378_v27, %v14684_v42  ;;  %v7342_v0 = vpop.permute.xlu1 %7341 }
0x1180   : > { %v16939_v62 = vrot.slane %v12622_v15, %v14681_v39  ;;  %v16942_v48 = vrot.slane %v12624_v26, %v14681_v39  ;;  %v12601_v63 = vcombine.low %v8165_v2, %v8172_v32  ;;  %v12603_v53 = vcombine.high %v8165_v2, %v8172_v32 }
0x1181   : > { %v16945_v36 = vrot.slane %v12593_v46, %v14681_v39  ;;  %v16948_v49 = vrot.slane %v12595_v7, %v14681_v39  ;;  %v16951_v45 = vrot.slane %v12597_v6, %v14681_v39  ;;  %v16954_v12 = vrot.slane %v12599_v37, %v14681_v39 }
0x1182   : > { %18515 = vst [vmem:[#allocation33_spill] sm:$0xff] %v16939_v62  ;;  %18516 = vst [vmem:[#allocation34_spill] sm:$0xff] %v16942_v48  ;;  %v12605_v15 = vcombine.low %v8181_v40, %v8188_v11  ;;  %v12607_v22 = vcombine.high %v8181_v40, %v8188_v11  ;;  %v8501_v26 = vcombine.low %v16540_v3, %v7324_v55 }
0x1183   : > { %v8502_v44 = vcombine.high %v16540_v3, %v7324_v55  ;;  %v12609_v25 = vcombine.low %v8369_v60, %v8376_v13  ;;  %v12611_v46 = vcombine.high %v8369_v60, %v8376_v13  ;;  %v12613_v52 = vcombine.low %v16935_v35, %v8392_v30 }
0x1184   : > { %v12615_v7 = vcombine.high %v16935_v35, %v8392_v30  ;;  %v16963_v6 = vrot.slane %v12601_v63, %v14681_v39  ;;  %v16966_v37 = vrot.slane %v12603_v53, %v14681_v39  ;;  %v18517_v27 = vcombine.low %v16812_v14, %v16815_v10 }
0x1185   : > { %v18518_v3 = vcombine.high %v16812_v14, %v16815_v10  ;;  %v18519_v32 = vcombine.low %v16821_v28, %v16827_v47  ;;  %v18521_v11 = vcombine.high %v16821_v28, %v16827_v47  ;;  %v9465_v13 = vcombine.low %v16890_v21, %v16893_v59 }
0x1186   : > { %v16972_v2 = vrot.slane %v18517_v27, %v14681_v39  ;;  %v9497_v14 = vcombine.low %v16939_v62, %v16942_v48  ;;  %v16997_v10 = vrot.slane %v12605_v15, %v14681_v39  ;;  %v17000_v35 = vrot.slane %v12607_v22, %v14681_v39  ;;  %v7464_v27 = vpop.permute.xlu0 %7463 }
0x1187   : > { %v16978_v55 = vrot.slane %v18518_v3, %v14681_v39  ;;  %v16984_v40 = vrot.slane %v18519_v32, %v14681_v39  ;;  %v16990_v60 = vrot.slane %v18521_v11, %v14681_v39  ;;  %v8517_v63 = vcombine.low %v16911_v33, %v7342_v0 }
0x1188   : > { %v9473_v47 = vrot.slane %v9465_v13, %v14684_v42  ;;  %v9505_v53 = vrot.slane %v9497_v14, %v14684_v42  ;;  %v8518_v3 = vcombine.high %v16911_v33, %v7342_v0  ;;  %v8509_v15 = vrot.slane %v8501_v26, %v14681_v39  ;;  %v17020_v26 = vpop.permute.xlu1 %7429 }
0x1189   : > { %18520 = vst [vmem:[#allocation35_spill] sm:$0xff] %v16984_v40  ;;  %v9329_v30 = vcombine.low %v16972_v2, %v16978_v55  ;;  %v9361_v28 = vcombine.low %v16984_v40, %v16990_v60  ;;  %v8516_v22 = vrot.slane %v8502_v44, %v14681_v39  ;;  %v8525_v11 = vrot.slane %v8517_v63, %v14681_v39 }
0x118a   : > { %v9517_v62 = vcombine.low %v9473_v47, %v9505_v53  ;;  %v9518_v48 = vcombine.high %v9473_v47, %v9505_v53  ;;  %v8532_v21 = vrot.slane %v8518_v3, %v14681_v39  ;;  %v17017_v13 = vrot.slane %v12609_v25, %v14681_v39 }
0x118b   : > { %v9337_v32 = vrot.slane %v9329_v30, %v14684_v42  ;;  %v9369_v61 = vrot.slane %v9361_v28, %v14684_v42  ;;  %v7633_v14 = vcombine.low %v16956_v4, %v7464_v27  ;;  %v8565_v33 = vcombine.low %v8509_v15, %v8525_v11 }
0x118c   : > { %v8566_v0 = vcombine.high %v8509_v15, %v8525_v11  ;;  %v8581_v30 = vcombine.low %v8516_v22, %v8532_v21  ;;  %v8582_v40 = vcombine.high %v8516_v22, %v8532_v21  ;;  %v7634_v63 = vcombine.high %v16956_v4, %v7464_v27  ;;  %v7432_v4 = vpop.permute.xlu0 %7431 }
0x118d   : > { %v9381_v44 = vcombine.low %v9337_v32, %v9369_v61  ;;  %v9382_v59 = vcombine.high %v9337_v32, %v9369_v61  ;;  %v8573_v28 = vrot.slane %v8565_v33, %v14684_v42  ;;  %v8969_v25 = vcombine.low %v16752_v34, %v16803_v51 }
0x118e   : > { %v8580_v47 = vrot.slane %v8566_v0, %v14684_v42  ;;  %v17028_v53 = vrot.slane %v12611_v46, %v14681_v39  ;;  %v17031_v3 = vrot.slane %v12613_v52, %v14681_v39  ;;  %v17034_v61 = vrot.slane %v12615_v7, %v14681_v39 }
0x118f   : > { %v9943_v15 = vpack.c.bf16 %v9517_v62, %v9381_v44  ;;  %v9946_v11 = vpack.c.bf16 %v9518_v48, %v9382_v59  ;;  %v17037_v21 = vrot.slane %v7633_v14, %v14681_v39  ;;  %v8833_v27 = vcombine.low %v16729_v54, %v16740_v20  ;;  %v7446_v14 = vpop.permute.xlu1 %7445 }
0x1190   : > { %v8786_v22 = vcombine.high %v16639_v1, %v16642_v38  ;;  %v8589_v62 = vrot.slane %v8581_v30, %v14684_v42  ;;  %v8596_v59 = vrot.slane %v8582_v40, %v14684_v42  ;;  %v17048_v48 = vrot.slane %v7634_v63, %v14681_v39 }
0x1191   : > { %v9981_v46 = vsel %vm1520_vm4, %v9943_v15, 0  ;;  %v10056_v52 = vsel %vm1520_vm4, %v9946_v11, 0  ;;  %v12617_v7 = vcombine.low %v8573_v28, %v8580_v47  ;;  %v9929_v32 = vpack.c.bf16 %v8969_v25, %v8833_v27 }
0x1192   : > { %13192 = vmatpush3.bf16.xpose.msra.mxu0 %v9981_v46  ;;  %13210 = vmatpush3.bf16.xpose.msra.mxu1 %v10056_v52  ;;  %v12619_v33 = vcombine.high %v8573_v28, %v8580_v47  ;;  %v8834_v1 = vcombine.high %v16729_v54, %v16740_v20  ;;  %v8970_v38 = vcombine.high %v16752_v34, %v16803_v51 }
0x1193   : > { %13223 = vmatprep.subr.bf16.mxu0 %v18432_v31  ;;  %13241 = vmatprep.subr.bf16.mxu1 %v18432_v31  ;;  %v8800_v40 = vrot.slane %v8786_v22, %v14684_v42  ;;  %v8818_v0 = vcombine.high %v16645_v23, %v16648_v43  ;;  %v8922_v44 = vcombine.high %v16723_v16, %v16726_v18  ;;  %v7468_v43 = vpop.permute.xlu0 %7467  ;;  %v7448_v27 = vpop.permute.xlu1 %7447 }
0x1194   : > { %v8954_v30 = vcombine.high %v16734_v19, %v16755_v24  ;;  %v12621_v63 = vcombine.low %v8589_v62, %v8596_v59  ;;  %v12623_v54 = vcombine.high %v8589_v62, %v8596_v59  ;;  %v7617_v20 = vcombine.low %v16576_v17, %v7446_v14 }
0x1195   : > { %v7618_v34 = vcombine.high %v16576_v17, %v7446_v14  ;;  %v17066_v51 = vrot.slane %v12617_v7, %v14681_v39  ;;  %v8832_v28 = vrot.slane %v8818_v0, %v14684_v42  ;;  %v8936_v47 = vrot.slane %v8922_v44, %v14684_v42 }
0x1196   : > { %v8968_v23 = vrot.slane %v8954_v30, %v14684_v42  ;;  %v17072_v16 = vrot.slane %v12619_v33, %v14681_v39  ;;  %v9932_v18 = vpack.c.bf16 %v8970_v38, %v8834_v1  ;;  %v7625_v19 = vrot.slane %v7617_v20, %v14681_v39 }
0x1197   : > { %v7632_v24 = vrot.slane %v7618_v34, %v14681_v39  ;;  %v8839_v25 = vcombine.low %v8800_v40, %v8832_v28  ;;  %v8840_v15 = vcombine.high %v8800_v40, %v8832_v28  ;;  %v8041_v22 = vcombine.low %v7432_v4, %v7468_v43 }
0x1198   : > { %v8975_v17 = vcombine.low %v8936_v47, %v8968_v23  ;;  %v8976_v11 = vcombine.high %v8936_v47, %v8968_v23  ;;  %v8042_v46 = vcombine.high %v7432_v4, %v7468_v43  ;;  %v7649_v52 = vcombine.low %v7625_v19, %v17037_v21 }
0x1199   : > { %13194 = vmatmul.mubr.msk.bf16.vlgmr.msra.gmra.mrb[96].mxu0 %vm1520_vm4, %v9929_v32  ;;  %13212 = vmatmul.mubr.msk.bf16.vlgmr.msra.gmra.mrb[124].mxu1 %vm1520_vm4, %v9932_v18  ;;  %v7650_v7 = vcombine.high %v7625_v19, %v17037_v21  ;;  %v17085_v14 = vrot.slane %v12621_v63, %v14681_v39  ;;  %v17088_v32 = vrot.slane %v12623_v54, %v14681_v39 }
0x119a   : > { %v9947_v62 = vpack.c.bf16 %v8975_v17, %v8839_v25  ;;  %v9950_v59 = vpack.c.bf16 %v8976_v11, %v8840_v15  ;;  %13197 = vmatprep.mubr.msk.bf16.mxu0 %vm13999_vm0, %v18432_v31  ;;  %13215 = vmatprep.mubr.msk.bf16.mxu1 %vm13999_vm0, %v18432_v31  ;;  %v7665_v4 = vcombine.low %v7632_v24, %v17048_v48 }
0x119b   : > { %v7821_v33 = vcombine.low %v16586_v50, %v7448_v27  ;;  %v7666_v38 = vcombine.high %v7632_v24, %v17048_v48  ;;  %v7822_v40 = vcombine.high %v16586_v50, %v7448_v27  ;;  %v17097_v0 = vrot.slane %v8041_v22, %v14681_v39  ;;  %v7466_v24 = vpop.permute.xlu1 %7465 }
0x119c   : > { %v10125_v1 = vsel %vm1520_vm4, %v9947_v62, 0  ;;  %v10200_v21 = vsel %vm1520_vm4, %v9950_v59, 0  ;;  %v17100_v44 = vrot.slane %v8042_v46, %v14681_v39  ;;  %v9041_v30 = vcombine.low %v16945_v36, %v16948_v49 }
0x119d   : > { %13224 = vmatpush3.bf16.xpose.msra.mxu0 %v10125_v1  ;;  %13242 = vmatpush3.bf16.xpose.msra.mxu1 %v10200_v21  ;;  %v17105_v63 = vrot.slane %v7649_v52, %v14684_v42  ;;  %v17108_v54 = vrot.slane %v7650_v7, %v14684_v42  ;;  %v9073_v50 = vcombine.low %v16951_v45, %v16954_v12 }
0x119e   : > { %v9177_v48 = vcombine.low %v16963_v6, %v16966_v37  ;;  %13225 = vmatprep.subr.bf16.mxu0 %v18432_v31  ;;  %v17116_v20 = vrot.slane %v7665_v4, %v14684_v42  ;;  %v7829_v34 = vrot.slane %v7821_v33, %v14681_v39  ;;  %v9049_v28 = vrot.slane %v9041_v30, %v14684_v42 }
0x119f   : > { %v9209_v47 = vcombine.low %v16997_v10, %v17000_v35  ;;  %13243 = vmatprep.subr.bf16.mxu1 %v18432_v31  ;;  %v17124_v23 = vrot.slane %v7666_v38, %v14684_v42  ;;  %v7836_v43 = vrot.slane %v7822_v40, %v14681_v39  ;;  %v9081_v18 = vrot.slane %v9073_v50, %v14684_v42  ;;  %v17151_v40 = vpop.permute.xlu1 %7433 }
0x11a0   : > { %v9185_v19 = vrot.slane %v9177_v48, %v14684_v42  ;;  %v9058_v17 = vcombine.high %v16777_v29, %v16780_v8  ;;  %v9090_v15 = vcombine.high %v16794_v56, %v16797_v57  ;;  %v9194_v11 = vcombine.high %v16832_v9, %v16835_v58 }
0x11a1   : > { %v9217_v25 = vrot.slane %v9209_v47, %v14684_v42  ;;  %v9521_v27 = vcombine.low %v17105_v63, %v17108_v54  ;;  %v9105_v22 = vcombine.low %v9049_v28, %v9081_v18  ;;  %v9106_v46 = vcombine.high %v9049_v28, %v9081_v18 }
0x11a2   : > { %v9226_v52 = vcombine.high %v16838_v5, %v16842_v41  ;;  %v9072_v7 = vrot.slane %v9058_v17, %v14684_v42  ;;  %v9104_v29 = vrot.slane %v9090_v15, %v14684_v42  ;;  %v12625_v8 = vcombine.high %v17105_v63, %v17108_v54 }
0x11a3   : > { %v9241_v62 = vcombine.low %v9185_v19, %v9217_v25  ;;  %v9242_v59 = vcombine.high %v9185_v19, %v9217_v25  ;;  %v9537_v56 = vcombine.low %v17116_v20, %v17124_v23  ;;  %v9208_v57 = vrot.slane %v9194_v11, %v14684_v42 }
0x11a4   : > { %v9240_v9 = vrot.slane %v9226_v52, %v14684_v42  ;;  %v12626_v58 = vcombine.high %v17116_v20, %v17124_v23  ;;  %v9111_v4 = vcombine.low %v9072_v7, %v9104_v29  ;;  %v9112_v1 = vcombine.high %v9072_v7, %v9104_v29 }
0x11a5   : > { %v9930_v5 = vpack.c.bf16 %v9241_v62, %v9105_v22  ;;  %v9933_v41 = vpack.c.bf16 %v9242_v59, %v9106_v46  ;;  %v7837_v38 = vcombine.low %v17020_v26, %v7466_v24  ;;  %v7838_v30 = vcombine.high %v17020_v26, %v7466_v24  ;;  %v7450_v59 = vpop.permute.xlu1 %7449 }
0x11a6   : > { %v9247_v33 = vcombine.low %v9208_v57, %v9240_v9  ;;  %v9248_v21 = vcombine.high %v9208_v57, %v9240_v9  ;;  %v9313_v63 = vcombine.low %v17017_v13, %v17028_v53  ;;  %v9345_v54 = vcombine.low %v17031_v3, %v17034_v61 }
0x11a7   : > { %13198 = vmatmul.mubr.msk.bf16.gmra.mrb[100].mxu0 %vm1520_vm4, %v9930_v5  ;;  %13216 = vmatmul.mubr.msk.bf16.gmra.mrb[128].mxu1 %vm1520_vm4, %v9933_v41  ;;  %v7845_v20 = vrot.slane %v7837_v38, %v14681_v39  ;;  %v7852_v28 = vrot.slane %v7838_v30, %v14681_v39  ;;  %v9449_v23 = vcombine.low %v17066_v51, %v17072_v16  ;;  %v18522_v5 = vld [vmem:[#allocation35_spill] sm:$0xff] }
0x11a8   : > { %v9948_v50 = vpack.c.bf16 %v9247_v33, %v9111_v4  ;;  %v9951_v48 = vpack.c.bf16 %v9248_v21, %v9112_v1  ;;  %13201 = vmatprep.mubr.msk.bf16.mxu0 %vm13999_vm0, %v18432_v31  ;;  %13219 = vmatprep.mubr.msk.bf16.mxu1 %vm13999_vm0, %v18432_v31  ;;  %v9321_v26 = vrot.slane %v9313_v63, %v14684_v42  ;;  %v18523_v1 = vld [vmem:[#allocation12_spill] sm:$0xff]  ;;  %v18524_v21 = vld [vmem:[#allocation18_spill] sm:$0xff] }
0x11a9   : > { %v9353_v47 = vrot.slane %v9345_v54, %v14684_v42  ;;  %v7853_v24 = vcombine.low %v7829_v34, %v7845_v20  ;;  %v7854_v25 = vcombine.high %v7829_v34, %v7845_v20  ;;  %v17173_v17 = vrot.slane %v9521_v27, %v14681_v39 }
0x11aa   : > { %v10128_v18 = vsel %vm1520_vm4, %v9948_v50, 0  ;;  %v10203_v19 = vsel %vm1520_vm4, %v9951_v48, 0  ;;  %v7869_v15 = vcombine.low %v7836_v43, %v7852_v28  ;;  %v7870_v11 = vcombine.high %v7836_v43, %v7852_v28  ;;  %v18525_v28 = vld [vmem:[#allocation34_spill] sm:$0xff] }
0x11ab   : > { %13226 = vmatpush3.bf16.xpose.msra.mxu0 %v10128_v18  ;;  %13244 = vmatpush3.bf16.xpose.msra.mxu1 %v10203_v19  ;;  %v7861_v22 = vrot.slane %v7853_v24, %v14684_v42  ;;  %v7868_v46 = vrot.slane %v7854_v25, %v14684_v42  ;;  %v9457_v52 = vrot.slane %v9449_v23, %v14684_v42  ;;  %v18526_v23 = vld [vmem:[#allocation33_spill] sm:$0xff]  ;;  %v18527_v19 = vld [vmem:[#allocation11_spill] sm:$0xff]  ;;  %v7452_v25 = vpop.permute.xlu1 %7451 }
0x11ac   : > { %v9481_v62 = vcombine.low %v17085_v14, %v17088_v32  ;;  %13227 = vmatprep.subr.bf16.mxu0 %v18432_v31  ;;  %v17182_v34 = vrot.slane %v12625_v8, %v14681_v39  ;;  %v7877_v27 = vrot.slane %v7869_v15, %v14684_v42  ;;  %v7884_v7 = vrot.slane %v7870_v11, %v14684_v42 }
0x11ad   : > { %13245 = vmatprep.subr.bf16.mxu1 %v18432_v31  ;;  %v9330_v43 = vcombine.high %v16972_v2, %v16978_v55  ;;  %v17190_v29 = vrot.slane %v9537_v56, %v14681_v39  ;;  %v9377_v57 = vcombine.low %v9321_v26, %v9353_v47  ;;  %v9362_v41 = vcombine.high %v18522_v5, %v16990_v60 }
0x11ae   : > { %v9489_v9 = vrot.slane %v9481_v62, %v14684_v42  ;;  %v9589_v8 = vcombine.low %v7861_v22, %v7868_v46  ;;  %v12627_v4 = vcombine.high %v7861_v22, %v7868_v46  ;;  %v9605_v33 = vcombine.low %v7877_v27, %v7884_v7 }
0x11af   : > { %v9466_v38 = vcombine.high %v18524_v21, %v18523_v1  ;;  %v9378_v63 = vcombine.high %v9321_v26, %v9353_v47  ;;  %v9344_v2 = vrot.slane %v9330_v43, %v14684_v42  ;;  %v17199_v55 = vrot.slane %v12626_v58, %v14681_v39 }
0x11b0   : > { %v9513_v30 = vcombine.low %v9457_v52, %v9489_v9  ;;  %v9514_v54 = vcombine.high %v9457_v52, %v9489_v9  ;;  %v12628_v56 = vcombine.high %v7877_v27, %v7884_v7  ;;  %v9376_v50 = vrot.slane %v9362_v41, %v14684_v42  ;;  %v18528_v27 = vld [vmem:[#allocation22_spill] sm:$0xff] }
0x11b1   : > { %v9480_v48 = vrot.slane %v9466_v38, %v14684_v42  ;;  %v9498_v18 = vcombine.high %v18526_v23, %v18525_v28  ;;  %v8025_v24 = vcombine.low %v18527_v19, %v7450_v59  ;;  %v17207_v26 = vrot.slane %v9589_v8, %v14681_v39 }
0x11b2   : > { %v9931_v60 = vpack.c.bf16 %v9513_v30, %v9377_v57  ;;  %v9934_v20 = vpack.c.bf16 %v9514_v54, %v9378_v63  ;;  %v17210_v47 = vrot.slane %v12627_v4, %v14681_v39  ;;  %v17213_v58 = vrot.slane %v9605_v33, %v14681_v39  ;;  %v18529_v4 = vld [vmem:[#allocation17_spill] sm:$0xff]  ;;  %v18530_v33 = vld [vmem:[#allocation16_spill] sm:$0xff] }
0x11b3   : > { %v8026_v15 = vcombine.high %v18527_v19, %v7450_v59  ;;  %v9383_v11 = vcombine.low %v9344_v2, %v9376_v50  ;;  %v9512_v22 = vrot.slane %v9498_v18, %v14684_v42  ;;  %v8033_v46 = vrot.slane %v8025_v24, %v14681_v39 }
0x11b4   : > { %13202 = vmatmul.mubr.msk.bf16.gmra.mrb[104].mxu0 %vm1520_vm4, %v9931_v60  ;;  %13220 = vmatmul.mubr.msk.bf16.gmra.mrb[132].mxu1 %vm1520_vm4, %v9934_v20  ;;  %v9384_v52 = vcombine.high %v9344_v2, %v9376_v50  ;;  %v8229_v59 = vcombine.low %v18528_v27, %v7452_v25  ;;  %v8230_v8 = vcombine.high %v18528_v27, %v7452_v25  ;;  %v18531_v50 = vld [vmem:[#allocation15_spill] sm:$0xff]  ;;  %v7470_v60 = vpop.permute.xlu1 %7469 }
0x11b5   : > { %v8040_v62 = vrot.slane %v8026_v15, %v14681_v39  ;;  %13229 = vmatprep.mubr.msk.bf16.mxu0 %vm13999_vm0, %v18432_v31  ;;  %13247 = vmatprep.mubr.msk.bf16.mxu1 %vm13999_vm0, %v18432_v31  ;;  %v9519_v7 = vcombine.low %v9480_v48, %v9512_v22  ;;  %v9520_v43 = vcombine.high %v9480_v48, %v9512_v22 }
0x11b6   : > { %v8057_v57 = vcombine.low %v8033_v46, %v17097_v0  ;;  %v8058_v9 = vcombine.high %v8033_v46, %v17097_v0  ;;  %v8971_v1 = vcombine.low %v18530_v33, %v18529_v4  ;;  %v17236_v54 = vrot.slane %v12628_v56, %v14681_v39 }
0x11b7   : > { %v8073_v5 = vcombine.low %v8040_v62, %v17100_v44  ;;  %v8074_v41 = vcombine.high %v8040_v62, %v17100_v44  ;;  %v9949_v21 = vpack.c.bf16 %v9519_v7, %v9383_v11  ;;  %v9952_v38 = vpack.c.bf16 %v9520_v43, %v9384_v52  ;;  %v18532_v44 = vld [vmem:[#allocation14_spill] sm:$0xff] }
0x11b8   : > { %v8065_v30 = vrot.slane %v8057_v57, %v14684_v42  ;;  %v8072_v63 = vrot.slane %v8058_v9, %v14684_v42  ;;  %v8835_v48 = vcombine.low %v18532_v44, %v18531_v50  ;;  %v8237_v18 = vrot.slane %v8229_v59, %v14681_v39 }
0x11b9   : > { %v8081_v0 = vrot.slane %v8073_v5, %v14684_v42  ;;  %v8088_v2 = vrot.slane %v8074_v41, %v14684_v42  ;;  %v10131_v20 = vsel %vm1520_vm4, %v9949_v21, 0  ;;  %v10206_v28 = vsel %vm1520_vm4, %v9952_v38, 0 }
0x11ba   : > { %v9657_v23 = vcombine.low %v8065_v30, %v8072_v63  ;;  %13228 = vmatpush3.bf16.xpose.msra.mxu0 %v10131_v20  ;;  %13246 = vmatpush3.bf16.xpose.msra.mxu1 %v10206_v28  ;;  %v8244_v56 = vrot.slane %v8230_v8, %v14681_v39  ;;  %v9935_v19 = vpack.c.bf16 %v8971_v1, %v8835_v48 }
0x11bb   : > { %v8972_v24 = vcombine.high %v18530_v33, %v18529_v4  ;;  %v12629_v25 = vcombine.high %v8065_v30, %v8072_v63  ;;  %v8836_v15 = vcombine.high %v18532_v44, %v18531_v50  ;;  %v8245_v11 = vcombine.low %v17151_v40, %v7470_v60  ;;  %13259 = vmatprep.subr.bf16.mxu0 %v18432_v31 }
0x11bc   : > { %v8246_v22 = vcombine.high %v17151_v40, %v7470_v60  ;;  %v17254_v46 = vrot.slane %v9657_v23, %v14681_v39  ;;  %v9673_v52 = vcombine.low %v8081_v0, %v8088_v2  ;;  %v12630_v62 = vcombine.high %v8081_v0, %v8088_v2  ;;  %13277 = vmatprep.subr.bf16.mxu1 %v18432_v31 }
0x11bd   : > { %v9042_v27 = vcombine.high %v16945_v36, %v16948_v49  ;;  %v8253_v59 = vrot.slane %v8245_v11, %v14681_v39  ;;  %v9074_v43 = vcombine.high %v16951_v45, %v16954_v12  ;;  %v9178_v40 = vcombine.high %v16963_v6, %v16966_v37 }
0x11be   : > { %v8260_v7 = vrot.slane %v8246_v22, %v14681_v39  ;;  %v9938_v57 = vpack.c.bf16 %v8972_v24, %v8836_v15  ;;  %v9210_v5 = vcombine.high %v16997_v10, %v17000_v35  ;;  %v9553_v41 = vcombine.low %v17173_v17, %v17182_v34 }
0x11bf   : > { %v9056_v9 = vrot.slane %v9042_v27, %v14684_v42  ;;  %v8261_v36 = vcombine.low %v8237_v18, %v8253_v59  ;;  %v8262_v49 = vcombine.high %v8237_v18, %v8253_v59  ;;  %v9088_v33 = vrot.slane %v9074_v43, %v14684_v42 }
0x11c0   : > { %v8277_v8 = vcombine.low %v8244_v56, %v8260_v7  ;;  %v8278_v4 = vcombine.high %v8244_v56, %v8260_v7  ;;  %v9192_v45 = vrot.slane %v9178_v40, %v14684_v42  ;;  %v9224_v12 = vrot.slane %v9210_v5, %v14684_v42 }
0x11c1   : > { %v9569_v6 = vcombine.low %v17190_v29, %v17199_v55  ;;  %13230 = vmatmul.mubr.msk.bf16.vlgmr.msra.gmra.mrb[108].mxu0 %vm1520_vm4, %v9935_v19  ;;  %13248 = vmatmul.mubr.msk.bf16.vlgmr.msra.gmra.mrb[136].mxu1 %vm1520_vm4, %v9938_v57  ;;  %v8269_v37 = vrot.slane %v8261_v36, %v14684_v42  ;;  %v8276_v10 = vrot.slane %v8262_v49, %v14684_v42 }
0x11c2   : > { %v8285_v35 = vrot.slane %v8277_v8, %v14684_v42  ;;  %v17281_v1 = vrot.slane %v12629_v25, %v14681_v39  ;;  %v8292_v21 = vrot.slane %v8278_v4, %v14684_v42  ;;  %13233 = vmatprep.mubr.msk.bf16.mxu0 %vm13999_vm0, %v18432_v31  ;;  %13251 = vmatprep.mubr.msk.bf16.mxu1 %vm13999_vm0, %v18432_v31 }
0x11c3   : > { %v9243_v38 = vcombine.low %v9192_v45, %v9224_v12  ;;  %v17289_v30 = vrot.slane %v9673_v52, %v14681_v39  ;;  %v9725_v63 = vcombine.low %v8269_v37, %v8276_v10  ;;  %v12631_v0 = vcombine.high %v8269_v37, %v8276_v10 }
0x11c4   : > { %v9244_v2 = vcombine.high %v9192_v45, %v9224_v12  ;;  %v17292_v50 = vrot.slane %v12630_v62, %v14681_v39  ;;  %v9741_v44 = vcombine.low %v8285_v35, %v8292_v21  ;;  %v12632_v48 = vcombine.high %v8285_v35, %v8292_v21 }
0x11c5   : > { %v9107_v60 = vcombine.low %v9056_v9, %v9088_v33  ;;  %v9108_v20 = vcombine.high %v9056_v9, %v9088_v33  ;;  %v9561_v28 = vrot.slane %v9553_v41, %v14684_v42  ;;  %v9577_v23 = vrot.slane %v9569_v6, %v14684_v42 }
0x11c6   : > { %v9621_v18 = vcombine.low %v17207_v26, %v17210_v47  ;;  %v17299_v56 = vrot.slane %v9725_v63, %v14681_v39  ;;  %v17302_v19 = vrot.slane %v12631_v0, %v14681_v39  ;;  %v9637_v25 = vcombine.low %v17213_v58, %v17236_v54 }
0x11c7   : > { %v9936_v24 = vpack.c.bf16 %v9243_v38, %v9107_v60  ;;  %v17307_v15 = vrot.slane %v9741_v44, %v14681_v39  ;;  %v17310_v11 = vrot.slane %v12632_v48, %v14681_v39  ;;  %v9939_v22 = vpack.c.bf16 %v9244_v2, %v9108_v20 }
0x11c8   : > { %v9629_v52 = vrot.slane %v9621_v18, %v14684_v42  ;;  %v9645_v62 = vrot.slane %v9637_v25, %v14684_v42  ;;  %v9314_v27 = vcombine.high %v17017_v13, %v17028_v53  ;;  %v9346_v59 = vcombine.high %v17031_v3, %v17034_v61 }
0x11c9   : > { %v9450_v7 = vcombine.high %v17066_v51, %v17072_v16  ;;  %13234 = vmatmul.mubr.msk.bf16.gmra.mrb[112].mxu0 %vm1520_vm4, %v9936_v24  ;;  %13252 = vmatmul.mubr.msk.bf16.gmra.mrb[140].mxu1 %vm1520_vm4, %v9939_v22  ;;  %v9585_v43 = vcombine.low %v9561_v28, %v9577_v23  ;;  %v9586_v40 = vcombine.high %v9561_v28, %v9577_v23 }
0x11ca   : > { %v9482_v57 = vcombine.high %v17085_v14, %v17088_v32  ;;  %v9653_v9 = vcombine.low %v9629_v52, %v9645_v62  ;;  %v9654_v5 = vcombine.high %v9629_v52, %v9645_v62  ;;  %13237 = vmatprep.mubr.msk.bf16.mxu0 %vm13999_vm0, %v18432_v31  ;;  %13255 = vmatprep.mubr.msk.bf16.mxu1 %vm13999_vm0, %v18432_v31 }
0x11cb   : > { %v9328_v13 = vrot.slane %v9314_v27, %v14684_v42  ;;  %v9360_v53 = vrot.slane %v9346_v59, %v14684_v42  ;;  %v9464_v3 = vrot.slane %v9450_v7, %v14684_v42  ;;  %v9689_v51 = vcombine.low %v17254_v46, %v17281_v1 }
0x11cc   : > { %v9496_v61 = vrot.slane %v9482_v57, %v14684_v42  ;;  %v9953_v16 = vpack.c.bf16 %v9653_v9, %v9585_v43  ;;  %v9956_v14 = vpack.c.bf16 %v9654_v5, %v9586_v40  ;;  %v9705_v32 = vcombine.low %v17289_v30, %v17292_v50 }
0x11cd   : > { %v9757_v41 = vcombine.low %v17299_v56, %v17302_v19  ;;  %v9379_v36 = vcombine.low %v9328_v13, %v9360_v53  ;;  %v9380_v8 = vcombine.high %v9328_v13, %v9360_v53  ;;  %v9697_v33 = vrot.slane %v9689_v51, %v14684_v42 }
0x11ce   : > { %v9515_v49 = vcombine.low %v9464_v3, %v9496_v61  ;;  %v9516_v4 = vcombine.high %v9464_v3, %v9496_v61  ;;  %13260 = vmatpush3.bf16.msra.mxu0 %v9953_v16  ;;  %13278 = vmatpush3.bf16.msra.mxu1 %v9956_v14  ;;  %v9713_v45 = vrot.slane %v9705_v32, %v14684_v42 }
0x11cf   : > { %v9765_v12 = vrot.slane %v9757_v41, %v14684_v42  ;;  %13261 = vmatprep.subr.bf16.mxu0 %v18432_v31  ;;  %13279 = vmatprep.subr.bf16.mxu1 %v18432_v31  ;;  %v9773_v10 = vcombine.low %v17307_v15, %v17310_v11  ;;  %v9554_v38 = vcombine.high %v17173_v17, %v17182_v34 }
0x11d0   : > { %v9937_v6 = vpack.c.bf16 %v9515_v49, %v9379_v36  ;;  %v9940_v37 = vpack.c.bf16 %v9516_v4, %v9380_v8  ;;  %v9721_v35 = vcombine.low %v9697_v33, %v9713_v45  ;;  %v9722_v21 = vcombine.high %v9697_v33, %v9713_v45 }
0x11d1   : > { %v9570_v63 = vcombine.high %v17190_v29, %v17199_v55  ;;  %v9781_v0 = vrot.slane %v9773_v10, %v14684_v42  ;;  %v9622_v2 = vcombine.high %v17207_v26, %v17210_v47  ;;  %v9638_v44 = vcombine.high %v17213_v58, %v17236_v54 }
0x11d2   : > { %13238 = vmatmul.mubr.msk.bf16.gmra.mrb[116].mxu0 %vm1520_vm4, %v9937_v6  ;;  %13256 = vmatmul.mubr.msk.bf16.gmra.mrb[144].mxu1 %vm1520_vm4, %v9940_v37  ;;  %v9568_v17 = vrot.slane %v9554_v38, %v14684_v42  ;;  %v9690_v29 = vcombine.high %v17254_v46, %v17281_v1  ;;  %v9706_v20 = vcombine.high %v17289_v30, %v17292_v50 }
0x11d3   : > { %13265 = vmatprep.mubr.msk.bf16.mxu0 %vm13999_vm0, %v18432_v31  ;;  %13283 = vmatprep.mubr.msk.bf16.mxu1 %vm13999_vm0, %v18432_v31  ;;  %v9584_v34 = vrot.slane %v9570_v63, %v14684_v42  ;;  %v9789_v55 = vcombine.low %v9765_v12, %v9781_v0  ;;  %v9790_v48 = vcombine.high %v9765_v12, %v9781_v0 }
0x11d4   : > { %v9636_v26 = vrot.slane %v9622_v2, %v14684_v42  ;;  %v9652_v47 = vrot.slane %v9638_v44, %v14684_v42  ;;  %v9704_v60 = vrot.slane %v9690_v29, %v14684_v42  ;;  %v9720_v25 = vrot.slane %v9706_v20, %v14684_v42 }
0x11d5   : > { %v9587_v58 = vcombine.low %v9568_v17, %v9584_v34  ;;  %v9588_v54 = vcombine.high %v9568_v17, %v9584_v34  ;;  %v9954_v28 = vpack.c.bf16 %v9789_v55, %v9721_v35  ;;  %v9957_v23 = vpack.c.bf16 %v9790_v48, %v9722_v21 }
0x11d6   : > { %v9655_v18 = vcombine.low %v9636_v26, %v9652_v47  ;;  %v9656_v24 = vcombine.high %v9636_v26, %v9652_v47  ;;  %v9758_v46 = vcombine.high %v17299_v56, %v17302_v19  ;;  %v9774_v1 = vcombine.high %v17307_v15, %v17310_v11 }
0x11d7   : > { %13262 = vmatpush3.bf16.msra.mxu0 %v9954_v28  ;;  %13280 = vmatpush3.bf16.msra.mxu1 %v9957_v23  ;;  %v9723_v30 = vcombine.low %v9704_v60, %v9720_v25  ;;  %v9724_v27 = vcombine.high %v9704_v60, %v9720_v25 }
0x11d8   : > { %v17374_v22 = vpack.c.bf16 %v9655_v18, %v9587_v58  ;;  %v17376_v52 = vpack.c.bf16 %v9656_v24, %v9588_v54  ;;  %13263 = vmatprep.subr.bf16.mxu0 %v18432_v31  ;;  %13281 = vmatprep.subr.bf16.mxu1 %v18432_v31  ;;  %v9772_v50 = vrot.slane %v9758_v46, %v14684_v42 }
0x11d9   : > { %v9788_v62 = vrot.slane %v9774_v1, %v14684_v42 }
0x11db   : > { %v9791_v56 = vcombine.low %v9772_v50, %v9788_v62  ;;  %v9792_v19 = vcombine.high %v9772_v50, %v9788_v62 }
0x11dd   : > { %v17382_v59 = vpack.c.bf16 %v9791_v56, %v9723_v30  ;;  %v17384_v15 = vpack.c.bf16 %v9792_v19, %v9724_v27 }
0x126c   : > { %v10017_v11 = vpop.f32.mrb[96].mxu0  ;;  %v10092_v7 = vpop.f32.mrb[124].mxu1 }
0x126d   : > { %v10265_v43 = vmul.f32 0.25, %v10017_v11  ;;  %v10271_v40 = vmul.f32 0.25, %v10092_v7  ;;  %v13195_v57 = vpop.f32.mrb[97].mxu0  ;;  %v13213_v9 = vpop.f32.mrb[125].mxu1 }
0x126e   : > { %v10020_v5 = vpop.f32.mrb[98].mxu0  ;;  %v10095_v13 = vpop.f32.mrb[126].mxu1 }
0x126f   : > { %v17388_v3 = vsel %vm15477_vm5, %v10265_v43, -1e+30  ;;  %v10266_v61 = vmul.f32 0.25, %v10020_v5  ;;  %v13196_v51 = vpop.f32.mrb[99].mxu0  ;;  %v13214_v16 = vpop.f32.mrb[127].mxu1  ;;  %v10272_v49 = vmul.f32 0.25, %v10095_v13 }
0x1270   : > { %v10313_v14 = vsel %vm5082_vm6, %v17388_v3, -inf  ;;  %v17394_v32 = vsel %vm15477_vm5, %v10271_v40, -1e+30 }
0x1271   : > { %v17398_v36 = vsel %vm15482_vm7, %v10266_v61, -1e+30  ;;  %10314 = vmax.xlane.f32.xlu0 %v10313_v14  ;;  %v10331_v4 = vsel %vm5082_vm6, %v17394_v32, -inf  ;;  %v17406_v33 = vsel %vm15482_vm7, %v10272_v49, -1e+30 }
0x1272   : > { %v10316_v8 = vsel %vm5082_vm6, %v17398_v36, -inf  ;;  %v10334_v45 = vsel %vm5082_vm6, %v17406_v33, -inf }
0x1273   : > { %10317 = vmax.xlane.f32.xlu1 %v10316_v8 }
0x1275   : > { %10332 = vmax.xlane.f32.xlu0 %v10331_v4 }
0x1279   : > { %10335 = vmax.xlane.f32.xlu0 %v10334_v45 }
0x127a   : > { %v10025_v12 = vpop.f32.mrb[100].mxu0  ;;  %v10100_v6 = vpop.f32.mrb[128].mxu1 }
0x127b   : > { %v10267_v37 = vmul.f32 0.25, %v10025_v12  ;;  %v10273_v10 = vmul.f32 0.25, %v10100_v6  ;;  %v13199_v35 = vpop.f32.mrb[101].mxu0  ;;  %v13217_v21 = vpop.f32.mrb[129].mxu1 }
0x127c   : > { %v10028_v38 = vpop.f32.mrb[102].mxu0  ;;  %v10103_v63 = vpop.f32.mrb[130].mxu1 }
0x127d   : > { %v17412_v2 = vsel %vm15513_vm8, %v10267_v37, -1e+30  ;;  %v10268_v44 = vmul.f32 0.25, %v10028_v38  ;;  %v10274_v17 = vmul.f32 0.25, %v10103_v63  ;;  %v13200_v34 = vpop.f32.mrb[103].mxu0  ;;  %v13218_v29 = vpop.f32.mrb[131].mxu1 }
0x127e   : > { %v10319_v55 = vsel %vm5082_vm6, %v17412_v2, -inf  ;;  %v17418_v48 = vsel %vm15513_vm8, %v10273_v10, -1e+30 }
0x127f   : > { %v17422_v47 = vsel %vm15518_vm9, %v10268_v44, -1e+30  ;;  %10320 = vmax.xlane.f32.xlu0 %v10319_v55  ;;  %v17428_v54 = vsel %vm15518_vm9, %v10274_v17, -1e+30  ;;  %v10337_v60 = vsel %vm5082_vm6, %v17418_v48, -inf }
0x1280   : > { %v10322_v58 = vsel %vm5082_vm6, %v17422_v47, -inf  ;;  %v10340_v20 = vsel %vm5082_vm6, %v17428_v54, -inf }
0x1281   : > { %10323 = vmax.xlane.f32.xlu1 %v10322_v58 }
0x1283   : > { %10338 = vmax.xlane.f32.xlu0 %v10337_v60 }
0x1285   : > { %10341 = vmax.xlane.f32.xlu1 %v10340_v20 }
0x1287   : > { %v10033_v28 = vpop.f32.mrb[104].mxu0  ;;  %v10108_v23 = vpop.f32.mrb[132].mxu1 }
0x1288   : > { %v10269_v18 = vmul.f32 0.25, %v10033_v28  ;;  %v10275_v24 = vmul.f32 0.25, %v10108_v23  ;;  %v13203_v25 = vpop.f32.mrb[105].mxu0  ;;  %v13221_v46 = vpop.f32.mrb[133].mxu1 }
0x1289   : > { %v10036_v1 = vpop.f32.mrb[106].mxu0  ;;  %v10111_v30 = vpop.f32.mrb[134].mxu1 }
0x128a   : > { %v17436_v62 = vsel %vm15549_vm10, %v10269_v18, -1e+30  ;;  %v10270_v27 = vmul.f32 0.25, %v10036_v1  ;;  %v10276_v56 = vmul.f32 0.25, %v10111_v30  ;;  %v13204_v19 = vpop.f32.mrb[107].mxu0  ;;  %v13222_v11 = vpop.f32.mrb[135].mxu1 }
0x128b   : > { %v10325_v7 = vsel %vm5082_vm6, %v17436_v62, -inf  ;;  %v17442_v43 = vsel %vm15549_vm10, %v10275_v24, -1e+30 }
0x128c   : > { %v17446_v57 = vsel %vm15554_vm11, %v10270_v27, -1e+30  ;;  %10326 = vmax.xlane.f32.xlu0 %v10325_v7  ;;  %v17452_v5 = vsel %vm15554_vm11, %v10276_v56, -1e+30  ;;  %v10343_v13 = vsel %vm5082_vm6, %v17442_v43, -inf }
0x128d   : > { %v10328_v9 = vsel %vm5082_vm6, %v17446_v57, -inf  ;;  %v10346_v61 = vsel %vm5082_vm6, %v17452_v5, -inf }
0x128e   : > { %10329 = vmax.xlane.f32.xlu1 %v10328_v9 }
0x1290   : > { %10344 = vmax.xlane.f32.xlu0 %v10343_v13 }
0x1292   : > { %10347 = vmax.xlane.f32.xlu1 %v10346_v61 }
0x1294   : > { %v10167_v51 = vpop.f32.mrb[108].mxu0  ;;  %v10242_v16 = vpop.f32.mrb[136].mxu1 }
0x1295   : > { %v10277_v14 = vmul.f32 0.25, %v10167_v51  ;;  %v10283_v49 = vmul.f32 0.25, %v10242_v16  ;;  %v13231_v8 = vpop.f32.mrb[109].mxu0  ;;  %v13249_v4 = vpop.f32.mrb[137].mxu1 }
0x1296   : > { %v10170_v45 = vpop.f32.mrb[110].mxu0  ;;  %v10245_v12 = vpop.f32.mrb[138].mxu1 }
0x1297   : > { %v17460_v6 = vsel %vm15477_vm5, %v10277_v14, -1e+30  ;;  %v10278_v37 = vmul.f32 0.25, %v10170_v45  ;;  %v10284_v10 = vmul.f32 0.25, %v10245_v12  ;;  %v13232_v35 = vpop.f32.mrb[111].mxu0  ;;  %v13250_v21 = vpop.f32.mrb[139].mxu1 }
0x1298   : > { %v10349_v38 = vsel %vm5082_vm6, %v17460_v6, -inf  ;;  %v17466_v63 = vsel %vm15477_vm5, %v10283_v49, -1e+30 }
0x1299   : > { %v17470_v44 = vsel %vm15482_vm7, %v10278_v37, -1e+30  ;;  %10350 = vmax.xlane.f32.xlu0 %v10349_v38  ;;  %v17476_v34 = vsel %vm15482_vm7, %v10284_v10, -1e+30  ;;  %v10367_v53 = vsel %vm5082_vm6, %v17466_v63, -inf }
0x129a   : > { %v10352_v17 = vsel %vm5082_vm6, %v17470_v44, -inf  ;;  %v10370_v24 = vsel %vm5082_vm6, %v17476_v34, -inf }
0x129b   : > { %10353 = vmax.xlane.f32.xlu1 %v10352_v17 }
0x129c   : > { %v10175_v29 = vpop.f32.mrb[112].mxu0  ;;  %v10250_v55 = vpop.f32.mrb[140].mxu1 }
0x129d   : > { %v10279_v58 = vmul.f32 0.25, %v10175_v29  ;;  %v10285_v60 = vmul.f32 0.25, %v10250_v55  ;;  %v13235_v20 = vpop.f32.mrb[113].mxu0  ;;  %v13253_v28 = vpop.f32.mrb[141].mxu1  ;;  %10368 = vmax.xlane.f32.xlu0 %v10367_v53  ;;  %v18539_v53 = vld [vmem:[#allocation20_spill] sm:$0xff] }
0x129e   : > { %v10178_v23 = vpop.f32.mrb[114].mxu0  ;;  %v10253_v18 = vpop.f32.mrb[142].mxu1 }
0x129f   : > { %v17484_v41 = vsel %vm15513_vm8, %v10279_v58, -1e+30  ;;  %v10280_v25 = vmul.f32 0.25, %v10178_v23  ;;  %v10286_v46 = vmul.f32 0.25, %v10253_v18  ;;  %10371 = vmax.xlane.f32.xlu1 %v10370_v24  ;;  %v13236_v1 = vpop.f32.mrb[115].mxu0  ;;  %v13254_v30 = vpop.f32.mrb[143].mxu1 }
0x12a0   : > { %v10355_v27 = vsel %vm5082_vm6, %v17484_v41, -inf  ;;  %v17490_v56 = vsel %vm15513_vm8, %v10285_v60, -1e+30  ;;  %v17532_v58 = vpop.permute.xlu0 %7435  ;;  %v17534_v60 = vpop.permute.xlu1 %7437 }
0x12a1   : > { %v17494_v19 = vsel %vm15518_vm9, %v10280_v25, -1e+30  ;;  %10356 = vmax.xlane.f32.xlu0 %v10355_v27  ;;  %v17500_v7 = vsel %vm15518_vm9, %v10286_v46, -1e+30  ;;  %v10373_v0 = vsel %vm5082_vm6, %v17490_v56, -inf }
0x12a2   : > { %v10358_v11 = vsel %vm5082_vm6, %v17494_v19, -inf  ;;  %v10376_v4 = vsel %vm5082_vm6, %v17500_v7, -inf }
0x12a3   : > { %10359 = vmax.xlane.f32.xlu1 %v10358_v11 }
0x12a4   : > { %v17536_v20 = vpop.permute.xlu0 %7453  ;;  %v17538_v40 = vpop.permute.xlu1 %7455 }
0x12a5   : > { %v10183_v9 = vpop.f32.mrb[116].mxu0  ;;  %v10258_v13 = vpop.f32.mrb[144].mxu1  ;;  %10374 = vmax.xlane.f32.xlu0 %v10373_v0 }
0x12a6   : > { %v10281_v61 = vmul.f32 0.25, %v10183_v9  ;;  %v10287_v51 = vmul.f32 0.25, %v10258_v13  ;;  %v13239_v16 = vpop.f32.mrb[117].mxu0  ;;  %v13257_v14 = vpop.f32.mrb[145].mxu1 }
0x12a7   : > { %v10186_v49 = vpop.f32.mrb[118].mxu0  ;;  %v10261_v8 = vpop.f32.mrb[146].mxu1  ;;  %10377 = vmax.xlane.f32.xlu1 %v10376_v4 }
0x12a8   : > { %v17508_v26 = vsel %vm15549_vm10, %v10281_v61, -1e+30  ;;  %v10282_v45 = vmul.f32 0.25, %v10186_v49  ;;  %v10288_v12 = vmul.f32 0.25, %v10261_v8  ;;  %v13240_v37 = vpop.f32.mrb[119].mxu0  ;;  %v13258_v10 = vpop.f32.mrb[147].mxu1 }
0x12a9   : > { %v10361_v35 = vsel %vm5082_vm6, %v17508_v26, -inf  ;;  %v17514_v21 = vsel %vm15549_vm10, %v10287_v51, -1e+30 }
0x12aa   : > { %v17518_v38 = vsel %vm15554_vm11, %v10282_v45, -1e+30  ;;  %10362 = vmax.xlane.f32.xlu0 %v10361_v35  ;;  %v17524_v29 = vsel %vm15554_vm11, %v10288_v12, -1e+30  ;;  %v10379_v55 = vsel %vm5082_vm6, %v17514_v21, -inf }
0x12ab   : > { %v10364_v17 = vsel %vm5082_vm6, %v17518_v38, -inf  ;;  %v10382_v50 = vsel %vm5082_vm6, %v17524_v29, -inf }
0x12ac   : > { %10365 = vmax.xlane.f32.xlu1 %v10364_v17 }
0x12ae   : > { %10380 = vmax.xlane.f32.xlu0 %v10379_v55 }
0x12b0   : > { %10383 = vmax.xlane.f32.xlu1 %v10382_v50 }
0x12c4   : > { %7471 = vrot.lane.b32.xlu0 %v18539_v53, %s18501_s23 }
0x12fe   : > { %v10315_v28 = vpop.xlane.xlu0 %10314 }
0x12ff   : > { %v10385_v23 = vsub.f32 %v17388_v3, %v10315_v28 }
0x1300   : > { %v10318_v18 = vpop.xlane.xlu1 %10317 }
0x1301   : > { %v10409_v24 = vmul.f32 1.442695, %v10385_v23  ;;  %v10386_v25 = vsub.f32 %v17398_v36, %v10318_v18 }
0x1302   : > { %v10333_v46 = vpop.xlane.xlu0 %10332 }
0x1303   : > { %13813 = vpow2.f32 %v10409_v24  ;;  %v10411_v1 = vmul.f32 1.442695, %v10386_v25  ;;  %v10391_v30 = vsub.f32 %v17394_v32, %v10333_v46 }
0x1305   : > { %13815 = vpow2.f32 %v10411_v1  ;;  %v10421_v27 = vmul.f32 1.442695, %v10391_v30 }
0x1306   : > { %v10336_v11 = vpop.xlane.xlu0 %10335 }
0x1307   : > { %13817 = vpow2.f32 %v10421_v27  ;;  %v10392_v9 = vsub.f32 %v17406_v33, %v10336_v11 }
0x1309   : > { %v10423_v13 = vmul.f32 1.442695, %v10392_v9 }
0x130b   : > { %13819 = vpow2.f32 %v10423_v13 }
0x130c   : > { %v10321_v0 = vpop.xlane.xlu0 %10320 }
0x130d   : > { %v17544_v61 = vpop.eup %13813  ;;  %v10387_v3 = vsub.f32 %v17412_v2, %v10321_v0 }
0x130e   : > { %v10324_v51 = vpop.xlane.xlu1 %10323  ;;  %v10457_v36 = vsel %vm5082_vm6, %v17544_v61, 0.0 }
0x130f   : > { %v17549_v16 = vpop.eup %13815  ;;  %v10413_v32 = vmul.f32 1.442695, %v10387_v3  ;;  %10458 = vadd.xlane.f32.xlu0 %v10457_v36 }
0x1310   : > { %v10339_v14 = vpop.xlane.xlu0 %10338  ;;  %v10460_v49 = vsel %vm5082_vm6, %v17549_v16, 0.0 }
0x1311   : > { %v17553_v33 = vpop.eup %13817  ;;  %13821 = vpow2.f32 %v10413_v32  ;;  %v10393_v8 = vsub.f32 %v17418_v48, %v10339_v14  ;;  %10461 = vadd.xlane.f32.xlu1 %v10460_v49 }
0x1312   : > { %v10342_v4 = vpop.xlane.xlu1 %10341  ;;  %v10475_v2 = vsel %vm5082_vm6, %v17553_v33, 0.0 }
0x1313   : > { %v10394_v45 = vsub.f32 %v17428_v54, %v10342_v4  ;;  %v10425_v12 = vmul.f32 1.442695, %v10393_v8  ;;  %10476 = vadd.xlane.f32.xlu0 %v10475_v2  ;;  %v10388_v8 = vsub.f32 %v17422_v47, %v10324_v51 }
0x1315   : > { %v17559_v37 = vpop.eup %13819  ;;  %v10427_v10 = vmul.f32 1.442695, %v10394_v45  ;;  %13823 = vpow2.f32 %v10425_v12  ;;  %v10415_v12 = vmul.f32 1.442695, %v10388_v8 }
0x1316   : > { %v10478_v35 = vsel %vm5082_vm6, %v17559_v37, 0.0 }
0x1317   : > { %13825 = vpow2.f32 %v10427_v10  ;;  %10479 = vadd.xlane.f32.xlu0 %v10478_v35 }
0x1319   : > { %v10327_v17 = vpop.xlane.xlu0 %10326 }
0x131a   : > { %v10389_v48 = vsub.f32 %v17436_v62, %v10327_v17  ;;  %v18540_v62 = vld [vmem:[#allocation13_spill] sm:$0xff] }
0x131b   : > { %v17564_v55 = vpop.eup %13821  ;;  %v10330_v1 = vpop.xlane.xlu1 %10329 }
0x131c   : > { %v10417_v50 = vmul.f32 1.442695, %v10389_v48  ;;  %v10463_v54 = vsel %vm5082_vm6, %v17564_v55, 0.0  ;;  %v10390_v10 = vsub.f32 %v17446_v57, %v10330_v1 }
0x131d   : > { %v10345_v28 = vpop.xlane.xlu0 %10344  ;;  %10464 = vadd.xlane.f32.xlu0 %v10463_v54 }
0x131e   : > { %13827 = vpow2.f32 %v10417_v50  ;;  %v10395_v23 = vsub.f32 %v17442_v43, %v10345_v28  ;;  %v10419_v54 = vmul.f32 1.442695, %v10390_v10 }
0x131f   : > { %v17569_v18 = vpop.eup %13823  ;;  %v10348_v9 = vpop.xlane.xlu1 %10347 }
0x1320   : > { %v10429_v24 = vmul.f32 1.442695, %v10395_v23  ;;  %v10481_v25 = vsel %vm5082_vm6, %v17569_v18, 0.0  ;;  %v10396_v47 = vsub.f32 %v17452_v5, %v10348_v9 }
0x1321   : > { %v17573_v46 = vpop.eup %13825  ;;  %10482 = vadd.xlane.f32.xlu0 %v10481_v25 }
0x1322   : > { %13829 = vpow2.f32 %v10429_v24  ;;  %7473 = vrot.lane.b32.xlu1 %v18540_v62, %s18501_s23  ;;  %v10484_v30 = vsel %vm5082_vm6, %v17573_v46, 0.0 }
0x1325   : > { %10485 = vadd.xlane.f32.xlu0 %v10484_v30 }
0x1326   : > { %v10351_v27 = vpop.xlane.xlu0 %10350 }
0x1327   : > { %v10397_v11 = vsub.f32 %v17460_v6, %v10351_v27 }
0x1328   : > { %v17579_v43 = vpop.eup %13827  ;;  %v10354_v6 = vpop.xlane.xlu1 %10353 }
0x1329   : > { %v10469_v13 = vsel %vm5082_vm6, %v17579_v43, 0.0  ;;  %v10433_v0 = vmul.f32 1.442695, %v10397_v11  ;;  %v10398_v5 = vsub.f32 %v17470_v44, %v10354_v6 }
0x132a   : > { %10470 = vadd.xlane.f32.xlu0 %v10469_v13  ;;  %v10369_v3 = vpop.xlane.xlu0 %10368 }
0x132b   : > { %13831 = vpow2.f32 %v10433_v0  ;;  %v10403_v32 = vsub.f32 %v17466_v63, %v10369_v3  ;;  %v10435_v9 = vmul.f32 1.442695, %v10398_v5 }
0x132c   : > { %v17584_v36 = vpop.eup %13829  ;;  %v10372_v17 = vpop.xlane.xlu1 %10371 }
0x132d   : > { %v10487_v14 = vsel %vm5082_vm6, %v17584_v36, 0.0  ;;  %v10445_v49 = vmul.f32 1.442695, %v10403_v32  ;;  %v10404_v13 = vsub.f32 %v17476_v34, %v10372_v17 }
0x132e   : > { %10488 = vadd.xlane.f32.xlu0 %v10487_v14  ;;  %v10357_v4 = vpop.xlane.xlu0 %10356 }
0x132f   : > { %13833 = vpow2.f32 %v10445_v49  ;;  %v10399_v2 = vsub.f32 %v17484_v41, %v10357_v4  ;;  %v10447_v32 = vmul.f32 1.442695, %v10404_v13 }
0x1330   : > { %v10360_v24 = vpop.xlane.xlu1 %10359 }
0x1331   : > { %v10437_v45 = vmul.f32 1.442695, %v10399_v2  ;;  %v10400_v14 = vsub.f32 %v17494_v19, %v10360_v24 }
0x1332   : > { %v10375_v35 = vpop.xlane.xlu0 %10374 }
0x1333   : > { %13835 = vpow2.f32 %v10437_v45  ;;  %v10405_v63 = vsub.f32 %v17490_v56, %v10375_v35  ;;  %v10431_v56 = vmul.f32 1.442695, %v10396_v47  ;;  %v10439_v2 = vmul.f32 1.442695, %v10400_v14 }
0x1334   : > { %13837 = vpow2.f32 %v10415_v12  ;;  %v10378_v3 = vpop.xlane.xlu1 %10377 }
0x1335   : > { %v17593_v48 = vpop.eup %13831  ;;  %v10449_v50 = vmul.f32 1.442695, %v10405_v63  ;;  %v10406_v45 = vsub.f32 %v17500_v7, %v10378_v3  ;;  %v8433_v3 = vcombine.low %v18539_v53, %v17536_v20 }
0x1336   : > { %v10493_v41 = vsel %vm5082_vm6, %v17593_v48, 0.0 }
0x1337   : > { %v10363_v51 = vpop.xlane.xlu0 %10362  ;;  %13839 = vpow2.f32 %v10449_v50  ;;  %10494 = vadd.xlane.f32.xlu0 %v10493_v41  ;;  %v10451_v63 = vmul.f32 1.442695, %v10406_v45 }
0x1338   : > { %v10401_v28 = vsub.f32 %v17508_v26, %v10363_v51  ;;  %13841 = vpow2.f32 %v10419_v54 }
0x1339   : > { %v17599_v57 = vpop.eup %13833  ;;  %v10366_v6 = vpop.xlane.xlu1 %10365 }
0x133a   : > { %v10441_v23 = vmul.f32 1.442695, %v10401_v28  ;;  %v10511_v1 = vsel %vm5082_vm6, %v17599_v57, 0.0  ;;  %v10402_v17 = vsub.f32 %v17518_v38, %v10366_v6 }
0x133b   : > { %v10381_v25 = vpop.xlane.xlu0 %10380  ;;  %10512 = vadd.xlane.f32.xlu0 %v10511_v1 }
0x133c   : > { %13843 = vpow2.f32 %v10441_v23  ;;  %v10407_v30 = vsub.f32 %v17514_v21, %v10381_v25  ;;  %v10443_v47 = vmul.f32 1.442695, %v10402_v17 }
0x133d   : > { %v17605_v27 = vpop.eup %13835  ;;  %13845 = vpow2.f32 %v10431_v56  ;;  %v10384_v50 = vpop.xlane.xlu1 %10383 }
0x133e   : > { %v10453_v26 = vmul.f32 1.442695, %v10407_v30  ;;  %v10499_v11 = vsel %vm5082_vm6, %v17605_v27, 0.0  ;;  %v17610_v0 = vpop.eup %13837  ;;  %v10408_v51 = vsub.f32 %v17524_v29, %v10384_v50  ;;  %v8637_v50 = vcombine.low %v18540_v62, %v17538_v40 }
0x133f   : > { %10500 = vadd.xlane.f32.xlu0 %v10499_v11  ;;  %v10466_v34 = vsel %vm5082_vm6, %v17610_v0, 0.0  ;;  %v7472_v11 = vpop.permute.xlu0 %7471 }
0x1340   : > { %13847 = vpow2.f32 %v10453_v26  ;;  %v10455_v38 = vmul.f32 1.442695, %v10408_v51  ;;  %v8450_v13 = vcombine.high %v17532_v58, %v7472_v11 }
0x1341   : > { %v17612_v44 = vpop.eup %13839  ;;  %13849 = vpow2.f32 %v10435_v9  ;;  %v8449_v9 = vcombine.low %v17532_v58, %v7472_v11 }
0x1342   : > { %v10517_v21 = vsel %vm5082_vm6, %v17612_v44, 0.0  ;;  %v17617_v49 = vpop.eup %13841  ;;  %13851 = vpow2.f32 %v10447_v32  ;;  %v8464_v14 = vrot.slane %v8450_v13, %v14681_v39 }
0x1343   : > { %10518 = vadd.xlane.f32.xlu0 %v10517_v21  ;;  %v10472_v19 = vsel %vm5082_vm6, %v17617_v49, 0.0  ;;  %13853 = vpow2.f32 %v10439_v2  ;;  %v8434_v21 = vcombine.high %v18539_v53, %v17536_v20  ;;  %v8457_v32 = vrot.slane %v8449_v9, %v14681_v39 }
0x1344   : > { %13855 = vpow2.f32 %v10451_v63 }
0x1345   : > { %13857 = vpow2.f32 %v10443_v47  ;;  %v8448_v6 = vrot.slane %v8434_v21, %v14681_v39 }
0x1346   : > { %v17621_v8 = vpop.eup %13843  ;;  %10467 = vadd.xlane.f32.xlu1 %v10466_v34  ;;  %13859 = vpow2.f32 %v10455_v38  ;;  %v8441_v34 = vrot.slane %v8433_v3, %v14681_v39 }
0x1347   : > { %v10505_v4 = vsel %vm5082_vm6, %v17621_v8, 0.0  ;;  %v17626_v12 = vpop.eup %13845  ;;  %v8481_v45 = vcombine.low %v8448_v6, %v8464_v14 }
0x1348   : > { %10506 = vadd.xlane.f32.xlu0 %v10505_v4  ;;  %v10490_v7 = vsel %vm5082_vm6, %v17626_v12, 0.0  ;;  %v8465_v4 = vcombine.low %v8441_v34, %v8457_v32  ;;  %v8466_v2 = vcombine.high %v8441_v34, %v8457_v32 }
0x1349   : > { %v8489_v17 = vrot.slane %v8481_v45, %v14684_v42 }
0x134a   : > { %v17630_v10 = vpop.eup %13847  ;;  %10473 = vadd.xlane.f32.xlu1 %v10472_v19  ;;  %v8482_v19 = vcombine.high %v8448_v6, %v8464_v14  ;;  %v8473_v58 = vrot.slane %v8465_v4, %v14684_v42  ;;  %v8480_v63 = vrot.slane %v8466_v2, %v14684_v42 }
0x134b   : > { %v10523_v35 = vsel %vm5082_vm6, %v17630_v10, 0.0  ;;  %v17637_v54 = vpop.eup %13849 }
0x134c   : > { %10524 = vadd.xlane.f32.xlu0 %v10523_v35  ;;  %v10496_v41 = vsel %vm5082_vm6, %v17637_v54, 0.0  ;;  %v17642_v28 = vpop.eup %13851  ;;  %v8496_v53 = vrot.slane %v8482_v19, %v14684_v42  ;;  %v9793_v51 = vcombine.low %v8473_v58, %v8480_v63 }
0x134d   : > { %v10514_v23 = vsel %vm5082_vm6, %v17642_v28, 0.0  ;;  %v17646_v56 = vpop.eup %13853 }
0x134e   : > { %10491 = vadd.xlane.f32.xlu1 %v10490_v7  ;;  %v10502_v24 = vsel %vm5082_vm6, %v17646_v56, 0.0  ;;  %v17650_v25 = vpop.eup %13855  ;;  %v8638_v7 = vcombine.high %v18540_v62, %v17538_v40  ;;  %v9809_v38 = vcombine.low %v8489_v17, %v8496_v53  ;;  %v17685_v13 = vrot.slane %v9793_v51, %v14681_v39 }
0x134f   : > { %v10520_v29 = vsel %vm5082_vm6, %v17650_v25, 0.0  ;;  %v17654_v1 = vpop.eup %13857 }
0x1350   : > { %v10508_v5 = vsel %vm5082_vm6, %v17654_v1, 0.0  ;;  %v17658_v30 = vpop.eup %13859  ;;  %v8652_v11 = vrot.slane %v8638_v7, %v14681_v39  ;;  %v17693_v21 = vrot.slane %v9809_v38, %v14681_v39 }
0x1351   : > { %v10526_v26 = vsel %vm5082_vm6, %v17658_v30, 0.0 }
0x1352   : > { %10497 = vadd.xlane.f32.xlu1 %v10496_v41  ;;  %v12633_v41 = vcombine.high %v8473_v58, %v8480_v63 }
0x1354   : > { %v17690_v3 = vrot.slane %v12633_v41, %v14681_v39 }
0x1356   : > { %10515 = vadd.xlane.f32.xlu1 %v10514_v23  ;;  %v12634_v23 = vcombine.high %v8489_v17, %v8496_v53  ;;  %v9825_v58 = vcombine.low %v17685_v13, %v17690_v3 }
0x135a   : > { %10503 = vadd.xlane.f32.xlu1 %v10502_v24 }
0x135e   : > { %10521 = vadd.xlane.f32.xlu1 %v10520_v29 }
0x1362   : > { %10509 = vadd.xlane.f32.xlu1 %v10508_v5 }
0x1366   : > { %10527 = vadd.xlane.f32.xlu1 %v10526_v26  ;;  %v8645_v26 = vrot.slane %v8637_v50, %v14681_v39 }
0x139c   : > { %v10459_v35 = vpop.xlane.xlu0 %10458 }
0x139d   : > { %13861 = vrcp.f32 %v10459_v35 }
0x139e   : > { %v10462_v20 = vpop.xlane.xlu1 %10461 }
0x139f   : > { %13863 = vrcp.f32 %v10462_v20 }
0x13a0   : > { %v10477_v47 = vpop.xlane.xlu0 %10476 }
0x13a2   : > { %v7474_v24 = vpop.permute.xlu1 %7473 }
0x13a3   : > { %v8653_v29 = vcombine.low %v17534_v60, %v7474_v24  ;;  %v8654_v5 = vcombine.high %v17534_v60, %v7474_v24  ;;  %v17696_v60 = vrot.slane %v12634_v23, %v14681_v39  ;;  %v9833_v24 = vrot.slane %v9825_v58, %v14684_v42 }
0x13a4   : > { %v10480_v9 = vpop.xlane.xlu0 %10479 }
0x13a5   : > { %v8661_v40 = vrot.slane %v8653_v29, %v14681_v39  ;;  %v8668_v62 = vrot.slane %v8654_v5, %v14681_v39  ;;  %13865 = vrcp.f32 %v10480_v9  ;;  %v9841_v63 = vcombine.low %v17693_v21, %v17696_v60 }
0x13a6   : > { %13867 = vrcp.f32 %v10477_v47 }
0x13a7   : > { %v8669_v32 = vcombine.low %v8645_v26, %v8661_v40  ;;  %v8670_v14 = vcombine.high %v8645_v26, %v8661_v40  ;;  %v8685_v34 = vcombine.low %v8652_v11, %v8668_v62  ;;  %v8686_v6 = vcombine.high %v8652_v11, %v8668_v62  ;;  %v13862_v38 = vpop.eup %13861 }
0x13a8   : > { %v9849_v29 = vrot.slane %v9841_v63, %v14684_v42 }
0x13a9   : > { %v8677_v4 = vrot.slane %v8669_v32, %v14684_v42  ;;  %v8684_v2 = vrot.slane %v8670_v14, %v14684_v42  ;;  %v8693_v45 = vrot.slane %v8685_v34, %v14684_v42  ;;  %v8700_v19 = vrot.slane %v8686_v6, %v14684_v42  ;;  %v13864_v5 = vpop.eup %13863 }
0x13aa   : > { %v17702_v35 = vpop.xlane.xlu0 %10464  ;;  %v9857_v34 = vcombine.low %v9833_v24, %v9849_v29 }
0x13ab   : > { %v9861_v17 = vcombine.low %v8677_v4, %v8684_v2  ;;  %v12635_v53 = vcombine.high %v8677_v4, %v8684_v2  ;;  %v9877_v20 = vcombine.low %v8693_v45, %v8700_v19  ;;  %v12636_v50 = vcombine.high %v8693_v45, %v8700_v19 }
0x13ac   : > { %v9858_v4 = vcombine.high %v9833_v24, %v9849_v29  ;;  %v10554_v45 = vmul.f32 %v13864_v5, %v17549_v16  ;;  %v9842_v24 = vcombine.high %v17693_v21, %v17696_v60 }
0x13ad   : > { %v9868_v7 = vrot.slane %v9861_v17, %v14681_v39  ;;  %v9876_v47 = vrot.slane %v12635_v53, %v14681_v39  ;;  %v9884_v51 = vrot.slane %v9877_v20, %v14681_v39  ;;  %v9892_v41 = vrot.slane %v12636_v50, %v14681_v39 }
0x13ae   : > { %v10483_v23 = vpop.xlane.xlu0 %10482  ;;  %v10553_v20 = vmul.f32 %v13862_v38, %v17544_v61 }
0x13af   : > { %v9893_v26 = vcombine.low %v9868_v7, %v9876_v47  ;;  %v9909_v11 = vcombine.low %v9884_v51, %v9892_v41  ;;  %v13866_v9 = vpop.eup %13865  ;;  %13869 = vrcp.f32 %v10483_v23  ;;  %v9894_v17 = vcombine.high %v9868_v7, %v9876_v47 }
0x13b0   : > { %v13868_v32 = vpop.eup %13867  ;;  %v10560_v19 = vmul.f32 %v13866_v9, %v17559_v37  ;;  %v9910_v53 = vcombine.high %v9884_v51, %v9892_v41  ;;  %v9826_v23 = vcombine.high %v17685_v13, %v17690_v3  ;;  %v10577_v29 = vpack.c.bf16 %v10554_v45, %v10553_v20 }
0x13b1   : > { %v9901_v40 = vrot.slane %v9893_v26, %v14684_v42  ;;  %v9917_v62 = vrot.slane %v9909_v11, %v14684_v42  ;;  %v10559_v50 = vmul.f32 %v13868_v32, %v17553_v33  ;;  %v9908_v37 = vrot.slane %v9894_v17, %v14684_v42 }
0x13b2   : > { %v10486_v14 = vpop.xlane.xlu0 %10485  ;;  %v9924_v61 = vrot.slane %v9910_v53, %v14684_v42  ;;  %v9840_v13 = vrot.slane %v9826_v23, %v14684_v42  ;;  %v9856_v3 = vrot.slane %v9842_v24, %v14684_v42 }
0x13b3   : > { %13871 = vrcp.f32 %v10486_v14  ;;  %v9925_v6 = vcombine.low %v9901_v40, %v9917_v62  ;;  %v9926_v2 = vcombine.high %v9901_v40, %v9917_v62  ;;  %v10580_v16 = vpack.c.bf16 %v10560_v19, %v10559_v50 }
0x13b4   : > { %v9927_v60 = vcombine.low %v9908_v37, %v9924_v61  ;;  %v9928_v7 = vcombine.high %v9908_v37, %v9924_v61  ;;  %v9859_v47 = vcombine.low %v9840_v13, %v9856_v3  ;;  %v9860_v51 = vcombine.high %v9840_v13, %v9856_v3 }
0x13b5   : > { %v9955_v58 = vpack.c.bf16 %v9925_v6, %v9857_v34  ;;  %v9958_v63 = vpack.c.bf16 %v9926_v2, %v9858_v4  ;;  %13873 = vrcp.f32 %v17702_v35 }
0x13b6   : > { %v9961_v38 = vpack.c.bf16 %v9927_v60, %v9859_v47  ;;  %v9964_v5 = vpack.c.bf16 %v9928_v7, %v9860_v51 }
0x13b7   : > { %13264 = vmatpush3.bf16.msra.mxu0 %v9955_v58  ;;  %13282 = vmatpush3.bf16.msra.mxu1 %v9958_v63 }
0x13b8   : > { %13295 = vmatprep.subr.bf16.mxu0 %v18432_v31  ;;  %13313 = vmatprep.subr.bf16.mxu1 %v18432_v31 }
0x13b9   : > { %v13870_v33 = vpop.eup %13869 }
0x13ba   : > { %13266 = vmatmul.mubr.msk.bf16.vlgmr.msra.gmra.mrb[120].mxu0 %vm5082_vm6, %v10577_v29  ;;  %13284 = vmatmul.mubr.msk.bf16.vlgmr.msra.gmra.mrb[148].mxu1 %vm5082_vm6, %v10580_v16 }
0x13bb   : > { %13296 = vmatpush3.bf16.msra.mxu0 %v17374_v22  ;;  %13314 = vmatpush3.bf16.msra.mxu1 %v17376_v52  ;;  %v10561_v22 = vmul.f32 %v13870_v33, %v17569_v18 }
0x13bc   : > { %13297 = vmatprep.subr.bf16.mxu0 %v18432_v31  ;;  %13315 = vmatprep.subr.bf16.mxu1 %v18432_v31 }
0x13bd   : > { %v13872_v21 = vpop.eup %13871  ;;  %13287 = vmatprep.mubr.msk.bf16.mxu1 %vm13999_vm0, %v18432_v31  ;;  %13269 = vmatprep.mubr.msk.bf16.mxu0 %vm13999_vm0, %v18432_v31 }
0x13be   : > { %v10562_v52 = vmul.f32 %v13872_v21, %v17573_v46 }
0x13bf   : > { %13298 = vmatpush3.bf16.msra.mxu0 %v17382_v59  ;;  %13316 = vmatpush3.bf16.msra.mxu1 %v17384_v15  ;;  %v10471_v59 = vpop.xlane.xlu0 %10470  ;;  %v13874_v40 = vpop.eup %13873 }
0x13c0   : > { %v10581_v41 = vpack.c.bf16 %v10562_v52, %v10561_v22  ;;  %13299 = vmatprep.subr.bf16.mxu0 %v18432_v31  ;;  %13317 = vmatprep.subr.bf16.mxu1 %v18432_v31  ;;  %v10555_v34 = vmul.f32 %v13874_v40, %v17564_v55 }
0x13c2   : > { %13288 = vmatmul.mubr.msk.bf16.gmra.mrb[152].mxu1 %vm5082_vm6, %v10581_v41 }
0x13c3   : > { %13300 = vmatpush3.bf16.msra.mxu0 %v9961_v38  ;;  %13318 = vmatpush3.bf16.msra.mxu1 %v9964_v5  ;;  %v10489_v15 = vpop.xlane.xlu0 %10488 }
0x13c4   : > { %13291 = vmatprep.mubr.msk.bf16.mxu1 %vm13999_vm0, %v18432_v31  ;;  %13331 = vmatprep.subr.bf16.mxu0 %v18432_v31 }
0x13c5   : > { %13351 = vmatprep.subr.bf16.mxu1 %v18432_v31 }
0x13c7   : > { %v10495_v18 = vpop.xlane.xlu0 %10494 }
0x13cb   : > { %v10513_v26 = vpop.xlane.xlu0 %10512 }
0x13cf   : > { %v10501_v62 = vpop.xlane.xlu0 %10500 }
0x13d3   : > { %v10468_v46 = vpop.xlane.xlu1 %10467  ;;  %v10519_v45 = vpop.xlane.xlu0 %10518 }
0x13d4   : > { %13875 = vrcp.f32 %v10468_v46 }
0x13d7   : > { %v10474_v11 = vpop.xlane.xlu1 %10473  ;;  %v10507_v50 = vpop.xlane.xlu0 %10506 }
0x13d8   : > { %13877 = vrcp.f32 %v10474_v11  ;;  %v13619_v11 = vld [vmem:[%s18297_s12 + $0x30] sm:$0xff]  }
0x13d9   : > { %13879 = vrcp.f32 %v10471_v59 }
0x13da   : > { %13881 = vrcp.f32 %v10489_v15 }
0x13db   : > { %v10492_v9 = vpop.xlane.xlu1 %10491  ;;  %v10525_v33 = vpop.xlane.xlu0 %10524 }
0x13dc   : > { %13883 = vrcp.f32 %v10492_v9 }
0x13de   : > { %v13876_v32 = vpop.eup %13875 }
0x13df   : > { %v10498_v14 = vpop.xlane.xlu1 %10497  ;;  %v10556_v6 = vmul.f32 %v13876_v32, %v17610_v0 }
0x13e0   : > { %13885 = vrcp.f32 %v10498_v14 }
0x13e1   : > { %13887 = vrcp.f32 %v10495_v18  ;;  %v10578_v35 = vpack.c.bf16 %v10556_v6, %v10555_v34 }
0x13e2   : > { %v13878_v4 = vpop.eup %13877  ;;  %13889 = vrcp.f32 %v10513_v26 }
0x13e3   : > { %v13880_v2 = vpop.eup %13879  ;;  %13270 = vmatmul.mubr.msk.bf16.gmra.mrb[124].mxu0 %vm5082_vm6, %v10578_v35  ;;  %v10516_v19 = vpop.xlane.xlu1 %10515  ;;  %v10558_v63 = vmul.f32 %v13878_v4, %v17617_v49 }
0x13e4   : > { %v13882_v58 = vpop.eup %13881  ;;  %13891 = vrcp.f32 %v10516_v19  ;;  %13273 = vmatprep.mubr.msk.bf16.mxu0 %vm13999_vm0, %v18432_v31  ;;  %v10557_v0 = vmul.f32 %v13880_v2, %v17579_v43 }
0x13e5   : > { %v10563_v53 = vmul.f32 %v13882_v58, %v17584_v36 }
0x13e6   : > { %v13884_v55 = vpop.eup %13883  ;;  %v10579_v23 = vpack.c.bf16 %v10558_v63, %v10557_v0 }
0x13e7   : > { %v10504_v17 = vpop.xlane.xlu1 %10503  ;;  %v10564_v20 = vmul.f32 %v13884_v55, %v17626_v12 }
0x13e8   : > { %13893 = vrcp.f32 %v10504_v17 }
0x13e9   : > { %13895 = vrcp.f32 %v10501_v62  ;;  %v10582_v24 = vpack.c.bf16 %v10564_v20, %v10563_v53 }
0x13ea   : > { %v13886_v29 = vpop.eup %13885  ;;  %13897 = vrcp.f32 %v10519_v45 }
0x13eb   : > { %v13888_v16 = vpop.eup %13887  ;;  %13274 = vmatmul.mubr.msk.bf16.gmra.mrb[128].mxu0 %vm5082_vm6, %v10579_v23  ;;  %13292 = vmatmul.mubr.msk.bf16.gmra.mrb[156].mxu1 %vm5082_vm6, %v10582_v24  ;;  %v10522_v49 = vpop.xlane.xlu1 %10521  ;;  %v10566_v43 = vmul.f32 %v13886_v29, %v17637_v54 }
0x13ec   : > { %v13890_v37 = vpop.eup %13889  ;;  %13899 = vrcp.f32 %v10522_v49  ;;  %13301 = vmatprep.mubr.msk.bf16.mxu0 %vm13999_vm0, %v18432_v31  ;;  %13319 = vmatprep.mubr.msk.bf16.mxu1 %vm13999_vm0, %v18432_v31  ;;  %v10565_v12 = vmul.f32 %v13888_v16, %v17593_v48 }
0x13ed   : > { %v10571_v61 = vmul.f32 %v13890_v37, %v17599_v57 }
0x13ee   : > { %v13892_v36 = vpop.eup %13891  ;;  %v10583_v21 = vpack.c.bf16 %v10566_v43, %v10565_v12 }
0x13ef   : > { %v10572_v13 = vmul.f32 %v13892_v36, %v17642_v28  ;;  %v10510_v3 = vpop.xlane.xlu1 %10509 }
0x13f0   : > { %13901 = vrcp.f32 %v10510_v3 }
0x13f1   : > { %13903 = vrcp.f32 %v10507_v50  ;;  %v10586_v60 = vpack.c.bf16 %v10572_v13, %v10571_v61 }
0x13f2   : > { %v13894_v7 = vpop.eup %13893  ;;  %13905 = vrcp.f32 %v10525_v33 }
0x13f3   : > { %v13896_v22 = vpop.eup %13895  ;;  %13302 = vmatmul.mubr.msk.bf16.vlgmr.msra.gmra.mrb[132].mxu0 %vm5082_vm6, %v10583_v21  ;;  %13320 = vmatmul.mubr.msk.bf16.vlgmr.msra.gmra.mrb[160].mxu1 %vm5082_vm6, %v10586_v60  ;;  %v10528_v54 = vpop.xlane.xlu1 %10527  ;;  %v10568_v48 = vmul.f32 %v13894_v7, %v17646_v56 }
0x13f4   : > { %v13898_v52 = vpop.eup %13897  ;;  %13907 = vrcp.f32 %v10528_v54  ;;  %13305 = vmatprep.mubr.msk.bf16.mxu0 %vm13999_vm0, %v18432_v31  ;;  %13323 = vmatprep.mubr.msk.bf16.mxu1 %vm13999_vm0, %v18432_v31  ;;  %v10567_v28 = vmul.f32 %v13896_v22, %v17605_v27 }
0x13f5   : > { %v10573_v47 = vmul.f32 %v13898_v52, %v17612_v44 }
0x13f6   : > { %v13900_v57 = vpop.eup %13899  ;;  %v10584_v41 = vpack.c.bf16 %v10568_v48, %v10567_v28 }
0x13f7   : > { %v10574_v51 = vmul.f32 %v13900_v57, %v17650_v25 }
0x13f9   : > { %v10587_v38 = vpack.c.bf16 %v10574_v51, %v10573_v47 }
0x13fa   : > { %v13902_v5 = vpop.eup %13901 }
0x13fb   : > { %v13904_v59 = vpop.eup %13903  ;;  %13306 = vmatmul.mubr.msk.bf16.gmra.mrb[136].mxu0 %vm5082_vm6, %v10584_v41  ;;  %13324 = vmatmul.mubr.msk.bf16.gmra.mrb[164].mxu1 %vm5082_vm6, %v10587_v38  ;;  %v10570_v27 = vmul.f32 %v13902_v5, %v17654_v1 }
0x13fc   : > { %v13906_v15 = vpop.eup %13905  ;;  %13309 = vmatprep.mubr.msk.bf16.mxu0 %vm13999_vm0, %v18432_v31  ;;  %13327 = vmatprep.mubr.msk.bf16.mxu1 %vm13999_vm0, %v18432_v31  ;;  %v10569_v56 = vmul.f32 %v13904_v59, %v17621_v8  ;;  %v13617_v8 = vld [vmem:[%s18297_s12 + $0x20] sm:$0xff]  }
0x13fd   : > { %v10575_v25 = vmul.f32 %v13906_v15, %v17630_v10  ;;  %13332 = vmatpush3.bf16.msra.mxu0 %v13617_v8  ;;  %v13618_v10 = vld [vmem:[%s18297_s12 + $0x28] sm:$0xff]  }
0x13fe   : > { %v13908_v44 = vpop.eup %13907  ;;  %v10585_v46 = vpack.c.bf16 %v10570_v27, %v10569_v56  ;;  %13333 = vmatprep.subr.bf16.mxu0 %v18432_v31 }
0x13ff   : > { %v10576_v18 = vmul.f32 %v13908_v44, %v17658_v30 }
0x1401   : > { %v10588_v26 = vpack.c.bf16 %v10576_v18, %v10575_v25  ;;  %13334 = vmatpush3.bf16.msra.mxu0 %v13618_v10 }
0x1402   : > { %13335 = vmatprep.subr.bf16.mxu0 %v18432_v31 }
0x1403   : > { %13310 = vmatmul.mubr.msk.bf16.gmra.mrb[140].mxu0 %vm5082_vm6, %v10585_v46  ;;  %13328 = vmatmul.mubr.msk.bf16.gmra.mrb[168].mxu1 %vm5082_vm6, %v10588_v26 }
0x1404   : > { %13339 = vmatprep.mubr.msk.bf16.mxu0 %vm13999_vm0, %v18432_v31  ;;  %13359 = vmatprep.mubr.msk.bf16.mxu1 %vm13999_vm0, %v18432_v31 }
0x1405   : > { %13336 = vmatpush3.bf16.msra.mxu0 %v13619_v11 }
0x1406   : > { %13337 = vmatprep.subr.bf16.mxu0 %v18432_v31 }
0x148d   : > { %v10632_v1 = vpop.f32.mrb[120].mxu0  ;;  %v10698_v30 = vpop.f32.mrb[148].mxu1 }
0x148e   : > { %v13267_v9 = vpop.f32.mrb[121].mxu0  ;;  %v13285_v40 = vpop.f32.mrb[149].mxu1 }
0x148f   : > { %v10635_v62 = vpop.f32.mrb[122].mxu0  ;;  %v10701_v32 = vpop.f32.mrb[150].mxu1 }
0x1490   : > { %v13268_v14 = vpop.f32.mrb[123].mxu0  ;;  %v13286_v34 = vpop.f32.mrb[151].mxu1 }
0x1495   : > { %v17809_v6 = vpop.f32.mrb[152].mxu1 }
0x1496   : > { %v13289_v35 = vpop.f32.mrb[153].mxu1 }
0x1497   : > { %v17811_v4 = vpop.f32.mrb[154].mxu1 }
0x1498   : > { %v13290_v2 = vpop.f32.mrb[155].mxu1 }
0x14b6   : > { %v17813_v45 = vpop.f32.mrb[124].mxu0 }
0x14b7   : > { %v13271_v19 = vpop.f32.mrb[125].mxu0 }
0x14b8   : > { %v17815_v58 = vpop.f32.mrb[126].mxu0 }
0x14b9   : > { %v13272_v63 = vpop.f32.mrb[127].mxu0 }
0x14be   : > { %v17817_v55 = vpop.f32.mrb[128].mxu0  ;;  %v17819_v17 = vpop.f32.mrb[156].mxu1 }
0x14bf   : > { %v13275_v0 = vpop.f32.mrb[129].mxu0  ;;  %v13293_v53 = vpop.f32.mrb[157].mxu1 }
0x14c0   : > { %v17821_v20 = vpop.f32.mrb[130].mxu0  ;;  %v17823_v50 = vpop.f32.mrb[158].mxu1 }
0x14c1   : > { %v13276_v23 = vpop.f32.mrb[131].mxu0  ;;  %v13294_v24 = vpop.f32.mrb[159].mxu1 }
0x14c6   : > { %v10764_v29 = vpop.f32.mrb[132].mxu0  ;;  %v10830_v16 = vpop.f32.mrb[160].mxu1 }
0x14c7   : > { %v10853_v49 = vcombine.low %v10632_v1, %v10764_v29  ;;  %v10854_v37 = vcombine.high %v10632_v1, %v10764_v29  ;;  %v10869_v43 = vcombine.low %v10698_v30, %v10830_v16  ;;  %v10870_v36 = vcombine.high %v10698_v30, %v10830_v16  ;;  %v13303_v12 = vpop.f32.mrb[133].mxu0  ;;  %v13321_v61 = vpop.f32.mrb[161].mxu1 }
0x14c8   : > { %v10767_v33 = vpop.f32.mrb[134].mxu0  ;;  %v10833_v13 = vpop.f32.mrb[162].mxu1 }
0x14c9   : > { %v10861_v3 = vrot.slane %v10853_v49, %v14681_v39  ;;  %v10868_v21 = vrot.slane %v10854_v37, %v14681_v39  ;;  %v10877_v60 = vrot.slane %v10869_v43, %v14681_v39  ;;  %v10884_v7 = vrot.slane %v10870_v36, %v14681_v39  ;;  %v13304_v22 = vpop.f32.mrb[135].mxu0  ;;  %v13322_v54 = vpop.f32.mrb[163].mxu1 }
0x14ca   : > { %v10921_v52 = vcombine.low %v10635_v62, %v10767_v33  ;;  %v10922_v48 = vcombine.high %v10635_v62, %v10767_v33  ;;  %v10937_v57 = vcombine.low %v10701_v32, %v10833_v13  ;;  %v10938_v28 = vcombine.high %v10701_v32, %v10833_v13 }
0x14cb   : > { %v10885_v47 = vcombine.low %v10861_v3, %v10877_v60  ;;  %v10886_v51 = vcombine.high %v10861_v3, %v10877_v60  ;;  %v10901_v41 = vcombine.low %v10868_v21, %v10884_v7  ;;  %v10902_v38 = vcombine.high %v10868_v21, %v10884_v7 }
0x14cc   : > { %v10929_v5 = vrot.slane %v10921_v52, %v14681_v39  ;;  %v10936_v59 = vrot.slane %v10922_v48, %v14681_v39  ;;  %v10945_v15 = vrot.slane %v10937_v57, %v14681_v39  ;;  %v10952_v27 = vrot.slane %v10938_v28, %v14681_v39 }
0x14cd   : > { %v10893_v44 = vrot.slane %v10885_v47, %v14684_v42  ;;  %v10900_v56 = vrot.slane %v10886_v51, %v14684_v42  ;;  %v10909_v25 = vrot.slane %v10901_v41, %v14684_v42  ;;  %v10916_v18 = vrot.slane %v10902_v38, %v14684_v42 }
0x14ce   : > { %v10953_v46 = vcombine.low %v10929_v5, %v10945_v15  ;;  %v10954_v26 = vcombine.high %v10929_v5, %v10945_v15  ;;  %v10969_v8 = vcombine.low %v10936_v59, %v10952_v27  ;;  %v10970_v10 = vcombine.high %v10936_v59, %v10952_v27  ;;  %v10772_v1 = vpop.f32.mrb[136].mxu0  ;;  %v10838_v30 = vpop.f32.mrb[164].mxu1 }
0x14cf   : > { %v11261_v11 = vcombine.low %v10893_v44, %v10900_v56  ;;  %v12661_v9 = vcombine.high %v10893_v44, %v10900_v56  ;;  %v11277_v40 = vcombine.low %v10909_v25, %v10916_v18  ;;  %v12662_v62 = vcombine.high %v10909_v25, %v10916_v18  ;;  %v13307_v32 = vpop.f32.mrb[137].mxu0  ;;  %v13325_v14 = vpop.f32.mrb[165].mxu1 }
0x14d0   : > { %v10961_v34 = vrot.slane %v10953_v46, %v14684_v42  ;;  %v10968_v35 = vrot.slane %v10954_v26, %v14684_v42  ;;  %v10977_v2 = vrot.slane %v10969_v8, %v14684_v42  ;;  %v10984_v19 = vrot.slane %v10970_v10, %v14684_v42  ;;  %v10775_v63 = vpop.f32.mrb[138].mxu0  ;;  %v10841_v0 = vpop.f32.mrb[166].mxu1 }
0x14d1   : > { %v17842_v53 = vrot.slane %v11261_v11, %v14681_v39  ;;  %v17845_v23 = vrot.slane %v12661_v9, %v14681_v39  ;;  %v17848_v24 = vrot.slane %v11277_v40, %v14681_v39  ;;  %v17851_v29 = vrot.slane %v12662_v62, %v14681_v39  ;;  %v13308_v16 = vpop.f32.mrb[139].mxu0  ;;  %v13326_v49 = vpop.f32.mrb[167].mxu1 }
0x14d2   : > { %v11329_v37 = vcombine.low %v10961_v34, %v10968_v35  ;;  %v12663_v43 = vcombine.high %v10961_v34, %v10968_v35  ;;  %v11345_v36 = vcombine.low %v10977_v2, %v10984_v19  ;;  %v12664_v12 = vcombine.high %v10977_v2, %v10984_v19 }
0x14d3   : > { %v10989_v61 = vcombine.low %v17813_v45, %v10772_v1  ;;  %v10990_v33 = vcombine.high %v17813_v45, %v10772_v1  ;;  %v11005_v13 = vcombine.low %v17809_v6, %v10838_v30  ;;  %v11006_v3 = vcombine.high %v17809_v6, %v10838_v30 }
0x14d4   : > { %v17858_v21 = vrot.slane %v11329_v37, %v14681_v39  ;;  %v17861_v60 = vrot.slane %v12663_v43, %v14681_v39  ;;  %v17864_v7 = vrot.slane %v11345_v36, %v14681_v39  ;;  %v17867_v22 = vrot.slane %v12664_v12, %v14681_v39 }
0x14d5   : > { %v10997_v54 = vrot.slane %v10989_v61, %v14681_v39  ;;  %v11004_v45 = vrot.slane %v10990_v33, %v14681_v39  ;;  %v11013_v52 = vrot.slane %v11005_v13, %v14681_v39  ;;  %v11020_v6 = vrot.slane %v11006_v3, %v14681_v39 }
0x14d6   : > { %v11057_v48 = vcombine.low %v17815_v58, %v10775_v63  ;;  %v11058_v57 = vcombine.high %v17815_v58, %v10775_v63  ;;  %v11073_v28 = vcombine.low %v17811_v4, %v10841_v0  ;;  %v11074_v47 = vcombine.high %v17811_v4, %v10841_v0  ;;  %v10780_v51 = vpop.f32.mrb[140].mxu0  ;;  %v10846_v41 = vpop.f32.mrb[168].mxu1 }
0x14d7   : > { %v11021_v38 = vcombine.low %v10997_v54, %v11013_v52  ;;  %v11022_v5 = vcombine.high %v10997_v54, %v11013_v52  ;;  %v11037_v59 = vcombine.low %v11004_v45, %v11020_v6  ;;  %v11038_v15 = vcombine.high %v11004_v45, %v11020_v6  ;;  %v13311_v27 = vpop.f32.mrb[141].mxu0  ;;  %v13329_v44 = vpop.f32.mrb[169].mxu1 }
0x14d8   : > { %v11065_v56 = vrot.slane %v11057_v48, %v14681_v39  ;;  %v11072_v25 = vrot.slane %v11058_v57, %v14681_v39  ;;  %v11081_v18 = vrot.slane %v11073_v28, %v14681_v39  ;;  %v11088_v58 = vrot.slane %v11074_v47, %v14681_v39  ;;  %v10783_v46 = vpop.f32.mrb[142].mxu0  ;;  %v10849_v26 = vpop.f32.mrb[170].mxu1 }
0x14d9   : > { %v11029_v4 = vrot.slane %v11021_v38, %v14684_v42  ;;  %v11036_v8 = vrot.slane %v11022_v5, %v14684_v42  ;;  %v11045_v10 = vrot.slane %v11037_v59, %v14684_v42  ;;  %v11052_v1 = vrot.slane %v11038_v15, %v14684_v42  ;;  %v13312_v30 = vpop.f32.mrb[143].mxu0  ;;  %v13330_v11 = vpop.f32.mrb[171].mxu1 }
0x14da   : > { %v11089_v9 = vcombine.low %v11065_v56, %v11081_v18  ;;  %v11090_v40 = vcombine.high %v11065_v56, %v11081_v18  ;;  %v11105_v62 = vcombine.low %v11072_v25, %v11088_v58  ;;  %v11106_v32 = vcombine.high %v11072_v25, %v11088_v58 }
0x14db   : > { %v11397_v14 = vcombine.low %v11029_v4, %v11036_v8  ;;  %v12665_v34 = vcombine.high %v11029_v4, %v11036_v8  ;;  %v11413_v35 = vcombine.low %v11045_v10, %v11052_v1  ;;  %v12666_v2 = vcombine.high %v11045_v10, %v11052_v1 }
0x14dc   : > { %v11097_v19 = vrot.slane %v11089_v9, %v14684_v42  ;;  %v11104_v63 = vrot.slane %v11090_v40, %v14684_v42  ;;  %v11113_v0 = vrot.slane %v11105_v62, %v14684_v42  ;;  %v11120_v16 = vrot.slane %v11106_v32, %v14684_v42 }
0x14dd   : > { %v17890_v49 = vrot.slane %v11397_v14, %v14681_v39  ;;  %v17893_v37 = vrot.slane %v12665_v34, %v14681_v39  ;;  %v17896_v43 = vrot.slane %v11413_v35, %v14681_v39  ;;  %v17899_v36 = vrot.slane %v12666_v2, %v14681_v39 }
0x14de   : > { %v11465_v12 = vcombine.low %v11097_v19, %v11104_v63  ;;  %v12667_v61 = vcombine.high %v11097_v19, %v11104_v63  ;;  %v11481_v33 = vcombine.low %v11113_v0, %v11120_v16  ;;  %v12668_v13 = vcombine.high %v11113_v0, %v11120_v16 }
0x14df   : > { %v11125_v3 = vcombine.low %v17817_v55, %v10780_v51  ;;  %v11126_v54 = vcombine.high %v17817_v55, %v10780_v51  ;;  %v11141_v45 = vcombine.low %v17819_v17, %v10846_v41  ;;  %v11142_v52 = vcombine.high %v17819_v17, %v10846_v41 }
0x14e0   : > { %v17906_v6 = vrot.slane %v11465_v12, %v14681_v39  ;;  %v17909_v48 = vrot.slane %v12667_v61, %v14681_v39  ;;  %v17912_v57 = vrot.slane %v11481_v33, %v14681_v39  ;;  %v17915_v28 = vrot.slane %v12668_v13, %v14681_v39 }
0x14e1   : > { %v11133_v47 = vrot.slane %v11125_v3, %v14681_v39  ;;  %v11140_v55 = vrot.slane %v11126_v54, %v14681_v39  ;;  %v11149_v51 = vrot.slane %v11141_v45, %v14681_v39  ;;  %v11156_v17 = vrot.slane %v11142_v52, %v14681_v39 }
0x14e2   : > { %v11193_v41 = vcombine.low %v17821_v20, %v10783_v46  ;;  %v11194_v38 = vcombine.high %v17821_v20, %v10783_v46  ;;  %v11209_v5 = vcombine.low %v17823_v50, %v10849_v26  ;;  %v11210_v59 = vcombine.high %v17823_v50, %v10849_v26 }
0x14e3   : > { %v11157_v15 = vcombine.low %v11133_v47, %v11149_v51  ;;  %v11158_v27 = vcombine.high %v11133_v47, %v11149_v51  ;;  %v11173_v44 = vcombine.low %v11140_v55, %v11156_v17  ;;  %v11174_v56 = vcombine.high %v11140_v55, %v11156_v17 }
0x14e4   : > { %v11201_v25 = vrot.slane %v11193_v41, %v14681_v39  ;;  %v11208_v18 = vrot.slane %v11194_v38, %v14681_v39  ;;  %v11217_v58 = vrot.slane %v11209_v5, %v14681_v39  ;;  %v11224_v4 = vrot.slane %v11210_v59, %v14681_v39 }
0x14e5   : > { %v11165_v8 = vrot.slane %v11157_v15, %v14684_v42  ;;  %v11172_v20 = vrot.slane %v11158_v27, %v14684_v42  ;;  %v11181_v46 = vrot.slane %v11173_v44, %v14684_v42  ;;  %v11188_v50 = vrot.slane %v11174_v56, %v14684_v42  ;;  %v13620_v44 = vld [vmem:[%s18297_s12 + $0x38] sm:$0xff]  }
0x14e6   : > { %v11225_v26 = vcombine.low %v11201_v25, %v11217_v58  ;;  %v11226_v10 = vcombine.high %v11201_v25, %v11217_v58  ;;  %v11241_v1 = vcombine.low %v11208_v18, %v11224_v4  ;;  %v11242_v30 = vcombine.high %v11208_v18, %v11224_v4  ;;  %13338 = vmatpush3.bf16.msra.mxu0 %v13620_v44 }
0x14e7   : > { %v11533_v11 = vcombine.low %v11165_v8, %v11172_v20  ;;  %v12669_v9 = vcombine.high %v11165_v8, %v11172_v20  ;;  %v11549_v40 = vcombine.low %v11181_v46, %v11188_v50  ;;  %v12670_v62 = vcombine.high %v11181_v46, %v11188_v50  ;;  %13371 = vmatprep.subr.bf16.mxu0 %v18432_v31 }
0x14e8   : > { %v11233_v32 = vrot.slane %v11225_v26, %v14684_v42  ;;  %v11240_v14 = vrot.slane %v11226_v10, %v14684_v42  ;;  %v11249_v34 = vrot.slane %v11241_v1, %v14684_v42  ;;  %v11256_v35 = vrot.slane %v11242_v30, %v14684_v42 }
0x14e9   : > { %v17938_v2 = vrot.slane %v11533_v11, %v14681_v39  ;;  %v17941_v19 = vrot.slane %v12669_v9, %v14681_v39  ;;  %v17944_v63 = vrot.slane %v11549_v40, %v14681_v39  ;;  %v17947_v0 = vrot.slane %v12670_v62, %v14681_v39 }
0x14ea   : > { %v11601_v16 = vcombine.low %v11233_v32, %v11240_v14  ;;  %v12671_v12 = vcombine.high %v11233_v32, %v11240_v14  ;;  %v11617_v61 = vcombine.low %v11249_v34, %v11256_v35  ;;  %v12672_v33 = vcombine.high %v11249_v34, %v11256_v35 }
0x14eb   : > { %v11294_v13 = vcombine.high %v17842_v53, %v17845_v23  ;;  %v11310_v3 = vcombine.high %v17848_v24, %v17851_v29  ;;  %v11362_v54 = vcombine.high %v17858_v21, %v17861_v60  ;;  %v11378_v45 = vcombine.high %v17864_v7, %v17867_v22 }
0x14ec   : > { %v17958_v52 = vrot.slane %v11601_v16, %v14681_v39  ;;  %v17961_v47 = vrot.slane %v12671_v12, %v14681_v39  ;;  %v17964_v55 = vrot.slane %v11617_v61, %v14681_v39  ;;  %v17967_v51 = vrot.slane %v12672_v33, %v14681_v39 }
0x14ed   : > { %v11308_v17 = vrot.slane %v11294_v13, %v14684_v42  ;;  %v11324_v41 = vrot.slane %v11310_v3, %v14684_v42  ;;  %v11376_v38 = vrot.slane %v11362_v54, %v14684_v42  ;;  %v11392_v5 = vrot.slane %v11378_v45, %v14684_v42 }
0x14ee   : > { %v11293_v59 = vcombine.low %v17842_v53, %v17845_v23  ;;  %v11309_v15 = vcombine.low %v17848_v24, %v17851_v29  ;;  %v11361_v27 = vcombine.low %v17858_v21, %v17861_v60  ;;  %v11377_v39 = vcombine.low %v17864_v7, %v17867_v22 }
0x14ef   : > { %v11327_v56 = vcombine.low %v11308_v17, %v11324_v41  ;;  %v11395_v25 = vcombine.low %v11376_v38, %v11392_v5  ;;  %v11328_v18 = vcombine.high %v11308_v17, %v11324_v41  ;;  %v11396_v58 = vcombine.high %v11376_v38, %v11392_v5 }
0x14f0   : > { %v17985_v4 = vrot.slane %v11293_v59, %v14684_v42  ;;  %v17988_v53 = vrot.slane %v11309_v15, %v14684_v42  ;;  %v17991_v23 = vrot.slane %v11361_v27, %v14684_v42  ;;  %v17994_v24 = vrot.slane %v11377_v39, %v14684_v42 }
0x14f1   : > { %v13501_v29 = vpack.i.bf16 %v11395_v25, %v11327_v56  ;;  %v13506_v21 = vpack.i.bf16 %v11396_v58, %v11328_v18  ;;  %v11430_v60 = vcombine.high %v17890_v49, %v17893_v37  ;;  %v11446_v7 = vcombine.high %v17896_v43, %v17899_v36 }
0x14f2   : > { %v11326_v22 = vcombine.high %v17985_v4, %v17988_v53  ;;  %v11394_v8 = vcombine.high %v17991_v23, %v17994_v24  ;;  %v11498_v20 = vcombine.high %v17906_v6, %v17909_v48  ;;  %v11514_v46 = vcombine.high %v17912_v57, %v17915_v28 }
0x14f3   : > { %13502 = vrot.lane.b32.xlu1 %v13501_v29, %s18497_s0  ;;  %v11444_v50 = vrot.slane %v11430_v60, %v14684_v42  ;;  %v11460_v26 = vrot.slane %v11446_v7, %v14684_v42  ;;  %v11429_v10 = vcombine.low %v17890_v49, %v17893_v37  ;;  %v11445_v1 = vcombine.low %v17896_v43, %v17899_v36 }
0x14f4   : > { %v13496_v30 = vpack.i.bf16 %v11394_v8, %v11326_v22  ;;  %v11512_v11 = vrot.slane %v11498_v20, %v14684_v42  ;;  %v11528_v9 = vrot.slane %v11514_v46, %v14684_v42  ;;  %v11497_v40 = vcombine.low %v17906_v6, %v17909_v48 }
0x14f5   : > { %v11463_v62 = vcombine.low %v11444_v50, %v11460_v26  ;;  %v18021_v32 = vrot.slane %v11429_v10, %v14684_v42  ;;  %v18024_v14 = vrot.slane %v11445_v1, %v14684_v42  ;;  %v11513_v49 = vcombine.low %v17912_v57, %v17915_v28 }
0x14f6   : > { %13497 = vrot.lane.b32.xlu0 %v13496_v30, %s18498_s30  ;;  %v11531_v37 = vcombine.low %v11512_v11, %v11528_v9  ;;  %v18030_v43 = vrot.slane %v11497_v40, %v14684_v42  ;;  %v11464_v36 = vcombine.high %v11444_v50, %v11460_v26  ;;  %v11532_v34 = vcombine.high %v11512_v11, %v11528_v9 }
0x14f7   : > { %13507 = vrot.lane.b32.xlu1 %v13506_v21, %s14001_s1  ;;  %v11462_v6 = vcombine.high %v18021_v32, %v18024_v14  ;;  %v18036_v48 = vrot.slane %v11513_v49, %v14684_v42  ;;  %v11566_v35 = vcombine.high %v17938_v2, %v17941_v19  ;;  %v11582_v57 = vcombine.high %v17944_v63, %v17947_v0 }
0x14f8   : > { %v13516_v28 = vpack.i.bf16 %v11531_v37, %v11463_v62  ;;  %v13521_v16 = vpack.i.bf16 %v11532_v34, %v11464_v36  ;;  %v11634_v12 = vcombine.high %v17958_v52, %v17961_v47  ;;  %v11650_v61 = vcombine.high %v17964_v55, %v17967_v51 }
0x14f9   : > { %v11530_v33 = vcombine.high %v18030_v43, %v18036_v48  ;;  %v11580_v13 = vrot.slane %v11566_v35, %v14684_v42  ;;  %v11596_v3 = vrot.slane %v11582_v57, %v14684_v42  ;;  %v11565_v54 = vcombine.low %v17938_v2, %v17941_v19 }
0x14fa   : > { %13517 = vrot.lane.b32.xlu0 %v13516_v28, %s18497_s0  ;;  %v11648_v45 = vrot.slane %v11634_v12, %v14684_v42  ;;  %v11664_v17 = vrot.slane %v11650_v61, %v14684_v42  ;;  %v11581_v41 = vcombine.low %v17944_v63, %v17947_v0  ;;  %v11633_v38 = vcombine.low %v17958_v52, %v17961_v47 }
0x14fb   : > { %v13511_v5 = vpack.i.bf16 %v11530_v33, %v11462_v6  ;;  %v11599_v59 = vcombine.low %v11580_v13, %v11596_v3  ;;  %v18060_v15 = vrot.slane %v11565_v54, %v14684_v42  ;;  %v11649_v2 = vcombine.low %v17964_v55, %v17967_v51 }
0x14fc   : > { %v11667_v19 = vcombine.low %v11648_v45, %v11664_v17  ;;  %v18065_v27 = vrot.slane %v11581_v41, %v14684_v42  ;;  %v18068_v39 = vrot.slane %v11633_v38, %v14684_v42  ;;  %v11600_v44 = vcombine.high %v11580_v13, %v11596_v3 }
0x14fd   : > { %13512 = vrot.lane.b32.xlu1 %v13511_v5, %s18498_s30  ;;  %v11657_v63 = vrot.slane %v11649_v2, %v14684_v42  ;;  %v11668_v0 = vcombine.high %v11648_v45, %v11664_v17  ;;  %v11325_v52 = vcombine.low %v17985_v4, %v17988_v53  ;;  %v11393_v47 = vcombine.low %v17991_v23, %v17994_v24 }
0x14fe   : > { %v13531_v55 = vpack.i.bf16 %v11667_v19, %v11599_v59  ;;  %v11598_v51 = vcombine.high %v18060_v15, %v18065_v27  ;;  %v11461_v56 = vcombine.low %v18021_v32, %v18024_v14  ;;  %v11529_v25 = vcombine.low %v18030_v43, %v18036_v48 }
0x14ff   : > { %v11666_v18 = vcombine.high %v18068_v39, %v11657_v63  ;;  %v13536_v42 = vpack.i.bf16 %v11668_v0, %v11600_v44  ;;  %v11597_v58 = vcombine.low %v18060_v15, %v18065_v27  ;;  %v11665_v4 = vcombine.low %v18068_v39, %v11657_v63  ;;  %v12682_v39 = vld [vmem:[%s18298_s13 + $0x1] ss:$0 sm:$0xff] }
0x1501   : > { %13522 = vrot.lane.b32.xlu1 %v13521_v16, %s14001_s1  ;;  %v13526_v53 = vpack.i.bf16 %v11666_v18, %v11598_v51 }
0x1503   : > { %13527 = vrot.lane.b32.xlu0 %v13526_v53, %s18498_s30  ;;  %s12737_s30 = sshll.u32 %s14136_s2, 4  ;;  %s14009_s2 = smov [#allocation2]  }
0x1504   : > { %s18243_s29 = scalar_lea.hbm %s18547_s26, %s12737_s30 }
0x1505   : > { %13532 = vrot.lane.b32.xlu1 %v13531_v55, %s18497_s0  ;;  %s631_s0 = sand.u32 1, %s13987_s22  }
0x1506   : > { %s632_s25 = scalar_lea.vmem [#allocation2], %s631_s0  ;;  %s12286_s3 = scalar_lea.sflag [#allocation3], %s631_s0 }
0x1507   : > { %13537 = vrot.lane.b32.xlu0 %v13536_v42, %s14001_s1  ;;  %s12298_s20 = sshll.u32 %s632_s25, 4  ;;  %s13937_s1 = sshll.u32 %s14009_s2, 4  ;;  %s18245_s20 = int_to_ptr.vmem [resolvable:$true] %s12298_s20  ;;  %s13938_s1 = int_to_ptr.vmem [resolvable:$false] %s13937_s1 }
0x1508   : > { %s13933_s23 = scalar_lea.vmem %s18245_s20, 16  ;;  %s13939_s5 = scalar_lea.vmem %s13938_s1, 32 }
0x1509   : > { %p13934_p11 = scmp.ne.s32.totalorder %s18245_s20, %s13933_s23  ;;  %p13940_p0 = scmp.lt.s32.totalorder %s18245_s20, %s13938_s1 }
0x150a   : > { %p13941_p1 = scmp.lt.s32.totalorder %s13939_s5, %s13933_s23 }
0x150b   : > { %p13935_p12 = pnand %p13934_p11, %p14153_p5 }
0x150c   : > { %p13942_p2 = por %p13941_p1, %p13940_p0 }
0x150d   : > { %p13936_p13 = pneg %p13935_p12 }
0x150f   : > { %p13943_p3 = pnand %p13942_p2, %p13936_p13 }
0x1565   : > { %v13503_v23 = vpop.permute.xlu1 %13502 }
0x1566   : > { %v13505_v24 = vunpack.i.h.bf16 %v13503_v23  ;;  %v13504_v29 = vunpack.i.l.bf16 %v13503_v23 }
0x1568   : > { %v13498_v21 = vpop.permute.xlu0 %13497 }
0x1569   : > { %v13500_v60 = vunpack.i.h.bf16 %v13498_v21  ;;  %v13499_v7 = vunpack.i.l.bf16 %v13498_v21  ;;  %v13508_v22 = vpop.permute.xlu1 %13507 }
0x156a   : > { %v13510_v8 = vunpack.i.h.bf16 %v13508_v22  ;;  %v13509_v20 = vunpack.i.l.bf16 %v13508_v22  ;;  %v18544_v22 = vld [vmem:[#allocation25_spill] sm:$0xff] }
0x156b   : > { %v11741_v46 = vsel %vm1520_vm4, %v11325_v52, %v13499_v7  ;;  %v11742_v50 = vsel %vm1520_vm4, %v11393_v47, %v13500_v60  ;;  %v18541_v47 = vld [vmem:[#allocation19_spill] sm:$0xff] }
0x156c   : > { %v11747_v26 = vsel %vm929_vm1, %v11741_v46, %v13504_v29  ;;  %v11748_v10 = vsel %vm929_vm1, %v11742_v50, %v13505_v24  ;;  %v13518_v9 = vpop.permute.xlu0 %13517  ;;  %v18543_v29 = vld [vmem:[#allocation26_spill] sm:$0xff] }
0x156d   : > { %v11753_v1 = vsel %vm5082_vm6, %v11747_v26, %v13509_v20  ;;  %v11754_v30 = vsel %vm5082_vm6, %v11748_v10, %v13510_v8  ;;  %v13520_v14 = vunpack.i.h.bf16 %v13518_v9  ;;  %v13519_v49 = vunpack.i.l.bf16 %v13518_v9 }
0x156e   : > { %v11759_v11 = vpack.c.bf16 %v11754_v30, %v11753_v1  ;;  %v18545_v30 = vld [vmem:[#allocation24_spill] sm:$0xff] }
0x156f   : > { %v13513_v40 = vpop.permute.xlu1 %13512 }
0x1570   : > { %v13515_v62 = vunpack.i.h.bf16 %v13513_v40  ;;  %v13514_v32 = vunpack.i.l.bf16 %v13513_v40  ;;  %13340 = vmatmul.mubr.msk.bf16.vlgmr.msra.gmra.mrb[144].mxu0 %vm812_vm2, %v11759_v11 }
0x1571   : > { %13343 = vmatprep.mubr.msk.bf16.mxu0 %vm13999_vm0, %v18432_v31 }
0x1572   : > { %v11743_v37 = vsel %vm1520_vm4, %v11461_v56, %v13514_v32  ;;  %v11744_v43 = vsel %vm1520_vm4, %v11529_v25, %v13515_v62  ;;  %v18542_v25 = vld [vmem:[#allocation21_spill] sm:$0xff]  ;;  %v18546_v62 = vld [vmem:[#allocation23_spill] sm:$0xff] }
0x1573   : > { %v13523_v36 = vpop.permute.xlu1 %13522  ;;  %v11749_v48 = vsel %vm929_vm1, %v11743_v37, %v13519_v49  ;;  %v11750_v35 = vsel %vm929_vm1, %v11744_v43, %v13520_v14 }
0x1574   : > { %v13525_v34 = vunpack.i.h.bf16 %v13523_v36  ;;  %v13524_v6 = vunpack.i.l.bf16 %v13523_v36 }
0x1575   : > { %v13528_v57 = vpop.permute.xlu0 %13527 }
0x1576   : > { %v11755_v28 = vsel %vm5082_vm6, %v11749_v48, %v13524_v6  ;;  %v11756_v16 = vsel %vm5082_vm6, %v11750_v35, %v13525_v34  ;;  %v13530_v12 = vunpack.i.h.bf16 %v13528_v57  ;;  %v13529_v61 = vunpack.i.l.bf16 %v13528_v57 }
0x1577   : > { %v11760_v33 = vpack.c.bf16 %v11756_v16, %v11755_v28  ;;  %v13533_v13 = vpop.permute.xlu1 %13532 }
0x1578   : > { %v13535_v3 = vunpack.i.h.bf16 %v13533_v13  ;;  %v13534_v54 = vunpack.i.l.bf16 %v13533_v13  ;;  %v11745_v45 = vsel %vm1520_vm4, %v11597_v58, %v13529_v61  ;;  %v11746_v17 = vsel %vm1520_vm4, %v11665_v4, %v13530_v12 }
0x1579   : > { %13344 = vmatmul.mubr.msk.bf16.gmra.mrb[148].mxu0 %vm812_vm2, %v11760_v33  ;;  %v13538_v41 = vpop.permute.xlu0 %13537 }
0x157a   : > { %v13540_v38 = vunpack.i.h.bf16 %v13538_v41  ;;  %v13539_v5 = vunpack.i.l.bf16 %v13538_v41  ;;  %13347 = vmatprep.mubr.msk.bf16.mxu0 %vm13999_vm0, %v18432_v31  ;;  %v11751_v59 = vsel %vm929_vm1, %v11745_v45, %v13534_v54  ;;  %v11752_v15 = vsel %vm929_vm1, %v11746_v17, %v13535_v3 }
0x157c   : > { %v11757_v2 = vsel %vm5082_vm6, %v11751_v59, %v13539_v5  ;;  %v11758_v19 = vsel %vm5082_vm6, %v11752_v15, %v13540_v38 }
0x157d   : > { %v11761_v27 = vpack.c.bf16 %v11758_v19, %v11757_v2 }
0x1581   : > { %13348 = vmatmul.mubr.msk.bf16.gmra.mrb[152].mxu0 %vm812_vm2, %v11761_v27 }
0x1582   : > { %13387 = vmatprep.mubr.msk.bf16.mxu0 %vm13999_vm0, %v18432_v31 }
0x1643   : > { %v11846_v44 = vpop.f32.mrb[144].mxu0 }
0x1644   : > { %v11847_v63 = vadd.f32 %v12682_v39, %v11846_v44  ;;  %v13341_v0 = vpop.f32.mrb[145].mxu0 }
0x1645   : > { %v11849_v52 = vpop.f32.mrb[146].mxu0 }
0x1646   : > { %v11869_v55 = vadd.f32 %v11847_v63, %v18541_v47  ;;  %v11850_v51 = vadd.f32 %v12682_v39, %v11849_v52  ;;  %v13342_v56 = vpop.f32.mrb[147].mxu0  ;;  %v13621_v52 = vld [vmem:[%s18301_s16 + $0x20] sm:$0xff]   ;;  %v13622_v47 = vld [vmem:[%s18301_s16 + $0x28] sm:$0xff]  }
0x1647   : > { %13352 = vmatpush3.bf16.msra.mxu1 %v13621_v52 }
0x1648   : > { %v11870_v18 = vadd.f32 %v11850_v51, %v18542_v25  ;;  %v11879_v42 = vsel %vm812_vm2, %v11869_v55, 0.0  ;;  %13353 = vmatprep.subr.bf16.mxu1 %v18432_v31  ;;  %v13624_v51 = vld [vmem:[%s18301_s16 + $0x38] sm:$0xff]  }
0x1649   : > { %11880 = vadd.xlane.f32.xlu1 %v11879_v42 }
0x164a   : > { %v11882_v58 = vsel %vm812_vm2, %v11870_v18, 0.0 }
0x164b   : > { %11883 = vadd.xlane.f32.xlu0 %v11882_v58  ;;  %13354 = vmatpush3.bf16.msra.mxu1 %v13622_v47 }
0x164c   : > { %v11854_v4 = vpop.f32.mrb[148].mxu0  ;;  %13355 = vmatprep.subr.bf16.mxu1 %v18432_v31 }
0x164d   : > { %v11855_v53 = vadd.f32 %v12682_v39, %v11854_v4  ;;  %v13345_v23 = vpop.f32.mrb[149].mxu0 }
0x164e   : > { %v11857_v24 = vpop.f32.mrb[150].mxu0 }
0x164f   : > { %v11871_v21 = vadd.f32 %v11855_v53, %v18543_v29  ;;  %v11858_v60 = vadd.f32 %v12682_v39, %v11857_v24  ;;  %v13346_v7 = vpop.f32.mrb[151].mxu0 }
0x1650   : > { %v12692_v7 = vld [vmem:[%s18299_s14 + $0x1] ss:$0 sm:$0xff] }
0x1651   : > { %v11872_v8 = vadd.f32 %v11858_v60, %v18544_v22  ;;  %v11885_v20 = vsel %vm812_vm2, %v11871_v21, 0.0 }
0x1652   : > { %11886 = vadd.xlane.f32.xlu0 %v11885_v20 }
0x1653   : > { %v11888_v10 = vsel %vm812_vm2, %v11872_v8, 0.0 }
0x1654   : > { %v11862_v46 = vpop.f32.mrb[152].mxu0 }
0x1655   : > { %v11863_v50 = vadd.f32 %v12682_v39, %v11862_v46  ;;  %v13349_v26 = vpop.f32.mrb[153].mxu0 }
0x1656   : > { %11889 = vadd.xlane.f32.xlu0 %v11888_v10  ;;  %v11865_v1 = vpop.f32.mrb[154].mxu0 }
0x1657   : > { %v11873_v11 = vadd.f32 %v11863_v50, %v18545_v30  ;;  %v11866_v9 = vadd.f32 %v12682_v39, %v11865_v1  ;;  %v13350_v40 = vpop.f32.mrb[155].mxu0  ;;  %v12693_v1 = vld [vmem:[%s18300_s15 + $0x1] ss:$0 sm:$0xff] }
0x1659   : > { %v18130_v32 = vadd.f32 %v11866_v9, %v18546_v62  ;;  %v11891_v14 = vsel %vm812_vm2, %v11873_v11, 0.0 }
0x165a   : > { %11892 = vadd.xlane.f32.xlu1 %v11891_v14 }
0x165b   : > { %v11894_v49 = vsel %vm812_vm2, %v18130_v32, 0.0 }
0x165c   : > { %11895 = vadd.xlane.f32.xlu0 %v11894_v49 }
0x16d6   : > { %v11881_v37 = vpop.xlane.xlu1 %11880 }
0x16d7   : > { %v11897_v43 = vmul.f32 0.015625, %v11881_v37 }
0x16d8   : > { %v11884_v36 = vpop.xlane.xlu0 %11883 }
0x16d9   : > { %v11903_v34 = vsub.f32 %v11869_v55, %v11897_v43  ;;  %v11898_v6 = vmul.f32 0.015625, %v11884_v36  ;;  %v13623_v55 = vld [vmem:[%s18301_s16 + $0x30] sm:$0xff]  }
0x16da   : > { %13356 = vmatpush3.bf16.msra.mxu1 %v13623_v55 }
0x16db   : > { %v18135_v48 = vsub.f32 %v11870_v18, %v11898_v6  ;;  %v11909_v35 = vmul.f32 %v11903_v34, %v11903_v34  ;;  %13357 = vmatprep.subr.bf16.mxu1 %v18432_v31 }
0x16dd   : > { %v11915_v57 = vsel %vm812_vm2, %v11909_v35, 0.0  ;;  %v11910_v28 = vmul.f32 %v18135_v48, %v18135_v48 }
0x16de   : > { %11916 = vadd.xlane.f32.xlu1 %v11915_v57  ;;  %13358 = vmatpush3.bf16.msra.mxu1 %v13624_v51 }
0x16df   : > { %v11887_v16 = vpop.xlane.xlu0 %11886  ;;  %v11918_v12 = vsel %vm812_vm2, %v11910_v28, 0.0 }
0x16e0   : > { %v11899_v61 = vmul.f32 0.015625, %v11887_v16  ;;  %11919 = vadd.xlane.f32.xlu0 %v11918_v12 }
0x16e2   : > { %v18141_v33 = vsub.f32 %v11871_v21, %v11899_v61 }
0x16e3   : > { %v11890_v13 = vpop.xlane.xlu0 %11889 }
0x16e4   : > { %v11900_v3 = vmul.f32 0.015625, %v11890_v13  ;;  %v11911_v54 = vmul.f32 %v18141_v33, %v18141_v33 }
0x16e6   : > { %v18145_v45 = vsub.f32 %v11872_v8, %v11900_v3  ;;  %v11921_v17 = vsel %vm812_vm2, %v11911_v54, 0.0 }
0x16e7   : > { %11922 = vadd.xlane.f32.xlu1 %v11921_v17  ;;  %v11893_v41 = vpop.xlane.xlu1 %11892 }
0x16e8   : > { %v11901_v38 = vmul.f32 0.015625, %v11893_v41  ;;  %v11912_v5 = vmul.f32 %v18145_v45, %v18145_v45 }
0x16e9   : > { %v11896_v59 = vpop.xlane.xlu0 %11895 }
0x16ea   : > { %v18150_v15 = vsub.f32 %v11873_v11, %v11901_v38  ;;  %v11902_v2 = vmul.f32 0.015625, %v11896_v59  ;;  %v11924_v19 = vsel %vm812_vm2, %v11912_v5, 0.0  ;;  %v13625_v38 = vld [vmem:[%s18303_s18 + $0x40] sm:$0xff]   ;;  %v13626_v5 = vld [vmem:[%s18303_s18 + $0x48] sm:$0xff]   ;;  %v13627_v59 = vld [vmem:[%s18303_s18 + $0x50] sm:$0xff]  }
0x16eb   : > { %11925 = vadd.xlane.f32.xlu0 %v11924_v19  ;;  %13372 = vmatpush3.bf16.msra.mxu0 %v13625_v38  ;;  %v13630_v19 = vld [vmem:[%s18303_s18 + $0x68] sm:$0xff]  }
0x16ec   : > { %v18154_v27 = vsub.f32 %v18130_v32, %v11902_v2  ;;  %v11913_v39 = vmul.f32 %v18150_v15, %v18150_v15  ;;  %13373 = vmatprep.subr.bf16.mxu0 %v18432_v31  ;;  %v13629_v2 = vld [vmem:[%s18303_s18 + $0x60] sm:$0xff]  }
0x16ee   : > { %v11927_v44 = vsel %vm812_vm2, %v11913_v39, 0.0  ;;  %v11914_v63 = vmul.f32 %v18154_v27, %v18154_v27  ;;  %v13632_v39 = vld [vmem:[%s18303_s18 + $0x78] sm:$0xff]  }
0x16ef   : > { %11928 = vadd.xlane.f32.xlu1 %v11927_v44  ;;  %13374 = vmatpush3.bf16.msra.mxu0 %v13626_v5  ;;  %v12703_v44 = vld [vmem:[%s18302_s17 + $0x1] ss:$0 sm:$0xff] }
0x16f0   : > { %v11930_v0 = vsel %vm812_vm2, %v11914_v63, 0.0  ;;  %13375 = vmatprep.subr.bf16.mxu0 %v18432_v31 }
0x16f1   : > { %11931 = vadd.xlane.f32.xlu0 %v11930_v0 }
0x16f3   : > { %13376 = vmatpush3.bf16.msra.mxu0 %v13627_v59 }
0x16f4   : > { %13377 = vmatprep.subr.bf16.mxu0 %v18432_v31 }
0x176b   : > { %v11917_v56 = vpop.xlane.xlu1 %11916 }
0x176c   : > { %v11933_v25 = vmul.f32 0.015625, %v11917_v56 }
0x176d   : > { %v11920_v18 = vpop.xlane.xlu0 %11919 }
0x176e   : > { %v11939_v42 = vadd.f32 1e-05, %v11933_v25  ;;  %v11934_v58 = vmul.f32 0.015625, %v11920_v18 }
0x1770   : > { %13909 = vrsqrt.f32 %v11939_v42  ;;  %v11940_v4 = vadd.f32 1e-05, %v11934_v58 }
0x1772   : > { %13911 = vrsqrt.f32 %v11940_v4 }
0x1774   : > { %v11923_v53 = vpop.xlane.xlu1 %11922 }
0x1775   : > { %v11935_v23 = vmul.f32 0.015625, %v11923_v53 }
0x1777   : > { %v11941_v24 = vadd.f32 1e-05, %v11935_v23 }
0x1778   : > { %v11926_v29 = vpop.xlane.xlu0 %11925 }
0x1779   : > { %13913 = vrsqrt.f32 %v11941_v24  ;;  %v11936_v21 = vmul.f32 0.015625, %v11926_v29 }
0x177a   : > { %v13910_v60 = vpop.eup %13909 }
0x177b   : > { %v11951_v22 = vmul.f32 %v13910_v60, %v11903_v34  ;;  %v11942_v8 = vadd.f32 1e-05, %v11936_v21 }
0x177c   : > { %v13912_v20 = vpop.eup %13911  ;;  %v11929_v46 = vpop.xlane.xlu1 %11928 }
0x177d   : > { %v11963_v50 = vmul.f32 %v12692_v7, %v11951_v22  ;;  %v11952_v26 = vmul.f32 %v13912_v20, %v18135_v48  ;;  %13915 = vrsqrt.f32 %v11942_v8  ;;  %v11937_v10 = vmul.f32 0.015625, %v11929_v46 }
0x177e   : > { %v11932_v30 = vpop.xlane.xlu0 %11931 }
0x177f   : > { %v11964_v11 = vmul.f32 %v12692_v7, %v11952_v26  ;;  %v11943_v9 = vadd.f32 1e-05, %v11937_v10  ;;  %v11938_v40 = vmul.f32 0.015625, %v11932_v30  ;;  %v11975_v62 = vadd.f32 %v12693_v1, %v11963_v50 }
0x1781   : > { %v11976_v14 = vadd.f32 %v12693_v1, %v11964_v11  ;;  %13917 = vrsqrt.f32 %v11943_v9  ;;  %v11944_v49 = vadd.f32 1e-05, %v11938_v40 }
0x1783   : > { %v13914_v37 = vpop.eup %13913  ;;  %13919 = vrsqrt.f32 %v11944_v49  ;;  %v11981_v43 = vpack.c.bf16 %v11976_v14, %v11975_v62 }
0x1784   : > { %v11953_v36 = vmul.f32 %v13914_v37, %v18141_v33 }
0x1785   : > { %13360 = vmatmul.mubr.msk.bf16.vlgmr.msra.gmra.mrb[172].mxu1 %vm812_vm2, %v11981_v43 }
0x1786   : > { %13363 = vmatprep.mubr.msk.bf16.mxu1 %vm13999_vm0, %v18432_v31  ;;  %v11965_v48 = vmul.f32 %v12692_v7, %v11953_v36 }
0x1787   : > { %v13916_v34 = vpop.eup %13915 }
0x1788   : > { %v11954_v6 = vmul.f32 %v13916_v34, %v18145_v45  ;;  %v11977_v16 = vadd.f32 %v12693_v1, %v11965_v48 }
0x178a   : > { %v11966_v35 = vmul.f32 %v12692_v7, %v11954_v6 }
0x178b   : > { %v13918_v57 = vpop.eup %13917 }
0x178c   : > { %v11955_v28 = vmul.f32 %v13918_v57, %v18150_v15  ;;  %v11978_v12 = vadd.f32 %v12693_v1, %v11966_v35  ;;  %v13628_v15 = vld [vmem:[%s18303_s18 + $0x58] sm:$0xff]  }
0x178d   : > { %v13920_v61 = vpop.eup %13919  ;;  %13378 = vmatpush3.bf16.msra.mxu0 %v13628_v15 }
0x178e   : > { %v11956_v13 = vmul.f32 %v13920_v61, %v18154_v27  ;;  %v11982_v3 = vpack.c.bf16 %v11978_v12, %v11977_v16  ;;  %v11967_v33 = vmul.f32 %v12692_v7, %v11955_v28  ;;  %13379 = vmatprep.subr.bf16.mxu0 %v18432_v31  ;;  %v13631_v27 = vld [vmem:[%s18303_s18 + $0x70] sm:$0xff]  }
0x1790   : > { %13364 = vmatmul.mubr.msk.bf16.gmra.mrb[176].mxu1 %vm812_vm2, %v11982_v3  ;;  %v11968_v54 = vmul.f32 %v12692_v7, %v11956_v13  ;;  %v11979_v45 = vadd.f32 %v12693_v1, %v11967_v33 }
0x1791   : > { %13367 = vmatprep.mubr.msk.bf16.mxu1 %vm13999_vm0, %v18432_v31  ;;  %13380 = vmatpush3.bf16.msra.mxu0 %v13629_v2 }
0x1792   : > { %v11980_v17 = vadd.f32 %v12693_v1, %v11968_v54  ;;  %13381 = vmatprep.subr.bf16.mxu0 %v18432_v31 }
0x1794   : > { %v11983_v41 = vpack.c.bf16 %v11980_v17, %v11979_v45 }
0x1795   : > { %13382 = vmatpush3.bf16.msra.mxu0 %v13630_v19 }
0x1796   : > { %13383 = vmatprep.subr.bf16.mxu0 %v18432_v31 }
0x1798   : > { %13368 = vmatmul.mubr.msk.bf16.gmra.mrb[180].mxu1 %vm812_vm2, %v11983_v41 }
0x1799   : > { %13384 = vmatpush3.bf16.msra.mxu0 %v13631_v27 }
0x179a   : > { %13385 = vmatprep.subr.bf16.mxu0 %v18432_v31 }
0x179d   : > { %13386 = vmatpush3.bf16.msra.mxu0 %v13632_v39 }
0x1858   : > { %v12068_v63 = vpop.f32.mrb[172].mxu1 }
0x1859   : > { %v12069_v0 = vadd.f32 %v12703_v44, %v12068_v63  ;;  %v13361_v52 = vpop.f32.mrb[173].mxu1 }
0x185a   : > { %v12071_v47 = vpop.f32.mrb[174].mxu1 }
0x185b   : > { %v12091_v55 = vmul.f32 %v12069_v0, %v12069_v0  ;;  %v12072_v51 = vadd.f32 %v12703_v44, %v12071_v47  ;;  %v13362_v56 = vpop.f32.mrb[175].mxu1 }
0x185d   : > { %v12097_v25 = vmul.f32 %v12091_v55, %v12069_v0  ;;  %v12092_v18 = vmul.f32 %v12072_v51, %v12072_v51 }
0x185f   : > { %v12103_v42 = vmul.f32 0.044715, %v12097_v25  ;;  %v12098_v58 = vmul.f32 %v12092_v18, %v12072_v51 }
0x1861   : > { %v12109_v4 = vadd.f32 %v12103_v42, %v12069_v0  ;;  %v12104_v53 = vmul.f32 0.044715, %v12098_v58 }
0x1863   : > { %v12115_v23 = vmul.f32 0.7978846, %v12109_v4  ;;  %v12110_v24 = vadd.f32 %v12104_v53, %v12072_v51  ;;  %v12076_v29 = vpop.f32.mrb[176].mxu1 }
0x1864   : > { %v12077_v21 = vadd.f32 %v12703_v44, %v12076_v29  ;;  %v13365_v60 = vpop.f32.mrb[177].mxu1 }
0x1865   : > { %13921 = vtanh.f32 %v12115_v23  ;;  %v12116_v7 = vmul.f32 0.7978846, %v12110_v24  ;;  %v12079_v22 = vpop.f32.mrb[178].mxu1 }
0x1866   : > { %v12093_v8 = vmul.f32 %v12077_v21, %v12077_v21  ;;  %v12080_v20 = vadd.f32 %v12703_v44, %v12079_v22  ;;  %v13366_v46 = vpop.f32.mrb[179].mxu1 }
0x1867   : > { %13923 = vtanh.f32 %v12116_v7 }
0x1868   : > { %v12099_v50 = vmul.f32 %v12093_v8, %v12077_v21  ;;  %v12094_v26 = vmul.f32 %v12080_v20, %v12080_v20 }
0x186a   : > { %v12105_v10 = vmul.f32 0.044715, %v12099_v50  ;;  %v12100_v1 = vmul.f32 %v12094_v26, %v12080_v20 }
0x186b   : > { %v12084_v30 = vpop.f32.mrb[180].mxu1 }
0x186c   : > { %v12111_v11 = vadd.f32 %v12105_v10, %v12077_v21  ;;  %v12106_v9 = vmul.f32 0.044715, %v12100_v1  ;;  %v12085_v40 = vadd.f32 %v12703_v44, %v12084_v30  ;;  %v13369_v62 = vpop.f32.mrb[181].mxu1 }
0x186d   : > { %v12087_v14 = vpop.f32.mrb[182].mxu1 }
0x186e   : > { %v12117_v49 = vmul.f32 0.7978846, %v12111_v11  ;;  %v12112_v37 = vadd.f32 %v12106_v9, %v12080_v20  ;;  %v12095_v43 = vmul.f32 %v12085_v40, %v12085_v40  ;;  %v12088_v36 = vadd.f32 %v12703_v44, %v12087_v14  ;;  %v13370_v34 = vpop.f32.mrb[183].mxu1 }
0x186f   : > { %v13922_v6 = vpop.eup %13921 }
0x1870   : > { %v12127_v48 = vadd.f32 1.0, %v13922_v6  ;;  %13925 = vtanh.f32 %v12117_v49  ;;  %v12118_v35 = vmul.f32 0.7978846, %v12112_v37  ;;  %v12101_v57 = vmul.f32 %v12095_v43, %v12085_v40 }
0x1871   : > { %v13924_v28 = vpop.eup %13923  ;;  %v12096_v16 = vmul.f32 %v12088_v36, %v12088_v36 }
0x1872   : > { %v12133_v12 = vmul.f32 0.5, %v12127_v48  ;;  %v12128_v61 = vadd.f32 1.0, %v13924_v28  ;;  %13927 = vtanh.f32 %v12118_v35  ;;  %v12107_v13 = vmul.f32 0.044715, %v12101_v57 }
0x1873   : > { %v12102_v3 = vmul.f32 %v12096_v16, %v12088_v36 }
0x1874   : > { %v12134_v33 = vmul.f32 0.5, %v12128_v61  ;;  %v12113_v54 = vadd.f32 %v12107_v13, %v12085_v40  ;;  %v12139_v45 = vmul.f32 %v12133_v12, %v12069_v0 }
0x1875   : > { %v12108_v17 = vmul.f32 0.044715, %v12102_v3 }
0x1876   : > { %v12140_v41 = vmul.f32 %v12134_v33, %v12072_v51  ;;  %v12119_v38 = vmul.f32 0.7978846, %v12113_v54 }
0x1877   : > { %v12114_v5 = vadd.f32 %v12108_v17, %v12088_v36 }
0x1878   : > { %v12145_v59 = vpack.c.bf16 %v12140_v41, %v12139_v45  ;;  %13929 = vtanh.f32 %v12119_v38 }
0x1879   : > { %v12120_v15 = vmul.f32 0.7978846, %v12114_v5 }
0x187a   : > { %v13926_v2 = vpop.eup %13925  ;;  %13388 = vmatmul.mubr.bf16.vlgmr.msra.gmra.mrb[156].mxu0 %v12145_v59 }
0x187b   : > { %13931 = vtanh.f32 %v12120_v15  ;;  %13391 = vmatprep.mubr.msk.bf16.mxu0 %vm13999_vm0, %v18432_v31  ;;  %v12129_v19 = vadd.f32 1.0, %v13926_v2 }
0x187c   : > { %v13928_v27 = vpop.eup %13927 }
0x187d   : > { %v12130_v39 = vadd.f32 1.0, %v13928_v27  ;;  %v12135_v44 = vmul.f32 0.5, %v12129_v19 }
0x187f   : > { %v12136_v63 = vmul.f32 0.5, %v12130_v39  ;;  %v12141_v52 = vmul.f32 %v12135_v44, %v12077_v21 }
0x1881   : > { %v12142_v47 = vmul.f32 %v12136_v63, %v12080_v20 }
0x1882   : > { %v13930_v0 = vpop.eup %13929 }
0x1883   : > { %v12146_v55 = vpack.c.bf16 %v12142_v47, %v12141_v52  ;;  %v12131_v51 = vadd.f32 1.0, %v13930_v0 }
0x1885   : > { %v13932_v56 = vpop.eup %13931  ;;  %13392 = vmatmul.mubr.bf16.gmra.mrb[160].mxu0 %v12146_v55  ;;  %v12137_v18 = vmul.f32 0.5, %v12131_v51 }
0x1886   : > { %13395 = vmatprep.mubr.msk.bf16.mxu0 %vm13999_vm0, %v18432_v31  ;;  %v12132_v25 = vadd.f32 1.0, %v13932_v56  ;;  %v12728_v31 = vld [vmem:[%s18304_s19 + $0x1] ss:$0 sm:$0xff] }
0x1887   : > { %v12143_v58 = vmul.f32 %v12137_v18, %v12085_v40 }
0x1888   : > { %v12138_v42 = vmul.f32 0.5, %v12132_v25 }
0x188a   : > { %v12144_v4 = vmul.f32 %v12138_v42, %v12088_v36 }
0x188c   : > { %v12147_v53 = vpack.c.bf16 %v12144_v4, %v12143_v58 }
0x188e   : > { %13396 = vmatmul.mubr.bf16.gmra.mrb[164].mxu0 %v12147_v53 }
0x194d   : > { %v12255_v23 = vpop.f32.mrb[156].mxu0 }
0x194e   : > { %v13389_v24 = vpop.f32.mrb[157].mxu0 }
0x194f   : > { %v12257_v29 = vpop.f32.mrb[158].mxu0 }
0x1950   : > { %v13390_v21 = vpop.f32.mrb[159].mxu0 }
0x1958   : > { %v12261_v60 = vpop.f32.mrb[160].mxu0 }
0x1959   : > { %v13393_v7 = vpop.f32.mrb[161].mxu0 }
0x195a   : > { %v12263_v22 = vpop.f32.mrb[162].mxu0 }
0x195b   : > { %v13394_v8 = vpop.f32.mrb[163].mxu0 }
0x1961   : > { %v12267_v20 = vpop.f32.mrb[164].mxu0 }
0x1962   : > { %v13397_v46 = vpop.f32.mrb[165].mxu0 }
0x1963   : > { %v12269_v50 = vpop.f32.mrb[166].mxu0 }
0x1964   : > { %v12270_v26 = vadd.f32 %v12728_v31, %v12269_v50  ;;  %v13398_v10 = vpop.f32.mrb[167].mxu0 }
0x1966   : > { %v12273_v1 = vadd.f32 %v12270_v26, %v18130_v32 }
0x1968   : > { %v12274_v30 = vsel %vm812_vm2, %v12273_v1, 0.0 }
0x1969   : > { %v12275_v11 = vrot.slane %v12274_v30, 4 }
0x196b   : > { %v12276_v9 = vadd.f32 %v12275_v11, %v12274_v30 }
0x196d   : > { %v12277_v40 = vrot.slane %v12276_v9, 2 }
0x196f   : > { %v12278_v62 = vadd.f32 %v12277_v40, %v12276_v9 }
0x1971   : > { %v12279_v14 = vrot.slane %v12278_v62, 1 }
0x1973   : > { %v12280_v49 = vadd.f32 %v12279_v14, %v12278_v62 }
0x1975   : > { %v12282_v37 = vmul.f32 0.125, %v12280_v49 }
0x1977   : > { %12284 = vst.msk [vmem:[%s632_s25] sm:$0x1] %vm12283_vm12, %v12282_v37 }
0x1978   : > { %13946 = shalt.err (!%p13943_p3)
}
0x1979   : > { %s13947_s0 = scalar_lea.hbm %s18243_s29, 16  ;;  %s13951_s24 = scalar_lea.hbm %s18547_s26, 32 }
0x197a   : > { %p13948_p4 = scmp.ne.s32.totalorder %s18243_s29, %s13947_s0  ;;  %p13952_p9 = scmp.lt.u32.totalorder %s18243_s29, %s18547_s26 }
0x197b   : > { %p13953_p10 = scmp.lt.u32.totalorder %s13951_s24, %s13947_s0  ;;  %p13955_p12 = scmp.lt.u32.totalorder %s13947_s0, %s18243_s29 }
0x197c   : > { %p13949_p7 = pnand %p13948_p4, %p14153_p5 }
0x197d   : > { %p13954_p11 = por %p13953_p10, %p13952_p9 }
0x197e   : > { %p13950_p8 = pneg %p13949_p7 }
0x197f   : > { %p13956_p13 = por %p13955_p12, %p13954_p11 }
0x1981   : > { %p13957_p0 = pnand %p13956_p13, %p13950_p8 }
0x1983   : > { %13960 = shalt.err (!%p13957_p0)
}
0x1984   : > { %13400 = dma.vmem_to_hbm [thread:$0]  (%p14153_p5), %s18245_s20, 16, %s18243_s29, %s12286_s3  }
0x1985 PF: > { %s18548_s5 = sld [smem:[#allocation7_spill]]  ;;  %s18549_s23 = sld [smem:[#allocation5_spill]] }
0x198b   : > { %p13406_p1 = scmp.ge.s32.totalorder %s18548_s5, 2  ;;  %s12310_s30 = sand.u32 1, %s18549_s23  }
0x198c   : > { %s12311_s25 = scalar_lea.sflag [#allocation3], %s12310_s30 }
0x198d   : > { %p13403_p2 = pnand %p13406_p1, %p14157_p6 }
0x198f   : > { %13978 = dma.done.wait (!%p13403_p2), %s12311_s25, 16  }
0x1990   : > { %13980 = vsyncadd (!%p13403_p2), %s12311_s25, 4294967280  ;;  %s18551_s24 = sld [smem:[#allocation8_spill]]  ;;  %s18552_s0 = sld [smem:[#allocation6_spill]] }
0x1991   : > { %s18553_s23 = sld [smem:[#allocation9_spill]]  ;;  %s18554_s1 = smov %s13987_s22 }
0x1996   : > { %p30_p3 = scmp.ge.s32.totalorder %s18551_s24, 4   ;;  %s18555_s22 = smov %s18552_s0 }
0x1998   :  { %32 = sbr.rel (!%p30_p3) target bundleno = 11 (0xb), region = 150 }
0x199f   :  { %12315 = vsyncpa [#allocation3], 1 }
0x19a0   :  { %12317 = vsyncpa [#allocation3 + $0x1], 1 }

</bundles_post_ra>
